<compile_context>
chip_gen: v6e
topology: v6e:2x2x1
jax: 0.10.0
libtpu: 0.0.40
codegen_flags: <defaults>
</compile_context>

<pallas_src>
import numpy as np

import jax
import jax.numpy as jnp
from jax.experimental import pallas as pl
from jax.experimental.pallas import tpu as pltpu

H, W = 6, 7              # Connect-4 board
HP = H + 2               # zero-padded board rows (8)
WP = W + 1               # padded board cols: 1 left guard col + 7 board cols (8)
C = 32                   # residual-stream channels
LANES = WP * C           # 256 = padded-width x channels lane layout
MAX_BT = 64              # max batches per grid step (R = 512 matmul rows)


# ------------------------------ Pallas kernel -------------------------------

def qnet_kernel(x_ref, m_init_ref, b_init_ref, m_res_ref, b_res_ref,
                wf_ref, bf_ref, w1f_ref, tfold_ref, apool_ref, b1_ref,
                w2_ref, b2_ref, out_ref, xin_s, xs_s, ts_s):
    f32 = jnp.float32
    bf16 = jnp.bfloat16
    R = x_ref.shape[0]              # Bt * 8 padded board rows in this tile
    L1 = w1f_ref.shape[1]           # 6 * 64 = 384

    # valid-board-row mask: row index within each 8-row batch block must be 1..6
    rid = jax.lax.broadcasted_iota(jnp.int32, (R, LANES), 0) & (HP - 1)
    row_mask = ((rid >= 1) & (rid <= H)).astype(f32)

    # Zero only the two guard rows of each scratch (never written elsewhere);
    # interior rows are fully overwritten every step and the left guard column
    # stays zero by construction (no weights / bias target lane block 0).
    zin = jnp.zeros((1, xin_s.shape[1]), f32)
    zac = jnp.zeros((1, LANES), f32)
    xin_s[pl.ds(0, 1), :] = zin
    xin_s[pl.ds(R + 1, 1), :] = zin
    xs_s[pl.ds(0, 1), :] = zac
    xs_s[pl.ds(R + 1, 1), :] = zac
    ts_s[pl.ds(0, 1), :] = zac
    ts_s[pl.ds(R + 1, 1), :] = zac
    xin_s[pl.ds(1, R), :] = x_ref[...]

    def conv3x3(src, m_ref, b_row, do_relu):
        # src: f32 scratch with one guard row above/below the R activation rows.
        # Vertical taps = reads at row offsets 0/1/2; horizontal taps + channel
        # mixing + folded BN scale live in the bf16 banded matrices m_ref[di].
        # Inputs are cast to bf16 at the matmul (native-bf16 MXU); accumulation
        # stays f32.  Sequential accumulation lets v7x's MRB accumulate in place.
        acc = jnp.dot(src[pl.ds(0, R), :].astype(bf16), m_ref[0],
                      preferred_element_type=f32)
        acc = acc + jnp.dot(src[pl.ds(1, R), :].astype(bf16), m_ref[1],
                            preferred_element_type=f32)
        acc = acc + jnp.dot(src[pl.ds(2, R), :].astype(bf16), m_ref[2],
                            preferred_element_type=f32)
        acc = acc + b_row
        if do_relu:
            acc = jnp.maximum(acc, 0.0)
        return acc * row_mask          # keep padding rows exactly zero

    b_init = b_init_ref[...]
    b_res = b_res_ref[...]

    # x = relu(conv_bn(initial_conv(x)))  -- carried in-register in f32
    x_res = conv3x3(xin_s, m_init_ref, b_init, True)            # (R, 256)

    # 6 residual blocks, shared res_conv / conv_bn weights (VMEM resident).
    # Unrolled at trace time; the same weight refs are reused every pass.
    for _ in range(6):
        xs_s[pl.ds(1, R), :] = x_res            # scratch copy only for tap reads
        t1 = conv3x3(xs_s, m_res_ref, b_res, True)
        ts_s[pl.ds(1, R), :] = t1
        t2 = conv3x3(ts_s, m_res_ref, b_res, False)              # no relu pre-add
        x_res = jnp.maximum(t2 + x_res, 0.0)    # residual add on carried f32

    # x = relu(conv_final(final_conv(x))): one scalar per padded column block jp
    z = jnp.maximum(
        jnp.dot(x_res, wf_ref[...], preferred_element_type=f32) + bf_ref[...],
        0.0)                                                      # (R, 8)

    # view(-1, 42) + fc1, as structured matmuls (no reshapes / transposes):
    #   u[r, i*64+n] = sum_j z[r, j+1] * W1[n, i*7+j]   (all 6 board-row candidates)
    #   sel keeps only the candidate whose board row matches this tile row,
    #   tfold sums the six 64-wide segments, apool sums the 8 rows of each batch.
    u = jnp.dot(z, w1f_ref[...], preferred_element_type=f32)      # (R, 384)
    seg = jax.lax.broadcasted_iota(jnp.int32, (R, L1), 1) >> 6    # lane // 64
    rid2 = jax.lax.broadcasted_iota(jnp.int32, (R, L1), 0) & (HP - 1)
    sel = (seg + 1 == rid2).astype(f32)
    v = jnp.dot(u * sel, tfold_ref[...], preferred_element_type=f32)   # (R, 64)
    h = jnp.dot(apool_ref[...], v, preferred_element_type=f32) + b1_ref[...]
    h = jnp.maximum(h, 0.0)                                       # (Bt, 64)

    # fc2 into a lane-dense 128-wide slab (weight cols >= 7 are zero);
    # the wrapper slices [:, :7] after the single HBM store.
    out_ref[...] = (jnp.dot(h, w2_ref[...], preferred_element_type=f32)
                    + b2_ref[...]).astype(out_ref.dtype)


# -------------------------- host-side param packing --------------------------

def init_raw_params(key):
    """Deterministic synthetic parameters in PyTorch layouts."""
    ks = jax.random.split(key, 18)
    nrm = lambda k, shp, s=0.1: s * jax.random.normal(k, shp, jnp.float32)
    p = {}
    p['w_init'] = nrm(ks[0], (32, 2, 3, 3))
    p['b_init'] = nrm(ks[1], (32,))
    p['w_res'] = nrm(ks[2], (32, 32, 3, 3), 0.05)
    p['b_res'] = nrm(ks[3], (32,))
    p['w_fin'] = nrm(ks[4], (1, 32, 1, 1), 0.2)
    p['b_fin'] = nrm(ks[5], (1,))
    p['bn1_g'] = 1.0 + nrm(ks[6], (32,))
    p['bn1_b'] = nrm(ks[7], (32,))
    p['bn1_m'] = nrm(ks[8], (32,))
    p['bn1_v'] = 0.5 + jnp.abs(nrm(ks[9], (32,)))
    p['bn2_g'] = 1.0 + nrm(ks[10], (1,))
    p['bn2_b'] = nrm(ks[11], (1,))
    p['bn2_m'] = nrm(ks[12], (1,))
    p['bn2_v'] = 0.5 + jnp.abs(nrm(ks[13], (1,)))
    p['w_fc1'] = nrm(ks[14], (64, 42))
    p['b_fc1'] = nrm(ks[15], (64,))
    p['w_fc2'] = nrm(ks[16], (7, 64))
    p['b_fc2'] = nrm(ks[17], (7,))
    return p


def pack_params(p, eps=1e-5):
    """Fold BN (eval mode) + conv biases into banded/structured kernel matrices.

    Banded conv matrices use the 8-column (256-lane) layout: padded col 0 is the
    left zero guard; the right-edge tap (would-be col 8) is simply dropped since
    the true padded activation there is zero.  Conv banded matrices are stored
    in bf16 (native MXU dtype); everything else stays f32.
    """
    np_ = lambda a: np.asarray(a, np.float32)
    s1 = np_(p['bn1_g']) / np.sqrt(np_(p['bn1_v']) + eps)
    c1 = np_(p['bn1_b']) - s1 * np_(p['bn1_m'])
    s2 = np_(p['bn2_g']) / np.sqrt(np_(p['bn2_v']) + eps)
    c2 = np_(p['bn2_b']) - s2 * np_(p['bn2_m'])

    def band_mats(w_oihw, scale):
        # (Cout,Cin,3,3) -> 3 block-banded matrices (8*Cin, 8*Cout), BN scale folded.
        w = np.transpose(np_(w_oihw), (2, 3, 1, 0)) * scale[None, None, None, :]
        cin, cout = w.shape[2], w.shape[3]
        M = np.zeros((3, WP * cin, WP * cout), np.float32)
        for di in range(3):
            for j in range(W):                 # output board col j -> padded col j+1
                for dj in range(3):
                    jp = j + dj                # input padded col
                    if jp < WP:                # right-edge tap (jp==8) dropped: zero pad
                        M[di, jp * cin:(jp + 1) * cin,
                          (j + 1) * cout:(j + 2) * cout] = w[di, dj]
        return M

    def bias_row(vec):
        c = vec.shape[0]
        row = np.zeros((1, WP * c), np.float32)
        for j in range(W):
            row[0, (j + 1) * c:(j + 2) * c] = vec
        return row

    kp = {}
    kp['m_init'] = band_mats(p['w_init'], s1)
    kp['b_init'] = bias_row(s1 * np_(p['b_init']) + c1)
    kp['m_res'] = band_mats(p['w_res'], s1)
    kp['b_res'] = bias_row(s1 * np_(p['b_res']) + c1)

    # final 1x1 conv (Cout=1) + BN(1), folded; output one scalar per column jp
    wf = np_(p['w_fin']).reshape(C) * s2[0]
    bf = float(s2[0] * np_(p['b_fin'])[0] + c2[0])
    wf_sp = np.zeros((LANES, WP), np.float32)
    bf_row = np.zeros((1, WP), np.float32)
    for jp in range(1, W + 1):
        wf_sp[jp * C:(jp + 1) * C, jp] = wf
        bf_row[0, jp] = bf
    kp['wf_sp'] = wf_sp
    kp['bf_row'] = bf_row

    # fc1 (42 -> 64), spread over the padded-column axis per board row i
    w1 = np_(p['w_fc1'])                      # (64, 42)
    w1_flat = np.zeros((WP, H * 64), np.float32)
    for i in range(H):
        for jp in range(1, W + 1):
            w1_flat[jp, i * 64:(i + 1) * 64] = w1[:, i * W + (jp - 1)]
    kp['w1_flat'] = w1_flat
    kp['t_fold'] = np.tile(np.eye(64, dtype=np.float32), (H, 1))  # (384, 64)
    kp['b1_row'] = np_(p['b_fc1']).reshape(1, 64)

    # fc2 (64 -> 7) padded to a 128-lane output slab
    w2p = np.zeros((64, 128), np.float32)
    w2p[:, :7] = np_(p['w_fc2']).T
    b2r = np.zeros((1, 128), np.float32)
    b2r[0, :7] = np_(p['b_fc2'])
    kp['w2_pad'] = w2p
    kp['b2_row'] = b2r

    bf16_keys = ('m_init', 'm_res')           # bf16 feeds the MXU natively
    return {k: jnp.asarray(v, jnp.bfloat16 if k in bf16_keys else jnp.float32)
            for k, v in kp.items()}


# ------------------------------ wrapper / driver ------------------------------

def qnet_forward(x_nchw, kp, max_bt=MAX_BT):
    """QNet forward (NCHW input, (B,7) output), single fused pallas_call."""
    B = x_nchw.shape[0]
    if B <= max_bt:
        Bt, Bpad = B, B                       # single grid step
    else:
        Bt = max_bt                           # >= 2 "parallel" steps (v7x: both TCs)
        Bpad = ((B + Bt - 1) // Bt) * Bt
    R = Bt * HP

    # one-time input prep: NCHW -> padded-board layout (Bpad*8, 8*2)
    x = x_nchw.astype(jnp.float32)
    if Bpad != B:
        x = jnp.pad(x, ((0, Bpad - B), (0, 0), (0, 0), (0, 0)))
    x = jnp.transpose(x, (0, 2, 3, 1))
    x = jnp.pad(x, ((0, 0), (1, 1), (1, 0), (0, 0)))   # left guard col only
    x_in = x.reshape(Bpad * HP, WP * 2)

    # batch-pooling matrix for this tile size (sums the 8 rows of each batch)
    a_pool = jnp.asarray(np.kron(np.eye(Bt, dtype=np.float32),
                                 np.ones((1, HP), np.float32)))

    weights = (kp['m_init'], kp['b_init'], kp['m_res'], kp['b_res'],
               kp['wf_sp'], kp['bf_row'], kp['w1_flat'], kp['t_fold'],
               a_pool, kp['b1_row'], kp['w2_pad'], kp['b2_row'])

    def full_spec(a):
        nd = a.ndim
        return pl.BlockSpec(a.shape, lambda g, nd=nd: (0,) * nd)

    out = pl.pallas_call(
        qnet_kernel,
        out_shape=jax.ShapeDtypeStruct((Bpad, 128), jnp.float32),
        grid=(Bpad // Bt,),
        in_specs=[pl.BlockSpec((R, WP * 2), lambda g: (g, 0))]
                 + [full_spec(a) for a in weights],
        out_specs=pl.BlockSpec((Bt, 128), lambda g: (g, 0)),
        scratch_shapes=[pltpu.VMEM((R + 2, WP * 2), jnp.float32),   # padded input
                        pltpu.VMEM((R + 2, LANES), jnp.float32),    # residual stream
                        pltpu.VMEM((R + 2, LANES), jnp.float32)],   # temp stream
        compiler_params=pltpu.CompilerParams(
            dimension_semantics=("parallel",)),
    )(x_in, *weights)
    return out[:B, :7]


def qnet_reference(x_nchw, p, eps=1e-5):
    """Pure-JAX reference of QNet.forward (eval-mode BN), for validation."""
    hp = jax.lax.Precision.HIGHEST

    def conv3x3(x, w, b):
        B, Hh, Ww, Cin = x.shape
        xp = jnp.pad(x, ((0, 0), (1, 1), (1, 1), (0, 0)))
        cols = [xp[:, di:di + Hh, dj:dj + Ww, :] for di in range(3) for dj in range(3)]
        patches = jnp.concatenate(cols, axis=-1).reshape(B * Hh * Ww, 9 * Cin)
        wmat = jnp.transpose(w, (2, 3, 1, 0)).reshape(9 * Cin, -1)
        return (jnp.dot(patches, wmat, precision=hp) + b).reshape(B, Hh, Ww, -1)

    def bn(x, g, be, m, v):
        return (x - m) * (g / jnp.sqrt(v + eps)) + be

    x = jnp.transpose(x_nchw.astype(jnp.float32), (0, 2, 3, 1))
    B = x.shape[0]
    bn1 = lambda t: bn(t, p['bn1_g'], p['bn1_b'], p['bn1_m'], p['bn1_v'])
    x = jax.nn.relu(bn1(conv3x3(x, p['w_init'], p['b_init'])))
    for _ in range(6):
        t = jax.nn.relu(bn1(conv3x3(x, p['w_res'], p['b_res'])))
        t = bn1(conv3x3(t, p['w_res'], p['b_res'])) 
        x = jax.nn.relu(t + x)
    y = jnp.einsum('bhwc,c->bhw', x, p['w_fin'].reshape(C), precision=hp) + p['b_fin'][0]
    y = bn(y[..., None], p['bn2_g'], p['bn2_b'], p['bn2_m'], p['bn2_v'])[..., 0]
    y = jax.nn.relu(y).reshape(B, H * W)
    h = jax.nn.relu(jnp.dot(y, p['w_fc1'].T, precision=hp) + p['b_fc1'])
    return jnp.dot(h, p['w_fc2'].T, precision=hp) + p['b_fc2']


if __name__ == "__main__":
    key = jax.random.PRNGKey(0)
    kparam, kx = jax.random.split(key)
    raw = init_raw_params(kparam)
    packed = pack_params(raw)

    # Connect-4 board: batch=2, 2 piece planes, 6x7 grid.
    x = (jax.random.uniform(kx, (2, 2, 6, 7)) > 0.5).astype(jnp.float32)

    fwd = jax.jit(qnet_forward)
    out = fwd(x, packed)
    jax.block_until_ready(out)
    assert out.shape == (2, 7) and out.dtype == jnp.float32

    # validate against the pure-JAX f32 reference (loose tol: covers the bf16
    # matmul-input cast through the 13-conv chain plus MXU pass rounding)
    ref = qnet_reference(x, raw)
    np.testing.assert_allclose(np.asarray(out), np.asarray(ref),
                               rtol=5e-2, atol=5e-2)
    print("KERNEL_OK")
</pallas_src>

<mosaic_0001>
module attributes {stable_mosaic.version = 11 : i64} {
  func.func @qnet_kernel(%arg0: i32, %arg1: memref<16x16xf32, #tpu.memory_space<vmem>>, %arg2: memref<3x16x256xbf16, #tpu.memory_space<vmem>>, %arg3: memref<1x256xf32, #tpu.memory_space<vmem>>, %arg4: memref<3x256x256xbf16, #tpu.memory_space<vmem>>, %arg5: memref<1x256xf32, #tpu.memory_space<vmem>>, %arg6: memref<256x8xf32, #tpu.memory_space<vmem>>, %arg7: memref<1x8xf32, #tpu.memory_space<vmem>>, %arg8: memref<8x384xf32, #tpu.memory_space<vmem>>, %arg9: memref<384x64xf32, #tpu.memory_space<vmem>>, %arg10: memref<2x16xf32, #tpu.memory_space<vmem>>, %arg11: memref<1x64xf32, #tpu.memory_space<vmem>>, %arg12: memref<64x128xf32, #tpu.memory_space<vmem>>, %arg13: memref<1x128xf32, #tpu.memory_space<vmem>>, %arg14: memref<2x128xf32, #tpu.memory_space<vmem>>, %arg15: memref<18x16xf32, #tpu.memory_space<vmem>>, %arg16: memref<18x256xf32, #tpu.memory_space<vmem>>, %arg17: memref<18x256xf32, #tpu.memory_space<vmem>>) attributes {dimension_semantics = [#tpu.dimension_semantics<parallel>], iteration_bounds = array<i64: 1>, scalar_prefetch = 0 : i64, scratch_operands = 3 : i64, tpu.core_type = #tpu.core_type<tc>, window_params = [{transform_indices = @transform_0, window_bounds = array<i64: 16, 16>}, {pipeline_mode = #tpu.pipeline_mode<synchronous>, transform_indices = @transform_1, window_bounds = array<i64: 3, 16, 256>}, {pipeline_mode = #tpu.pipeline_mode<synchronous>, transform_indices = @transform_2, window_bounds = array<i64: 1, 256>}, {pipeline_mode = #tpu.pipeline_mode<synchronous>, transform_indices = @transform_3, window_bounds = array<i64: 3, 256, 256>}, {pipeline_mode = #tpu.pipeline_mode<synchronous>, transform_indices = @transform_4, window_bounds = array<i64: 1, 256>}, {pipeline_mode = #tpu.pipeline_mode<synchronous>, transform_indices = @transform_5, window_bounds = array<i64: 256, 8>}, {pipeline_mode = #tpu.pipeline_mode<synchronous>, transform_indices = @transform_6, window_bounds = array<i64: 1, 8>}, {pipeline_mode = #tpu.pipeline_mode<synchronous>, transform_indices = @transform_7, window_bounds = array<i64: 8, 384>}, {pipeline_mode = #tpu.pipeline_mode<synchronous>, transform_indices = @transform_8, window_bounds = array<i64: 384, 64>}, {pipeline_mode = #tpu.pipeline_mode<synchronous>, transform_indices = @transform_9, window_bounds = array<i64: 2, 16>}, {pipeline_mode = #tpu.pipeline_mode<synchronous>, transform_indices = @transform_10, window_bounds = array<i64: 1, 64>}, {pipeline_mode = #tpu.pipeline_mode<synchronous>, transform_indices = @transform_11, window_bounds = array<i64: 64, 128>}, {pipeline_mode = #tpu.pipeline_mode<synchronous>, transform_indices = @transform_12, window_bounds = array<i64: 1, 128>}, {transform_indices = @transform_13, window_bounds = array<i64: 2, 128>}]} {
    %0 = tpu.iota {dimensions = array<i32: 0>} : vector<16x256xi32>
    %c7_i32 = arith.constant 7 : i32
    %1 = vector.broadcast %c7_i32 : i32 to vector<16x256xi32>
    %2 = arith.andi %0, %1 : vector<16x256xi32>
    %c1_i32 = arith.constant 1 : i32
    %3 = vector.broadcast %c1_i32 : i32 to vector<16x256xi32>
    %4 = arith.cmpi sge, %2, %3 : vector<16x256xi32>
    %c6_i32 = arith.constant 6 : i32
    %5 = vector.broadcast %c6_i32 : i32 to vector<16x256xi32>
    %6 = arith.cmpi sle, %2, %5 : vector<16x256xi32>
    %7 = arith.andi %4, %6 : vector<16x256xi1>
    %8 = arith.extui %7 : vector<16x256xi1> to vector<16x256xi32>
    %9 = arith.sitofp %8 : vector<16x256xi32> to vector<16x256xf32>
    %cst = arith.constant 0.000000e+00 : f32
    %10 = vector.broadcast %cst : f32 to vector<1x16xf32>
    %cst_0 = arith.constant 0.000000e+00 : f32
    %11 = vector.broadcast %cst_0 : f32 to vector<1x256xf32>
    %c0 = arith.constant 0 : index
    %c0_1 = arith.constant 0 : index
    %12 = vector.load %arg15[%c0, %c0_1] : memref<18x16xf32, #tpu.memory_space<vmem>>, vector<1x16xf32>
    tpu.vector_store %arg15[%c0, %c0_1], %10 {strides = array<i32>} : memref<18x16xf32, #tpu.memory_space<vmem>>, vector<1x16xf32>,
    %c17 = arith.constant 17 : index
    %c0_2 = arith.constant 0 : index
    %13 = vector.load %arg15[%c17, %c0_2] : memref<18x16xf32, #tpu.memory_space<vmem>>, vector<1x16xf32>
    tpu.vector_store %arg15[%c17, %c0_2], %10 {strides = array<i32>} : memref<18x16xf32, #tpu.memory_space<vmem>>, vector<1x16xf32>,
    %c0_3 = arith.constant 0 : index
    %c0_4 = arith.constant 0 : index
    %14 = vector.load %arg16[%c0_3, %c0_4] : memref<18x256xf32, #tpu.memory_space<vmem>>, vector<1x256xf32>
    tpu.vector_store %arg16[%c0_3, %c0_4], %11 {strides = array<i32>} : memref<18x256xf32, #tpu.memory_space<vmem>>, vector<1x256xf32>,
    %c17_5 = arith.constant 17 : index
    %c0_6 = arith.constant 0 : index
    %15 = vector.load %arg16[%c17_5, %c0_6] : memref<18x256xf32, #tpu.memory_space<vmem>>, vector<1x256xf32>
    tpu.vector_store %arg16[%c17_5, %c0_6], %11 {strides = array<i32>} : memref<18x256xf32, #tpu.memory_space<vmem>>, vector<1x256xf32>,
    %c0_7 = arith.constant 0 : index
    %c0_8 = arith.constant 0 : index
    %16 = vector.load %arg17[%c0_7, %c0_8] : memref<18x256xf32, #tpu.memory_space<vmem>>, vector<1x256xf32>
    tpu.vector_store %arg17[%c0_7, %c0_8], %11 {strides = array<i32>} : memref<18x256xf32, #tpu.memory_space<vmem>>, vector<1x256xf32>,
    %c17_9 = arith.constant 17 : index
    %c0_10 = arith.constant 0 : index
    %17 = vector.load %arg17[%c17_9, %c0_10] : memref<18x256xf32, #tpu.memory_space<vmem>>, vector<1x256xf32>
    tpu.vector_store %arg17[%c17_9, %c0_10], %11 {strides = array<i32>} : memref<18x256xf32, #tpu.memory_space<vmem>>, vector<1x256xf32>,
    %c0_11 = arith.constant 0 : index
    %c0_12 = arith.constant 0 : index
    %18 = vector.load %arg1[%c0_11, %c0_12] : memref<16x16xf32, #tpu.memory_space<vmem>>, vector<16x16xf32>
    %c1 = arith.constant 1 : index
    %c0_13 = arith.constant 0 : index
    %19 = vector.load %arg15[%c1, %c0_13] : memref<18x16xf32, #tpu.memory_space<vmem>>, vector<16x16xf32>
    tpu.vector_store %arg15[%c1, %c0_13], %18 {strides = array<i32>} : memref<18x16xf32, #tpu.memory_space<vmem>>, vector<16x16xf32>,
    %c0_14 = arith.constant 0 : index
    %c0_15 = arith.constant 0 : index
    %20 = vector.load %arg3[%c0_14, %c0_15] : memref<1x256xf32, #tpu.memory_space<vmem>>, vector<1x256xf32>
    %c0_16 = arith.constant 0 : index
    %c0_17 = arith.constant 0 : index
    %21 = vector.load %arg5[%c0_16, %c0_17] : memref<1x256xf32, #tpu.memory_space<vmem>>, vector<1x256xf32>
    %c0_18 = arith.constant 0 : index
    %c0_19 = arith.constant 0 : index
    %22 = vector.load %arg15[%c0_18, %c0_19] : memref<18x16xf32, #tpu.memory_space<vmem>>, vector<16x16xf32>
    %23 = arith.truncf %22 : vector<16x16xf32> to vector<16x16xbf16>
    %c0_20 = arith.constant 0 : index
    %c0_21 = arith.constant 0 : index
    %c0_22 = arith.constant 0 : index
    %24 = vector.load %arg2[%c0_20, %c0_21, %c0_22] : memref<3x16x256xbf16, #tpu.memory_space<vmem>>, vector<1x16x256xbf16>
    %25 = vector.shape_cast %24 : vector<1x16x256xbf16> to vector<16x256xbf16>
    %cst_23 = arith.constant dense<0.000000e+00> : vector<16x256xf32>
    %26 = tpu.matmul %23, %25, %cst_23 {dimension_numbers = #tpu.dot_dimension_numbers<[1], [0], [0], [1], [0, 0, 1, 1], [], []>} : vector<16x16xbf16>, vector<16x256xbf16>, vector<16x256xf32> -> vector<16x256xf32>
    %c1_24 = arith.constant 1 : index
    %c0_25 = arith.constant 0 : index
    %27 = vector.load %arg15[%c1_24, %c0_25] : memref<18x16xf32, #tpu.memory_space<vmem>>, vector<16x16xf32>
    %28 = arith.truncf %27 : vector<16x16xf32> to vector<16x16xbf16>
    %c1_26 = arith.constant 1 : index
    %c0_27 = arith.constant 0 : index
    %c0_28 = arith.constant 0 : index
    %29 = vector.load %arg2[%c1_26, %c0_27, %c0_28] : memref<3x16x256xbf16, #tpu.memory_space<vmem>>, vector<1x16x256xbf16>
    %30 = vector.shape_cast %29 : vector<1x16x256xbf16> to vector<16x256xbf16>
    %cst_29 = arith.constant dense<0.000000e+00> : vector<16x256xf32>
    %31 = tpu.matmul %28, %30, %cst_29 {dimension_numbers = #tpu.dot_dimension_numbers<[1], [0], [0], [1], [0, 0, 1, 1], [], []>} : vector<16x16xbf16>, vector<16x256xbf16>, vector<16x256xf32> -> vector<16x256xf32>
    %32 = arith.addf %26, %31 : vector<16x256xf32>
    %c2 = arith.constant 2 : index
    %c0_30 = arith.constant 0 : index
    %33 = vector.load %arg15[%c2, %c0_30] : memref<18x16xf32, #tpu.memory_space<vmem>>, vector<16x16xf32>
    %34 = arith.truncf %33 : vector<16x16xf32> to vector<16x16xbf16>
    %c2_31 = arith.constant 2 : index
    %c0_32 = arith.constant 0 : index
    %c0_33 = arith.constant 0 : index
    %35 = vector.load %arg2[%c2_31, %c0_32, %c0_33] : memref<3x16x256xbf16, #tpu.memory_space<vmem>>, vector<1x16x256xbf16>
    %36 = vector.shape_cast %35 : vector<1x16x256xbf16> to vector<16x256xbf16>
    %cst_34 = arith.constant dense<0.000000e+00> : vector<16x256xf32>
    %37 = tpu.matmul %34, %36, %cst_34 {dimension_numbers = #tpu.dot_dimension_numbers<[1], [0], [0], [1], [0, 0, 1, 1], [], []>} : vector<16x16xbf16>, vector<16x256xbf16>, vector<16x256xf32> -> vector<16x256xf32>
    %38 = arith.addf %32, %37 : vector<16x256xf32>
    %39 = vector.broadcast %20 : vector<1x256xf32> to vector<16x256xf32>
    %40 = arith.addf %38, %39 : vector<16x256xf32>
    %cst_35 = arith.constant 0.000000e+00 : f32
    %41 = vector.broadcast %cst_35 : f32 to vector<16x256xf32>
    %42 = arith.maximumf %40, %41 : vector<16x256xf32>
    %43 = arith.mulf %42, %9 : vector<16x256xf32>
    %c1_36 = arith.constant 1 : index
    %c0_37 = arith.constant 0 : index
    %44 = vector.load %arg16[%c1_36, %c0_37] : memref<18x256xf32, #tpu.memory_space<vmem>>, vector<16x256xf32>
    tpu.vector_store %arg16[%c1_36, %c0_37], %43 {strides = array<i32>} : memref<18x256xf32, #tpu.memory_space<vmem>>, vector<16x256xf32>,
    %c0_38 = arith.constant 0 : index
    %c0_39 = arith.constant 0 : index
    %45 = vector.load %arg16[%c0_38, %c0_39] : memref<18x256xf32, #tpu.memory_space<vmem>>, vector<16x256xf32>
    %46 = arith.truncf %45 : vector<16x256xf32> to vector<16x256xbf16>
    %c0_40 = arith.constant 0 : index
    %c0_41 = arith.constant 0 : index
    %c0_42 = arith.constant 0 : index
    %47 = vector.load %arg4[%c0_40, %c0_41, %c0_42] : memref<3x256x256xbf16, #tpu.memory_space<vmem>>, vector<1x256x256xbf16>
    %48 = vector.shape_cast %47 : vector<1x256x256xbf16> to vector<256x256xbf16>
    %cst_43 = arith.constant dense<0.000000e+00> : vector<16x256xf32>
    %49 = tpu.matmul %46, %48, %cst_43 {dimension_numbers = #tpu.dot_dimension_numbers<[1], [0], [0], [1], [0, 0, 1, 1], [], []>} : vector<16x256xbf16>, vector<256x256xbf16>, vector<16x256xf32> -> vector<16x256xf32>
    %c1_44 = arith.constant 1 : index
    %c0_45 = arith.constant 0 : index
    %50 = vector.load %arg16[%c1_44, %c0_45] : memref<18x256xf32, #tpu.memory_space<vmem>>, vector<16x256xf32>
    %51 = arith.truncf %50 : vector<16x256xf32> to vector<16x256xbf16>
    %c1_46 = arith.constant 1 : index
    %c0_47 = arith.constant 0 : index
    %c0_48 = arith.constant 0 : index
    %52 = vector.load %arg4[%c1_46, %c0_47, %c0_48] : memref<3x256x256xbf16, #tpu.memory_space<vmem>>, vector<1x256x256xbf16>
    %53 = vector.shape_cast %52 : vector<1x256x256xbf16> to vector<256x256xbf16>
    %cst_49 = arith.constant dense<0.000000e+00> : vector<16x256xf32>
    %54 = tpu.matmul %51, %53, %cst_49 {dimension_numbers = #tpu.dot_dimension_numbers<[1], [0], [0], [1], [0, 0, 1, 1], [], []>} : vector<16x256xbf16>, vector<256x256xbf16>, vector<16x256xf32> -> vector<16x256xf32>
    %55 = arith.addf %49, %54 : vector<16x256xf32>
    %c2_50 = arith.constant 2 : index
    %c0_51 = arith.constant 0 : index
    %56 = vector.load %arg16[%c2_50, %c0_51] : memref<18x256xf32, #tpu.memory_space<vmem>>, vector<16x256xf32>
    %57 = arith.truncf %56 : vector<16x256xf32> to vector<16x256xbf16>
    %c2_52 = arith.constant 2 : index
    %c0_53 = arith.constant 0 : index
    %c0_54 = arith.constant 0 : index
    %58 = vector.load %arg4[%c2_52, %c0_53, %c0_54] : memref<3x256x256xbf16, #tpu.memory_space<vmem>>, vector<1x256x256xbf16>
    %59 = vector.shape_cast %58 : vector<1x256x256xbf16> to vector<256x256xbf16>
    %cst_55 = arith.constant dense<0.000000e+00> : vector<16x256xf32>
    %60 = tpu.matmul %57, %59, %cst_55 {dimension_numbers = #tpu.dot_dimension_numbers<[1], [0], [0], [1], [0, 0, 1, 1], [], []>} : vector<16x256xbf16>, vector<256x256xbf16>, vector<16x256xf32> -> vector<16x256xf32>
    %61 = arith.addf %55, %60 : vector<16x256xf32>
    %62 = vector.broadcast %21 : vector<1x256xf32> to vector<16x256xf32>
    %63 = arith.addf %61, %62 : vector<16x256xf32>
    %cst_56 = arith.constant 0.000000e+00 : f32
    %64 = vector.broadcast %cst_56 : f32 to vector<16x256xf32>
    %65 = arith.maximumf %63, %64 : vector<16x256xf32>
    %66 = arith.mulf %65, %9 : vector<16x256xf32>
    %c1_57 = arith.constant 1 : index
    %c0_58 = arith.constant 0 : index
    %67 = vector.load %arg17[%c1_57, %c0_58] : memref<18x256xf32, #tpu.memory_space<vmem>>, vector<16x256xf32>
    tpu.vector_store %arg17[%c1_57, %c0_58], %66 {strides = array<i32>} : memref<18x256xf32, #tpu.memory_space<vmem>>, vector<16x256xf32>,
    %c0_59 = arith.constant 0 : index
    %c0_60 = arith.constant 0 : index
    %68 = vector.load %arg17[%c0_59, %c0_60] : memref<18x256xf32, #tpu.memory_space<vmem>>, vector<16x256xf32>
    %69 = arith.truncf %68 : vector<16x256xf32> to vector<16x256xbf16>
    %c0_61 = arith.constant 0 : index
    %c0_62 = arith.constant 0 : index
    %c0_63 = arith.constant 0 : index
    %70 = vector.load %arg4[%c0_61, %c0_62, %c0_63] : memref<3x256x256xbf16, #tpu.memory_space<vmem>>, vector<1x256x256xbf16>
    %71 = vector.shape_cast %70 : vector<1x256x256xbf16> to vector<256x256xbf16>
    %cst_64 = arith.constant dense<0.000000e+00> : vector<16x256xf32>
    %72 = tpu.matmul %69, %71, %cst_64 {dimension_numbers = #tpu.dot_dimension_numbers<[1], [0], [0], [1], [0, 0, 1, 1], [], []>} : vector<16x256xbf16>, vector<256x256xbf16>, vector<16x256xf32> -> vector<16x256xf32>
    %c1_65 = arith.constant 1 : index
    %c0_66 = arith.constant 0 : index
    %73 = vector.load %arg17[%c1_65, %c0_66] : memref<18x256xf32, #tpu.memory_space<vmem>>, vector<16x256xf32>
    %74 = arith.truncf %73 : vector<16x256xf32> to vector<16x256xbf16>
    %c1_67 = arith.constant 1 : index
    %c0_68 = arith.constant 0 : index
    %c0_69 = arith.constant 0 : index
    %75 = vector.load %arg4[%c1_67, %c0_68, %c0_69] : memref<3x256x256xbf16, #tpu.memory_space<vmem>>, vector<1x256x256xbf16>
    %76 = vector.shape_cast %75 : vector<1x256x256xbf16> to vector<256x256xbf16>
    %cst_70 = arith.constant dense<0.000000e+00> : vector<16x256xf32>
    %77 = tpu.matmul %74, %76, %cst_70 {dimension_numbers = #tpu.dot_dimension_numbers<[1], [0], [0], [1], [0, 0, 1, 1], [], []>} : vector<16x256xbf16>, vector<256x256xbf16>, vector<16x256xf32> -> vector<16x256xf32>
    %78 = arith.addf %72, %77 : vector<16x256xf32>
    %c2_71 = arith.constant 2 : index
    %c0_72 = arith.constant 0 : index
    %79 = vector.load %arg17[%c2_71, %c0_72] : memref<18x256xf32, #tpu.memory_space<vmem>>, vector<16x256xf32>
    %80 = arith.truncf %79 : vector<16x256xf32> to vector<16x256xbf16>
    %c2_73 = arith.constant 2 : index
    %c0_74 = arith.constant 0 : index
    %c0_75 = arith.constant 0 : index
    %81 = vector.load %arg4[%c2_73, %c0_74, %c0_75] : memref<3x256x256xbf16, #tpu.memory_space<vmem>>, vector<1x256x256xbf16>
    %82 = vector.shape_cast %81 : vector<1x256x256xbf16> to vector<256x256xbf16>
    %cst_76 = arith.constant dense<0.000000e+00> : vector<16x256xf32>
    %83 = tpu.matmul %80, %82, %cst_76 {dimension_numbers = #tpu.dot_dimension_numbers<[1], [0], [0], [1], [0, 0, 1, 1], [], []>} : vector<16x256xbf16>, vector<256x256xbf16>, vector<16x256xf32> -> vector<16x256xf32>
    %84 = arith.addf %78, %83 : vector<16x256xf32>
    %85 = vector.broadcast %21 : vector<1x256xf32> to vector<16x256xf32>
    %86 = arith.addf %84, %85 : vector<16x256xf32>
    %87 = arith.mulf %86, %9 : vector<16x256xf32>
    %88 = arith.addf %87, %43 : vector<16x256xf32>
    %cst_77 = arith.constant 0.000000e+00 : f32
    %89 = vector.broadcast %cst_77 : f32 to vector<16x256xf32>
    %90 = arith.maximumf %88, %89 : vector<16x256xf32>
    %c1_78 = arith.constant 1 : index
    %c0_79 = arith.constant 0 : index
    %91 = vector.load %arg16[%c1_78, %c0_79] : memref<18x256xf32, #tpu.memory_space<vmem>>, vector<16x256xf32>
    tpu.vector_store %arg16[%c1_78, %c0_79], %90 {strides = array<i32>} : memref<18x256xf32, #tpu.memory_space<vmem>>, vector<16x256xf32>,
    %c0_80 = arith.constant 0 : index
    %c0_81 = arith.constant 0 : index
    %92 = vector.load %arg16[%c0_80, %c0_81] : memref<18x256xf32, #tpu.memory_space<vmem>>, vector<16x256xf32>
    %93 = arith.truncf %92 : vector<16x256xf32> to vector<16x256xbf16>
    %c0_82 = arith.constant 0 : index
    %c0_83 = arith.constant 0 : index
    %c0_84 = arith.constant 0 : index
    %94 = vector.load %arg4[%c0_82, %c0_83, %c0_84] : memref<3x256x256xbf16, #tpu.memory_space<vmem>>, vector<1x256x256xbf16>
    %95 = vector.shape_cast %94 : vector<1x256x256xbf16> to vector<256x256xbf16>
    %cst_85 = arith.constant dense<0.000000e+00> : vector<16x256xf32>
    %96 = tpu.matmul %93, %95, %cst_85 {dimension_numbers = #tpu.dot_dimension_numbers<[1], [0], [0], [1], [0, 0, 1, 1], [], []>} : vector<16x256xbf16>, vector<256x256xbf16>, vector<16x256xf32> -> vector<16x256xf32>
    %c1_86 = arith.constant 1 : index
    %c0_87 = arith.constant 0 : index
    %97 = vector.load %arg16[%c1_86, %c0_87] : memref<18x256xf32, #tpu.memory_space<vmem>>, vector<16x256xf32>
    %98 = arith.truncf %97 : vector<16x256xf32> to vector<16x256xbf16>
    %c1_88 = arith.constant 1 : index
    %c0_89 = arith.constant 0 : index
    %c0_90 = arith.constant 0 : index
    %99 = vector.load %arg4[%c1_88, %c0_89, %c0_90] : memref<3x256x256xbf16, #tpu.memory_space<vmem>>, vector<1x256x256xbf16>
    %100 = vector.shape_cast %99 : vector<1x256x256xbf16> to vector<256x256xbf16>
    %cst_91 = arith.constant dense<0.000000e+00> : vector<16x256xf32>
    %101 = tpu.matmul %98, %100, %cst_91 {dimension_numbers = #tpu.dot_dimension_numbers<[1], [0], [0], [1], [0, 0, 1, 1], [], []>} : vector<16x256xbf16>, vector<256x256xbf16>, vector<16x256xf32> -> vector<16x256xf32>
    %102 = arith.addf %96, %101 : vector<16x256xf32>
    %c2_92 = arith.constant 2 : index
    %c0_93 = arith.constant 0 : index
    %103 = vector.load %arg16[%c2_92, %c0_93] : memref<18x256xf32, #tpu.memory_space<vmem>>, vector<16x256xf32>
    %104 = arith.truncf %103 : vector<16x256xf32> to vector<16x256xbf16>
    %c2_94 = arith.constant 2 : index
    %c0_95 = arith.constant 0 : index
    %c0_96 = arith.constant 0 : index
    %105 = vector.load %arg4[%c2_94, %c0_95, %c0_96] : memref<3x256x256xbf16, #tpu.memory_space<vmem>>, vector<1x256x256xbf16>
    %106 = vector.shape_cast %105 : vector<1x256x256xbf16> to vector<256x256xbf16>
    %cst_97 = arith.constant dense<0.000000e+00> : vector<16x256xf32>
    %107 = tpu.matmul %104, %106, %cst_97 {dimension_numbers = #tpu.dot_dimension_numbers<[1], [0], [0], [1], [0, 0, 1, 1], [], []>} : vector<16x256xbf16>, vector<256x256xbf16>, vector<16x256xf32> -> vector<16x256xf32>
    %108 = arith.addf %102, %107 : vector<16x256xf32>
    %109 = vector.broadcast %21 : vector<1x256xf32> to vector<16x256xf32>
    %110 = arith.addf %108, %109 : vector<16x256xf32>
    %cst_98 = arith.constant 0.000000e+00 : f32
    %111 = vector.broadcast %cst_98 : f32 to vector<16x256xf32>
    %112 = arith.maximumf %110, %111 : vector<16x256xf32>
    %113 = arith.mulf %112, %9 : vector<16x256xf32>
    %c1_99 = arith.constant 1 : index
    %c0_100 = arith.constant 0 : index
    %114 = vector.load %arg17[%c1_99, %c0_100] : memref<18x256xf32, #tpu.memory_space<vmem>>, vector<16x256xf32>
    tpu.vector_store %arg17[%c1_99, %c0_100], %113 {strides = array<i32>} : memref<18x256xf32, #tpu.memory_space<vmem>>, vector<16x256xf32>,
    %c0_101 = arith.constant 0 : index
    %c0_102 = arith.constant 0 : index
    %115 = vector.load %arg17[%c0_101, %c0_102] : memref<18x256xf32, #tpu.memory_space<vmem>>, vector<16x256xf32>
    %116 = arith.truncf %115 : vector<16x256xf32> to vector<16x256xbf16>
    %c0_103 = arith.constant 0 : index
    %c0_104 = arith.constant 0 : index
    %c0_105 = arith.constant 0 : index
    %117 = vector.load %arg4[%c0_103, %c0_104, %c0_105] : memref<3x256x256xbf16, #tpu.memory_space<vmem>>, vector<1x256x256xbf16>
    %118 = vector.shape_cast %117 : vector<1x256x256xbf16> to vector<256x256xbf16>
    %cst_106 = arith.constant dense<0.000000e+00> : vector<16x256xf32>
    %119 = tpu.matmul %116, %118, %cst_106 {dimension_numbers = #tpu.dot_dimension_numbers<[1], [0], [0], [1], [0, 0, 1, 1], [], []>} : vector<16x256xbf16>, vector<256x256xbf16>, vector<16x256xf32> -> vector<16x256xf32>
    %c1_107 = arith.constant 1 : index
    %c0_108 = arith.constant 0 : index
    %120 = vector.load %arg17[%c1_107, %c0_108] : memref<18x256xf32, #tpu.memory_space<vmem>>, vector<16x256xf32>
    %121 = arith.truncf %120 : vector<16x256xf32> to vector<16x256xbf16>
    %c1_109 = arith.constant 1 : index
    %c0_110 = arith.constant 0 : index
    %c0_111 = arith.constant 0 : index
    %122 = vector.load %arg4[%c1_109, %c0_110, %c0_111] : memref<3x256x256xbf16, #tpu.memory_space<vmem>>, vector<1x256x256xbf16>
    %123 = vector.shape_cast %122 : vector<1x256x256xbf16> to vector<256x256xbf16>
    %cst_112 = arith.constant dense<0.000000e+00> : vector<16x256xf32>
    %124 = tpu.matmul %121, %123, %cst_112 {dimension_numbers = #tpu.dot_dimension_numbers<[1], [0], [0], [1], [0, 0, 1, 1], [], []>} : vector<16x256xbf16>, vector<256x256xbf16>, vector<16x256xf32> -> vector<16x256xf32>
    %125 = arith.addf %119, %124 : vector<16x256xf32>
    %c2_113 = arith.constant 2 : index
    %c0_114 = arith.constant 0 : index
    %126 = vector.load %arg17[%c2_113, %c0_114] : memref<18x256xf32, #tpu.memory_space<vmem>>, vector<16x256xf32>
    %127 = arith.truncf %126 : vector<16x256xf32> to vector<16x256xbf16>
    %c2_115 = arith.constant 2 : index
    %c0_116 = arith.constant 0 : index
    %c0_117 = arith.constant 0 : index
    %128 = vector.load %arg4[%c2_115, %c0_116, %c0_117] : memref<3x256x256xbf16, #tpu.memory_space<vmem>>, vector<1x256x256xbf16>
    %129 = vector.shape_cast %128 : vector<1x256x256xbf16> to vector<256x256xbf16>
    %cst_118 = arith.constant dense<0.000000e+00> : vector<16x256xf32>
    %130 = tpu.matmul %127, %129, %cst_118 {dimension_numbers = #tpu.dot_dimension_numbers<[1], [0], [0], [1], [0, 0, 1, 1], [], []>} : vector<16x256xbf16>, vector<256x256xbf16>, vector<16x256xf32> -> vector<16x256xf32>
    %131 = arith.addf %125, %130 : vector<16x256xf32>
    %132 = vector.broadcast %21 : vector<1x256xf32> to vector<16x256xf32>
    %133 = arith.addf %131, %132 : vector<16x256xf32>
    %134 = arith.mulf %133, %9 : vector<16x256xf32>
    %135 = arith.addf %134, %90 : vector<16x256xf32>
    %cst_119 = arith.constant 0.000000e+00 : f32
    %136 = vector.broadcast %cst_119 : f32 to vector<16x256xf32>
    %137 = arith.maximumf %135, %136 : vector<16x256xf32>
    %c1_120 = arith.constant 1 : index
    %c0_121 = arith.constant 0 : index
    %138 = vector.load %arg16[%c1_120, %c0_121] : memref<18x256xf32, #tpu.memory_space<vmem>>, vector<16x256xf32>
    tpu.vector_store %arg16[%c1_120, %c0_121], %137 {strides = array<i32>} : memref<18x256xf32, #tpu.memory_space<vmem>>, vector<16x256xf32>,
    %c0_122 = arith.constant 0 : index
    %c0_123 = arith.constant 0 : index
    %139 = vector.load %arg16[%c0_122, %c0_123] : memref<18x256xf32, #tpu.memory_space<vmem>>, vector<16x256xf32>
    %140 = arith.truncf %139 : vector<16x256xf32> to vector<16x256xbf16>
    %c0_124 = arith.constant 0 : index
    %c0_125 = arith.constant 0 : index
    %c0_126 = arith.constant 0 : index
    %141 = vector.load %arg4[%c0_124, %c0_125, %c0_126] : memref<3x256x256xbf16, #tpu.memory_space<vmem>>, vector<1x256x256xbf16>
    %142 = vector.shape_cast %141 : vector<1x256x256xbf16> to vector<256x256xbf16>
    %cst_127 = arith.constant dense<0.000000e+00> : vector<16x256xf32>
    %143 = tpu.matmul %140, %142, %cst_127 {dimension_numbers = #tpu.dot_dimension_numbers<[1], [0], [0], [1], [0, 0, 1, 1], [], []>} : vector<16x256xbf16>, vector<256x256xbf16>, vector<16x256xf32> -> vector<16x256xf32>
    %c1_128 = arith.constant 1 : index
    %c0_129 = arith.constant 0 : index
    %144 = vector.load %arg16[%c1_128, %c0_129] : memref<18x256xf32, #tpu.memory_space<vmem>>, vector<16x256xf32>
    %145 = arith.truncf %144 : vector<16x256xf32> to vector<16x256xbf16>
    %c1_130 = arith.constant 1 : index
    %c0_131 = arith.constant 0 : index
    %c0_132 = arith.constant 0 : index
    %146 = vector.load %arg4[%c1_130, %c0_131, %c0_132] : memref<3x256x256xbf16, #tpu.memory_space<vmem>>, vector<1x256x256xbf16>
    %147 = vector.shape_cast %146 : vector<1x256x256xbf16> to vector<256x256xbf16>
    %cst_133 = arith.constant dense<0.000000e+00> : vector<16x256xf32>
    %148 = tpu.matmul %145, %147, %cst_133 {dimension_numbers = #tpu.dot_dimension_numbers<[1], [0], [0], [1], [0, 0, 1, 1], [], []>} : vector<16x256xbf16>, vector<256x256xbf16>, vector<16x256xf32> -> vector<16x256xf32>
    %149 = arith.addf %143, %148 : vector<16x256xf32>
    %c2_134 = arith.constant 2 : index
    %c0_135 = arith.constant 0 : index
    %150 = vector.load %arg16[%c2_134, %c0_135] : memref<18x256xf32, #tpu.memory_space<vmem>>, vector<16x256xf32>
    %151 = arith.truncf %150 : vector<16x256xf32> to vector<16x256xbf16>
    %c2_136 = arith.constant 2 : index
    %c0_137 = arith.constant 0 : index
    %c0_138 = arith.constant 0 : index
    %152 = vector.load %arg4[%c2_136, %c0_137, %c0_138] : memref<3x256x256xbf16, #tpu.memory_space<vmem>>, vector<1x256x256xbf16>
    %153 = vector.shape_cast %152 : vector<1x256x256xbf16> to vector<256x256xbf16>
    %cst_139 = arith.constant dense<0.000000e+00> : vector<16x256xf32>
    %154 = tpu.matmul %151, %153, %cst_139 {dimension_numbers = #tpu.dot_dimension_numbers<[1], [0], [0], [1], [0, 0, 1, 1], [], []>} : vector<16x256xbf16>, vector<256x256xbf16>, vector<16x256xf32> -> vector<16x256xf32>
    %155 = arith.addf %149, %154 : vector<16x256xf32>
    %156 = vector.broadcast %21 : vector<1x256xf32> to vector<16x256xf32>
    %157 = arith.addf %155, %156 : vector<16x256xf32>
    %cst_140 = arith.constant 0.000000e+00 : f32
    %158 = vector.broadcast %cst_140 : f32 to vector<16x256xf32>
    %159 = arith.maximumf %157, %158 : vector<16x256xf32>
    %160 = arith.mulf %159, %9 : vector<16x256xf32>
    %c1_141 = arith.constant 1 : index
    %c0_142 = arith.constant 0 : index
    %161 = vector.load %arg17[%c1_141, %c0_142] : memref<18x256xf32, #tpu.memory_space<vmem>>, vector<16x256xf32>
    tpu.vector_store %arg17[%c1_141, %c0_142], %160 {strides = array<i32>} : memref<18x256xf32, #tpu.memory_space<vmem>>, vector<16x256xf32>,
    %c0_143 = arith.constant 0 : index
    %c0_144 = arith.constant 0 : index
    %162 = vector.load %arg17[%c0_143, %c0_144] : memref<18x256xf32, #tpu.memory_space<vmem>>, vector<16x256xf32>
    %163 = arith.truncf %162 : vector<16x256xf32> to vector<16x256xbf16>
    %c0_145 = arith.constant 0 : index
    %c0_146 = arith.constant 0 : index
    %c0_147 = arith.constant 0 : index
    %164 = vector.load %arg4[%c0_145, %c0_146, %c0_147] : memref<3x256x256xbf16, #tpu.memory_space<vmem>>, vector<1x256x256xbf16>
    %165 = vector.shape_cast %164 : vector<1x256x256xbf16> to vector<256x256xbf16>
    %cst_148 = arith.constant dense<0.000000e+00> : vector<16x256xf32>
    %166 = tpu.matmul %163, %165, %cst_148 {dimension_numbers = #tpu.dot_dimension_numbers<[1], [0], [0], [1], [0, 0, 1, 1], [], []>} : vector<16x256xbf16>, vector<256x256xbf16>, vector<16x256xf32> -> vector<16x256xf32>
    %c1_149 = arith.constant 1 : index
    %c0_150 = arith.constant 0 : index
    %167 = vector.load %arg17[%c1_149, %c0_150] : memref<18x256xf32, #tpu.memory_space<vmem>>, vector<16x256xf32>
    %168 = arith.truncf %167 : vector<16x256xf32> to vector<16x256xbf16>
    %c1_151 = arith.constant 1 : index
    %c0_152 = arith.constant 0 : index
    %c0_153 = arith.constant 0 : index
    %169 = vector.load %arg4[%c1_151, %c0_152, %c0_153] : memref<3x256x256xbf16, #tpu.memory_space<vmem>>, vector<1x256x256xbf16>
    %170 = vector.shape_cast %169 : vector<1x256x256xbf16> to vector<256x256xbf16>
    %cst_154 = arith.constant dense<0.000000e+00> : vector<16x256xf32>
    %171 = tpu.matmul %168, %170, %cst_154 {dimension_numbers = #tpu.dot_dimension_numbers<[1], [0], [0], [1], [0, 0, 1, 1], [], []>} : vector<16x256xbf16>, vector<256x256xbf16>, vector<16x256xf32> -> vector<16x256xf32>
    %172 = arith.addf %166, %171 : vector<16x256xf32>
    %c2_155 = arith.constant 2 : index
    %c0_156 = arith.constant 0 : index
    %173 = vector.load %arg17[%c2_155, %c0_156] : memref<18x256xf32, #tpu.memory_space<vmem>>, vector<16x256xf32>
    %174 = arith.truncf %173 : vector<16x256xf32> to vector<16x256xbf16>
    %c2_157 = arith.constant 2 : index
    %c0_158 = arith.constant 0 : index
    %c0_159 = arith.constant 0 : index
    %175 = vector.load %arg4[%c2_157, %c0_158, %c0_159] : memref<3x256x256xbf16, #tpu.memory_space<vmem>>, vector<1x256x256xbf16>
    %176 = vector.shape_cast %175 : vector<1x256x256xbf16> to vector<256x256xbf16>
    %cst_160 = arith.constant dense<0.000000e+00> : vector<16x256xf32>
    %177 = tpu.matmul %174, %176, %cst_160 {dimension_numbers = #tpu.dot_dimension_numbers<[1], [0], [0], [1], [0, 0, 1, 1], [], []>} : vector<16x256xbf16>, vector<256x256xbf16>, vector<16x256xf32> -> vector<16x256xf32>
    %178 = arith.addf %172, %177 : vector<16x256xf32>
    %179 = vector.broadcast %21 : vector<1x256xf32> to vector<16x256xf32>
    %180 = arith.addf %178, %179 : vector<16x256xf32>
    %181 = arith.mulf %180, %9 : vector<16x256xf32>
    %182 = arith.addf %181, %137 : vector<16x256xf32>
    %cst_161 = arith.constant 0.000000e+00 : f32
    %183 = vector.broadcast %cst_161 : f32 to vector<16x256xf32>
    %184 = arith.maximumf %182, %183 : vector<16x256xf32>
    %c1_162 = arith.constant 1 : index
    %c0_163 = arith.constant 0 : index
    %185 = vector.load %arg16[%c1_162, %c0_163] : memref<18x256xf32, #tpu.memory_space<vmem>>, vector<16x256xf32>
    tpu.vector_store %arg16[%c1_162, %c0_163], %184 {strides = array<i32>} : memref<18x256xf32, #tpu.memory_space<vmem>>, vector<16x256xf32>,
    %c0_164 = arith.constant 0 : index
    %c0_165 = arith.constant 0 : index
    %186 = vector.load %arg16[%c0_164, %c0_165] : memref<18x256xf32, #tpu.memory_space<vmem>>, vector<16x256xf32>
    %187 = arith.truncf %186 : vector<16x256xf32> to vector<16x256xbf16>
    %c0_166 = arith.constant 0 : index
    %c0_167 = arith.constant 0 : index
    %c0_168 = arith.constant 0 : index
    %188 = vector.load %arg4[%c0_166, %c0_167, %c0_168] : memref<3x256x256xbf16, #tpu.memory_space<vmem>>, vector<1x256x256xbf16>
    %189 = vector.shape_cast %188 : vector<1x256x256xbf16> to vector<256x256xbf16>
    %cst_169 = arith.constant dense<0.000000e+00> : vector<16x256xf32>
    %190 = tpu.matmul %187, %189, %cst_169 {dimension_numbers = #tpu.dot_dimension_numbers<[1], [0], [0], [1], [0, 0, 1, 1], [], []>} : vector<16x256xbf16>, vector<256x256xbf16>, vector<16x256xf32> -> vector<16x256xf32>
    %c1_170 = arith.constant 1 : index
    %c0_171 = arith.constant 0 : index
    %191 = vector.load %arg16[%c1_170, %c0_171] : memref<18x256xf32, #tpu.memory_space<vmem>>, vector<16x256xf32>
    %192 = arith.truncf %191 : vector<16x256xf32> to vector<16x256xbf16>
    %c1_172 = arith.constant 1 : index
    %c0_173 = arith.constant 0 : index
    %c0_174 = arith.constant 0 : index
    %193 = vector.load %arg4[%c1_172, %c0_173, %c0_174] : memref<3x256x256xbf16, #tpu.memory_space<vmem>>, vector<1x256x256xbf16>
    %194 = vector.shape_cast %193 : vector<1x256x256xbf16> to vector<256x256xbf16>
    %cst_175 = arith.constant dense<0.000000e+00> : vector<16x256xf32>
    %195 = tpu.matmul %192, %194, %cst_175 {dimension_numbers = #tpu.dot_dimension_numbers<[1], [0], [0], [1], [0, 0, 1, 1], [], []>} : vector<16x256xbf16>, vector<256x256xbf16>, vector<16x256xf32> -> vector<16x256xf32>
    %196 = arith.addf %190, %195 : vector<16x256xf32>
    %c2_176 = arith.constant 2 : index
    %c0_177 = arith.constant 0 : index
    %197 = vector.load %arg16[%c2_176, %c0_177] : memref<18x256xf32, #tpu.memory_space<vmem>>, vector<16x256xf32>
    %198 = arith.truncf %197 : vector<16x256xf32> to vector<16x256xbf16>
    %c2_178 = arith.constant 2 : index
    %c0_179 = arith.constant 0 : index
    %c0_180 = arith.constant 0 : index
    %199 = vector.load %arg4[%c2_178, %c0_179, %c0_180] : memref<3x256x256xbf16, #tpu.memory_space<vmem>>, vector<1x256x256xbf16>
    %200 = vector.shape_cast %199 : vector<1x256x256xbf16> to vector<256x256xbf16>
    %cst_181 = arith.constant dense<0.000000e+00> : vector<16x256xf32>
    %201 = tpu.matmul %198, %200, %cst_181 {dimension_numbers = #tpu.dot_dimension_numbers<[1], [0], [0], [1], [0, 0, 1, 1], [], []>} : vector<16x256xbf16>, vector<256x256xbf16>, vector<16x256xf32> -> vector<16x256xf32>
    %202 = arith.addf %196, %201 : vector<16x256xf32>
    %203 = vector.broadcast %21 : vector<1x256xf32> to vector<16x256xf32>
    %204 = arith.addf %202, %203 : vector<16x256xf32>
    %cst_182 = arith.constant 0.000000e+00 : f32
    %205 = vector.broadcast %cst_182 : f32 to vector<16x256xf32>
    %206 = arith.maximumf %204, %205 : vector<16x256xf32>
    %207 = arith.mulf %206, %9 : vector<16x256xf32>
    %c1_183 = arith.constant 1 : index
    %c0_184 = arith.constant 0 : index
    %208 = vector.load %arg17[%c1_183, %c0_184] : memref<18x256xf32, #tpu.memory_space<vmem>>, vector<16x256xf32>
    tpu.vector_store %arg17[%c1_183, %c0_184], %207 {strides = array<i32>} : memref<18x256xf32, #tpu.memory_space<vmem>>, vector<16x256xf32>,
    %c0_185 = arith.constant 0 : index
    %c0_186 = arith.constant 0 : index
    %209 = vector.load %arg17[%c0_185, %c0_186] : memref<18x256xf32, #tpu.memory_space<vmem>>, vector<16x256xf32>
    %210 = arith.truncf %209 : vector<16x256xf32> to vector<16x256xbf16>
    %c0_187 = arith.constant 0 : index
    %c0_188 = arith.constant 0 : index
    %c0_189 = arith.constant 0 : index
    %211 = vector.load %arg4[%c0_187, %c0_188, %c0_189] : memref<3x256x256xbf16, #tpu.memory_space<vmem>>, vector<1x256x256xbf16>
    %212 = vector.shape_cast %211 : vector<1x256x256xbf16> to vector<256x256xbf16>
    %cst_190 = arith.constant dense<0.000000e+00> : vector<16x256xf32>
    %213 = tpu.matmul %210, %212, %cst_190 {dimension_numbers = #tpu.dot_dimension_numbers<[1], [0], [0], [1], [0, 0, 1, 1], [], []>} : vector<16x256xbf16>, vector<256x256xbf16>, vector<16x256xf32> -> vector<16x256xf32>
    %c1_191 = arith.constant 1 : index
    %c0_192 = arith.constant 0 : index
    %214 = vector.load %arg17[%c1_191, %c0_192] : memref<18x256xf32, #tpu.memory_space<vmem>>, vector<16x256xf32>
    %215 = arith.truncf %214 : vector<16x256xf32> to vector<16x256xbf16>
    %c1_193 = arith.constant 1 : index
    %c0_194 = arith.constant 0 : index
    %c0_195 = arith.constant 0 : index
    %216 = vector.load %arg4[%c1_193, %c0_194, %c0_195] : memref<3x256x256xbf16, #tpu.memory_space<vmem>>, vector<1x256x256xbf16>
    %217 = vector.shape_cast %216 : vector<1x256x256xbf16> to vector<256x256xbf16>
    %cst_196 = arith.constant dense<0.000000e+00> : vector<16x256xf32>
    %218 = tpu.matmul %215, %217, %cst_196 {dimension_numbers = #tpu.dot_dimension_numbers<[1], [0], [0], [1], [0, 0, 1, 1], [], []>} : vector<16x256xbf16>, vector<256x256xbf16>, vector<16x256xf32> -> vector<16x256xf32>
    %219 = arith.addf %213, %218 : vector<16x256xf32>
    %c2_197 = arith.constant 2 : index
    %c0_198 = arith.constant 0 : index
    %220 = vector.load %arg17[%c2_197, %c0_198] : memref<18x256xf32, #tpu.memory_space<vmem>>, vector<16x256xf32>
    %221 = arith.truncf %220 : vector<16x256xf32> to vector<16x256xbf16>
    %c2_199 = arith.constant 2 : index
    %c0_200 = arith.constant 0 : index
    %c0_201 = arith.constant 0 : index
    %222 = vector.load %arg4[%c2_199, %c0_200, %c0_201] : memref<3x256x256xbf16, #tpu.memory_space<vmem>>, vector<1x256x256xbf16>
    %223 = vector.shape_cast %222 : vector<1x256x256xbf16> to vector<256x256xbf16>
    %cst_202 = arith.constant dense<0.000000e+00> : vector<16x256xf32>
    %224 = tpu.matmul %221, %223, %cst_202 {dimension_numbers = #tpu.dot_dimension_numbers<[1], [0], [0], [1], [0, 0, 1, 1], [], []>} : vector<16x256xbf16>, vector<256x256xbf16>, vector<16x256xf32> -> vector<16x256xf32>
    %225 = arith.addf %219, %224 : vector<16x256xf32>
    %226 = vector.broadcast %21 : vector<1x256xf32> to vector<16x256xf32>
    %227 = arith.addf %225, %226 : vector<16x256xf32>
    %228 = arith.mulf %227, %9 : vector<16x256xf32>
    %229 = arith.addf %228, %184 : vector<16x256xf32>
    %cst_203 = arith.constant 0.000000e+00 : f32
    %230 = vector.broadcast %cst_203 : f32 to vector<16x256xf32>
    %231 = arith.maximumf %229, %230 : vector<16x256xf32>
    %c1_204 = arith.constant 1 : index
    %c0_205 = arith.constant 0 : index
    %232 = vector.load %arg16[%c1_204, %c0_205] : memref<18x256xf32, #tpu.memory_space<vmem>>, vector<16x256xf32>
    tpu.vector_store %arg16[%c1_204, %c0_205], %231 {strides = array<i32>} : memref<18x256xf32, #tpu.memory_space<vmem>>, vector<16x256xf32>,
    %c0_206 = arith.constant 0 : index
    %c0_207 = arith.constant 0 : index
    %233 = vector.load %arg16[%c0_206, %c0_207] : memref<18x256xf32, #tpu.memory_space<vmem>>, vector<16x256xf32>
    %234 = arith.truncf %233 : vector<16x256xf32> to vector<16x256xbf16>
    %c0_208 = arith.constant 0 : index
    %c0_209 = arith.constant 0 : index
    %c0_210 = arith.constant 0 : index
    %235 = vector.load %arg4[%c0_208, %c0_209, %c0_210] : memref<3x256x256xbf16, #tpu.memory_space<vmem>>, vector<1x256x256xbf16>
    %236 = vector.shape_cast %235 : vector<1x256x256xbf16> to vector<256x256xbf16>
    %cst_211 = arith.constant dense<0.000000e+00> : vector<16x256xf32>
    %237 = tpu.matmul %234, %236, %cst_211 {dimension_numbers = #tpu.dot_dimension_numbers<[1], [0], [0], [1], [0, 0, 1, 1], [], []>} : vector<16x256xbf16>, vector<256x256xbf16>, vector<16x256xf32> -> vector<16x256xf32>
    %c1_212 = arith.constant 1 : index
    %c0_213 = arith.constant 0 : index
    %238 = vector.load %arg16[%c1_212, %c0_213] : memref<18x256xf32, #tpu.memory_space<vmem>>, vector<16x256xf32>
    %239 = arith.truncf %238 : vector<16x256xf32> to vector<16x256xbf16>
    %c1_214 = arith.constant 1 : index
    %c0_215 = arith.constant 0 : index
    %c0_216 = arith.constant 0 : index
    %240 = vector.load %arg4[%c1_214, %c0_215, %c0_216] : memref<3x256x256xbf16, #tpu.memory_space<vmem>>, vector<1x256x256xbf16>
    %241 = vector.shape_cast %240 : vector<1x256x256xbf16> to vector<256x256xbf16>
    %cst_217 = arith.constant dense<0.000000e+00> : vector<16x256xf32>
    %242 = tpu.matmul %239, %241, %cst_217 {dimension_numbers = #tpu.dot_dimension_numbers<[1], [0], [0], [1], [0, 0, 1, 1], [], []>} : vector<16x256xbf16>, vector<256x256xbf16>, vector<16x256xf32> -> vector<16x256xf32>
    %243 = arith.addf %237, %242 : vector<16x256xf32>
    %c2_218 = arith.constant 2 : index
    %c0_219 = arith.constant 0 : index
    %244 = vector.load %arg16[%c2_218, %c0_219] : memref<18x256xf32, #tpu.memory_space<vmem>>, vector<16x256xf32>
    %245 = arith.truncf %244 : vector<16x256xf32> to vector<16x256xbf16>
    %c2_220 = arith.constant 2 : index
    %c0_221 = arith.constant 0 : index
    %c0_222 = arith.constant 0 : index
    %246 = vector.load %arg4[%c2_220, %c0_221, %c0_222] : memref<3x256x256xbf16, #tpu.memory_space<vmem>>, vector<1x256x256xbf16>
    %247 = vector.shape_cast %246 : vector<1x256x256xbf16> to vector<256x256xbf16>
    %cst_223 = arith.constant dense<0.000000e+00> : vector<16x256xf32>
    %248 = tpu.matmul %245, %247, %cst_223 {dimension_numbers = #tpu.dot_dimension_numbers<[1], [0], [0], [1], [0, 0, 1, 1], [], []>} : vector<16x256xbf16>, vector<256x256xbf16>, vector<16x256xf32> -> vector<16x256xf32>
    %249 = arith.addf %243, %248 : vector<16x256xf32>
    %250 = vector.broadcast %21 : vector<1x256xf32> to vector<16x256xf32>
    %251 = arith.addf %249, %250 : vector<16x256xf32>
    %cst_224 = arith.constant 0.000000e+00 : f32
    %252 = vector.broadcast %cst_224 : f32 to vector<16x256xf32>
    %253 = arith.maximumf %251, %252 : vector<16x256xf32>
    %254 = arith.mulf %253, %9 : vector<16x256xf32>
    %c1_225 = arith.constant 1 : index
    %c0_226 = arith.constant 0 : index
    %255 = vector.load %arg17[%c1_225, %c0_226] : memref<18x256xf32, #tpu.memory_space<vmem>>, vector<16x256xf32>
    tpu.vector_store %arg17[%c1_225, %c0_226], %254 {strides = array<i32>} : memref<18x256xf32, #tpu.memory_space<vmem>>, vector<16x256xf32>,
    %c0_227 = arith.constant 0 : index
    %c0_228 = arith.constant 0 : index
    %256 = vector.load %arg17[%c0_227, %c0_228] : memref<18x256xf32, #tpu.memory_space<vmem>>, vector<16x256xf32>
    %257 = arith.truncf %256 : vector<16x256xf32> to vector<16x256xbf16>
    %c0_229 = arith.constant 0 : index
    %c0_230 = arith.constant 0 : index
    %c0_231 = arith.constant 0 : index
    %258 = vector.load %arg4[%c0_229, %c0_230, %c0_231] : memref<3x256x256xbf16, #tpu.memory_space<vmem>>, vector<1x256x256xbf16>
    %259 = vector.shape_cast %258 : vector<1x256x256xbf16> to vector<256x256xbf16>
    %cst_232 = arith.constant dense<0.000000e+00> : vector<16x256xf32>
    %260 = tpu.matmul %257, %259, %cst_232 {dimension_numbers = #tpu.dot_dimension_numbers<[1], [0], [0], [1], [0, 0, 1, 1], [], []>} : vector<16x256xbf16>, vector<256x256xbf16>, vector<16x256xf32> -> vector<16x256xf32>
    %c1_233 = arith.constant 1 : index
    %c0_234 = arith.constant 0 : index
    %261 = vector.load %arg17[%c1_233, %c0_234] : memref<18x256xf32, #tpu.memory_space<vmem>>, vector<16x256xf32>
    %262 = arith.truncf %261 : vector<16x256xf32> to vector<16x256xbf16>
    %c1_235 = arith.constant 1 : index
    %c0_236 = arith.constant 0 : index
    %c0_237 = arith.constant 0 : index
    %263 = vector.load %arg4[%c1_235, %c0_236, %c0_237] : memref<3x256x256xbf16, #tpu.memory_space<vmem>>, vector<1x256x256xbf16>
    %264 = vector.shape_cast %263 : vector<1x256x256xbf16> to vector<256x256xbf16>
    %cst_238 = arith.constant dense<0.000000e+00> : vector<16x256xf32>
    %265 = tpu.matmul %262, %264, %cst_238 {dimension_numbers = #tpu.dot_dimension_numbers<[1], [0], [0], [1], [0, 0, 1, 1], [], []>} : vector<16x256xbf16>, vector<256x256xbf16>, vector<16x256xf32> -> vector<16x256xf32>
    %266 = arith.addf %260, %265 : vector<16x256xf32>
    %c2_239 = arith.constant 2 : index
    %c0_240 = arith.constant 0 : index
    %267 = vector.load %arg17[%c2_239, %c0_240] : memref<18x256xf32, #tpu.memory_space<vmem>>, vector<16x256xf32>
    %268 = arith.truncf %267 : vector<16x256xf32> to vector<16x256xbf16>
    %c2_241 = arith.constant 2 : index
    %c0_242 = arith.constant 0 : index
    %c0_243 = arith.constant 0 : index
    %269 = vector.load %arg4[%c2_241, %c0_242, %c0_243] : memref<3x256x256xbf16, #tpu.memory_space<vmem>>, vector<1x256x256xbf16>
    %270 = vector.shape_cast %269 : vector<1x256x256xbf16> to vector<256x256xbf16>
    %cst_244 = arith.constant dense<0.000000e+00> : vector<16x256xf32>
    %271 = tpu.matmul %268, %270, %cst_244 {dimension_numbers = #tpu.dot_dimension_numbers<[1], [0], [0], [1], [0, 0, 1, 1], [], []>} : vector<16x256xbf16>, vector<256x256xbf16>, vector<16x256xf32> -> vector<16x256xf32>
    %272 = arith.addf %266, %271 : vector<16x256xf32>
    %273 = vector.broadcast %21 : vector<1x256xf32> to vector<16x256xf32>
    %274 = arith.addf %272, %273 : vector<16x256xf32>
    %275 = arith.mulf %274, %9 : vector<16x256xf32>
    %276 = arith.addf %275, %231 : vector<16x256xf32>
    %cst_245 = arith.constant 0.000000e+00 : f32
    %277 = vector.broadcast %cst_245 : f32 to vector<16x256xf32>
    %278 = arith.maximumf %276, %277 : vector<16x256xf32>
    %c1_246 = arith.constant 1 : index
    %c0_247 = arith.constant 0 : index
    %279 = vector.load %arg16[%c1_246, %c0_247] : memref<18x256xf32, #tpu.memory_space<vmem>>, vector<16x256xf32>
    tpu.vector_store %arg16[%c1_246, %c0_247], %278 {strides = array<i32>} : memref<18x256xf32, #tpu.memory_space<vmem>>, vector<16x256xf32>,
    %c0_248 = arith.constant 0 : index
    %c0_249 = arith.constant 0 : index
    %280 = vector.load %arg16[%c0_248, %c0_249] : memref<18x256xf32, #tpu.memory_space<vmem>>, vector<16x256xf32>
    %281 = arith.truncf %280 : vector<16x256xf32> to vector<16x256xbf16>
    %c0_250 = arith.constant 0 : index
    %c0_251 = arith.constant 0 : index
    %c0_252 = arith.constant 0 : index
    %282 = vector.load %arg4[%c0_250, %c0_251, %c0_252] : memref<3x256x256xbf16, #tpu.memory_space<vmem>>, vector<1x256x256xbf16>
    %283 = vector.shape_cast %282 : vector<1x256x256xbf16> to vector<256x256xbf16>
    %cst_253 = arith.constant dense<0.000000e+00> : vector<16x256xf32>
    %284 = tpu.matmul %281, %283, %cst_253 {dimension_numbers = #tpu.dot_dimension_numbers<[1], [0], [0], [1], [0, 0, 1, 1], [], []>} : vector<16x256xbf16>, vector<256x256xbf16>, vector<16x256xf32> -> vector<16x256xf32>
    %c1_254 = arith.constant 1 : index
    %c0_255 = arith.constant 0 : index
    %285 = vector.load %arg16[%c1_254, %c0_255] : memref<18x256xf32, #tpu.memory_space<vmem>>, vector<16x256xf32>
    %286 = arith.truncf %285 : vector<16x256xf32> to vector<16x256xbf16>
    %c1_256 = arith.constant 1 : index
    %c0_257 = arith.constant 0 : index
    %c0_258 = arith.constant 0 : index
    %287 = vector.load %arg4[%c1_256, %c0_257, %c0_258] : memref<3x256x256xbf16, #tpu.memory_space<vmem>>, vector<1x256x256xbf16>
    %288 = vector.shape_cast %287 : vector<1x256x256xbf16> to vector<256x256xbf16>
    %cst_259 = arith.constant dense<0.000000e+00> : vector<16x256xf32>
    %289 = tpu.matmul %286, %288, %cst_259 {dimension_numbers = #tpu.dot_dimension_numbers<[1], [0], [0], [1], [0, 0, 1, 1], [], []>} : vector<16x256xbf16>, vector<256x256xbf16>, vector<16x256xf32> -> vector<16x256xf32>
    %290 = arith.addf %284, %289 : vector<16x256xf32>
    %c2_260 = arith.constant 2 : index
    %c0_261 = arith.constant 0 : index
    %291 = vector.load %arg16[%c2_260, %c0_261] : memref<18x256xf32, #tpu.memory_space<vmem>>, vector<16x256xf32>
    %292 = arith.truncf %291 : vector<16x256xf32> to vector<16x256xbf16>
    %c2_262 = arith.constant 2 : index
    %c0_263 = arith.constant 0 : index
    %c0_264 = arith.constant 0 : index
    %293 = vector.load %arg4[%c2_262, %c0_263, %c0_264] : memref<3x256x256xbf16, #tpu.memory_space<vmem>>, vector<1x256x256xbf16>
    %294 = vector.shape_cast %293 : vector<1x256x256xbf16> to vector<256x256xbf16>
    %cst_265 = arith.constant dense<0.000000e+00> : vector<16x256xf32>
    %295 = tpu.matmul %292, %294, %cst_265 {dimension_numbers = #tpu.dot_dimension_numbers<[1], [0], [0], [1], [0, 0, 1, 1], [], []>} : vector<16x256xbf16>, vector<256x256xbf16>, vector<16x256xf32> -> vector<16x256xf32>
    %296 = arith.addf %290, %295 : vector<16x256xf32>
    %297 = vector.broadcast %21 : vector<1x256xf32> to vector<16x256xf32>
    %298 = arith.addf %296, %297 : vector<16x256xf32>
    %cst_266 = arith.constant 0.000000e+00 : f32
    %299 = vector.broadcast %cst_266 : f32 to vector<16x256xf32>
    %300 = arith.maximumf %298, %299 : vector<16x256xf32>
    %301 = arith.mulf %300, %9 : vector<16x256xf32>
    %c1_267 = arith.constant 1 : index
    %c0_268 = arith.constant 0 : index
    %302 = vector.load %arg17[%c1_267, %c0_268] : memref<18x256xf32, #tpu.memory_space<vmem>>, vector<16x256xf32>
    tpu.vector_store %arg17[%c1_267, %c0_268], %301 {strides = array<i32>} : memref<18x256xf32, #tpu.memory_space<vmem>>, vector<16x256xf32>,
    %c0_269 = arith.constant 0 : index
    %c0_270 = arith.constant 0 : index
    %303 = vector.load %arg17[%c0_269, %c0_270] : memref<18x256xf32, #tpu.memory_space<vmem>>, vector<16x256xf32>
    %304 = arith.truncf %303 : vector<16x256xf32> to vector<16x256xbf16>
    %c0_271 = arith.constant 0 : index
    %c0_272 = arith.constant 0 : index
    %c0_273 = arith.constant 0 : index
    %305 = vector.load %arg4[%c0_271, %c0_272, %c0_273] : memref<3x256x256xbf16, #tpu.memory_space<vmem>>, vector<1x256x256xbf16>
    %306 = vector.shape_cast %305 : vector<1x256x256xbf16> to vector<256x256xbf16>
    %cst_274 = arith.constant dense<0.000000e+00> : vector<16x256xf32>
    %307 = tpu.matmul %304, %306, %cst_274 {dimension_numbers = #tpu.dot_dimension_numbers<[1], [0], [0], [1], [0, 0, 1, 1], [], []>} : vector<16x256xbf16>, vector<256x256xbf16>, vector<16x256xf32> -> vector<16x256xf32>
    %c1_275 = arith.constant 1 : index
    %c0_276 = arith.constant 0 : index
    %308 = vector.load %arg17[%c1_275, %c0_276] : memref<18x256xf32, #tpu.memory_space<vmem>>, vector<16x256xf32>
    %309 = arith.truncf %308 : vector<16x256xf32> to vector<16x256xbf16>
    %c1_277 = arith.constant 1 : index
    %c0_278 = arith.constant 0 : index
    %c0_279 = arith.constant 0 : index
    %310 = vector.load %arg4[%c1_277, %c0_278, %c0_279] : memref<3x256x256xbf16, #tpu.memory_space<vmem>>, vector<1x256x256xbf16>
    %311 = vector.shape_cast %310 : vector<1x256x256xbf16> to vector<256x256xbf16>
    %cst_280 = arith.constant dense<0.000000e+00> : vector<16x256xf32>
    %312 = tpu.matmul %309, %311, %cst_280 {dimension_numbers = #tpu.dot_dimension_numbers<[1], [0], [0], [1], [0, 0, 1, 1], [], []>} : vector<16x256xbf16>, vector<256x256xbf16>, vector<16x256xf32> -> vector<16x256xf32>
    %313 = arith.addf %307, %312 : vector<16x256xf32>
    %c2_281 = arith.constant 2 : index
    %c0_282 = arith.constant 0 : index
    %314 = vector.load %arg17[%c2_281, %c0_282] : memref<18x256xf32, #tpu.memory_space<vmem>>, vector<16x256xf32>
    %315 = arith.truncf %314 : vector<16x256xf32> to vector<16x256xbf16>
    %c2_283 = arith.constant 2 : index
    %c0_284 = arith.constant 0 : index
    %c0_285 = arith.constant 0 : index
    %316 = vector.load %arg4[%c2_283, %c0_284, %c0_285] : memref<3x256x256xbf16, #tpu.memory_space<vmem>>, vector<1x256x256xbf16>
    %317 = vector.shape_cast %316 : vector<1x256x256xbf16> to vector<256x256xbf16>
    %cst_286 = arith.constant dense<0.000000e+00> : vector<16x256xf32>
    %318 = tpu.matmul %315, %317, %cst_286 {dimension_numbers = #tpu.dot_dimension_numbers<[1], [0], [0], [1], [0, 0, 1, 1], [], []>} : vector<16x256xbf16>, vector<256x256xbf16>, vector<16x256xf32> -> vector<16x256xf32>
    %319 = arith.addf %313, %318 : vector<16x256xf32>
    %320 = vector.broadcast %21 : vector<1x256xf32> to vector<16x256xf32>
    %321 = arith.addf %319, %320 : vector<16x256xf32>
    %322 = arith.mulf %321, %9 : vector<16x256xf32>
    %323 = arith.addf %322, %278 : vector<16x256xf32>
    %cst_287 = arith.constant 0.000000e+00 : f32
    %324 = vector.broadcast %cst_287 : f32 to vector<16x256xf32>
    %325 = arith.maximumf %323, %324 : vector<16x256xf32>
    %c0_288 = arith.constant 0 : index
    %c0_289 = arith.constant 0 : index
    %326 = vector.load %arg6[%c0_288, %c0_289] : memref<256x8xf32, #tpu.memory_space<vmem>>, vector<256x8xf32>
    %cst_290 = arith.constant dense<0.000000e+00> : vector<16x8xf32>
    %327 = tpu.matmul %325, %326, %cst_290 {dimension_numbers = #tpu.dot_dimension_numbers<[1], [0], [0], [1], [0, 0, 1, 1], [], []>} : vector<16x256xf32>, vector<256x8xf32>, vector<16x8xf32> -> vector<16x8xf32>
    %c0_291 = arith.constant 0 : index
    %c0_292 = arith.constant 0 : index
    %328 = vector.load %arg7[%c0_291, %c0_292] : memref<1x8xf32, #tpu.memory_space<vmem>>, vector<1x8xf32>
    %329 = vector.broadcast %328 : vector<1x8xf32> to vector<16x8xf32>
    %330 = arith.addf %327, %329 : vector<16x8xf32>
    %cst_293 = arith.constant 0.000000e+00 : f32
    %331 = vector.broadcast %cst_293 : f32 to vector<16x8xf32>
    %332 = arith.maximumf %330, %331 : vector<16x8xf32>
    %c0_294 = arith.constant 0 : index
    %c0_295 = arith.constant 0 : index
    %333 = vector.load %arg8[%c0_294, %c0_295] : memref<8x384xf32, #tpu.memory_space<vmem>>, vector<8x384xf32>
    %cst_296 = arith.constant dense<0.000000e+00> : vector<16x384xf32>
    %334 = tpu.matmul %332, %333, %cst_296 {dimension_numbers = #tpu.dot_dimension_numbers<[1], [0], [0], [1], [0, 0, 1, 1], [], []>} : vector<16x8xf32>, vector<8x384xf32>, vector<16x384xf32> -> vector<16x384xf32>
    %335 = tpu.iota {dimensions = array<i32: 1>} : vector<16x384xi32>
    %c6_i32_297 = arith.constant 6 : i32
    %336 = vector.broadcast %c6_i32_297 : i32 to vector<16x384xi32>
    %337 = arith.shrsi %335, %336 : vector<16x384xi32>
    %338 = tpu.iota {dimensions = array<i32: 0>} : vector<16x384xi32>
    %c7_i32_298 = arith.constant 7 : i32
    %339 = vector.broadcast %c7_i32_298 : i32 to vector<16x384xi32>
    %340 = arith.andi %338, %339 : vector<16x384xi32>
    %c1_i32_299 = arith.constant 1 : i32
    %341 = vector.broadcast %c1_i32_299 : i32 to vector<16x384xi32>
    %342 = arith.addi %337, %341 : vector<16x384xi32>
    %343 = arith.cmpi eq, %342, %340 : vector<16x384xi32>
    %344 = arith.extui %343 : vector<16x384xi1> to vector<16x384xi32>
    %345 = arith.sitofp %344 : vector<16x384xi32> to vector<16x384xf32>
    %346 = arith.mulf %334, %345 : vector<16x384xf32>
    %c0_300 = arith.constant 0 : index
    %c0_301 = arith.constant 0 : index
    %347 = vector.load %arg9[%c0_300, %c0_301] : memref<384x64xf32, #tpu.memory_space<vmem>>, vector<384x64xf32>
    %cst_302 = arith.constant dense<0.000000e+00> : vector<16x64xf32>
    %348 = tpu.matmul %346, %347, %cst_302 {dimension_numbers = #tpu.dot_dimension_numbers<[1], [0], [0], [1], [0, 0, 1, 1], [], []>} : vector<16x384xf32>, vector<384x64xf32>, vector<16x64xf32> -> vector<16x64xf32>
    %c0_303 = arith.constant 0 : index
    %c0_304 = arith.constant 0 : index
    %349 = vector.load %arg10[%c0_303, %c0_304] : memref<2x16xf32, #tpu.memory_space<vmem>>, vector<2x16xf32>
    %cst_305 = arith.constant dense<0.000000e+00> : vector<2x64xf32>
    %350 = tpu.matmul %349, %348, %cst_305 {dimension_numbers = #tpu.dot_dimension_numbers<[1], [0], [0], [1], [0, 0, 1, 1], [], []>} : vector<2x16xf32>, vector<16x64xf32>, vector<2x64xf32> -> vector<2x64xf32>
    %c0_306 = arith.constant 0 : index
    %c0_307 = arith.constant 0 : index
    %351 = vector.load %arg11[%c0_306, %c0_307] : memref<1x64xf32, #tpu.memory_space<vmem>>, vector<1x64xf32>
    %352 = vector.broadcast %351 : vector<1x64xf32> to vector<2x64xf32>
    %353 = arith.addf %350, %352 : vector<2x64xf32>
    %cst_308 = arith.constant 0.000000e+00 : f32
    %354 = vector.broadcast %cst_308 : f32 to vector<2x64xf32>
    %355 = arith.maximumf %353, %354 : vector<2x64xf32>
    %c0_309 = arith.constant 0 : index
    %c0_310 = arith.constant 0 : index
    %356 = vector.load %arg12[%c0_309, %c0_310] : memref<64x128xf32, #tpu.memory_space<vmem>>, vector<64x128xf32>
    %cst_311 = arith.constant dense<0.000000e+00> : vector<2x128xf32>
    %357 = tpu.matmul %355, %356, %cst_311 {dimension_numbers = #tpu.dot_dimension_numbers<[1], [0], [0], [1], [0, 0, 1, 1], [], []>} : vector<2x64xf32>, vector<64x128xf32>, vector<2x128xf32> -> vector<2x128xf32>
    %c0_312 = arith.constant 0 : index
    %c0_313 = arith.constant 0 : index
    %358 = vector.load %arg13[%c0_312, %c0_313] : memref<1x128xf32, #tpu.memory_space<vmem>>, vector<1x128xf32>
    %359 = vector.broadcast %358 : vector<1x128xf32> to vector<2x128xf32>
    %360 = arith.addf %357, %359 : vector<2x128xf32>
    %c0_314 = arith.constant 0 : index
    %c0_315 = arith.constant 0 : index
    %361 = vector.load %arg14[%c0_314, %c0_315] : memref<2x128xf32, #tpu.memory_space<vmem>>, vector<2x128xf32>
    tpu.vector_store %arg14[%c0_314, %c0_315], %360 {strides = array<i32>} : memref<2x128xf32, #tpu.memory_space<vmem>>, vector<2x128xf32>,
    return
  }
  func.func @transform_0(%arg0: i32) -> (i32, i32) {
    %c0_i32 = arith.constant 0 : i32
    %c0_i32_0 = arith.constant 0 : i32
    return %arg0, %c0_i32 : i32, i32
  }
  func.func @transform_1(%arg0: i32) -> (i32, i32, i32) {
    %c0_i32 = arith.constant 0 : i32
    %c0_i32_0 = arith.constant 0 : i32
    %c0_i32_1 = arith.constant 0 : i32
    %c0_i32_2 = arith.constant 0 : i32
    return %c0_i32, %c0_i32_0, %c0_i32_1 : i32, i32, i32
  }
  func.func @transform_2(%arg0: i32) -> (i32, i32) {
    %c0_i32 = arith.constant 0 : i32
    %c0_i32_0 = arith.constant 0 : i32
    %c0_i32_1 = arith.constant 0 : i32
    return %c0_i32, %c0_i32_0 : i32, i32
  }
  func.func @transform_3(%arg0: i32) -> (i32, i32, i32) {
    %c0_i32 = arith.constant 0 : i32
    %c0_i32_0 = arith.constant 0 : i32
    %c0_i32_1 = arith.constant 0 : i32
    %c0_i32_2 = arith.constant 0 : i32
    return %c0_i32, %c0_i32_0, %c0_i32_1 : i32, i32, i32
  }
  func.func @transform_4(%arg0: i32) -> (i32, i32) {
    %c0_i32 = arith.constant 0 : i32
    %c0_i32_0 = arith.constant 0 : i32
    %c0_i32_1 = arith.constant 0 : i32
    return %c0_i32, %c0_i32_0 : i32, i32
  }
  func.func @transform_5(%arg0: i32) -> (i32, i32) {
    %c0_i32 = arith.constant 0 : i32
    %c0_i32_0 = arith.constant 0 : i32
    %c0_i32_1 = arith.constant 0 : i32
    return %c0_i32, %c0_i32_0 : i32, i32
  }
  func.func @transform_6(%arg0: i32) -> (i32, i32) {
    %c0_i32 = arith.constant 0 : i32
    %c0_i32_0 = arith.constant 0 : i32
    %c0_i32_1 = arith.constant 0 : i32
    return %c0_i32, %c0_i32_0 : i32, i32
  }
  func.func @transform_7(%arg0: i32) -> (i32, i32) {
    %c0_i32 = arith.constant 0 : i32
    %c0_i32_0 = arith.constant 0 : i32
    %c0_i32_1 = arith.constant 0 : i32
    return %c0_i32, %c0_i32_0 : i32, i32
  }
  func.func @transform_8(%arg0: i32) -> (i32, i32) {
    %c0_i32 = arith.constant 0 : i32
    %c0_i32_0 = arith.constant 0 : i32
    %c0_i32_1 = arith.constant 0 : i32
    return %c0_i32, %c0_i32_0 : i32, i32
  }
  func.func @transform_9(%arg0: i32) -> (i32, i32) {
    %c0_i32 = arith.constant 0 : i32
    %c0_i32_0 = arith.constant 0 : i32
    %c0_i32_1 = arith.constant 0 : i32
    return %c0_i32, %c0_i32_0 : i32, i32
  }
  func.func @transform_10(%arg0: i32) -> (i32, i32) {
    %c0_i32 = arith.constant 0 : i32
    %c0_i32_0 = arith.constant 0 : i32
    %c0_i32_1 = arith.constant 0 : i32
    return %c0_i32, %c0_i32_0 : i32, i32
  }
  func.func @transform_11(%arg0: i32) -> (i32, i32) {
    %c0_i32 = arith.constant 0 : i32
    %c0_i32_0 = arith.constant 0 : i32
    %c0_i32_1 = arith.constant 0 : i32
    return %c0_i32, %c0_i32_0 : i32, i32
  }
  func.func @transform_12(%arg0: i32) -> (i32, i32) {
    %c0_i32 = arith.constant 0 : i32
    %c0_i32_0 = arith.constant 0 : i32
    %c0_i32_1 = arith.constant 0 : i32
    return %c0_i32, %c0_i32_0 : i32, i32
  }
  func.func @transform_13(%arg0: i32) -> (i32, i32) {
    %c0_i32 = arith.constant 0 : i32
    %c0_i32_0 = arith.constant 0 : i32
    return %arg0, %c0_i32 : i32, i32
  }
}

</mosaic_0001>

<bundles_post_ra>
// kernel: qnet_forward.1
= control target key start
LH: loop header
LB: loop body
LE: loop exit
PB: predicated region body
PF: predicated region fallthrough
CT: control target
= control target key end

     0   :  { %vm80_vm0 = vcmask 130048   ;;  %v13756_v2 = vmov 0   ;;  %vm61_vm1 = vcmask 122880   ;;  %v18607_v6 = vmov 0.0   ;;  %s18592_s0 = inlined_call_operand.vmem [shape: f32[16,16], index: 0, kind: input, shape index: {}]   ;;  %s18593_s1 = inlined_call_operand.vmem [shape: bf16[3,16,256], index: 1, kind: input, shape index: {}]   ;;  %s18594_s2 = inlined_call_operand.vmem [shape: f32[1,256], index: 2, kind: input, shape index: {}]   ;;  %s18595_s3 = inlined_call_operand.vmem [shape: bf16[3,256,256], index: 3, kind: input, shape index: {}]   ;;  %s18596_s4 = inlined_call_operand.vmem [shape: f32[1,256], index: 4, kind: input, shape index: {}]   ;;  %s18597_s5 = inlined_call_operand.vmem [shape: f32[256,8], index: 5, kind: input, shape index: {}]   ;;  %s18598_s6 = inlined_call_operand.vmem [shape: f32[1,8], index: 6, kind: input, shape index: {}]   ;;  %s18599_s7 = inlined_call_operand.vmem [shape: f32[8,384], index: 7, kind: input, shape index: {}]   ;;  %s18600_s8 = inlined_call_operand.vmem [shape: f32[384,64], index: 8, kind: input, shape index: {}]   ;;  %s18601_s9 = inlined_call_operand.vmem [shape: f32[2,16], index: 9, kind: input, shape index: {}]   ;;  %s18602_s10 = inlined_call_operand.vmem [shape: f32[1,64], index: 10, kind: input, shape index: {}]   ;;  %s18603_s11 = inlined_call_operand.vmem [shape: f32[64,128], index: 11, kind: input, shape index: {}]   ;;  %s18604_s12 = inlined_call_operand.vmem [shape: f32[1,128], index: 12, kind: input, shape index: {}]   ;;  %s18605_s13 = inlined_call_operand.hbm [shape: f32[2,128], index: 13, kind: output, shape index: {}]  }
   0x1   :  { %v12798_v0 = vld [vmem:[%s18593_s1 + $0x14] ss:$8 sps:$4 sm:$0xff]   ;;  %v12800_v1 = vld [vmem:[%s18593_s1 + $0x10] ss:$8 sps:$4 sm:$0xff]   ;;  %141 = vmatprep.mubr.bf16.mxu1 %v13756_v2  ;;  %v78_v3 = vld [vmem:[%s18592_s0] sm:$0xff]  ;;  %259 = vmatprep.mubr.bf16.mxu0 %v13756_v2  ;;  %v18606_v53 = vlaneseq  ;;  %vm301_vm9 = vcmask 1040384  }
   0x2   :  { %v79_v4 = vld [vmem:[%s18592_s0 + $0x8] sm:$0xff]  ;;  %123 = vmatprep.subr.bf16.mxu1 %v12798_v0  ;;  %81 = vst.msk [vmem:[#allocation2 + $0x1] sm:$0xff] %vm80_vm0, %v78_v3  ;;  %v12809_v9 = vld [vmem:[%s18595_s3 + $0x74] ss:$8 sps:$4 sm:$0xff]   ;;  %v12807_v16 = vld [vmem:[%s18595_s3 + $0x70] ss:$8 sps:$4 sm:$0xff]  }
   0x3   :  { %82 = vst.msk [vmem:[#allocation2 + $0x9] sm:$0xff] %vm80_vm0, %v79_v4  ;;  %v12801_v5 = vld [vmem:[%s18593_s1 + $0x24] ss:$8 sps:$4 sm:$0xff]   ;;  %124 = vmatpush1.bf16.msra.mxu1 %v12800_v1  ;;  %v12803_v7 = vld [vmem:[%s18593_s1 + $0x20] ss:$8 sps:$4 sm:$0xff]   ;;  %vm66_vm2 = vcmp.lt.s32.totalorder %v18606_v53, 256 }
   0x4   :  { %62 = vst.msk [vmem:[#allocation2] sm:$0x1] %vm61_vm1, %v18607_v6  ;;  %63 = vst.msk [vmem:[#allocation2 + $0x11] sm:$0x1] %vm61_vm1, %v18607_v6  ;;  %241 = vmatprep.subr.bf16.mxu0 %v12801_v5  ;;  %v12806_v8 = vld [vmem:[%s18593_s1 + $0x4] ss:$8 sps:$4 sm:$0xff]  }
   0x5   :  { %242 = vmatpush1.bf16.msra.mxu0 %v12803_v7  ;;  %179 = vmatprep.subr.bf16.mxu1 %v12806_v8  ;;  %v12804_v10 = vld [vmem:[%s18593_s1] ss:$8 sps:$4 sm:$0xff]   ;;  %v12812_v18 = vld [vmem:[%s18595_s3 + $0x64] ss:$8 sps:$4 sm:$0xff]   ;;  %v13870_v19 = vld [vmem:[%s18595_s3 + $0x174] ss:$8 sps:$4 sm:$0xff]  }
   0x6   :  { %789 = vmatprep.subr.bf16.mxu0 %v12809_v9  ;;  %v12810_v22 = vld [vmem:[%s18595_s3 + $0x60] ss:$8 sps:$4 sm:$0xff]   ;;  %v12818_v23 = vld [vmem:[%s18595_s3 + $0x54] ss:$8 sps:$4 sm:$0xff]   ;;  %v12813_v25 = vld [vmem:[%s18595_s3 + $0x170] ss:$8 sps:$4 sm:$0xff]  }
   0x7   :  { %v12816_v26 = vld [vmem:[%s18595_s3 + $0x50] ss:$8 sps:$4 sm:$0xff]   ;;  %v12821_v27 = vld [vmem:[%s18595_s3 + $0x164] ss:$8 sps:$4 sm:$0xff]   ;;  %v12819_v29 = vld [vmem:[%s18595_s3 + $0x160] ss:$8 sps:$4 sm:$0xff]  }
   0x8   :  { %v12824_v28 = vld [vmem:[%s18595_s3 + $0x44] ss:$8 sps:$4 sm:$0xff]   ;;  %v12822_v30 = vld [vmem:[%s18595_s3 + $0x40] ss:$8 sps:$4 sm:$0xff]   ;;  %v12827_v31 = vld [vmem:[%s18595_s3 + $0x154] ss:$8 sps:$4 sm:$0xff]  }
   0x9   :  { %v90_v11 = vld [vmem:[#allocation2 + $0x1] sm:$0xff]  ;;  %v12830_v32 = vld [vmem:[%s18595_s3 + $0x34] ss:$8 sps:$4 sm:$0xff]   ;;  %v12825_v33 = vld [vmem:[%s18595_s3 + $0x150] ss:$8 sps:$4 sm:$0xff]  }
   0xa   :  { %v91_v12 = vld [vmem:[#allocation2 + $0x9] sm:$0xff]  ;;  %v12839_v39 = vld [vmem:[%s18595_s3 + $0x134] ss:$8 sps:$4 sm:$0xff]   ;;  %68 = vst.msk [vmem:[#allocation3] ss:$8 sm:$0x3] %vm66_vm2, %v18607_v6 }
   0xb   :  { %v208_v13 = vld [vmem:[#allocation2 + $0x2] sm:$0xff]  ;;  %v92_v14 = vpack.c.bf16 %v91_v12, %v90_v11  ;;  %v209_v15 = vld [vmem:[#allocation2 + $0xa] sm:$0xff]  ;;  %v12842_v40 = vld [vmem:[%s18595_s3 + $0x14] ss:$8 sps:$4 sm:$0xff]  }
   0xc   :  { %v210_v17 = vpack.c.bf16 %v209_v15, %v208_v13  ;;  %v85_v20 = vld [vmem:[#allocation2] sm:$0xff]  ;;  %v86_v21 = vld [vmem:[#allocation2 + $0x8] sm:$0xff]  ;;  %v12828_v34 = vld [vmem:[%s18595_s3 + $0x30] ss:$8 sps:$4 sm:$0xff]  }
   0xd   :  { %10675 = vmatmul.mubr.msk.bf16.vlgmr.msra.gmra.mxu1 %vm80_vm0, %v92_v14  ;;  %v87_v24 = vpack.c.bf16 %v86_v21, %v85_v20  ;;  %v12833_v35 = vld [vmem:[%s18595_s3 + $0x144] ss:$8 sps:$4 sm:$0xff]   ;;  %v12831_v37 = vld [vmem:[%s18595_s3 + $0x140] ss:$8 sps:$4 sm:$0xff]   ;;  %v12837_v41 = vld [vmem:[%s18595_s3 + $0x130] ss:$8 sps:$4 sm:$0xff]  }
   0xe   :  { %10683 = vmatmul.mubr.msk.bf16.vlgmr.msra.gmra.mxu0 %vm80_vm0, %v210_v17  ;;  %180 = vmatpush1.bf16.msra.mxu1 %v12804_v10  ;;  %v12836_v36 = vld [vmem:[%s18595_s3 + $0x24] ss:$8 sps:$4 sm:$0xff]   ;;  %v12834_v38 = vld [vmem:[%s18595_s3 + $0x20] ss:$8 sps:$4 sm:$0xff]   ;;  %v12840_v42 = vld [vmem:[%s18595_s3 + $0x10] ss:$8 sps:$4 sm:$0xff]  }
   0xf   :  { %197 = vmatprep.mubr.bf16.mxu1 %v13756_v2  ;;  %790 = vmatpush1.bf16.msra.mxu0 %v12807_v16  ;;  %v12845_v43 = vld [vmem:[%s18595_s3 + $0x124] ss:$8 sps:$4 sm:$0xff]   ;;  %v12843_v45 = vld [vmem:[%s18595_s3 + $0x120] ss:$8 sps:$4 sm:$0xff]   ;;  %v12851_v47 = vld [vmem:[%s18595_s3 + $0x114] ss:$8 sps:$4 sm:$0xff]  }
  0x10   :  { %791 = vmatprep.subr.bf16.mxu0 %v12812_v18  ;;  %586 = vmatprep.subr.bf16.mxu1 %v13870_v19  ;;  %v12848_v44 = vld [vmem:[%s18595_s3 + $0x4] ss:$8 sps:$4 sm:$0xff]   ;;  %v12846_v46 = vld [vmem:[%s18595_s3] ss:$8 sps:$4 sm:$0xff]   ;;  %v12854_v48 = vld [vmem:[%s18595_s3 + $0xf4] ss:$8 sps:$4 sm:$0xff]  }
  0x11   :  { %v12849_v49 = vld [vmem:[%s18595_s3 + $0x110] ss:$8 sps:$4 sm:$0xff]   ;;  %v12857_v51 = vld [vmem:[%s18595_s3 + $0x104] ss:$8 sps:$4 sm:$0xff]   ;;  %v12855_v54 = vld [vmem:[%s18595_s3 + $0x100] ss:$8 sps:$4 sm:$0xff]  }
  0x12   :  { %v12852_v50 = vld [vmem:[%s18595_s3 + $0xf0] ss:$8 sps:$4 sm:$0xff]   ;;  %v12860_v52 = vld [vmem:[%s18595_s3 + $0xe4] ss:$8 sps:$4 sm:$0xff]   ;;  %v12858_v55 = vld [vmem:[%s18595_s3 + $0xe0] ss:$8 sps:$4 sm:$0xff]  }
  0x13   :  { %792 = vmatpush1.bf16.msra.mxu0 %v12810_v22  ;;  %71 = vst.msk [vmem:[#allocation3 + $0x21] ss:$8 sm:$0x3] %vm66_vm2, %v18607_v6  ;;  %73 = vst.msk [vmem:[#allocation4] ss:$8 sm:$0x3] %vm66_vm2, %v18607_v6 }
  0x14   :  { %793 = vmatprep.subr.bf16.mxu0 %v12818_v23  ;;  %76 = vst.msk [vmem:[#allocation4 + $0x21] ss:$8 sm:$0x3] %vm66_vm2, %v18607_v6  ;;  %v12863_v56 = vld [vmem:[%s18595_s3 + $0x1f4] ss:$8 sps:$4 sm:$0xff]  }
  0x15   :  { %10678 = vmatmul.mubr.msk.bf16.vlgmr.msra.gmra.mxu1 %vm80_vm0, %v87_v24  ;;  %v12866_v57 = vld [vmem:[%s18595_s3 + $0xd4] ss:$8 sps:$4 sm:$0xff]   ;;  %v12861_v58 = vld [vmem:[%s18595_s3 + $0x1f0] ss:$8 sps:$4 sm:$0xff]   ;;  %v12869_v60 = vld [vmem:[%s18595_s3 + $0x1e4] ss:$8 sps:$4 sm:$0xff]  }
  0x16   :  { %587 = vmatpush1.bf16.msra.mxu1 %v12813_v25  ;;  %v12864_v59 = vld [vmem:[%s18595_s3 + $0xd0] ss:$8 sps:$4 sm:$0xff]   ;;  %v12872_v61 = vld [vmem:[%s18595_s3 + $0xc4] ss:$8 sps:$4 sm:$0xff]   ;;  %v12867_v62 = vld [vmem:[%s18595_s3 + $0x1e0] ss:$8 sps:$4 sm:$0xff]  }
  0x17   :  { %794 = vmatpush1.bf16.msra.mxu0 %v12816_v26  ;;  %588 = vmatprep.subr.bf16.mxu1 %v12821_v27  ;;  %v12870_v63 = vld [vmem:[%s18595_s3 + $0xc0] ss:$8 sps:$4 sm:$0xff]   ;;  %v12875_v0 = vld [vmem:[%s18595_s3 + $0x1d4] ss:$8 sps:$4 sm:$0xff]   ;;  %v12873_v2 = vld [vmem:[%s18595_s3 + $0x1d0] ss:$8 sps:$4 sm:$0xff]  }
  0x18   :  { %795 = vmatprep.subr.bf16.mxu0 %v12824_v28  ;;  %v12878_v1 = vld [vmem:[%s18595_s3 + $0xb4] ss:$8 sps:$4 sm:$0xff]   ;;  %v12876_v3 = vld [vmem:[%s18595_s3 + $0xb0] ss:$8 sps:$4 sm:$0xff]   ;;  %v12881_v4 = vld [vmem:[%s18595_s3 + $0x1c4] ss:$8 sps:$4 sm:$0xff]  }
  0x19   :  { %v12884_v5 = vld [vmem:[%s18595_s3 + $0xa4] ss:$8 sps:$4 sm:$0xff]   ;;  %v12879_v7 = vld [vmem:[%s18595_s3 + $0x1c0] ss:$8 sps:$4 sm:$0xff]   ;;  %v12887_v9 = vld [vmem:[%s18595_s3 + $0x1b4] ss:$8 sps:$4 sm:$0xff]  }
  0x1a   :  { %589 = vmatpush1.bf16.msra.mxu1 %v12819_v29  ;;  %v12882_v8 = vld [vmem:[%s18595_s3 + $0xa0] ss:$8 sps:$4 sm:$0xff]   ;;  %v12890_v10 = vld [vmem:[%s18595_s3 + $0x94] ss:$8 sps:$4 sm:$0xff]   ;;  %v12885_v11 = vld [vmem:[%s18595_s3 + $0x1b0] ss:$8 sps:$4 sm:$0xff]  }
  0x1b   :  { %796 = vmatpush1.bf16.msra.mxu0 %v12822_v30  ;;  %590 = vmatprep.subr.bf16.mxu1 %v12827_v31  ;;  %v12888_v12 = vld [vmem:[%s18595_s3 + $0x90] ss:$8 sps:$4 sm:$0xff]   ;;  %v12891_v13 = vld [vmem:[%s18595_s3 + $0x1a0] ss:$8 sps:$4 sm:$0xff]   ;;  %v12893_v14 = vld [vmem:[%s18595_s3 + $0x1a4] ss:$8 sps:$4 sm:$0xff]  }
  0x1c   :  { %797 = vmatprep.subr.bf16.mxu0 %v12830_v32  ;;  %v12894_v15 = vld [vmem:[%s18595_s3 + $0x80] ss:$8 sps:$4 sm:$0xff]   ;;  %v12896_v16 = vld [vmem:[%s18595_s3 + $0x84] ss:$8 sps:$4 sm:$0xff]   ;;  %v12899_v17 = vld [vmem:[%s18595_s3 + $0x194] ss:$8 sps:$4 sm:$0xff]  }
  0x1d   :  { %v12897_v18 = vld [vmem:[%s18595_s3 + $0x190] ss:$8 sps:$4 sm:$0xff]   ;;  %v12900_v20 = vld [vmem:[%s18595_s3 + $0x180] ss:$8 sps:$4 sm:$0xff]   ;;  %v12902_v21 = vld [vmem:[%s18595_s3 + $0x184] ss:$8 sps:$4 sm:$0xff]  }
  0x1e   :  { %591 = vmatpush1.bf16.msra.mxu1 %v12825_v33  ;;  %v14065_v22 = vld [vmem:[%s18595_s3 + $0x274] ss:$8 sps:$4 sm:$0xff]   ;;  %v83_v31 = vld [vmem:[%s18594_s2] sm:$0x3] }
  0x1f   :  { %798 = vmatpush1.bf16.msra.mxu0 %v12828_v34  ;;  %592 = vmatprep.subr.bf16.mxu1 %v12833_v35 }
  0x20   :  { %799 = vmatprep.subr.bf16.mxu0 %v12836_v36 }
  0x22   :  { %593 = vmatpush1.bf16.msra.mxu1 %v12831_v37 }
  0x23   :  { %800 = vmatpush1.bf16.msra.mxu0 %v12834_v38  ;;  %594 = vmatprep.subr.bf16.mxu1 %v12839_v39 }
  0x24   :  { %801 = vmatprep.subr.bf16.mxu0 %v12842_v40 }
  0x26   :  { %595 = vmatpush1.bf16.msra.mxu1 %v12837_v41 }
  0x27   :  { %802 = vmatpush1.bf16.msra.mxu0 %v12840_v42  ;;  %596 = vmatprep.subr.bf16.mxu1 %v12845_v43 }
  0x28   :  { %803 = vmatprep.subr.bf16.mxu0 %v12848_v44 }
  0x2a   :  { %597 = vmatpush1.bf16.msra.mxu1 %v12843_v45 }
  0x2b   :  { %804 = vmatpush1.bf16.msra.mxu0 %v12846_v46  ;;  %598 = vmatprep.subr.bf16.mxu1 %v12851_v47 }
  0x2c   :  { %805 = vmatprep.subr.bf16.mxu0 %v12854_v48 }
  0x2e   :  { %599 = vmatpush1.bf16.msra.mxu1 %v12849_v49 }
  0x2f   :  { %806 = vmatpush2.bf16.msra.mxu0 %v12852_v50  ;;  %600 = vmatprep.subr.bf16.mxu1 %v12857_v51 }
  0x30   :  { %807 = vmatprep.subr.bf16.mxu0 %v12860_v52 }
  0x32   :  { %601 = vmatpush1.bf16.msra.mxu1 %v12855_v54 }
  0x33   :  { %808 = vmatpush2.bf16.msra.mxu0 %v12858_v55  ;;  %602 = vmatprep.subr.bf16.mxu1 %v12863_v56 }
  0x34   :  { %809 = vmatprep.subr.bf16.mxu0 %v12866_v57 }
  0x36   :  { %603 = vmatpush2.bf16.msra.mxu1 %v12861_v58 }
  0x37   :  { %810 = vmatpush2.bf16.msra.mxu0 %v12864_v59  ;;  %604 = vmatprep.subr.bf16.mxu1 %v12869_v60 }
  0x38   :  { %811 = vmatprep.subr.bf16.mxu0 %v12872_v61 }
  0x3a   :  { %605 = vmatpush2.bf16.msra.mxu1 %v12867_v62 }
  0x3b   :  { %812 = vmatpush2.bf16.msra.mxu0 %v12870_v63  ;;  %606 = vmatprep.subr.bf16.mxu1 %v12875_v0 }
  0x3c   :  { %813 = vmatprep.subr.bf16.mxu0 %v12878_v1 }
  0x3e   :  { %607 = vmatpush2.bf16.msra.mxu1 %v12873_v2 }
  0x3f   :  { %814 = vmatpush2.bf16.msra.mxu0 %v12876_v3  ;;  %608 = vmatprep.subr.bf16.mxu1 %v12881_v4 }
  0x40   :  { %815 = vmatprep.subr.bf16.mxu0 %v12884_v5 }
  0x42   :  { %609 = vmatpush2.bf16.msra.mxu1 %v12879_v7 }
  0x43   :  { %816 = vmatpush2.bf16.msra.mxu0 %v12882_v8  ;;  %610 = vmatprep.subr.bf16.mxu1 %v12887_v9 }
  0x44   :  { %817 = vmatprep.subr.bf16.mxu0 %v12890_v10 }
  0x46   :  { %611 = vmatpush2.bf16.msra.mxu1 %v12885_v11 }
  0x47   :  { %818 = vmatpush2.bf16.msra.mxu0 %v12888_v12  ;;  %612 = vmatprep.subr.bf16.mxu1 %v12893_v14 }
  0x48   :  { %819 = vmatprep.subr.bf16.mxu0 %v12896_v16 }
  0x4a   :  { %613 = vmatpush2.bf16.msra.mxu1 %v12891_v13 }
  0x4b   :  { %820 = vmatpush2.bf16.msra.mxu0 %v12894_v15  ;;  %614 = vmatprep.subr.bf16.mxu1 %v12899_v17 }
  0x4c   :  { %1402 = vmatprep.subr.bf16.mxu0 %v13870_v19  ;;  %v14069_v19 = vshrl.u32 %v18606_v53, 7 }
  0x4e   :  { %615 = vmatpush2.bf16.msra.mxu1 %v12897_v18  ;;  %v48_v23 = vadd.s32 8, %v14069_v19  ;;  %v14073_v24 = vand.u32 7, %v14069_v19  ;;  %v277_v32 = vsub.s32 0, %v14069_v19  ;;  %v281_v35 = vsub.s32 1, %v14069_v19 }
  0x4f   :  { %616 = vmatprep.subr.bf16.mxu1 %v12902_v21 }
  0x50   :  { %18790 = vst [vmem:[#allocation8_spill] sm:$0xff] %v14073_v24  ;;  %v14075_v26 = vand.u32 7, %v48_v23  ;;  %vm51_vm3 = vcmp.ge.s32.totalorder %v14073_v24, 1  ;;  %vm53_vm4 = vcmp.le.s32.totalorder %v14073_v24, 6  ;;  %v278_v39 = vrot.slane %v83_v31, %v277_v32 }
  0x51   :  { %vm14079_vm5 = vmand %vm51_vm3, %vm53_vm4  ;;  %v282_v43 = vrot.slane %v83_v31, %v281_v35 }
  0x52   :  { %617 = vmatpush2.bf16.msra.mxu1 %v12900_v20  ;;  %18791 = vst [vmem:[#allocation9_spill] sm:$0xff] %v14075_v26  ;;  %vm52_vm6 = vcmp.ge.s32.totalorder %v14075_v26, 1  ;;  %vm54_vm7 = vcmp.le.s32.totalorder %v14075_v26, 6  ;;  %v14101_v49 = vsel %vm14079_vm5, 1.0, %v18607_v6 }
  0x53   :  { %1046 = vmatprep.subr.bf16.mxu1 %v14065_v22  ;;  %vm14089_vm8 = vmand %vm52_vm6, %vm54_vm7 }
  0x54   :  { %v14109_v61 = vsel %vm14089_vm8, 1.0, %v18607_v6 }
  0xcd   :  { %v143_v25 = vpop.f32.mrf.mxu1 }
  0xce   :  { %v261_v30 = vpop.f32.mrf.mxu0 }
  0xcf   :  { %v145_v27 = vpop.f32.mrf.mxu1 }
  0xd0   :  { %v263_v36 = vpop.f32.mrf.mxu0 }
  0xd1   :  { %v147_v29 = vpop.f32.mrf.mxu1 }
  0xd2   :  { %v265_v44 = vpop.f32.mrf.mxu0 }
  0xd3   :  { %v149_v33 = vpop.f32.mrf.mxu1 }
  0xd4   :  { %v267_v56 = vpop.f32.mrf.mxu0 }
  0xd5   :  { %v199_v37 = vpop.f32.mrf.mxu1 }
  0xd6   :  { %v200_v38 = vadd.f32 %v199_v37, %v143_v25 }
  0xd7   :  { %v201_v40 = vpop.f32.mrf.mxu1 }
  0xd8   :  { %v270_v41 = vadd.f32 %v261_v30, %v200_v38  ;;  %v202_v42 = vadd.f32 %v201_v40, %v145_v27 }
  0xd9   :  { %v203_v45 = vpop.f32.mrf.mxu1 }
  0xda   :  { %v285_v46 = vadd.f32 %v278_v39, %v270_v41  ;;  %v271_v47 = vadd.f32 %v263_v36, %v202_v42  ;;  %v204_v48 = vadd.f32 %v203_v45, %v147_v29 }
  0xdb   :  { %v205_v50 = vpop.f32.mrf.mxu1 }
  0xdc   :  { %v289_v51 = vmax.f32 %v285_v46, 0.0  ;;  %v286_v52 = vadd.f32 %v282_v43, %v271_v47  ;;  %v272_v54 = vadd.f32 %v265_v44, %v204_v48  ;;  %v206_v55 = vadd.f32 %v205_v50, %v149_v33 }
  0xde   :  { %v14104_v57 = vmul.f32 %v14101_v49, %v289_v51  ;;  %v290_v58 = vmax.f32 %v286_v52, 0.0  ;;  %v287_v59 = vadd.f32 %v278_v39, %v272_v54  ;;  %v273_v60 = vadd.f32 %v267_v56, %v206_v55 }
  0xe0   :  { %v302_v62 = vrot.slane %v14104_v57, 7  ;;  %v14113_v63 = vmul.f32 %v14101_v49, %v290_v58  ;;  %v291_v0 = vmax.f32 %v287_v59, 0.0  ;;  %v288_v1 = vadd.f32 %v282_v43, %v273_v60 }
  0xe2   :  { %314 = vst [vmem:[#allocation3] sm:$0xfe] %v302_v62  ;;  %v303_v2 = vrot.slane %v14113_v63, 7  ;;  %v14117_v3 = vmul.f32 %v14109_v61, %v291_v0  ;;  %v292_v4 = vmax.f32 %v288_v1, 0.0 }
  0xe4   :  { %18796 = vst [vmem:[#allocation10_spill] sm:$0xff] %v14117_v3  ;;  %315 = vst [vmem:[#allocation3 + $0x8] sm:$0xfe] %v303_v2  ;;  %v304_v5 = vrot.slane %v14117_v3, 7  ;;  %v14121_v7 = vmul.f32 %v14109_v61, %v292_v4 }
  0xe6   :  { %18797 = vst [vmem:[#allocation11_spill] sm:$0xff] %v14121_v7  ;;  %318 = vst [vmem:[#allocation3 + $0x20] sm:$0x1] %v304_v5  ;;  %v306_v8 = vrot.slane %v14121_v7, 7  ;;  %v14125_v9 = vsel %vm301_vm9, %v302_v62, %v304_v5 }
  0xe8   :  { %319 = vst [vmem:[#allocation3 + $0x28] sm:$0x1] %v306_v8 }
  0xe9   :  { %v320_v10 = vld [vmem:[#allocation3] sm:$0xff] }
  0xea   :  { %v358_v11 = vld [vmem:[#allocation3] sm:$0xfe] }
  0xeb   :  { %v362_v12 = vpack.c.bf16 %v14125_v9, %v358_v11 }
  0xec   :  { %18 = vsyncpa [#allocation6], 0  ;;  %v307_v13 = vsel %vm301_vm9, %v303_v2, %v306_v8  ;;  %v321_v14 = vld [vmem:[#allocation3 + $0x8] sm:$0xff]  ;;  %v324_v18 = vpack.c.bf16 %v14125_v9, %v320_v10  ;;  %v13671_v34 = vld [vmem:[%s18595_s3 + $0x170] ss:$8 sps:$4 sm:$0xff]   ;;  %vm877_vm11 = vcmask 1046528  }
  0xed   :  { %v359_v15 = vld [vmem:[#allocation3 + $0x8] sm:$0xfe]  ;;  %v325_v16 = vpack.c.bf16 %v307_v13, %v321_v14  ;;  %v360_v20 = vld [vmem:[#allocation3 + $0x20] sm:$0x1]  ;;  %v403_v21 = vshll.u32 %v362_v12, 16  ;;  %v401_v42 = vshrl.u32 %v362_v12, 16 }
  0xee   :  { %v363_v17 = vpack.c.bf16 %v307_v13, %v359_v15  ;;  %v364_v25 = vpack.c.bf16 %v360_v20, %v360_v20  ;;  %v833_v28 = vld [vmem:[#allocation3 + $0x8] sm:$0xfc]  ;;  %vm399_vm10 = vsmask.f32 7424  ;;  %v14142_v48 = vld [vmem:[%s18595_s3 + $0x270] ss:$8 sps:$4 sm:$0xff]  }
  0xef   :  { %821 = vmatprep.mubr.bf16.mxu0 %v325_v16  ;;  %v361_v27 = vld [vmem:[#allocation3 + $0x28] sm:$0x1]  ;;  %v405_v36 = vrot.slane %v403_v21, 1  ;;  %v13672_v38 = vld [vmem:[%s18595_s3 + $0x164] ss:$8 sps:$4 sm:$0xff]   ;;  %v837_v41 = vpack.c.bf16 %v307_v13, %v833_v28  ;;  %vm10092_vm12 = vcmask 64512  }
  0xf0   :  { %v415_v23 = vshll.u32 %v363_v17, 16  ;;  %822 = vmatmul.mubr.bf16.vlgmr.msra.gmra.mxu0 %v324_v18  ;;  %v835_v29 = vld [vmem:[#allocation3 + $0x28] sm:$0x3]  ;;  %v365_v30 = vpack.c.bf16 %v361_v27, %v361_v27  ;;  %v408_v33 = vshll.u32 %v364_v25, 16  ;;  %v413_v39 = vshrl.u32 %v363_v17, 16 }
  0xf1   :  { %1403 = vmatpush1.bf16.msra.mxu0 %v13671_v34  ;;  %v839_v37 = vpack.c.bf16 %v835_v29, %v835_v29  ;;  %v13673_v47 = vld [vmem:[%s18595_s3 + $0x160] ss:$8 sps:$4 sm:$0xff]   ;;  %v406_v50 = vor.u32 %v405_v36, %v401_v42  ;;  %v13674_v51 = vld [vmem:[%s18595_s3 + $0x154] ss:$8 sps:$4 sm:$0xff]   ;;  %v881_v54 = vrot.slane %v837_v41, 1  ;;  %vm13758_vm4 = vmmov 0  }
  0xf2   :  { %v417_v31 = vrot.slane %v415_v23, 1  ;;  %1404 = vmatprep.subr.bf16.mxu0 %v13672_v38  ;;  %v420_v40 = vshll.u32 %v365_v30, 16  ;;  %v410_v43 = vrot.slane %v408_v33, 1  ;;  %v14151_v55 = vld [vmem:[%s18595_s3 + $0x264] ss:$8 sps:$4 sm:$0xff]  }
  0xf3   :  { %v882_v46 = vrot.slane %v839_v37, 1  ;;  %v13675_v59 = vld [vmem:[%s18595_s3 + $0x150] ss:$8 sps:$4 sm:$0xff]   ;;  %v14162_v60 = vld [vmem:[%s18595_s3 + $0x260] ss:$8 sps:$4 sm:$0xff]  }
  0xf4   :  { %v418_v44 = vor.u32 %v417_v31, %v413_v39  ;;  %v422_v45 = vrot.slane %v420_v40, 1  ;;  %v411_v56 = vsel %vm399_vm10, %v406_v50, %v410_v43  ;;  %v14168_v62 = vld [vmem:[%s18595_s3 + $0x254] ss:$8 sps:$4 sm:$0xff]   ;;  %v13676_v0 = vld [vmem:[%s18595_s3 + $0x144] ss:$8 sps:$4 sm:$0xff]  }
  0xf5   :  { %1405 = vmatpush1.bf16.msra.mxu0 %v13673_v47  ;;  %v883_v58 = vsel %vm877_vm11, %v881_v54, %v882_v46  ;;  %v13677_v1 = vld [vmem:[%s18595_s3 + $0x140] ss:$8 sps:$4 sm:$0xff]   ;;  %v14180_v2 = vld [vmem:[%s18595_s3 + $0x250] ss:$8 sps:$4 sm:$0xff]   ;;  %v13678_v4 = vld [vmem:[%s18595_s3 + $0x134] ss:$8 sps:$4 sm:$0xff]  }
  0xf6   :  { %1406 = vmatprep.subr.bf16.mxu0 %v13674_v51  ;;  %v423_v52 = vsel %vm399_vm10, %v418_v44, %v422_v45  ;;  %v14189_v5 = vld [vmem:[%s18595_s3 + $0x244] ss:$8 sps:$4 sm:$0xff]   ;;  %v13679_v8 = vld [vmem:[%s18595_s3 + $0x130] ss:$8 sps:$4 sm:$0xff]   ;;  %v14198_v10 = vld [vmem:[%s18595_s3 + $0x240] ss:$8 sps:$4 sm:$0xff]  }
  0xf7   :  { %618 = vmatprep.mubr.bf16.mxu1 %v423_v52  ;;  %v13680_v11 = vld [vmem:[%s18595_s3 + $0x124] ss:$8 sps:$4 sm:$0xff]   ;;  %v14207_v12 = vld [vmem:[%s18595_s3 + $0x234] ss:$8 sps:$4 sm:$0xff]   ;;  %v13681_v13 = vld [vmem:[%s18595_s3 + $0x120] ss:$8 sps:$4 sm:$0xff]  }
  0xf8   :  { %619 = vmatmul.mubr.bf16.vlgmr.msra.gmra.mxu1 %v411_v56  ;;  %v14216_v14 = vld [vmem:[%s18595_s3 + $0x230] ss:$8 sps:$4 sm:$0xff]   ;;  %v13682_v15 = vld [vmem:[%s18595_s3 + $0x114] ss:$8 sps:$4 sm:$0xff]   ;;  %v14225_v16 = vld [vmem:[%s18595_s3 + $0x224] ss:$8 sps:$4 sm:$0xff]  }
  0xf9   :  { %1407 = vmatpush1.bf16.msra.mxu0 %v13675_v59  ;;  %1047 = vmatpush1.bf16.msra.mxu1 %v14142_v48  ;;  %v13683_v17 = vld [vmem:[%s18595_s3 + $0x110] ss:$8 sps:$4 sm:$0xff]   ;;  %v14234_v18 = vld [vmem:[%s18595_s3 + $0x220] ss:$8 sps:$4 sm:$0xff]   ;;  %v13684_v20 = vld [vmem:[%s18595_s3 + $0x104] ss:$8 sps:$4 sm:$0xff]  }
  0xfa   :  { %1078 = vmatprep.mubr.bf16.mxu1 %v883_v58  ;;  %1048 = vmatprep.subr.bf16.mxu1 %v14151_v55  ;;  %v14243_v21 = vld [vmem:[%s18595_s3 + $0x214] ss:$8 sps:$4 sm:$0xff]   ;;  %v13685_v23 = vld [vmem:[%s18595_s3 + $0x100] ss:$8 sps:$4 sm:$0xff]   ;;  %v14252_v25 = vld [vmem:[%s18595_s3 + $0x210] ss:$8 sps:$4 sm:$0xff]  }
  0xfb   :  { %1408 = vmatprep.subr.bf16.mxu0 %v13676_v0  ;;  %v13686_v27 = vld [vmem:[%s18595_s3 + $0x1f4] ss:$8 sps:$4 sm:$0xff]   ;;  %v14261_v28 = vld [vmem:[%s18595_s3 + $0x204] ss:$8 sps:$4 sm:$0xff]   ;;  %v13687_v29 = vld [vmem:[%s18595_s3 + $0x1f0] ss:$8 sps:$4 sm:$0xff]  }
  0xfc   :  { %v14270_v30 = vld [vmem:[%s18595_s3 + $0x200] ss:$8 sps:$4 sm:$0xff]   ;;  %v13688_v31 = vld [vmem:[%s18595_s3 + $0x1e4] ss:$8 sps:$4 sm:$0xff]   ;;  %v14279_v33 = vld [vmem:[%s18595_s3 + $0x2f4] ss:$8 sps:$4 sm:$0xff]  }
  0xfd   :  { %1409 = vmatpush1.bf16.msra.mxu0 %v13677_v1  ;;  %1049 = vmatpush1.bf16.msra.mxu1 %v14162_v60  ;;  %v13689_v34 = vld [vmem:[%s18595_s3 + $0x1e0] ss:$8 sps:$4 sm:$0xff]   ;;  %v14288_v36 = vld [vmem:[%s18595_s3 + $0x2f0] ss:$8 sps:$4 sm:$0xff]   ;;  %v13690_v37 = vld [vmem:[%s18595_s3 + $0x1d4] ss:$8 sps:$4 sm:$0xff]  }
  0xfe   :  { %1410 = vmatprep.subr.bf16.mxu0 %v13678_v4  ;;  %1050 = vmatprep.subr.bf16.mxu1 %v14168_v62  ;;  %v14297_v38 = vld [vmem:[%s18595_s3 + $0x2e4] ss:$8 sps:$4 sm:$0xff]   ;;  %v13691_v39 = vld [vmem:[%s18595_s3 + $0x1d0] ss:$8 sps:$4 sm:$0xff]   ;;  %v14306_v40 = vld [vmem:[%s18595_s3 + $0x2e0] ss:$8 sps:$4 sm:$0xff]  }
  0xff   :  { %v13692_v41 = vld [vmem:[%s18595_s3 + $0x1c4] ss:$8 sps:$4 sm:$0xff]   ;;  %v14315_v42 = vld [vmem:[%s18595_s3 + $0x2d4] ss:$8 sps:$4 sm:$0xff]   ;;  %v13693_v43 = vld [vmem:[%s18595_s3 + $0x1c0] ss:$8 sps:$4 sm:$0xff]  }
 0x100   :  { %v14324_v44 = vld [vmem:[%s18595_s3 + $0x2d0] ss:$8 sps:$4 sm:$0xff]   ;;  %v13694_v45 = vld [vmem:[%s18595_s3 + $0x1b4] ss:$8 sps:$4 sm:$0xff]   ;;  %v14333_v46 = vld [vmem:[%s18595_s3 + $0x2c4] ss:$8 sps:$4 sm:$0xff]  }
 0x101   :  { %1411 = vmatpush1.bf16.msra.mxu0 %v13679_v8  ;;  %1051 = vmatpush1.bf16.msra.mxu1 %v14180_v2  ;;  %v13695_v47 = vld [vmem:[%s18595_s3 + $0x1b0] ss:$8 sps:$4 sm:$0xff]   ;;  %v14342_v50 = vld [vmem:[%s18595_s3 + $0x2c0] ss:$8 sps:$4 sm:$0xff]   ;;  %v13696_v51 = vld [vmem:[%s18595_s3 + $0x1a4] ss:$8 sps:$4 sm:$0xff]  }
 0x102   :  { %1412 = vmatprep.subr.bf16.mxu0 %v13680_v11  ;;  %1052 = vmatprep.subr.bf16.mxu1 %v14189_v5  ;;  %v14351_v52 = vld [vmem:[%s18595_s3 + $0x2b4] ss:$8 sps:$4 sm:$0xff]   ;;  %v13697_v54 = vld [vmem:[%s18595_s3 + $0x1a0] ss:$8 sps:$4 sm:$0xff]   ;;  %v14360_v56 = vld [vmem:[%s18595_s3 + $0x2b0] ss:$8 sps:$4 sm:$0xff]  }
 0x103   :  { %v13698_v58 = vld [vmem:[%s18595_s3 + $0x194] ss:$8 sps:$4 sm:$0xff]   ;;  %v14369_v59 = vld [vmem:[%s18595_s3 + $0x2a4] ss:$8 sps:$4 sm:$0xff]   ;;  %v13699_v0 = vld [vmem:[%s18595_s3 + $0x190] ss:$8 sps:$4 sm:$0xff]  }
 0x104   :  { %v14378_v1 = vld [vmem:[%s18595_s3 + $0x2a0] ss:$8 sps:$4 sm:$0xff]   ;;  %v13700_v4 = vld [vmem:[%s18595_s3 + $0x184] ss:$8 sps:$4 sm:$0xff]   ;;  %v14387_v8 = vld [vmem:[%s18595_s3 + $0x294] ss:$8 sps:$4 sm:$0xff]  }
 0x105   :  { %1413 = vmatpush1.bf16.msra.mxu0 %v13681_v13  ;;  %1053 = vmatpush1.bf16.msra.mxu1 %v14198_v10  ;;  %v834_v11 = vld [vmem:[#allocation3 + $0x20] sm:$0x3]  ;;  %v13701_v13 = vld [vmem:[%s18595_s3 + $0x180] ss:$8 sps:$4 sm:$0xff]  }
 0x106   :  { %1414 = vmatprep.subr.bf16.mxu0 %v13682_v15  ;;  %1054 = vmatprep.subr.bf16.mxu1 %v14207_v12  ;;  %v14396_v15 = vld [vmem:[%s18595_s3 + $0x290] ss:$8 sps:$4 sm:$0xff]  }
 0x109   :  { %1415 = vmatpush1.bf16.msra.mxu0 %v13683_v17  ;;  %1055 = vmatpush1.bf16.msra.mxu1 %v14216_v14  ;;  %v14403_v17 = vld [vmem:[%s18595_s3 + $0x284] ss:$8 sps:$4 sm:$0xff]  }
 0x10a   :  { %1416 = vmatprep.subr.bf16.mxu0 %v13684_v20  ;;  %1056 = vmatprep.subr.bf16.mxu1 %v14225_v16  ;;  %v832_v20 = vld [vmem:[#allocation3] sm:$0xfc] }
 0x10d   :  { %1417 = vmatpush1.bf16.msra.mxu0 %v13685_v23  ;;  %1057 = vmatpush1.bf16.msra.mxu1 %v14234_v18  ;;  %v838_v23 = vpack.c.bf16 %v834_v11, %v834_v11  ;;  %v13714_v11 = vld [vmem:[%s18595_s3 + $0x14] ss:$8 sps:$4 sm:$0xff]  }
 0x10e   :  { %1418 = vmatprep.subr.bf16.mxu0 %v13686_v27  ;;  %1058 = vmatprep.subr.bf16.mxu1 %v14243_v21  ;;  %v14409_v27 = vld [vmem:[%s18595_s3 + $0x280] ss:$8 sps:$4 sm:$0xff]  }
 0x111   :  { %1419 = vmatpush2.bf16.msra.mxu0 %v13687_v29  ;;  %1059 = vmatpush1.bf16.msra.mxu1 %v14252_v25  ;;  %v836_v29 = vpack.c.bf16 %v14125_v9, %v832_v20  ;;  %v13704_v9 = vld [vmem:[%s18595_s3 + $0x64] ss:$8 sps:$4 sm:$0xff]  }
 0x112   :  { %1420 = vmatprep.subr.bf16.mxu0 %v13688_v31  ;;  %1060 = vmatprep.subr.bf16.mxu1 %v14261_v28  ;;  %v13716_v20 = vld [vmem:[%s18595_s3 + $0x4] ss:$8 sps:$4 sm:$0xff]  }
 0x113   :  { %v878_v31 = vrot.slane %v836_v29, 1  ;;  %v13718_v29 = vld [vmem:[%s18595_s3 + $0xf4] ss:$8 sps:$4 sm:$0xff]  }
 0x115   :  { %1421 = vmatpush2.bf16.msra.mxu0 %v13689_v34  ;;  %1061 = vmatpush1.bf16.msra.mxu1 %v14270_v30  ;;  %v13702_v34 = vld [vmem:[%s18595_s3 + $0x74] ss:$8 sps:$4 sm:$0xff]  }
 0x116   :  { %1422 = vmatprep.subr.bf16.mxu0 %v13690_v37  ;;  %1062 = vmatprep.subr.bf16.mxu1 %v14279_v33 }
 0x119   :  { %1423 = vmatpush2.bf16.msra.mxu0 %v13691_v39  ;;  %1063 = vmatpush2.bf16.msra.mxu1 %v14288_v36  ;;  %v13703_v39 = vld [vmem:[%s18595_s3 + $0x70] ss:$8 sps:$4 sm:$0xff]  }
 0x11a   :  { %1424 = vmatprep.subr.bf16.mxu0 %v13692_v41  ;;  %1064 = vmatprep.subr.bf16.mxu1 %v14297_v38  ;;  %v13705_v41 = vld [vmem:[%s18595_s3 + $0x60] ss:$8 sps:$4 sm:$0xff]  }
 0x11d   :  { %1425 = vmatpush2.bf16.msra.mxu0 %v13693_v43  ;;  %1065 = vmatpush2.bf16.msra.mxu1 %v14306_v40  ;;  %v13706_v43 = vld [vmem:[%s18595_s3 + $0x54] ss:$8 sps:$4 sm:$0xff]  }
 0x11e   :  { %1426 = vmatprep.subr.bf16.mxu0 %v13694_v45  ;;  %1066 = vmatprep.subr.bf16.mxu1 %v14315_v42  ;;  %v13707_v45 = vld [vmem:[%s18595_s3 + $0x50] ss:$8 sps:$4 sm:$0xff]  }
 0x121   :  { %1427 = vmatpush2.bf16.msra.mxu0 %v13695_v47  ;;  %1067 = vmatpush2.bf16.msra.mxu1 %v14324_v44  ;;  %v13708_v47 = vld [vmem:[%s18595_s3 + $0x44] ss:$8 sps:$4 sm:$0xff]  }
 0x122   :  { %1428 = vmatprep.subr.bf16.mxu0 %v13696_v51  ;;  %1068 = vmatprep.subr.bf16.mxu1 %v14333_v46  ;;  %v13709_v51 = vld [vmem:[%s18595_s3 + $0x40] ss:$8 sps:$4 sm:$0xff]  }
 0x125   :  { %1429 = vmatpush2.bf16.msra.mxu0 %v13697_v54  ;;  %1069 = vmatpush2.bf16.msra.mxu1 %v14342_v50  ;;  %v13710_v54 = vld [vmem:[%s18595_s3 + $0x34] ss:$8 sps:$4 sm:$0xff]  }
 0x126   :  { %1430 = vmatprep.subr.bf16.mxu0 %v13698_v58  ;;  %1070 = vmatprep.subr.bf16.mxu1 %v14351_v52  ;;  %v13711_v58 = vld [vmem:[%s18595_s3 + $0x30] ss:$8 sps:$4 sm:$0xff]  }
 0x129   :  { %1431 = vmatpush2.bf16.msra.mxu0 %v13699_v0  ;;  %1071 = vmatpush2.bf16.msra.mxu1 %v14360_v56  ;;  %v13712_v0 = vld [vmem:[%s18595_s3 + $0x24] ss:$8 sps:$4 sm:$0xff]  }
 0x12a   :  { %1432 = vmatprep.subr.bf16.mxu0 %v13700_v4  ;;  %1072 = vmatprep.subr.bf16.mxu1 %v14369_v59  ;;  %v13713_v4 = vld [vmem:[%s18595_s3 + $0x20] ss:$8 sps:$4 sm:$0xff]  }
 0x12d   :  { %1433 = vmatpush2.bf16.msra.mxu0 %v13701_v13  ;;  %1073 = vmatpush2.bf16.msra.mxu1 %v14378_v1  ;;  %v13715_v13 = vld [vmem:[%s18595_s3 + $0x10] ss:$8 sps:$4 sm:$0xff]  }
 0x12e   :  { %1860 = vmatprep.subr.bf16.mxu0 %v14065_v22  ;;  %1074 = vmatprep.subr.bf16.mxu1 %v14387_v8  ;;  %v879_v22 = vrot.slane %v838_v23, 1  ;;  %v13717_v23 = vld [vmem:[%s18595_s3] ss:$8 sps:$4 sm:$0xff]  }
 0x130   :  { %v880_v37 = vsel %vm877_vm11, %v878_v31, %v879_v22  ;;  %v13719_v22 = vld [vmem:[%s18595_s3 + $0xf0] ss:$8 sps:$4 sm:$0xff]   ;;  %v13720_v31 = vld [vmem:[%s18595_s3 + $0xe4] ss:$8 sps:$4 sm:$0xff]  }
 0x131   :  { %1075 = vmatpush2.bf16.msra.mxu1 %v14396_v15 }
 0x132   :  { %1076 = vmatprep.subr.bf16.mxu1 %v14403_v17 }
 0x135   :  { %1077 = vmatpush2.bf16.msra.mxu1 %v14409_v27 }
 0x136   :  { %1605 = vmatprep.subr.bf16.mxu1 %v13702_v34  ;;  %v13721_v34 = vld [vmem:[%s18595_s3 + $0xe0] ss:$8 sps:$4 sm:$0xff]  }
 0x138   :  { %1079 = vmatmul.mubr.bf16.vlgmr.msra.gmra.mxu1 %v880_v37  ;;  %v13722_v37 = vld [vmem:[%s18595_s3 + $0xd4] ss:$8 sps:$4 sm:$0xff]  }
 0x139   :  { %1606 = vmatpush1.bf16.msra.mxu1 %v13703_v39  ;;  %v13723_v39 = vld [vmem:[%s18595_s3 + $0xd0] ss:$8 sps:$4 sm:$0xff]  }
 0x13a   :  { %1607 = vmatprep.subr.bf16.mxu1 %v13704_v9  ;;  %v13724_v9 = vld [vmem:[%s18595_s3 + $0xc4] ss:$8 sps:$4 sm:$0xff]  }
 0x13d   :  { %1608 = vmatpush1.bf16.msra.mxu1 %v13705_v41  ;;  %v13725_v41 = vld [vmem:[%s18595_s3 + $0xc0] ss:$8 sps:$4 sm:$0xff]  }
 0x13e   :  { %1609 = vmatprep.subr.bf16.mxu1 %v13706_v43  ;;  %v13726_v43 = vld [vmem:[%s18595_s3 + $0xb4] ss:$8 sps:$4 sm:$0xff]  }
 0x141   :  { %1610 = vmatpush1.bf16.msra.mxu1 %v13707_v45  ;;  %v13727_v45 = vld [vmem:[%s18595_s3 + $0xb0] ss:$8 sps:$4 sm:$0xff]  }
 0x142   :  { %1611 = vmatprep.subr.bf16.mxu1 %v13708_v47  ;;  %v13728_v47 = vld [vmem:[%s18595_s3 + $0xa4] ss:$8 sps:$4 sm:$0xff]  }
 0x145   :  { %1612 = vmatpush1.bf16.msra.mxu1 %v13709_v51  ;;  %v13729_v51 = vld [vmem:[%s18595_s3 + $0xa0] ss:$8 sps:$4 sm:$0xff]  }
 0x146   :  { %1613 = vmatprep.subr.bf16.mxu1 %v13710_v54  ;;  %v13730_v54 = vld [vmem:[%s18595_s3 + $0x94] ss:$8 sps:$4 sm:$0xff]  }
 0x149   :  { %1614 = vmatpush1.bf16.msra.mxu1 %v13711_v58  ;;  %v13731_v58 = vld [vmem:[%s18595_s3 + $0x90] ss:$8 sps:$4 sm:$0xff]  }
 0x14a   :  { %1615 = vmatprep.subr.bf16.mxu1 %v13712_v0  ;;  %v13732_v0 = vld [vmem:[%s18595_s3 + $0x84] ss:$8 sps:$4 sm:$0xff]  }
 0x14d   :  { %1616 = vmatpush1.bf16.msra.mxu1 %v13713_v4  ;;  %v13733_v4 = vld [vmem:[%s18595_s3 + $0x80] ss:$8 sps:$4 sm:$0xff]  }
 0x14e   :  { %1617 = vmatprep.subr.bf16.mxu1 %v13714_v11 }
 0x151   :  { %1618 = vmatpush1.bf16.msra.mxu1 %v13715_v13 }
 0x152   :  { %1619 = vmatprep.subr.bf16.mxu1 %v13716_v20 }
 0x155   :  { %1620 = vmatpush1.bf16.msra.mxu1 %v13717_v23 }
 0x156   :  { %1621 = vmatprep.subr.bf16.mxu1 %v13718_v29  ;;  %v84_v29 = vld [vmem:[%s18596_s4] sm:$0x3] }
 0x159   :  { %1622 = vmatpush2.bf16.msra.mxu1 %v13719_v22 }
 0x15a   :  { %1623 = vmatprep.subr.bf16.mxu1 %v13720_v31 }
 0x15d   :  { %1624 = vmatpush2.bf16.msra.mxu1 %v13721_v34  ;;  %v14516_v34 = vrot.slane %v84_v29, %v277_v32 }
 0x15e   :  { %1625 = vmatprep.subr.bf16.mxu1 %v13722_v37 }
 0x161   :  { %1626 = vmatpush2.bf16.msra.mxu1 %v13723_v39 }
 0x162   :  { %1627 = vmatprep.subr.bf16.mxu1 %v13724_v9 }
 0x165   :  { %1628 = vmatpush2.bf16.msra.mxu1 %v13725_v41  ;;  %v14520_v41 = vrot.slane %v84_v29, %v281_v35 }
 0x166   :  { %1629 = vmatprep.subr.bf16.mxu1 %v13726_v43 }
 0x169   :  { %1630 = vmatpush2.bf16.msra.mxu1 %v13727_v45 }
 0x16a   :  { %1631 = vmatprep.subr.bf16.mxu1 %v13728_v47 }
 0x16d   :  { %1632 = vmatpush2.bf16.msra.mxu1 %v13729_v51 }
 0x16e   :  { %1633 = vmatprep.subr.bf16.mxu1 %v13730_v54 }
 0x171   :  { %1634 = vmatpush2.bf16.msra.mxu1 %v13731_v58 }
 0x172   :  { %1635 = vmatprep.subr.bf16.mxu1 %v13732_v0 }
 0x175   :  { %1636 = vmatpush2.bf16.msra.mxu1 %v13733_v4 }
 0x1b0   :  { %v823_v20 = vpop.f32.mrf.mxu0 }
 0x1b2   :  { %v825_v22 = vpop.f32.mrf.mxu0 }
 0x1b4   :  { %v827_v39 = vpop.f32.mrf.mxu0 }
 0x1b6   :  { %v829_v0 = vpop.f32.mrf.mxu0 }
 0x1b8   :  { %v620_v11 = vpop.f32.mrf.mxu1 }
 0x1b9   :  { %v824_v37 = vadd.f32 %v823_v20, %v620_v11 }
 0x1ba   :  { %v622_v13 = vpop.f32.mrf.mxu1 }
 0x1bb   :  { %v826_v43 = vadd.f32 %v825_v22, %v622_v13 }
 0x1bc   :  { %v624_v23 = vpop.f32.mrf.mxu1 }
 0x1bd   :  { %v828_v51 = vadd.f32 %v827_v39, %v624_v23 }
 0x1be   :  { %v626_v31 = vpop.f32.mrf.mxu1 }
 0x1bf   :  { %v830_v53 = vadd.f32 %v829_v0, %v626_v31 }
 0x1f8   :  { %v1080_v9 = vpop.f32.mrf.mxu1 }
 0x1f9   :  { %v1089_v45 = vadd.f32 %v1080_v9, %v824_v37 }
 0x1fa   :  { %v1082_v47 = vpop.f32.mrf.mxu1 }
 0x1fb   :  { %v1104_v54 = vadd.f32 %v14516_v34, %v1089_v45  ;;  %v1090_v58 = vadd.f32 %v1082_v47, %v826_v43 }
 0x1fc   :  { %v1084_v4 = vpop.f32.mrf.mxu1 }
 0x1fd   :  { %v1108_v6 = vmax.f32 %v1104_v54, 0.0  ;;  %v1105_v32 = vadd.f32 %v14520_v41, %v1090_v58  ;;  %v1091_v11 = vadd.f32 %v1084_v4, %v828_v51 }
 0x1fe   :  { %v1086_v20 = vpop.f32.mrf.mxu1 }
 0x1ff   :  { %v1112_v26 = vmul.f32 %v14101_v49, %v1108_v6  ;;  %v1109_v19 = vmax.f32 %v1105_v32, 0.0  ;;  %v1106_v35 = vadd.f32 %v14516_v34, %v1091_v11  ;;  %v1092_v13 = vadd.f32 %v1086_v20, %v830_v53 }
 0x201   :  { %v1120_v29 = vrot.slane %v1112_v26, 7  ;;  %v1113_v23 = vmul.f32 %v14101_v49, %v1109_v19  ;;  %v1110_v22 = vmax.f32 %v1106_v35, 0.0  ;;  %v1107_v37 = vadd.f32 %v14520_v41, %v1092_v13 }
 0x203   :  { %1132 = vst [vmem:[#allocation4] sm:$0xfe] %v1120_v29  ;;  %v1121_v39 = vrot.slane %v1113_v23, 7  ;;  %v1114_v31 = vmul.f32 %v14109_v61, %v1110_v22  ;;  %v1111_v9 = vmax.f32 %v1107_v37, 0.0 }
 0x205   :  { %1133 = vst [vmem:[#allocation4 + $0x8] sm:$0xfe] %v1121_v39  ;;  %v1122_v43 = vrot.slane %v1114_v31, 7  ;;  %v1115_v45 = vmul.f32 %v14109_v61, %v1111_v9 }
 0x207   :  { %1136 = vst [vmem:[#allocation4 + $0x20] sm:$0x1] %v1122_v43  ;;  %v1124_v6 = vrot.slane %v1115_v45, 7  ;;  %v14531_v53 = vsel %vm301_vm9, %v1120_v29, %v1122_v43 }
 0x209   :  { %1137 = vst [vmem:[#allocation4 + $0x28] sm:$0x1] %v1124_v6  ;;  %v1125_v54 = vsel %vm301_vm9, %v1121_v39, %v1124_v6 }
 0x20a   :  { %v1176_v26 = vld [vmem:[#allocation4] sm:$0xfe] }
 0x20b   :  { %v1138_v47 = vld [vmem:[#allocation4] sm:$0xff]  ;;  %v1180_v51 = vpack.c.bf16 %v14531_v53, %v1176_v26 }
 0x20c   :  { %v1139_v58 = vld [vmem:[#allocation4 + $0x8] sm:$0xff]  ;;  %v1142_v11 = vpack.c.bf16 %v14531_v53, %v1138_v47 }
 0x20d   :  { %v1177_v0 = vld [vmem:[#allocation4 + $0x8] sm:$0xfe]  ;;  %v1143_v4 = vpack.c.bf16 %v1125_v54, %v1139_v58  ;;  %v1219_v19 = vshll.u32 %v1180_v51, 16  ;;  %v1217_v58 = vshrl.u32 %v1180_v51, 16 }
 0x20e   :  { %v1181_v32 = vpack.c.bf16 %v1125_v54, %v1177_v0  ;;  %v1178_v20 = vld [vmem:[#allocation4 + $0x20] sm:$0x1]  ;;  %v1649_v23 = vld [vmem:[#allocation4 + $0x8] sm:$0xfc] }
 0x20f   :  { %1637 = vmatprep.mubr.bf16.mxu1 %v1143_v4  ;;  %v1182_v13 = vpack.c.bf16 %v1178_v20, %v1178_v20  ;;  %v1221_v43 = vrot.slane %v1219_v19, 1  ;;  %v1653_v26 = vpack.c.bf16 %v1125_v54, %v1649_v23  ;;  %v14740_v51 = vld [vmem:[%s18595_s3 + $0x110] ss:$8 sps:$4 sm:$0xff]   ;;  %v14747_v54 = vld [vmem:[%s18595_s3] ss:$8 sps:$4 sm:$0xff]  }
 0x210   :  { %v1231_v35 = vshll.u32 %v1181_v32, 16  ;;  %1638 = vmatmul.mubr.bf16.vlgmr.msra.gmra.mxu1 %v1142_v11  ;;  %v1179_v29 = vld [vmem:[#allocation4 + $0x28] sm:$0x1]  ;;  %v1229_v45 = vshrl.u32 %v1181_v32, 16  ;;  %18809 = vst [vmem:[#allocation23_spill] sm:$0xff] %v14747_v54 }
 0x211   :  { %v1651_v22 = vld [vmem:[#allocation4 + $0x28] sm:$0x3]  ;;  %v1183_v37 = vpack.c.bf16 %v1179_v29, %v1179_v29  ;;  %v1224_v9 = vshll.u32 %v1182_v13, 16  ;;  %v1222_v4 = vor.u32 %v1221_v43, %v1217_v58  ;;  %v1695_v11 = vrot.slane %v1653_v26, 1  ;;  %v14754_v32 = vld [vmem:[%s18595_s3 + $0xf4] ss:$8 sps:$4 sm:$0xff]  }
 0x212   :  { %v1233_v31 = vrot.slane %v1231_v35, 1  ;;  %v1655_v39 = vpack.c.bf16 %v1651_v22, %v1651_v22  ;;  %18810 = vst [vmem:[#allocation24_spill] sm:$0xff] %v14754_v32  ;;  %v14760_v19 = vld [vmem:[%s18595_s3 + $0xf0] ss:$8 sps:$4 sm:$0xff]   ;;  %v14767_v13 = vld [vmem:[%s18595_s3 + $0x104] ss:$8 sps:$4 sm:$0xff]  }
 0x213   :  { %v1236_v6 = vshll.u32 %v1183_v37, 16  ;;  %v1226_v0 = vrot.slane %v1224_v9, 1  ;;  %18811 = vst [vmem:[#allocation25_spill] sm:$0xff] %v14760_v19  ;;  %v14772_v29 = vld [vmem:[%s18595_s3 + $0xe4] ss:$8 sps:$4 sm:$0xff]  }
 0x214   :  { %v1234_v47 = vor.u32 %v1233_v31, %v1229_v45  ;;  %v1696_v7 = vrot.slane %v1655_v39, 1  ;;  %18812 = vst [vmem:[#allocation26_spill] sm:$0xff] %v14772_v29  ;;  %v14777_v23 = vld [vmem:[%s18595_s3 + $0x100] ss:$8 sps:$4 sm:$0xff]   ;;  %v14791_v37 = vld [vmem:[%s18595_s3 + $0x1f4] ss:$8 sps:$4 sm:$0xff]  }
 0x215   :  { %v1238_v24 = vrot.slane %v1236_v6, 1  ;;  %v1227_v3 = vsel %vm399_vm10, %v1222_v4, %v1226_v0  ;;  %v14782_v22 = vld [vmem:[%s18595_s3 + $0xe0] ss:$8 sps:$4 sm:$0xff]   ;;  %v14796_v31 = vld [vmem:[%s18595_s3 + $0xd4] ss:$8 sps:$4 sm:$0xff]  }
 0x216   :  { %v1697_v35 = vsel %vm877_vm11, %v1695_v11, %v1696_v7  ;;  %18813 = vst [vmem:[#allocation27_spill] sm:$0xff] %v14782_v22  ;;  %18814 = vst [vmem:[#allocation28_spill] sm:$0xff] %v14796_v31  ;;  %v14801_v9 = vld [vmem:[%s18595_s3 + $0x1f0] ss:$8 sps:$4 sm:$0xff]   ;;  %v14815_v39 = vld [vmem:[%s18595_s3 + $0x1e4] ss:$8 sps:$4 sm:$0xff]  }
 0x217   :  { %v1239_v20 = vsel %vm399_vm10, %v1234_v47, %v1238_v24  ;;  %v1650_v24 = vld [vmem:[#allocation4 + $0x20] sm:$0x3]  ;;  %v14806_v43 = vld [vmem:[%s18595_s3 + $0xd0] ss:$8 sps:$4 sm:$0xff]   ;;  %v14820_v45 = vld [vmem:[%s18595_s3 + $0xc4] ss:$8 sps:$4 sm:$0xff]  }
 0x218   :  { %1434 = vmatprep.mubr.bf16.mxu0 %v1239_v20  ;;  %v1654_v7 = vpack.c.bf16 %v1650_v24, %v1650_v24  ;;  %18815 = vst [vmem:[#allocation29_spill] sm:$0xff] %v14806_v43  ;;  %18816 = vst [vmem:[#allocation30_spill] sm:$0xff] %v14820_v45  ;;  %v14825_v6 = vld [vmem:[%s18595_s3 + $0x1e0] ss:$8 sps:$4 sm:$0xff]   ;;  %v14839_v58 = vld [vmem:[%s18595_s3 + $0x1d4] ss:$8 sps:$4 sm:$0xff]  }
 0x219   :  { %1435 = vmatmul.mubr.bf16.vlgmr.msra.gmra.mxu0 %v1227_v3  ;;  %v1648_v3 = vld [vmem:[#allocation4] sm:$0xfc]  ;;  %v14844_v0 = vld [vmem:[%s18595_s3 + $0xb4] ss:$8 sps:$4 sm:$0xff]   ;;  %v14849_v47 = vld [vmem:[%s18595_s3 + $0x1d0] ss:$8 sps:$4 sm:$0xff]  }
 0x21a   :  { %1861 = vmatpush1.bf16.msra.mxu0 %v14142_v48  ;;  %1892 = vmatprep.mubr.bf16.mxu0 %v1697_v35  ;;  %v1652_v48 = vpack.c.bf16 %v14531_v53, %v1648_v3  ;;  %v14735_v53 = vld [vmem:[%s18595_s3 + $0x4] ss:$8 sps:$4 sm:$0xff]   ;;  %v14830_v26 = vld [vmem:[%s18595_s3 + $0xc0] ss:$8 sps:$4 sm:$0xff]   ;;  %18818 = vst [vmem:[#allocation32_spill] sm:$0xff] %v14844_v0 }
 0x21b   :  { %1862 = vmatprep.subr.bf16.mxu0 %v14151_v55  ;;  %v1693_v55 = vrot.slane %v1654_v7, 1  ;;  %18808 = vst [vmem:[#allocation22_spill] sm:$0xff] %v14735_v53  ;;  %18817 = vst [vmem:[#allocation31_spill] sm:$0xff] %v14830_v26  ;;  %v14854_v4 = vld [vmem:[%s18595_s3 + $0xb0] ss:$8 sps:$4 sm:$0xff]  }
 0x21c   :  { %18819 = vst [vmem:[#allocation33_spill] sm:$0xff] %v14854_v4  ;;  %v14863_v20 = vld [vmem:[%s18595_s3 + $0x1c4] ss:$8 sps:$4 sm:$0xff]   ;;  %v14873_v35 = vld [vmem:[%s18595_s3 + $0x1c0] ss:$8 sps:$4 sm:$0xff]  }
 0x21d   :  { %v14868_v11 = vld [vmem:[%s18595_s3 + $0xa4] ss:$8 sps:$4 sm:$0xff]   ;;  %v14878_v24 = vld [vmem:[%s18595_s3 + $0xa0] ss:$8 sps:$4 sm:$0xff]   ;;  %v14887_v3 = vld [vmem:[%s18595_s3 + $0x1b4] ss:$8 sps:$4 sm:$0xff]  }
 0x21e   :  { %1863 = vmatpush1.bf16.msra.mxu0 %v14162_v60  ;;  %v1692_v60 = vrot.slane %v1652_v48, 1  ;;  %18820 = vst [vmem:[#allocation34_spill] sm:$0xff] %v14868_v11  ;;  %18821 = vst [vmem:[#allocation35_spill] sm:$0xff] %v14878_v24  ;;  %v14892_v7 = vld [vmem:[%s18595_s3 + $0x94] ss:$8 sps:$4 sm:$0xff]  }
 0x21f   :  { %1864 = vmatprep.subr.bf16.mxu0 %v14168_v62  ;;  %18822 = vst [vmem:[#allocation36_spill] sm:$0xff] %v14892_v7  ;;  %v14897_v48 = vld [vmem:[%s18595_s3 + $0x1b0] ss:$8 sps:$4 sm:$0xff]  }
 0x220   :  { %v1694_v62 = vsel %vm877_vm11, %v1692_v60, %v1693_v55  ;;  %v14902_v55 = vld [vmem:[%s18595_s3 + $0x90] ss:$8 sps:$4 sm:$0xff]   ;;  %v14911_v60 = vld [vmem:[%s18595_s3 + $0x1a0] ss:$8 sps:$4 sm:$0xff]  }
 0x221   :  { %18823 = vst [vmem:[#allocation37_spill] sm:$0xff] %v14902_v55 }
 0x222   :  { %1865 = vmatpush1.bf16.msra.mxu0 %v14180_v2  ;;  %v14575_v2 = vld [vmem:[%s18595_s3 + $0x70] ss:$8 sps:$4 sm:$0xff]  }
 0x223   :  { %1866 = vmatprep.subr.bf16.mxu0 %v14189_v5  ;;  %v14580_v5 = vld [vmem:[%s18595_s3 + $0x74] ss:$8 sps:$4 sm:$0xff]  }
 0x226   :  { %1867 = vmatpush1.bf16.msra.mxu0 %v14198_v10  ;;  %v14585_v10 = vld [vmem:[%s18595_s3 + $0x64] ss:$8 sps:$4 sm:$0xff]  }
 0x227   :  { %1868 = vmatprep.subr.bf16.mxu0 %v14207_v12  ;;  %v14590_v12 = vld [vmem:[%s18595_s3 + $0x170] ss:$8 sps:$4 sm:$0xff]  }
 0x22a   :  { %1869 = vmatpush1.bf16.msra.mxu0 %v14216_v14  ;;  %v14595_v14 = vld [vmem:[%s18595_s3 + $0x174] ss:$8 sps:$4 sm:$0xff]  }
 0x22b   :  { %1870 = vmatprep.subr.bf16.mxu0 %v14225_v16  ;;  %v14602_v16 = vld [vmem:[%s18595_s3 + $0x60] ss:$8 sps:$4 sm:$0xff]   ;;  %2209 = vmatprep.subr.bf16.mxu1 %v14595_v14 }
 0x22c   :  { %2210 = vmatpush1.bf16.msra.mxu1 %v14590_v12 }
 0x22e   :  { %1871 = vmatpush1.bf16.msra.mxu0 %v14234_v18  ;;  %v14608_v18 = vld [vmem:[%s18595_s3 + $0x164] ss:$8 sps:$4 sm:$0xff]  }
 0x22f   :  { %1872 = vmatprep.subr.bf16.mxu0 %v14243_v21  ;;  %v14615_v21 = vld [vmem:[%s18595_s3 + $0x54] ss:$8 sps:$4 sm:$0xff]   ;;  %2211 = vmatprep.subr.bf16.mxu1 %v14608_v18 }
 0x230   :  { %18798 = vst [vmem:[#allocation12_spill] sm:$0xff] %v14615_v21 }
 0x232   :  { %1873 = vmatpush1.bf16.msra.mxu0 %v14252_v25  ;;  %v14620_v25 = vld [vmem:[%s18595_s3 + $0x160] ss:$8 sps:$4 sm:$0xff]  }
 0x233   :  { %1874 = vmatprep.subr.bf16.mxu0 %v14261_v28  ;;  %v14626_v28 = vld [vmem:[%s18595_s3 + $0x154] ss:$8 sps:$4 sm:$0xff]   ;;  %2212 = vmatpush1.bf16.msra.mxu1 %v14620_v25 }
 0x234   :  { %2213 = vmatprep.subr.bf16.mxu1 %v14626_v28 }
 0x236   :  { %1875 = vmatpush1.bf16.msra.mxu0 %v14270_v30  ;;  %v14632_v30 = vld [vmem:[%s18595_s3 + $0x50] ss:$8 sps:$4 sm:$0xff]  }
 0x237   :  { %1876 = vmatprep.subr.bf16.mxu0 %v14279_v33  ;;  %18799 = vst [vmem:[#allocation13_spill] sm:$0xff] %v14632_v30  ;;  %v14639_v33 = vld [vmem:[%s18595_s3 + $0x44] ss:$8 sps:$4 sm:$0xff]  }
 0x238   :  { %18800 = vst [vmem:[#allocation14_spill] sm:$0xff] %v14639_v33 }
 0x23a   :  { %1877 = vmatpush2.bf16.msra.mxu0 %v14288_v36  ;;  %v14644_v36 = vld [vmem:[%s18595_s3 + $0x150] ss:$8 sps:$4 sm:$0xff]  }
 0x23b   :  { %1878 = vmatprep.subr.bf16.mxu0 %v14297_v38  ;;  %v14650_v38 = vld [vmem:[%s18595_s3 + $0x144] ss:$8 sps:$4 sm:$0xff]   ;;  %2214 = vmatpush1.bf16.msra.mxu1 %v14644_v36 }
 0x23c   :  { %2215 = vmatprep.subr.bf16.mxu1 %v14650_v38 }
 0x23e   :  { %1879 = vmatpush2.bf16.msra.mxu0 %v14306_v40  ;;  %v14656_v40 = vld [vmem:[%s18595_s3 + $0x40] ss:$8 sps:$4 sm:$0xff]  }
 0x23f   :  { %1880 = vmatprep.subr.bf16.mxu0 %v14315_v42  ;;  %18801 = vst [vmem:[#allocation15_spill] sm:$0xff] %v14656_v40  ;;  %v14663_v42 = vld [vmem:[%s18595_s3 + $0x34] ss:$8 sps:$4 sm:$0xff]  }
 0x240   :  { %18802 = vst [vmem:[#allocation16_spill] sm:$0xff] %v14663_v42 }
 0x242   :  { %1881 = vmatpush2.bf16.msra.mxu0 %v14324_v44  ;;  %v14668_v44 = vld [vmem:[%s18595_s3 + $0x140] ss:$8 sps:$4 sm:$0xff]  }
 0x243   :  { %1882 = vmatprep.subr.bf16.mxu0 %v14333_v46  ;;  %v14674_v46 = vld [vmem:[%s18595_s3 + $0x134] ss:$8 sps:$4 sm:$0xff]   ;;  %2216 = vmatpush1.bf16.msra.mxu1 %v14668_v44 }
 0x244   :  { %2217 = vmatprep.subr.bf16.mxu1 %v14674_v46 }
 0x246   :  { %1883 = vmatpush2.bf16.msra.mxu0 %v14342_v50  ;;  %v14680_v50 = vld [vmem:[%s18595_s3 + $0x30] ss:$8 sps:$4 sm:$0xff]  }
 0x247   :  { %1884 = vmatprep.subr.bf16.mxu0 %v14351_v52  ;;  %18803 = vst [vmem:[#allocation17_spill] sm:$0xff] %v14680_v50  ;;  %v14687_v52 = vld [vmem:[%s18595_s3 + $0x24] ss:$8 sps:$4 sm:$0xff]  }
 0x248   :  { %18804 = vst [vmem:[#allocation18_spill] sm:$0xff] %v14687_v52 }
 0x24a   :  { %1885 = vmatpush2.bf16.msra.mxu0 %v14360_v56  ;;  %v14692_v56 = vld [vmem:[%s18595_s3 + $0x130] ss:$8 sps:$4 sm:$0xff]  }
 0x24b   :  { %1886 = vmatprep.subr.bf16.mxu0 %v14369_v59  ;;  %v14698_v59 = vld [vmem:[%s18595_s3 + $0x124] ss:$8 sps:$4 sm:$0xff]   ;;  %2218 = vmatpush1.bf16.msra.mxu1 %v14692_v56 }
 0x24c   :  { %2219 = vmatprep.subr.bf16.mxu1 %v14698_v59 }
 0x24e   :  { %1887 = vmatpush2.bf16.msra.mxu0 %v14378_v1  ;;  %v14704_v1 = vld [vmem:[%s18595_s3 + $0x20] ss:$8 sps:$4 sm:$0xff]  }
 0x24f   :  { %1888 = vmatprep.subr.bf16.mxu0 %v14387_v8  ;;  %18805 = vst [vmem:[#allocation19_spill] sm:$0xff] %v14704_v1  ;;  %v14711_v8 = vld [vmem:[%s18595_s3 + $0x14] ss:$8 sps:$4 sm:$0xff]  }
 0x250   :  { %18806 = vst [vmem:[#allocation20_spill] sm:$0xff] %v14711_v8 }
 0x252   :  { %1889 = vmatpush2.bf16.msra.mxu0 %v14396_v15  ;;  %v14716_v15 = vld [vmem:[%s18595_s3 + $0x120] ss:$8 sps:$4 sm:$0xff]  }
 0x253   :  { %1890 = vmatprep.subr.bf16.mxu0 %v14403_v17  ;;  %v14722_v17 = vld [vmem:[%s18595_s3 + $0x114] ss:$8 sps:$4 sm:$0xff]   ;;  %2220 = vmatpush1.bf16.msra.mxu1 %v14716_v15 }
 0x254   :  { %2221 = vmatprep.subr.bf16.mxu1 %v14722_v17 }
 0x256   :  { %1891 = vmatpush2.bf16.msra.mxu0 %v14409_v27  ;;  %v14728_v27 = vld [vmem:[%s18595_s3 + $0x10] ss:$8 sps:$4 sm:$0xff]  }
 0x257   :  { %2412 = vmatprep.subr.bf16.mxu0 %v14580_v5  ;;  %18807 = vst [vmem:[#allocation21_spill] sm:$0xff] %v14728_v27  ;;  %2222 = vmatpush1.bf16.msra.mxu1 %v14740_v51 }
 0x258   :  { %2223 = vmatprep.subr.bf16.mxu1 %v14767_v13 }
 0x259   :  { %1893 = vmatmul.mubr.bf16.vlgmr.msra.gmra.mxu0 %v1694_v62  ;;  %v14916_v62 = vld [vmem:[%s18595_s3 + $0x1a4] ss:$8 sps:$4 sm:$0xff]  }
 0x25a   :  { %2413 = vmatpush1.bf16.msra.mxu0 %v14575_v2 }
 0x25b   :  { %2414 = vmatprep.subr.bf16.mxu0 %v14585_v10  ;;  %2224 = vmatpush1.bf16.msra.mxu1 %v14777_v23 }
 0x25c   :  { %2225 = vmatprep.subr.bf16.mxu1 %v14791_v37 }
 0x25e   :  { %2415 = vmatpush1.bf16.msra.mxu0 %v14602_v16 }
 0x25f   :  { %2416 = vmatprep.subr.bf16.mxu0 %v14615_v21  ;;  %2226 = vmatpush2.bf16.msra.mxu1 %v14801_v9 }
 0x260   :  { %2227 = vmatprep.subr.bf16.mxu1 %v14815_v39 }
 0x262   :  { %2417 = vmatpush1.bf16.msra.mxu0 %v14632_v30 }
 0x263   :  { %2418 = vmatprep.subr.bf16.mxu0 %v14639_v33  ;;  %2228 = vmatpush2.bf16.msra.mxu1 %v14825_v6 }
 0x264   :  { %2229 = vmatprep.subr.bf16.mxu1 %v14839_v58 }
 0x266   :  { %2419 = vmatpush1.bf16.msra.mxu0 %v14656_v40 }
 0x267   :  { %2420 = vmatprep.subr.bf16.mxu0 %v14663_v42  ;;  %2230 = vmatpush2.bf16.msra.mxu1 %v14849_v47 }
 0x268   :  { %2231 = vmatprep.subr.bf16.mxu1 %v14863_v20 }
 0x26a   :  { %2421 = vmatpush1.bf16.msra.mxu0 %v14680_v50 }
 0x26b   :  { %2422 = vmatprep.subr.bf16.mxu0 %v14687_v52  ;;  %2232 = vmatpush2.bf16.msra.mxu1 %v14873_v35 }
 0x26c   :  { %2233 = vmatprep.subr.bf16.mxu1 %v14887_v3 }
 0x26e   :  { %2423 = vmatpush1.bf16.msra.mxu0 %v14704_v1 }
 0x26f   :  { %2424 = vmatprep.subr.bf16.mxu0 %v14711_v8  ;;  %2234 = vmatpush2.bf16.msra.mxu1 %v14897_v48 }
 0x270   :  { %2235 = vmatprep.subr.bf16.mxu1 %v14916_v62 }
 0x272   :  { %2425 = vmatpush1.bf16.msra.mxu0 %v14728_v27 }
 0x273   :  { %2426 = vmatprep.subr.bf16.mxu0 %v14735_v53  ;;  %2236 = vmatpush2.bf16.msra.mxu1 %v14911_v60 }
 0x276   :  { %2427 = vmatpush1.bf16.msra.mxu0 %v14747_v54 }
 0x277   :  { %2428 = vmatprep.subr.bf16.mxu0 %v14754_v32 }
 0x27a   :  { %2429 = vmatpush2.bf16.msra.mxu0 %v14760_v19 }
 0x27b   :  { %2430 = vmatprep.subr.bf16.mxu0 %v14772_v29 }
 0x27e   :  { %2431 = vmatpush2.bf16.msra.mxu0 %v14782_v22 }
 0x27f   :  { %2432 = vmatprep.subr.bf16.mxu0 %v14796_v31 }
 0x282   :  { %2433 = vmatpush2.bf16.msra.mxu0 %v14806_v43 }
 0x283   :  { %2434 = vmatprep.subr.bf16.mxu0 %v14820_v45 }
 0x286   :  { %2435 = vmatpush2.bf16.msra.mxu0 %v14830_v26 }
 0x287   :  { %2436 = vmatprep.subr.bf16.mxu0 %v14844_v0 }
 0x28a   :  { %2437 = vmatpush2.bf16.msra.mxu0 %v14854_v4  ;;  %v14947_v4 = vld [vmem:[%s18595_s3 + $0x184] ss:$8 sps:$4 sm:$0xff]  }
 0x28b   :  { %2438 = vmatprep.subr.bf16.mxu0 %v14868_v11  ;;  %v14940_v11 = vld [vmem:[%s18595_s3 + $0x190] ss:$8 sps:$4 sm:$0xff]  }
 0x28e   :  { %2439 = vmatpush2.bf16.msra.mxu0 %v14878_v24  ;;  %v14921_v24 = vld [vmem:[%s18595_s3 + $0x80] ss:$8 sps:$4 sm:$0xff]  }
 0x28f   :  { %2440 = vmatprep.subr.bf16.mxu0 %v14892_v7  ;;  %18824 = vst [vmem:[#allocation38_spill] sm:$0xff] %v14921_v24  ;;  %v14926_v7 = vld [vmem:[%s18595_s3 + $0x84] ss:$8 sps:$4 sm:$0xff]  }
 0x290   :  { %18825 = vst [vmem:[#allocation39_spill] sm:$0xff] %v14926_v7 }
 0x292   :  { %2441 = vmatpush2.bf16.msra.mxu0 %v14902_v55  ;;  %v14931_v55 = vld [vmem:[%s18595_s3 + $0x194] ss:$8 sps:$4 sm:$0xff]  }
 0x293   :  { %2442 = vmatprep.subr.bf16.mxu0 %v14926_v7  ;;  %2237 = vmatprep.subr.bf16.mxu1 %v14931_v55 }
 0x294   :  { %2238 = vmatpush2.bf16.msra.mxu1 %v14940_v11 }
 0x295   :  { %2239 = vmatprep.subr.bf16.mxu1 %v14947_v4 }
 0x296   :  { %2443 = vmatpush2.bf16.msra.mxu0 %v14921_v24  ;;  %v14953_v24 = vld [vmem:[%s18595_s3 + $0x180] ss:$8 sps:$4 sm:$0xff]  }
 0x297   :  { %3012 = vmatprep.subr.bf16.mxu0 %v14595_v14  ;;  %v14960_v14 = vld [vmem:[%s18595_s3 + $0x274] ss:$8 sps:$4 sm:$0xff]  }
 0x298   :  { %2240 = vmatpush2.bf16.msra.mxu1 %v14953_v24 }
 0x299   :  { %2667 = vmatprep.subr.bf16.mxu1 %v14960_v14 }
 0x2d0   :  { %v1639_v26 = vpop.f32.mrf.mxu1 }
 0x2d2   :  { %v1641_v43 = vpop.f32.mrf.mxu1 }
 0x2d4   :  { %v1643_v29 = vpop.f32.mrf.mxu1 }
 0x2d6   :  { %v1645_v52 = vpop.f32.mrf.mxu1 }
 0x2d9   :  { %v1436_v7 = vpop.f32.mrf.mxu0 }
 0x2da   :  { %v1640_v22 = vadd.f32 %v1639_v26, %v1436_v7 }
 0x2db   :  { %v1438_v0 = vpop.f32.mrf.mxu0 }
 0x2dc   :  { %v1642_v32 = vadd.f32 %v1641_v43, %v1438_v0 }
 0x2dd   :  { %v1440_v45 = vpop.f32.mrf.mxu0 }
 0x2de   :  { %v1644_v27 = vadd.f32 %v1643_v29, %v1440_v45 }
 0x2df   :  { %v1442_v31 = vpop.f32.mrf.mxu0 }
 0x2e0   :  { %v1646_v42 = vadd.f32 %v1645_v52, %v1442_v31 }
 0x319   :  { %v1894_v19 = vpop.f32.mrf.mxu0 }
 0x31a   :  { %v1903_v54 = vadd.f32 %v1894_v19, %v1640_v22 }
 0x31b   :  { %v1896_v53 = vpop.f32.mrf.mxu0 }
 0x31c   :  { %v1907_v8 = vadd.f32 %v1903_v54, %v14516_v34  ;;  %v1904_v1 = vadd.f32 %v1896_v53, %v1642_v32 }
 0x31d   :  { %v1898_v50 = vpop.f32.mrf.mxu0 }
 0x31e   :  { %v1911_v40 = vmul.f32 %v14101_v49, %v1907_v8  ;;  %v1908_v33 = vadd.f32 %v1904_v1, %v14520_v41  ;;  %v1905_v30 = vadd.f32 %v1898_v50, %v1644_v27 }
 0x31f   :  { %v1900_v21 = vpop.f32.mrf.mxu0 }
 0x320   :  { %v14967_v26 = vadd.f32 %v1911_v40, %v14104_v57  ;;  %v1912_v43 = vmul.f32 %v14101_v49, %v1908_v33  ;;  %v1909_v19 = vadd.f32 %v1905_v30, %v14516_v34  ;;  %v1906_v29 = vadd.f32 %v1900_v21, %v1646_v42  ;;  %v18827_v40 = vld [vmem:[#allocation10_spill] sm:$0xff]  ;;  %v18829_v33 = vld [vmem:[#allocation11_spill] sm:$0xff] }
 0x322   :  { %v18646_v54 = vmax.f32 %v14967_v26, 0.0  ;;  %v14973_v53 = vadd.f32 %v1912_v43, %v14113_v63  ;;  %v1913_v52 = vmul.f32 %v14109_v61, %v1909_v19  ;;  %v1910_v8 = vadd.f32 %v1906_v29, %v14520_v41 }
 0x324   :  { %18826 = vst [vmem:[#allocation40_spill] sm:$0xff] %v14973_v53  ;;  %v1927_v50 = vrot.slane %v18646_v54, 7  ;;  %v18645_v57 = vmax.f32 %v14973_v53, 0.0  ;;  %v14981_v1 = vadd.f32 %v1913_v52, %v18827_v40  ;;  %v1914_v30 = vmul.f32 %v14109_v61, %v1910_v8 }
 0x326   :  { %18828 = vst [vmem:[#allocation10_spill] sm:$0xff] %v14981_v1  ;;  %1939 = vst [vmem:[#allocation3] sm:$0xfe] %v1927_v50  ;;  %v1928_v21 = vrot.slane %v18645_v57, 7  ;;  %v18644_v63 = vmax.f32 %v14981_v1, 0.0  ;;  %v14988_v42 = vadd.f32 %v1914_v30, %v18829_v33 }
 0x328   :  { %18830 = vst [vmem:[#allocation11_spill] sm:$0xff] %v14988_v42  ;;  %1940 = vst [vmem:[#allocation3 + $0x8] sm:$0xfe] %v1928_v21  ;;  %v1929_v27 = vrot.slane %v18644_v63, 7  ;;  %v18643_v32 = vmax.f32 %v14988_v42, 0.0 }
 0x32a   :  { %1943 = vst [vmem:[#allocation3 + $0x20] sm:$0x1] %v1929_v27  ;;  %v1931_v22 = vrot.slane %v18643_v32, 7  ;;  %v14996_v31 = vsel %vm301_vm9, %v1927_v50, %v1929_v27 }
 0x32c   :  { %1944 = vst [vmem:[#allocation3 + $0x28] sm:$0x1] %v1931_v22  ;;  %v1932_v43 = vsel %vm301_vm9, %v1928_v21, %v1931_v22 }
 0x32d   :  { %v1983_v45 = vld [vmem:[#allocation3] sm:$0xfe] }
 0x32e   :  { %v1945_v0 = vld [vmem:[#allocation3] sm:$0xff]  ;;  %v1987_v7 = vpack.c.bf16 %v14996_v31, %v1983_v45 }
 0x32f   :  { %v1946_v19 = vld [vmem:[#allocation3 + $0x8] sm:$0xff]  ;;  %v1949_v40 = vpack.c.bf16 %v14996_v31, %v1945_v0 }
 0x330   :  { %v1984_v29 = vld [vmem:[#allocation3 + $0x8] sm:$0xfe]  ;;  %v1950_v52 = vpack.c.bf16 %v1932_v43, %v1946_v19  ;;  %v2026_v33 = vshll.u32 %v1987_v7, 16  ;;  %v2024_v1 = vshrl.u32 %v1987_v7, 16 }
 0x331   :  { %v1988_v8 = vpack.c.bf16 %v1932_v43, %v1984_v29  ;;  %v1985_v30 = vld [vmem:[#allocation3 + $0x20] sm:$0x1]  ;;  %v2456_v27 = vld [vmem:[#allocation3 + $0x8] sm:$0xfc] }
 0x332   :  { %2444 = vmatprep.mubr.bf16.mxu0 %v1950_v52  ;;  %v1989_v63 = vpack.c.bf16 %v1985_v30, %v1985_v30  ;;  %v2028_v21 = vrot.slane %v2026_v33, 1  ;;  %v2460_v29 = vpack.c.bf16 %v1932_v43, %v2456_v27  ;;  %v18833_v27 = vld [vmem:[#allocation14_spill] sm:$0xff] }
 0x333   :  { %v2038_v32 = vshll.u32 %v1988_v8, 16  ;;  %2445 = vmatmul.mubr.bf16.vlgmr.msra.gmra.mxu0 %v1949_v40  ;;  %v1986_v50 = vld [vmem:[#allocation3 + $0x28] sm:$0x1]  ;;  %v2036_v19 = vshrl.u32 %v1988_v8, 16 }
 0x334   :  { %v2458_v57 = vld [vmem:[#allocation3 + $0x28] sm:$0x3]  ;;  %v1990_v54 = vpack.c.bf16 %v1986_v50, %v1986_v50  ;;  %v2031_v45 = vshll.u32 %v1989_v63, 16  ;;  %3013 = vmatpush1.bf16.msra.mxu0 %v14590_v12  ;;  %v15007_v63 = vld [vmem:[%s18595_s3 + $0x270] ss:$8 sps:$4 sm:$0xff]   ;;  %v2029_v12 = vor.u32 %v2028_v21, %v2024_v1 }
 0x335   :  { %v2040_v42 = vrot.slane %v2038_v32, 1  ;;  %v2462_v22 = vpack.c.bf16 %v2458_v57, %v2458_v57  ;;  %3014 = vmatprep.subr.bf16.mxu0 %v14608_v18  ;;  %v2502_v57 = vrot.slane %v2460_v29, 1  ;;  %v15044_v1 = vld [vmem:[%s18595_s3 + $0x244] ss:$8 sps:$4 sm:$0xff]   ;;  %v2455_v32 = vld [vmem:[#allocation3] sm:$0xfc] }
 0x336   :  { %v2043_v0 = vshll.u32 %v1990_v54, 16  ;;  %v2033_v52 = vrot.slane %v2031_v45, 1  ;;  %v15014_v54 = vld [vmem:[%s18595_s3 + $0x264] ss:$8 sps:$4 sm:$0xff]   ;;  %v2459_v43 = vpack.c.bf16 %v14996_v31, %v2455_v32  ;;  %v18831_v50 = vld [vmem:[#allocation12_spill] sm:$0xff]  ;;  %v18834_v45 = vld [vmem:[#allocation15_spill] sm:$0xff] }
 0x337   :  { %v2041_v53 = vor.u32 %v2040_v42, %v2036_v19  ;;  %v2503_v40 = vrot.slane %v2462_v22, 1  ;;  %v18832_v31 = vld [vmem:[#allocation13_spill] sm:$0xff]  ;;  %v18835_v21 = vld [vmem:[#allocation16_spill] sm:$0xff]  ;;  %v18837_v22 = vld [vmem:[#allocation18_spill] sm:$0xff] }
 0x338   :  { %v2045_v30 = vrot.slane %v2043_v0, 1  ;;  %3015 = vmatpush1.bf16.msra.mxu0 %v14620_v25  ;;  %v2034_v42 = vsel %vm399_vm10, %v2029_v12, %v2033_v52  ;;  %v2499_v8 = vrot.slane %v2459_v43, 1  ;;  %v18838_v19 = vld [vmem:[#allocation19_spill] sm:$0xff]  ;;  %v18843_v29 = vld [vmem:[#allocation24_spill] sm:$0xff]  ;;  %v18844_v52 = vld [vmem:[#allocation25_spill] sm:$0xff] }
 0x339   :  { %3016 = vmatprep.subr.bf16.mxu0 %v14626_v28  ;;  %v2504_v25 = vsel %vm877_vm11, %v2502_v57, %v2503_v40  ;;  %v15023_v28 = vld [vmem:[%s18595_s3 + $0x260] ss:$8 sps:$4 sm:$0xff]   ;;  %v18842_v0 = vld [vmem:[#allocation23_spill] sm:$0xff] }
 0x33a   :  { %v2046_v18 = vsel %vm399_vm10, %v2041_v53, %v2045_v30  ;;  %v15029_v53 = vld [vmem:[%s18595_s3 + $0x254] ss:$8 sps:$4 sm:$0xff]   ;;  %v18845_v30 = vld [vmem:[#allocation26_spill] sm:$0xff] }
 0x33b   :  { %2241 = vmatprep.mubr.bf16.mxu1 %v2046_v18  ;;  %v18846_v40 = vld [vmem:[#allocation27_spill] sm:$0xff]  ;;  %v18847_v12 = vld [vmem:[#allocation28_spill] sm:$0xff]  ;;  %v18848_v18 = vld [vmem:[#allocation29_spill] sm:$0xff] }
 0x33c   :  { %2242 = vmatmul.mubr.bf16.vlgmr.msra.gmra.mxu1 %v2034_v42  ;;  %3017 = vmatpush1.bf16.msra.mxu0 %v14644_v36  ;;  %v15037_v36 = vld [vmem:[%s18595_s3 + $0x250] ss:$8 sps:$4 sm:$0xff]  }
 0x33d   :  { %2668 = vmatpush1.bf16.msra.mxu1 %v15007_v63  ;;  %2699 = vmatprep.mubr.bf16.mxu1 %v2504_v25  ;;  %v18849_v57 = vld [vmem:[#allocation30_spill] sm:$0xff]  ;;  %v18850_v42 = vld [vmem:[#allocation31_spill] sm:$0xff]  ;;  %v18851_v25 = vld [vmem:[#allocation32_spill] sm:$0xff] }
 0x33e   :  { %2669 = vmatprep.subr.bf16.mxu1 %v15014_v54  ;;  %3018 = vmatprep.subr.bf16.mxu0 %v14650_v38  ;;  %v15051_v38 = vld [vmem:[%s18595_s3 + $0x240] ss:$8 sps:$4 sm:$0xff]  }
 0x33f   :  { %v18853_v32 = vld [vmem:[#allocation34_spill] sm:$0xff]  ;;  %v18855_v43 = vld [vmem:[#allocation36_spill] sm:$0xff] }
 0x340   :  { %3019 = vmatpush1.bf16.msra.mxu0 %v14668_v44  ;;  %v15058_v44 = vld [vmem:[%s18595_s3 + $0x234] ss:$8 sps:$4 sm:$0xff]  }
 0x341   :  { %2670 = vmatpush1.bf16.msra.mxu1 %v15023_v28  ;;  %3020 = vmatprep.subr.bf16.mxu0 %v14674_v46  ;;  %v15065_v46 = vld [vmem:[%s18595_s3 + $0x230] ss:$8 sps:$4 sm:$0xff]  }
 0x342   :  { %2671 = vmatprep.subr.bf16.mxu1 %v15029_v53 }
 0x344   :  { %3021 = vmatpush1.bf16.msra.mxu0 %v14692_v56  ;;  %v15072_v56 = vld [vmem:[%s18595_s3 + $0x224] ss:$8 sps:$4 sm:$0xff]  }
 0x345   :  { %2672 = vmatpush1.bf16.msra.mxu1 %v15037_v36  ;;  %3022 = vmatprep.subr.bf16.mxu0 %v14698_v59  ;;  %v15079_v59 = vld [vmem:[%s18595_s3 + $0x220] ss:$8 sps:$4 sm:$0xff]  }
 0x346   :  { %2673 = vmatprep.subr.bf16.mxu1 %v15044_v1 }
 0x348   :  { %3023 = vmatpush1.bf16.msra.mxu0 %v14716_v15  ;;  %v15086_v15 = vld [vmem:[%s18595_s3 + $0x214] ss:$8 sps:$4 sm:$0xff]  }
 0x349   :  { %2674 = vmatpush1.bf16.msra.mxu1 %v15051_v38  ;;  %3024 = vmatprep.subr.bf16.mxu0 %v14722_v17  ;;  %v15093_v17 = vld [vmem:[%s18595_s3 + $0x210] ss:$8 sps:$4 sm:$0xff]  }
 0x34a   :  { %2675 = vmatprep.subr.bf16.mxu1 %v15058_v44 }
 0x34c   :  { %3025 = vmatpush1.bf16.msra.mxu0 %v14740_v51  ;;  %v15100_v51 = vld [vmem:[%s18595_s3 + $0x204] ss:$8 sps:$4 sm:$0xff]  }
 0x34d   :  { %2676 = vmatpush1.bf16.msra.mxu1 %v15065_v46  ;;  %3026 = vmatprep.subr.bf16.mxu0 %v14767_v13  ;;  %v15107_v13 = vld [vmem:[%s18595_s3 + $0x200] ss:$8 sps:$4 sm:$0xff]  }
 0x34e   :  { %2677 = vmatprep.subr.bf16.mxu1 %v15072_v56 }
 0x350   :  { %3027 = vmatpush1.bf16.msra.mxu0 %v14777_v23  ;;  %v15114_v23 = vld [vmem:[%s18595_s3 + $0x2f4] ss:$8 sps:$4 sm:$0xff]  }
 0x351   :  { %2678 = vmatpush1.bf16.msra.mxu1 %v15079_v59  ;;  %3028 = vmatprep.subr.bf16.mxu0 %v14791_v37  ;;  %v15121_v37 = vld [vmem:[%s18595_s3 + $0x2f0] ss:$8 sps:$4 sm:$0xff]  }
 0x352   :  { %2679 = vmatprep.subr.bf16.mxu1 %v15086_v15 }
 0x354   :  { %3029 = vmatpush2.bf16.msra.mxu0 %v14801_v9  ;;  %v15128_v9 = vld [vmem:[%s18595_s3 + $0x2e4] ss:$8 sps:$4 sm:$0xff]  }
 0x355   :  { %2680 = vmatpush1.bf16.msra.mxu1 %v15093_v17  ;;  %3030 = vmatprep.subr.bf16.mxu0 %v14815_v39  ;;  %v15135_v39 = vld [vmem:[%s18595_s3 + $0x2e0] ss:$8 sps:$4 sm:$0xff]  }
 0x356   :  { %2681 = vmatprep.subr.bf16.mxu1 %v15100_v51 }
 0x358   :  { %3031 = vmatpush2.bf16.msra.mxu0 %v14825_v6  ;;  %v15142_v6 = vld [vmem:[%s18595_s3 + $0x2d4] ss:$8 sps:$4 sm:$0xff]  }
 0x359   :  { %2682 = vmatpush1.bf16.msra.mxu1 %v15107_v13  ;;  %3032 = vmatprep.subr.bf16.mxu0 %v14839_v58  ;;  %v15149_v58 = vld [vmem:[%s18595_s3 + $0x2d0] ss:$8 sps:$4 sm:$0xff]  }
 0x35a   :  { %2683 = vmatprep.subr.bf16.mxu1 %v15114_v23 }
 0x35c   :  { %3033 = vmatpush2.bf16.msra.mxu0 %v14849_v47  ;;  %v15156_v47 = vld [vmem:[%s18595_s3 + $0x2c4] ss:$8 sps:$4 sm:$0xff]  }
 0x35d   :  { %2684 = vmatpush2.bf16.msra.mxu1 %v15121_v37  ;;  %3034 = vmatprep.subr.bf16.mxu0 %v14863_v20  ;;  %v15163_v20 = vld [vmem:[%s18595_s3 + $0x2c0] ss:$8 sps:$4 sm:$0xff]  }
 0x35e   :  { %2685 = vmatprep.subr.bf16.mxu1 %v15128_v9 }
 0x360   :  { %3035 = vmatpush2.bf16.msra.mxu0 %v14873_v35  ;;  %v15170_v35 = vld [vmem:[%s18595_s3 + $0x2b4] ss:$8 sps:$4 sm:$0xff]  }
 0x361   :  { %2686 = vmatpush2.bf16.msra.mxu1 %v15135_v39  ;;  %3036 = vmatprep.subr.bf16.mxu0 %v14887_v3  ;;  %v15177_v3 = vld [vmem:[%s18595_s3 + $0x2b0] ss:$8 sps:$4 sm:$0xff]  }
 0x362   :  { %2687 = vmatprep.subr.bf16.mxu1 %v15142_v6 }
 0x364   :  { %3037 = vmatpush2.bf16.msra.mxu0 %v14897_v48  ;;  %v15184_v48 = vld [vmem:[%s18595_s3 + $0x2a4] ss:$8 sps:$4 sm:$0xff]  }
 0x365   :  { %2688 = vmatpush2.bf16.msra.mxu1 %v15149_v58  ;;  %3038 = vmatprep.subr.bf16.mxu0 %v14916_v62  ;;  %v2457_v62 = vld [vmem:[#allocation3 + $0x20] sm:$0x3] }
 0x366   :  { %2689 = vmatprep.subr.bf16.mxu1 %v15156_v47  ;;  %v2461_v7 = vpack.c.bf16 %v2457_v62, %v2457_v62  ;;  %v18852_v62 = vld [vmem:[#allocation33_spill] sm:$0xff] }
 0x368   :  { %3039 = vmatpush2.bf16.msra.mxu0 %v14911_v60  ;;  %v15191_v60 = vld [vmem:[%s18595_s3 + $0x2a0] ss:$8 sps:$4 sm:$0xff]  }
 0x369   :  { %2690 = vmatpush2.bf16.msra.mxu1 %v15163_v20  ;;  %3040 = vmatprep.subr.bf16.mxu0 %v14931_v55  ;;  %v15198_v55 = vld [vmem:[%s18595_s3 + $0x294] ss:$8 sps:$4 sm:$0xff]  }
 0x36a   :  { %2691 = vmatprep.subr.bf16.mxu1 %v15170_v35 }
 0x36c   :  { %3041 = vmatpush2.bf16.msra.mxu0 %v14940_v11  ;;  %v15205_v11 = vld [vmem:[%s18595_s3 + $0x290] ss:$8 sps:$4 sm:$0xff]  }
 0x36d   :  { %2692 = vmatpush2.bf16.msra.mxu1 %v15177_v3  ;;  %3042 = vmatprep.subr.bf16.mxu0 %v14947_v4  ;;  %v15212_v4 = vld [vmem:[%s18595_s3 + $0x284] ss:$8 sps:$4 sm:$0xff]  }
 0x36e   :  { %2693 = vmatprep.subr.bf16.mxu1 %v15184_v48 }
 0x370   :  { %3043 = vmatpush2.bf16.msra.mxu0 %v14953_v24  ;;  %v15218_v24 = vld [vmem:[%s18595_s3 + $0x280] ss:$8 sps:$4 sm:$0xff]  }
 0x371   :  { %2694 = vmatpush2.bf16.msra.mxu1 %v15191_v60  ;;  %3470 = vmatprep.subr.bf16.mxu0 %v14960_v14  ;;  %v2500_v14 = vrot.slane %v2461_v7, 1  ;;  %v18854_v7 = vld [vmem:[#allocation35_spill] sm:$0xff] }
 0x372   :  { %2695 = vmatprep.subr.bf16.mxu1 %v15198_v55 }
 0x373   :  { %v2501_v33 = vsel %vm877_vm11, %v2499_v8, %v2500_v14  ;;  %v18856_v14 = vld [vmem:[#allocation37_spill] sm:$0xff]  ;;  %v18857_v8 = vld [vmem:[#allocation39_spill] sm:$0xff] }
 0x375   :  { %2696 = vmatpush2.bf16.msra.mxu1 %v15205_v11 }
 0x376   :  { %2697 = vmatprep.subr.bf16.mxu1 %v15212_v4 }
 0x379   :  { %2698 = vmatpush2.bf16.msra.mxu1 %v15218_v24 }
 0x37a   :  { %3215 = vmatprep.subr.bf16.mxu1 %v14580_v5  ;;  %v18836_v5 = vld [vmem:[#allocation17_spill] sm:$0xff] }
 0x37c   :  { %2700 = vmatmul.mubr.bf16.vlgmr.msra.gmra.mxu1 %v2501_v33  ;;  %v18858_v33 = vld [vmem:[#allocation38_spill] sm:$0xff] }
 0x37d   :  { %3216 = vmatpush1.bf16.msra.mxu1 %v14575_v2  ;;  %v18839_v2 = vld [vmem:[#allocation20_spill] sm:$0xff] }
 0x37e   :  { %3217 = vmatprep.subr.bf16.mxu1 %v14585_v10  ;;  %v18840_v10 = vld [vmem:[#allocation21_spill] sm:$0xff] }
 0x381   :  { %3218 = vmatpush1.bf16.msra.mxu1 %v14602_v16  ;;  %v18841_v16 = vld [vmem:[#allocation22_spill] sm:$0xff] }
 0x382   :  { %3219 = vmatprep.subr.bf16.mxu1 %v18831_v50 }
 0x385   :  { %3220 = vmatpush1.bf16.msra.mxu1 %v18832_v31 }
 0x386   :  { %3221 = vmatprep.subr.bf16.mxu1 %v18833_v27 }
 0x389   :  { %3222 = vmatpush1.bf16.msra.mxu1 %v18834_v45 }
 0x38a   :  { %3223 = vmatprep.subr.bf16.mxu1 %v18835_v21 }
 0x38d   :  { %3224 = vmatpush1.bf16.msra.mxu1 %v18836_v5 }
 0x38e   :  { %3225 = vmatprep.subr.bf16.mxu1 %v18837_v22 }
 0x391   :  { %3226 = vmatpush1.bf16.msra.mxu1 %v18838_v19 }
 0x392   :  { %3227 = vmatprep.subr.bf16.mxu1 %v18839_v2 }
 0x395   :  { %3228 = vmatpush1.bf16.msra.mxu1 %v18840_v10 }
 0x396   :  { %3229 = vmatprep.subr.bf16.mxu1 %v18841_v16 }
 0x399   :  { %3230 = vmatpush1.bf16.msra.mxu1 %v18842_v0 }
 0x39a   :  { %3231 = vmatprep.subr.bf16.mxu1 %v18843_v29 }
 0x39d   :  { %3232 = vmatpush2.bf16.msra.mxu1 %v18844_v52 }
 0x39e   :  { %3233 = vmatprep.subr.bf16.mxu1 %v18845_v30 }
 0x3a1   :  { %3234 = vmatpush2.bf16.msra.mxu1 %v18846_v40 }
 0x3a2   :  { %3235 = vmatprep.subr.bf16.mxu1 %v18847_v12 }
 0x3a5   :  { %3236 = vmatpush2.bf16.msra.mxu1 %v18848_v18 }
 0x3a6   :  { %3237 = vmatprep.subr.bf16.mxu1 %v18849_v57 }
 0x3a9   :  { %3238 = vmatpush2.bf16.msra.mxu1 %v18850_v42 }
 0x3aa   :  { %3239 = vmatprep.subr.bf16.mxu1 %v18851_v25 }
 0x3ad   :  { %3240 = vmatpush2.bf16.msra.mxu1 %v18852_v62 }
 0x3ae   :  { %3241 = vmatprep.subr.bf16.mxu1 %v18853_v32 }
 0x3b1   :  { %3242 = vmatpush2.bf16.msra.mxu1 %v18854_v7 }
 0x3b2   :  { %3243 = vmatprep.subr.bf16.mxu1 %v18855_v43 }
 0x3b5   :  { %3244 = vmatpush2.bf16.msra.mxu1 %v18856_v14 }
 0x3b6   :  { %3245 = vmatprep.subr.bf16.mxu1 %v18857_v8 }
 0x3b9   :  { %3246 = vmatpush2.bf16.msra.mxu1 %v18858_v33 }
 0x3f3   :  { %v2446_v27 = vpop.f32.mrf.mxu0 }
 0x3f5   :  { %v2448_v21 = vpop.f32.mrf.mxu0 }
 0x3f7   :  { %v2450_v19 = vpop.f32.mrf.mxu0 }
 0x3f9   :  { %v2452_v40 = vpop.f32.mrf.mxu0 }
 0x3fc   :  { %v2243_v50 = vpop.f32.mrf.mxu1 }
 0x3fd   :  { %v2447_v22 = vadd.f32 %v2446_v27, %v2243_v50 }
 0x3fe   :  { %v2245_v31 = vpop.f32.mrf.mxu1 }
 0x3ff   :  { %v2449_v10 = vadd.f32 %v2448_v21, %v2245_v31 }
 0x400   :  { %v2247_v45 = vpop.f32.mrf.mxu1 }
 0x401   :  { %v2451_v29 = vadd.f32 %v2450_v19, %v2247_v45 }
 0x402   :  { %v2249_v5 = vpop.f32.mrf.mxu1 }
 0x403   :  { %v2453_v18 = vadd.f32 %v2452_v40, %v2249_v5 }
 0x43c   :  { %v2701_v2 = vpop.f32.mrf.mxu1 }
 0x43d   :  { %v2710_v16 = vadd.f32 %v2701_v2, %v2447_v22 }
 0x43e   :  { %v2703_v0 = vpop.f32.mrf.mxu1 }
 0x43f   :  { %v2714_v52 = vadd.f32 %v2710_v16, %v14516_v34  ;;  %v2711_v30 = vadd.f32 %v2703_v0, %v2449_v10 }
 0x440   :  { %v2705_v12 = vpop.f32.mrf.mxu1 }
 0x441   :  { %v2718_v57 = vmax.f32 %v2714_v52, 0.0  ;;  %v2715_v42 = vadd.f32 %v2711_v30, %v14520_v41  ;;  %v2712_v25 = vadd.f32 %v2705_v12, %v2451_v29 }
 0x442   :  { %v2707_v62 = vpop.f32.mrf.mxu1 }
 0x443   :  { %v2722_v32 = vmul.f32 %v14101_v49, %v2718_v57  ;;  %v2719_v7 = vmax.f32 %v2715_v42, 0.0  ;;  %v2716_v43 = vadd.f32 %v2712_v25, %v14516_v34  ;;  %v2713_v14 = vadd.f32 %v2707_v62, %v2453_v18 }
 0x445   :  { %v2730_v8 = vrot.slane %v2722_v32, 7  ;;  %v2723_v33 = vmul.f32 %v14101_v49, %v2719_v7  ;;  %v2720_v50 = vmax.f32 %v2716_v43, 0.0  ;;  %v2717_v31 = vadd.f32 %v2713_v14, %v14520_v41 }
 0x447   :  { %2742 = vst [vmem:[#allocation4] sm:$0xfe] %v2730_v8  ;;  %v2731_v27 = vrot.slane %v2723_v33, 7  ;;  %v2724_v45 = vmul.f32 %v14109_v61, %v2720_v50  ;;  %v2721_v21 = vmax.f32 %v2717_v31, 0.0 }
 0x449   :  { %2743 = vst [vmem:[#allocation4 + $0x8] sm:$0xfe] %v2731_v27  ;;  %v2732_v5 = vrot.slane %v2724_v45, 7  ;;  %v2725_v22 = vmul.f32 %v14109_v61, %v2721_v21 }
 0x44b   :  { %2746 = vst [vmem:[#allocation4 + $0x20] sm:$0x1] %v2732_v5  ;;  %v2734_v19 = vrot.slane %v2725_v22, 7  ;;  %v15265_v2 = vsel %vm301_vm9, %v2730_v8, %v2732_v5 }
 0x44d   :  { %2747 = vst [vmem:[#allocation4 + $0x28] sm:$0x1] %v2734_v19  ;;  %v2735_v29 = vsel %vm301_vm9, %v2731_v27, %v2734_v19 }
 0x44e   :  { %v2786_v10 = vld [vmem:[#allocation4] sm:$0xfe] }
 0x44f   :  { %v2748_v16 = vld [vmem:[#allocation4] sm:$0xff]  ;;  %v2790_v0 = vpack.c.bf16 %v15265_v2, %v2786_v10 }
 0x450   :  { %v2749_v52 = vld [vmem:[#allocation4 + $0x8] sm:$0xff]  ;;  %v2752_v18 = vpack.c.bf16 %v15265_v2, %v2748_v16 }
 0x451   :  { %v2787_v30 = vld [vmem:[#allocation4 + $0x8] sm:$0xfe]  ;;  %v2753_v40 = vpack.c.bf16 %v2735_v29, %v2749_v52  ;;  %v2829_v42 = vshll.u32 %v2790_v0, 16  ;;  %v2827_v5 = vshrl.u32 %v2790_v0, 16 }
 0x452   :  { %v2791_v12 = vpack.c.bf16 %v2735_v29, %v2787_v30  ;;  %v2788_v57 = vld [vmem:[#allocation4 + $0x20] sm:$0x1]  ;;  %v3259_v7 = vld [vmem:[#allocation4 + $0x8] sm:$0xfc] }
 0x453   :  { %3247 = vmatprep.mubr.bf16.mxu1 %v2753_v40  ;;  %v2792_v62 = vpack.c.bf16 %v2788_v57, %v2788_v57  ;;  %v2831_v50 = vrot.slane %v2829_v42, 1  ;;  %v3263_v21 = vpack.c.bf16 %v2735_v29, %v3259_v7  ;;  %v15456_v0 = vld [vmem:[%s18595_s3 + $0x114] ss:$8 sps:$4 sm:$0xff]   ;;  %v15462_v29 = vld [vmem:[%s18595_s3 + $0x10] ss:$8 sps:$4 sm:$0xff]  }
 0x454   :  { %v2841_v25 = vshll.u32 %v2791_v12, 16  ;;  %3248 = vmatmul.mubr.bf16.vlgmr.msra.gmra.mxu1 %v2752_v18  ;;  %v2789_v32 = vld [vmem:[#allocation4 + $0x28] sm:$0x1]  ;;  %v2839_v27 = vshrl.u32 %v2791_v12, 16  ;;  %18867 = vst [vmem:[#allocation20_spill] sm:$0xff] %v15462_v29 }
 0x455   :  { %v3261_v43 = vld [vmem:[#allocation4 + $0x28] sm:$0x3]  ;;  %v2793_v14 = vpack.c.bf16 %v2789_v32, %v2789_v32  ;;  %v2834_v33 = vshll.u32 %v2792_v62, 16  ;;  %v2832_v52 = vor.u32 %v2831_v50, %v2827_v5  ;;  %v3305_v40 = vrot.slane %v3263_v21, 1  ;;  %v15469_v12 = vld [vmem:[%s18595_s3 + $0x4] ss:$8 sps:$4 sm:$0xff]  }
 0x456   :  { %v2843_v8 = vrot.slane %v2841_v25, 1  ;;  %v3265_v31 = vpack.c.bf16 %v3261_v43, %v3261_v43  ;;  %18868 = vst [vmem:[#allocation21_spill] sm:$0xff] %v15469_v12  ;;  %v15474_v42 = vld [vmem:[%s18595_s3 + $0x110] ss:$8 sps:$4 sm:$0xff]   ;;  %v15481_v25 = vld [vmem:[%s18595_s3] ss:$8 sps:$4 sm:$0xff]  }
 0x457   :  { %v2846_v45 = vshll.u32 %v2793_v14, 16  ;;  %v2836_v22 = vrot.slane %v2834_v33, 1  ;;  %18869 = vst [vmem:[#allocation22_spill] sm:$0xff] %v15481_v25  ;;  %v15488_v62 = vld [vmem:[%s18595_s3 + $0xf4] ss:$8 sps:$4 sm:$0xff]  }
 0x458   :  { %v2844_v19 = vor.u32 %v2843_v8, %v2839_v27  ;;  %v3306_v16 = vrot.slane %v3265_v31, 1  ;;  %18870 = vst [vmem:[#allocation23_spill] sm:$0xff] %v15488_v62  ;;  %v15494_v32 = vld [vmem:[%s18595_s3 + $0xf0] ss:$8 sps:$4 sm:$0xff]   ;;  %v15501_v7 = vld [vmem:[%s18595_s3 + $0x104] ss:$8 sps:$4 sm:$0xff]  }
 0x459   :  { %v2848_v10 = vrot.slane %v2846_v45, 1  ;;  %v2837_v18 = vsel %vm399_vm10, %v2832_v52, %v2836_v22  ;;  %18871 = vst [vmem:[#allocation24_spill] sm:$0xff] %v15494_v32  ;;  %v15506_v43 = vld [vmem:[%s18595_s3 + $0xe4] ss:$8 sps:$4 sm:$0xff]   ;;  %v15511_v14 = vld [vmem:[%s18595_s3 + $0x100] ss:$8 sps:$4 sm:$0xff]  }
 0x45a   :  { %v3307_v57 = vsel %vm877_vm11, %v3305_v40, %v3306_v16  ;;  %18872 = vst [vmem:[#allocation25_spill] sm:$0xff] %v15506_v43  ;;  %v15516_v8 = vld [vmem:[%s18595_s3 + $0xe0] ss:$8 sps:$4 sm:$0xff]   ;;  %v15525_v33 = vld [vmem:[%s18595_s3 + $0x1f4] ss:$8 sps:$4 sm:$0xff]  }
 0x45b   :  { %v2849_v30 = vsel %vm399_vm10, %v2844_v19, %v2848_v10  ;;  %18873 = vst [vmem:[#allocation26_spill] sm:$0xff] %v15516_v8  ;;  %v15530_v50 = vld [vmem:[%s18595_s3 + $0xd4] ss:$8 sps:$4 sm:$0xff]   ;;  %v15535_v31 = vld [vmem:[%s18595_s3 + $0x1f0] ss:$8 sps:$4 sm:$0xff]  }
 0x45c   :  { %3044 = vmatprep.mubr.bf16.mxu0 %v2849_v30  ;;  %18874 = vst [vmem:[#allocation27_spill] sm:$0xff] %v15530_v50  ;;  %v15540_v27 = vld [vmem:[%s18595_s3 + $0xd0] ss:$8 sps:$4 sm:$0xff]   ;;  %v15549_v45 = vld [vmem:[%s18595_s3 + $0x1e4] ss:$8 sps:$4 sm:$0xff]  }
 0x45d   :  { %3045 = vmatmul.mubr.bf16.vlgmr.msra.gmra.mxu0 %v2837_v18  ;;  %18875 = vst [vmem:[#allocation28_spill] sm:$0xff] %v15540_v27  ;;  %v15554_v21 = vld [vmem:[%s18595_s3 + $0xc4] ss:$8 sps:$4 sm:$0xff]   ;;  %v15559_v5 = vld [vmem:[%s18595_s3 + $0x1e0] ss:$8 sps:$4 sm:$0xff]  }
 0x45e   :  { %3471 = vmatpush1.bf16.msra.mxu0 %v15007_v63  ;;  %3502 = vmatprep.mubr.bf16.mxu0 %v3307_v57  ;;  %v3260_v63 = vld [vmem:[#allocation4 + $0x20] sm:$0x3]  ;;  %18876 = vst [vmem:[#allocation29_spill] sm:$0xff] %v15554_v21  ;;  %v15573_v19 = vld [vmem:[%s18595_s3 + $0x1d4] ss:$8 sps:$4 sm:$0xff]  }
 0x45f   :  { %3472 = vmatprep.subr.bf16.mxu0 %v15014_v54  ;;  %v3258_v54 = vld [vmem:[#allocation4] sm:$0xfc]  ;;  %v15578_v10 = vld [vmem:[%s18595_s3 + $0xb4] ss:$8 sps:$4 sm:$0xff]   ;;  %v15583_v16 = vld [vmem:[%s18595_s3 + $0x1d0] ss:$8 sps:$4 sm:$0xff]  }
 0x460   :  { %v15564_v22 = vld [vmem:[%s18595_s3 + $0xc0] ss:$8 sps:$4 sm:$0xff]   ;;  %18878 = vst [vmem:[#allocation31_spill] sm:$0xff] %v15578_v10  ;;  %v15588_v52 = vld [vmem:[%s18595_s3 + $0xb0] ss:$8 sps:$4 sm:$0xff]  }
 0x461   :  { %18877 = vst [vmem:[#allocation30_spill] sm:$0xff] %v15564_v22  ;;  %18879 = vst [vmem:[#allocation32_spill] sm:$0xff] %v15588_v52  ;;  %v15597_v30 = vld [vmem:[%s18595_s3 + $0x1c4] ss:$8 sps:$4 sm:$0xff]   ;;  %v15607_v18 = vld [vmem:[%s18595_s3 + $0x1c0] ss:$8 sps:$4 sm:$0xff]  }
 0x462   :  { %3473 = vmatpush1.bf16.msra.mxu0 %v15023_v28  ;;  %v3264_v28 = vpack.c.bf16 %v3260_v63, %v3260_v63  ;;  %v15602_v40 = vld [vmem:[%s18595_s3 + $0xa4] ss:$8 sps:$4 sm:$0xff]   ;;  %v15612_v57 = vld [vmem:[%s18595_s3 + $0xa0] ss:$8 sps:$4 sm:$0xff]   ;;  %v15621_v63 = vld [vmem:[%s18595_s3 + $0x1b4] ss:$8 sps:$4 sm:$0xff]  }
 0x463   :  { %3474 = vmatprep.subr.bf16.mxu0 %v15029_v53  ;;  %v3262_v53 = vpack.c.bf16 %v15265_v2, %v3258_v54  ;;  %v15450_v2 = vld [vmem:[%s18595_s3 + $0x120] ss:$8 sps:$4 sm:$0xff]   ;;  %18880 = vst [vmem:[#allocation33_spill] sm:$0xff] %v15602_v40  ;;  %18881 = vst [vmem:[#allocation34_spill] sm:$0xff] %v15612_v57  ;;  %v15626_v54 = vld [vmem:[%s18595_s3 + $0x94] ss:$8 sps:$4 sm:$0xff]  }
 0x464   :  { %18882 = vst [vmem:[#allocation35_spill] sm:$0xff] %v15626_v54 }
 0x466   :  { %3475 = vmatpush1.bf16.msra.mxu0 %v15037_v36  ;;  %v3303_v36 = vrot.slane %v3264_v28, 1  ;;  %v15631_v28 = vld [vmem:[%s18595_s3 + $0x1b0] ss:$8 sps:$4 sm:$0xff]  }
 0x467   :  { %3476 = vmatprep.subr.bf16.mxu0 %v15044_v1  ;;  %v3302_v1 = vrot.slane %v3262_v53, 1  ;;  %v15636_v53 = vld [vmem:[%s18595_s3 + $0x90] ss:$8 sps:$4 sm:$0xff]  }
 0x468   :  { %18883 = vst [vmem:[#allocation36_spill] sm:$0xff] %v15636_v53 }
 0x46a   :  { %3477 = vmatpush1.bf16.msra.mxu0 %v15051_v38  ;;  %v3304_v38 = vsel %vm877_vm11, %v3302_v1, %v3303_v36  ;;  %v15645_v36 = vld [vmem:[%s18595_s3 + $0x1a0] ss:$8 sps:$4 sm:$0xff]   ;;  %v15650_v1 = vld [vmem:[%s18595_s3 + $0x1a4] ss:$8 sps:$4 sm:$0xff]  }
 0x46b   :  { %3478 = vmatprep.subr.bf16.mxu0 %v15058_v44  ;;  %v15309_v44 = vld [vmem:[%s18595_s3 + $0x70] ss:$8 sps:$4 sm:$0xff]  }
 0x46e   :  { %3479 = vmatpush1.bf16.msra.mxu0 %v15065_v46  ;;  %v15314_v46 = vld [vmem:[%s18595_s3 + $0x74] ss:$8 sps:$4 sm:$0xff]  }
 0x46f   :  { %3480 = vmatprep.subr.bf16.mxu0 %v15072_v56  ;;  %v15319_v56 = vld [vmem:[%s18595_s3 + $0x64] ss:$8 sps:$4 sm:$0xff]  }
 0x472   :  { %3481 = vmatpush1.bf16.msra.mxu0 %v15079_v59  ;;  %v15324_v59 = vld [vmem:[%s18595_s3 + $0x170] ss:$8 sps:$4 sm:$0xff]  }
 0x473   :  { %3482 = vmatprep.subr.bf16.mxu0 %v15086_v15  ;;  %v15329_v15 = vld [vmem:[%s18595_s3 + $0x174] ss:$8 sps:$4 sm:$0xff]  }
 0x474   :  { %3819 = vmatprep.subr.bf16.mxu1 %v15329_v15 }
 0x475   :  { %3820 = vmatpush1.bf16.msra.mxu1 %v15324_v59 }
 0x476   :  { %3483 = vmatpush1.bf16.msra.mxu0 %v15093_v17  ;;  %v15336_v17 = vld [vmem:[%s18595_s3 + $0x60] ss:$8 sps:$4 sm:$0xff]  }
 0x477   :  { %3484 = vmatprep.subr.bf16.mxu0 %v15100_v51  ;;  %v15342_v51 = vld [vmem:[%s18595_s3 + $0x164] ss:$8 sps:$4 sm:$0xff]  }
 0x478   :  { %3821 = vmatprep.subr.bf16.mxu1 %v15342_v51 }
 0x47a   :  { %3485 = vmatpush1.bf16.msra.mxu0 %v15107_v13  ;;  %v15349_v13 = vld [vmem:[%s18595_s3 + $0x54] ss:$8 sps:$4 sm:$0xff]  }
 0x47b   :  { %3486 = vmatprep.subr.bf16.mxu0 %v15114_v23  ;;  %v15354_v23 = vld [vmem:[%s18595_s3 + $0x160] ss:$8 sps:$4 sm:$0xff]  }
 0x47c   :  { %3822 = vmatpush1.bf16.msra.mxu1 %v15354_v23 }
 0x47e   :  { %3487 = vmatpush2.bf16.msra.mxu0 %v15121_v37  ;;  %v15360_v37 = vld [vmem:[%s18595_s3 + $0x154] ss:$8 sps:$4 sm:$0xff]  }
 0x47f   :  { %3488 = vmatprep.subr.bf16.mxu0 %v15128_v9  ;;  %v15366_v9 = vld [vmem:[%s18595_s3 + $0x50] ss:$8 sps:$4 sm:$0xff]   ;;  %3823 = vmatprep.subr.bf16.mxu1 %v15360_v37 }
 0x480   :  { %18859 = vst [vmem:[#allocation12_spill] sm:$0xff] %v15366_v9 }
 0x482   :  { %3489 = vmatpush2.bf16.msra.mxu0 %v15135_v39  ;;  %v15373_v39 = vld [vmem:[%s18595_s3 + $0x44] ss:$8 sps:$4 sm:$0xff]  }
 0x483   :  { %3490 = vmatprep.subr.bf16.mxu0 %v15142_v6  ;;  %18860 = vst [vmem:[#allocation13_spill] sm:$0xff] %v15373_v39  ;;  %v15378_v6 = vld [vmem:[%s18595_s3 + $0x150] ss:$8 sps:$4 sm:$0xff]  }
 0x484   :  { %3824 = vmatpush1.bf16.msra.mxu1 %v15378_v6 }
 0x486   :  { %3491 = vmatpush2.bf16.msra.mxu0 %v15149_v58  ;;  %v15384_v58 = vld [vmem:[%s18595_s3 + $0x144] ss:$8 sps:$4 sm:$0xff]  }
 0x487   :  { %3492 = vmatprep.subr.bf16.mxu0 %v15156_v47  ;;  %v15390_v47 = vld [vmem:[%s18595_s3 + $0x40] ss:$8 sps:$4 sm:$0xff]   ;;  %3825 = vmatprep.subr.bf16.mxu1 %v15384_v58 }
 0x488   :  { %18861 = vst [vmem:[#allocation14_spill] sm:$0xff] %v15390_v47 }
 0x48a   :  { %3493 = vmatpush2.bf16.msra.mxu0 %v15163_v20  ;;  %v15397_v20 = vld [vmem:[%s18595_s3 + $0x34] ss:$8 sps:$4 sm:$0xff]  }
 0x48b   :  { %3494 = vmatprep.subr.bf16.mxu0 %v15170_v35  ;;  %18862 = vst [vmem:[#allocation15_spill] sm:$0xff] %v15397_v20  ;;  %v15402_v35 = vld [vmem:[%s18595_s3 + $0x140] ss:$8 sps:$4 sm:$0xff]  }
 0x48c   :  { %3826 = vmatpush1.bf16.msra.mxu1 %v15402_v35 }
 0x48e   :  { %3495 = vmatpush2.bf16.msra.mxu0 %v15177_v3  ;;  %v15408_v3 = vld [vmem:[%s18595_s3 + $0x134] ss:$8 sps:$4 sm:$0xff]  }
 0x48f   :  { %3496 = vmatprep.subr.bf16.mxu0 %v15184_v48  ;;  %v15414_v48 = vld [vmem:[%s18595_s3 + $0x30] ss:$8 sps:$4 sm:$0xff]   ;;  %3827 = vmatprep.subr.bf16.mxu1 %v15408_v3 }
 0x490   :  { %18863 = vst [vmem:[#allocation16_spill] sm:$0xff] %v15414_v48 }
 0x492   :  { %3497 = vmatpush2.bf16.msra.mxu0 %v15191_v60  ;;  %v15421_v60 = vld [vmem:[%s18595_s3 + $0x24] ss:$8 sps:$4 sm:$0xff]  }
 0x493   :  { %3498 = vmatprep.subr.bf16.mxu0 %v15198_v55  ;;  %18864 = vst [vmem:[#allocation17_spill] sm:$0xff] %v15421_v60  ;;  %v15426_v55 = vld [vmem:[%s18595_s3 + $0x130] ss:$8 sps:$4 sm:$0xff]  }
 0x494   :  { %3828 = vmatpush1.bf16.msra.mxu1 %v15426_v55 }
 0x496   :  { %3499 = vmatpush2.bf16.msra.mxu0 %v15205_v11  ;;  %v15432_v11 = vld [vmem:[%s18595_s3 + $0x124] ss:$8 sps:$4 sm:$0xff]  }
 0x497   :  { %3500 = vmatprep.subr.bf16.mxu0 %v15212_v4  ;;  %v15438_v4 = vld [vmem:[%s18595_s3 + $0x20] ss:$8 sps:$4 sm:$0xff]   ;;  %3829 = vmatprep.subr.bf16.mxu1 %v15432_v11 }
 0x498   :  { %18865 = vst [vmem:[#allocation18_spill] sm:$0xff] %v15438_v4  ;;  %3830 = vmatpush1.bf16.msra.mxu1 %v15450_v2 }
 0x499   :  { %3831 = vmatprep.subr.bf16.mxu1 %v15456_v0 }
 0x49a   :  { %3501 = vmatpush2.bf16.msra.mxu0 %v15218_v24  ;;  %v15445_v24 = vld [vmem:[%s18595_s3 + $0x14] ss:$8 sps:$4 sm:$0xff]  }
 0x49b   :  { %4022 = vmatprep.subr.bf16.mxu0 %v15314_v46  ;;  %18866 = vst [vmem:[#allocation19_spill] sm:$0xff] %v15445_v24 }
 0x49c   :  { %3832 = vmatpush1.bf16.msra.mxu1 %v15474_v42 }
 0x49d   :  { %3503 = vmatmul.mubr.bf16.vlgmr.msra.gmra.mxu0 %v3304_v38  ;;  %3833 = vmatprep.subr.bf16.mxu1 %v15501_v7  ;;  %v15655_v38 = vld [vmem:[%s18595_s3 + $0x80] ss:$8 sps:$4 sm:$0xff]  }
 0x49e   :  { %4023 = vmatpush1.bf16.msra.mxu0 %v15309_v44  ;;  %18884 = vst [vmem:[#allocation37_spill] sm:$0xff] %v15655_v38 }
 0x49f   :  { %4024 = vmatprep.subr.bf16.mxu0 %v15319_v56 }
 0x4a0   :  { %3834 = vmatpush1.bf16.msra.mxu1 %v15511_v14 }
 0x4a1   :  { %3835 = vmatprep.subr.bf16.mxu1 %v15525_v33 }
 0x4a2   :  { %4025 = vmatpush1.bf16.msra.mxu0 %v15336_v17 }
 0x4a3   :  { %4026 = vmatprep.subr.bf16.mxu0 %v15349_v13 }
 0x4a4   :  { %3836 = vmatpush2.bf16.msra.mxu1 %v15535_v31 }
 0x4a5   :  { %3837 = vmatprep.subr.bf16.mxu1 %v15549_v45 }
 0x4a6   :  { %4027 = vmatpush1.bf16.msra.mxu0 %v15366_v9 }
 0x4a7   :  { %4028 = vmatprep.subr.bf16.mxu0 %v15373_v39 }
 0x4a8   :  { %3838 = vmatpush2.bf16.msra.mxu1 %v15559_v5 }
 0x4a9   :  { %3839 = vmatprep.subr.bf16.mxu1 %v15573_v19 }
 0x4aa   :  { %4029 = vmatpush1.bf16.msra.mxu0 %v15390_v47 }
 0x4ab   :  { %4030 = vmatprep.subr.bf16.mxu0 %v15397_v20 }
 0x4ac   :  { %3840 = vmatpush2.bf16.msra.mxu1 %v15583_v16 }
 0x4ad   :  { %3841 = vmatprep.subr.bf16.mxu1 %v15597_v30 }
 0x4ae   :  { %4031 = vmatpush1.bf16.msra.mxu0 %v15414_v48 }
 0x4af   :  { %4032 = vmatprep.subr.bf16.mxu0 %v15421_v60 }
 0x4b0   :  { %3842 = vmatpush2.bf16.msra.mxu1 %v15607_v18 }
 0x4b1   :  { %3843 = vmatprep.subr.bf16.mxu1 %v15621_v63 }
 0x4b2   :  { %4033 = vmatpush1.bf16.msra.mxu0 %v15438_v4 }
 0x4b3   :  { %4034 = vmatprep.subr.bf16.mxu0 %v15445_v24 }
 0x4b4   :  { %3844 = vmatpush2.bf16.msra.mxu1 %v15631_v28 }
 0x4b5   :  { %3845 = vmatprep.subr.bf16.mxu1 %v15650_v1 }
 0x4b6   :  { %4035 = vmatpush1.bf16.msra.mxu0 %v15462_v29 }
 0x4b7   :  { %4036 = vmatprep.subr.bf16.mxu0 %v15469_v12 }
 0x4b8   :  { %3846 = vmatpush2.bf16.msra.mxu1 %v15645_v36 }
 0x4ba   :  { %4037 = vmatpush1.bf16.msra.mxu0 %v15481_v25 }
 0x4bb   :  { %4038 = vmatprep.subr.bf16.mxu0 %v15488_v62 }
 0x4be   :  { %4039 = vmatpush2.bf16.msra.mxu0 %v15494_v32 }
 0x4bf   :  { %4040 = vmatprep.subr.bf16.mxu0 %v15506_v43 }
 0x4c2   :  { %4041 = vmatpush2.bf16.msra.mxu0 %v15516_v8 }
 0x4c3   :  { %4042 = vmatprep.subr.bf16.mxu0 %v15530_v50 }
 0x4c6   :  { %4043 = vmatpush2.bf16.msra.mxu0 %v15540_v27 }
 0x4c7   :  { %4044 = vmatprep.subr.bf16.mxu0 %v15554_v21 }
 0x4ca   :  { %4045 = vmatpush2.bf16.msra.mxu0 %v15564_v22 }
 0x4cb   :  { %4046 = vmatprep.subr.bf16.mxu0 %v15578_v10 }
 0x4ce   :  { %4047 = vmatpush2.bf16.msra.mxu0 %v15588_v52 }
 0x4cf   :  { %4048 = vmatprep.subr.bf16.mxu0 %v15602_v40  ;;  %v15681_v40 = vld [vmem:[%s18595_s3 + $0x184] ss:$8 sps:$4 sm:$0xff]  }
 0x4d2   :  { %4049 = vmatpush2.bf16.msra.mxu0 %v15612_v57  ;;  %v15674_v57 = vld [vmem:[%s18595_s3 + $0x190] ss:$8 sps:$4 sm:$0xff]  }
 0x4d3   :  { %4050 = vmatprep.subr.bf16.mxu0 %v15626_v54  ;;  %v15660_v54 = vld [vmem:[%s18595_s3 + $0x84] ss:$8 sps:$4 sm:$0xff]  }
 0x4d4   :  { %18885 = vst [vmem:[#allocation39_spill] sm:$0xff] %v15660_v54 }
 0x4d6   :  { %4051 = vmatpush2.bf16.msra.mxu0 %v15636_v53  ;;  %v15665_v53 = vld [vmem:[%s18595_s3 + $0x194] ss:$8 sps:$4 sm:$0xff]  }
 0x4d7   :  { %4052 = vmatprep.subr.bf16.mxu0 %v15660_v54  ;;  %3847 = vmatprep.subr.bf16.mxu1 %v15665_v53 }
 0x4d8   :  { %3848 = vmatpush2.bf16.msra.mxu1 %v15674_v57 }
 0x4d9   :  { %3849 = vmatprep.subr.bf16.mxu1 %v15681_v40 }
 0x4da   :  { %4053 = vmatpush2.bf16.msra.mxu0 %v15655_v38  ;;  %v15687_v38 = vld [vmem:[%s18595_s3 + $0x180] ss:$8 sps:$4 sm:$0xff]  }
 0x4db   :  { %4622 = vmatprep.subr.bf16.mxu0 %v15329_v15  ;;  %v15694_v15 = vld [vmem:[%s18595_s3 + $0x274] ss:$8 sps:$4 sm:$0xff]  }
 0x4dc   :  { %3850 = vmatpush2.bf16.msra.mxu1 %v15687_v38 }
 0x4dd   :  { %4277 = vmatprep.subr.bf16.mxu1 %v15694_v15 }
 0x514   :  { %v3249_v10 = vpop.f32.mrf.mxu1 }
 0x516   :  { %v3251_v21 = vpop.f32.mrf.mxu1 }
 0x518   :  { %v3253_v8 = vpop.f32.mrf.mxu1 }
 0x51a   :  { %v3255_v4 = vpop.f32.mrf.mxu1 }
 0x51d   :  { %v3046_v54 = vpop.f32.mrf.mxu0 }
 0x51e   :  { %v3250_v50 = vadd.f32 %v3249_v10, %v3046_v54  ;;  %v18886_v10 = vmax.f32 %v14967_v26, 0.0 }
 0x51f   :  { %v3048_v52 = vpop.f32.mrf.mxu0 }
 0x520   :  { %v3252_v32 = vadd.f32 %v3251_v21, %v3048_v52 }
 0x521   :  { %v3050_v22 = vpop.f32.mrf.mxu0 }
 0x522   :  { %v3254_v12 = vadd.f32 %v3253_v8, %v3050_v22 }
 0x523   :  { %v3052_v27 = vpop.f32.mrf.mxu0 }
 0x524   :  { %v3256_v48 = vadd.f32 %v3255_v4, %v3052_v27  ;;  %v18894_v27 = vld [vmem:[#allocation11_spill] sm:$0xff] }
 0x525   :  { %v18895_v21 = vmax.f32 %v18894_v27, 0.0 }
 0x55d   :  { %v3504_v43 = vpop.f32.mrf.mxu0 }
 0x55e   :  { %v3513_v62 = vadd.f32 %v3504_v43, %v3250_v50 }
 0x55f   :  { %v3506_v25 = vpop.f32.mrf.mxu0 }
 0x560   :  { %v3517_v29 = vadd.f32 %v3513_v62, %v14516_v34  ;;  %v3514_v24 = vadd.f32 %v3506_v25, %v3252_v32  ;;  %v18888_v62 = vld [vmem:[#allocation40_spill] sm:$0xff] }
 0x561   :  { %v3508_v60 = vpop.f32.mrf.mxu0  ;;  %v18889_v32 = vmax.f32 %v18888_v62, 0.0 }
 0x562   :  { %v3521_v20 = vmul.f32 %v14101_v49, %v3517_v29  ;;  %v3518_v47 = vadd.f32 %v3514_v24, %v14520_v41  ;;  %v3515_v39 = vadd.f32 %v3508_v60, %v3254_v12  ;;  %v18891_v24 = vld [vmem:[#allocation10_spill] sm:$0xff] }
 0x563   :  { %v3510_v9 = vpop.f32.mrf.mxu0 }
 0x564   :  { %v15702_v54 = vadd.f32 %v3521_v20, %v18886_v10  ;;  %v3522_v43 = vmul.f32 %v14101_v49, %v3518_v47  ;;  %v3519_v8 = vadd.f32 %v3515_v39, %v14516_v34  ;;  %v3516_v50 = vadd.f32 %v3510_v9, %v3256_v48 }
 0x565   :  { %v18892_v47 = vmax.f32 %v18891_v24, 0.0 }
 0x566   :  { %18887 = vst [vmem:[#allocation38_spill] sm:$0xff] %v15702_v54  ;;  %v18680_v25 = vmax.f32 %v15702_v54, 0.0  ;;  %v15709_v4 = vadd.f32 %v3522_v43, %v18889_v32  ;;  %v3523_v29 = vmul.f32 %v14109_v61, %v3519_v8  ;;  %v3520_v60 = vadd.f32 %v3516_v50, %v14520_v41 }
 0x568   :  { %18890 = vst [vmem:[#allocation40_spill] sm:$0xff] %v15709_v4  ;;  %v3537_v26 = vrot.slane %v18680_v25, 7  ;;  %v18679_v20 = vmax.f32 %v15709_v4, 0.0  ;;  %v15718_v12 = vadd.f32 %v3523_v29, %v18892_v47  ;;  %v3524_v9 = vmul.f32 %v14109_v61, %v3520_v60 }
 0x56a   :  { %18893 = vst [vmem:[#allocation10_spill] sm:$0xff] %v15718_v12  ;;  %3549 = vst [vmem:[#allocation3] sm:$0xfe] %v3537_v26  ;;  %v3538_v39 = vrot.slane %v18679_v20, 7  ;;  %v18677_v48 = vmax.f32 %v15718_v12, 0.0  ;;  %v15726_v22 = vadd.f32 %v3524_v9, %v18895_v21 }
 0x56c   :  { %18896 = vst [vmem:[#allocation11_spill] sm:$0xff] %v15726_v22  ;;  %3550 = vst [vmem:[#allocation3 + $0x8] sm:$0xfe] %v3538_v39  ;;  %v3539_v52 = vrot.slane %v18677_v48, 7  ;;  %v18678_v10 = vmax.f32 %v15726_v22, 0.0 }
 0x56e   :  { %3553 = vst [vmem:[#allocation3 + $0x20] sm:$0x1] %v3539_v52  ;;  %v3541_v43 = vrot.slane %v18678_v10, 7  ;;  %v15734_v8 = vsel %vm301_vm9, %v3537_v26, %v3539_v52 }
 0x570   :  { %3554 = vst [vmem:[#allocation3 + $0x28] sm:$0x1] %v3541_v43  ;;  %v3542_v29 = vsel %vm301_vm9, %v3538_v39, %v3541_v43 }
 0x571   :  { %v3593_v50 = vld [vmem:[#allocation3] sm:$0xfe] }
 0x572   :  { %v3555_v62 = vld [vmem:[#allocation3] sm:$0xff]  ;;  %v3597_v32 = vpack.c.bf16 %v15734_v8, %v3593_v50 }
 0x573   :  { %v3556_v60 = vld [vmem:[#allocation3 + $0x8] sm:$0xff]  ;;  %v3559_v27 = vpack.c.bf16 %v15734_v8, %v3555_v62 }
 0x574   :  { %v3594_v24 = vld [vmem:[#allocation3 + $0x8] sm:$0xfe]  ;;  %v3560_v47 = vpack.c.bf16 %v3542_v29, %v3556_v60  ;;  %v3636_v48 = vshll.u32 %v3597_v32, 16  ;;  %v3634_v4 = vshrl.u32 %v3597_v32, 16 }
 0x575   :  { %v3598_v9 = vpack.c.bf16 %v3542_v29, %v3594_v24  ;;  %v3595_v21 = vld [vmem:[#allocation3 + $0x20] sm:$0x1]  ;;  %v4066_v52 = vld [vmem:[#allocation3 + $0x8] sm:$0xfc] }
 0x576   :  { %4054 = vmatprep.mubr.bf16.mxu0 %v3560_v47  ;;  %v3599_v20 = vpack.c.bf16 %v3595_v21, %v3595_v21  ;;  %v3638_v39 = vrot.slane %v3636_v48, 1  ;;  %v4070_v24 = vpack.c.bf16 %v3542_v29, %v4066_v52  ;;  %v15752_v48 = vld [vmem:[%s18595_s3 + $0x264] ss:$8 sps:$4 sm:$0xff]  }
 0x577   :  { %v3648_v10 = vshll.u32 %v3598_v9, 16  ;;  %4055 = vmatmul.mubr.bf16.vlgmr.msra.gmra.mxu0 %v3559_v27  ;;  %v3596_v26 = vld [vmem:[#allocation3 + $0x28] sm:$0x1]  ;;  %v3646_v60 = vshrl.u32 %v3598_v9, 16  ;;  %v18899_v52 = vld [vmem:[#allocation14_spill] sm:$0xff] }
 0x578   :  { %v4068_v25 = vld [vmem:[#allocation3 + $0x28] sm:$0x3]  ;;  %v3600_v22 = vpack.c.bf16 %v3596_v26, %v3596_v26  ;;  %v3641_v50 = vshll.u32 %v3599_v20, 16  ;;  %4623 = vmatpush1.bf16.msra.mxu0 %v15324_v59  ;;  %v15745_v20 = vld [vmem:[%s18595_s3 + $0x270] ss:$8 sps:$4 sm:$0xff]   ;;  %v3639_v59 = vor.u32 %v3638_v39, %v3634_v4  ;;  %v18898_v26 = vld [vmem:[#allocation13_spill] sm:$0xff] }
 0x579   :  { %v3650_v12 = vrot.slane %v3648_v10, 1  ;;  %v4072_v43 = vpack.c.bf16 %v4068_v25, %v4068_v25  ;;  %4624 = vmatprep.subr.bf16.mxu0 %v15342_v51  ;;  %v4112_v25 = vrot.slane %v4070_v24, 1  ;;  %v15782_v4 = vld [vmem:[%s18595_s3 + $0x244] ss:$8 sps:$4 sm:$0xff]  }
 0x57a   :  { %v3653_v62 = vshll.u32 %v3600_v22, 16  ;;  %v3643_v47 = vrot.slane %v3641_v50, 1  ;;  %v4065_v22 = vld [vmem:[#allocation3] sm:$0xfc]  ;;  %v18900_v50 = vld [vmem:[#allocation15_spill] sm:$0xff]  ;;  %v18902_v39 = vld [vmem:[#allocation17_spill] sm:$0xff] }
 0x57b   :  { %v3651_v54 = vor.u32 %v3650_v12, %v3646_v60  ;;  %v4113_v27 = vrot.slane %v4072_v43, 1  ;;  %v4069_v32 = vpack.c.bf16 %v15734_v8, %v4065_v22  ;;  %v18897_v8 = vld [vmem:[#allocation12_spill] sm:$0xff]  ;;  %v18903_v43 = vld [vmem:[#allocation18_spill] sm:$0xff]  ;;  %v18908_v60 = vld [vmem:[#allocation23_spill] sm:$0xff] }
 0x57c   :  { %v3655_v21 = vrot.slane %v3653_v62, 1  ;;  %4625 = vmatpush1.bf16.msra.mxu0 %v15354_v23  ;;  %v3644_v12 = vsel %vm399_vm10, %v3639_v59, %v3643_v47  ;;  %v18909_v62 = vld [vmem:[#allocation24_spill] sm:$0xff]  ;;  %v18910_v24 = vld [vmem:[#allocation25_spill] sm:$0xff]  ;;  %v18911_v47 = vld [vmem:[#allocation26_spill] sm:$0xff] }
 0x57d   :  { %4626 = vmatprep.subr.bf16.mxu0 %v15360_v37  ;;  %v4114_v23 = vsel %vm877_vm11, %v4112_v25, %v4113_v27  ;;  %v15761_v37 = vld [vmem:[%s18595_s3 + $0x260] ss:$8 sps:$4 sm:$0xff]   ;;  %v4109_v29 = vrot.slane %v4069_v32, 1  ;;  %v18916_v25 = vld [vmem:[#allocation31_spill] sm:$0xff] }
 0x57e   :  { %v3656_v51 = vsel %vm399_vm10, %v3651_v54, %v3655_v21  ;;  %v15767_v54 = vld [vmem:[%s18595_s3 + $0x254] ss:$8 sps:$4 sm:$0xff]   ;;  %v18914_v59 = vld [vmem:[#allocation29_spill] sm:$0xff] }
 0x57f   :  { %3851 = vmatprep.mubr.bf16.mxu1 %v3656_v51  ;;  %v18912_v21 = vld [vmem:[#allocation27_spill] sm:$0xff]  ;;  %v18913_v27 = vld [vmem:[#allocation28_spill] sm:$0xff]  ;;  %v18915_v51 = vld [vmem:[#allocation30_spill] sm:$0xff] }
 0x580   :  { %3852 = vmatmul.mubr.bf16.vlgmr.msra.gmra.mxu1 %v3644_v12  ;;  %4627 = vmatpush1.bf16.msra.mxu0 %v15378_v6  ;;  %v15775_v6 = vld [vmem:[%s18595_s3 + $0x250] ss:$8 sps:$4 sm:$0xff]  }
 0x581   :  { %4278 = vmatpush1.bf16.msra.mxu1 %v15745_v20  ;;  %4309 = vmatprep.mubr.bf16.mxu1 %v4114_v23  ;;  %v18917_v12 = vld [vmem:[#allocation32_spill] sm:$0xff]  ;;  %v18918_v23 = vld [vmem:[#allocation33_spill] sm:$0xff]  ;;  %v18920_v22 = vld [vmem:[#allocation35_spill] sm:$0xff] }
 0x582   :  { %4279 = vmatprep.subr.bf16.mxu1 %v15752_v48  ;;  %4628 = vmatprep.subr.bf16.mxu0 %v15384_v58  ;;  %v15789_v58 = vld [vmem:[%s18595_s3 + $0x240] ss:$8 sps:$4 sm:$0xff]   ;;  %v18922_v32 = vld [vmem:[#allocation39_spill] sm:$0xff] }
 0x584   :  { %4629 = vmatpush1.bf16.msra.mxu0 %v15402_v35  ;;  %v15796_v35 = vld [vmem:[%s18595_s3 + $0x234] ss:$8 sps:$4 sm:$0xff]  }
 0x585   :  { %4280 = vmatpush1.bf16.msra.mxu1 %v15761_v37  ;;  %4630 = vmatprep.subr.bf16.mxu0 %v15408_v3  ;;  %v15803_v3 = vld [vmem:[%s18595_s3 + $0x230] ss:$8 sps:$4 sm:$0xff]  }
 0x586   :  { %4281 = vmatprep.subr.bf16.mxu1 %v15767_v54 }
 0x588   :  { %4631 = vmatpush1.bf16.msra.mxu0 %v15426_v55  ;;  %v15810_v55 = vld [vmem:[%s18595_s3 + $0x224] ss:$8 sps:$4 sm:$0xff]  }
 0x589   :  { %4282 = vmatpush1.bf16.msra.mxu1 %v15775_v6  ;;  %4632 = vmatprep.subr.bf16.mxu0 %v15432_v11  ;;  %v15817_v11 = vld [vmem:[%s18595_s3 + $0x220] ss:$8 sps:$4 sm:$0xff]  }
 0x58a   :  { %4283 = vmatprep.subr.bf16.mxu1 %v15782_v4 }
 0x58c   :  { %4633 = vmatpush1.bf16.msra.mxu0 %v15450_v2  ;;  %v15824_v2 = vld [vmem:[%s18595_s3 + $0x214] ss:$8 sps:$4 sm:$0xff]  }
 0x58d   :  { %4284 = vmatpush1.bf16.msra.mxu1 %v15789_v58  ;;  %4634 = vmatprep.subr.bf16.mxu0 %v15456_v0  ;;  %v15831_v0 = vld [vmem:[%s18595_s3 + $0x210] ss:$8 sps:$4 sm:$0xff]  }
 0x58e   :  { %4285 = vmatprep.subr.bf16.mxu1 %v15796_v35 }
 0x590   :  { %4635 = vmatpush1.bf16.msra.mxu0 %v15474_v42  ;;  %v15838_v42 = vld [vmem:[%s18595_s3 + $0x204] ss:$8 sps:$4 sm:$0xff]  }
 0x591   :  { %4286 = vmatpush1.bf16.msra.mxu1 %v15803_v3  ;;  %4636 = vmatprep.subr.bf16.mxu0 %v15501_v7  ;;  %v15845_v7 = vld [vmem:[%s18595_s3 + $0x200] ss:$8 sps:$4 sm:$0xff]  }
 0x592   :  { %4287 = vmatprep.subr.bf16.mxu1 %v15810_v55 }
 0x594   :  { %4637 = vmatpush1.bf16.msra.mxu0 %v15511_v14  ;;  %v15852_v14 = vld [vmem:[%s18595_s3 + $0x2f4] ss:$8 sps:$4 sm:$0xff]  }
 0x595   :  { %4288 = vmatpush1.bf16.msra.mxu1 %v15817_v11  ;;  %4638 = vmatprep.subr.bf16.mxu0 %v15525_v33  ;;  %v15859_v33 = vld [vmem:[%s18595_s3 + $0x2f0] ss:$8 sps:$4 sm:$0xff]  }
 0x596   :  { %4289 = vmatprep.subr.bf16.mxu1 %v15824_v2 }
 0x598   :  { %4639 = vmatpush2.bf16.msra.mxu0 %v15535_v31  ;;  %v15866_v31 = vld [vmem:[%s18595_s3 + $0x2e4] ss:$8 sps:$4 sm:$0xff]  }
 0x599   :  { %4290 = vmatpush1.bf16.msra.mxu1 %v15831_v0  ;;  %4640 = vmatprep.subr.bf16.mxu0 %v15549_v45  ;;  %v15873_v45 = vld [vmem:[%s18595_s3 + $0x2e0] ss:$8 sps:$4 sm:$0xff]  }
 0x59a   :  { %4291 = vmatprep.subr.bf16.mxu1 %v15838_v42 }
 0x59c   :  { %4641 = vmatpush2.bf16.msra.mxu0 %v15559_v5  ;;  %v15880_v5 = vld [vmem:[%s18595_s3 + $0x2d4] ss:$8 sps:$4 sm:$0xff]  }
 0x59d   :  { %4292 = vmatpush1.bf16.msra.mxu1 %v15845_v7  ;;  %4642 = vmatprep.subr.bf16.mxu0 %v15573_v19  ;;  %v15887_v19 = vld [vmem:[%s18595_s3 + $0x2d0] ss:$8 sps:$4 sm:$0xff]  }
 0x59e   :  { %4293 = vmatprep.subr.bf16.mxu1 %v15852_v14 }
 0x5a0   :  { %4643 = vmatpush2.bf16.msra.mxu0 %v15583_v16  ;;  %v15894_v16 = vld [vmem:[%s18595_s3 + $0x2c4] ss:$8 sps:$4 sm:$0xff]  }
 0x5a1   :  { %4294 = vmatpush2.bf16.msra.mxu1 %v15859_v33  ;;  %4644 = vmatprep.subr.bf16.mxu0 %v15597_v30  ;;  %v15901_v30 = vld [vmem:[%s18595_s3 + $0x2c0] ss:$8 sps:$4 sm:$0xff]  }
 0x5a2   :  { %4295 = vmatprep.subr.bf16.mxu1 %v15866_v31 }
 0x5a4   :  { %4645 = vmatpush2.bf16.msra.mxu0 %v15607_v18  ;;  %v15908_v18 = vld [vmem:[%s18595_s3 + $0x2b4] ss:$8 sps:$4 sm:$0xff]  }
 0x5a5   :  { %4296 = vmatpush2.bf16.msra.mxu1 %v15873_v45  ;;  %4646 = vmatprep.subr.bf16.mxu0 %v15621_v63  ;;  %v15915_v63 = vld [vmem:[%s18595_s3 + $0x2b0] ss:$8 sps:$4 sm:$0xff]  }
 0x5a6   :  { %4297 = vmatprep.subr.bf16.mxu1 %v15880_v5 }
 0x5a8   :  { %4647 = vmatpush2.bf16.msra.mxu0 %v15631_v28  ;;  %v15922_v28 = vld [vmem:[%s18595_s3 + $0x2a4] ss:$8 sps:$4 sm:$0xff]  }
 0x5a9   :  { %4298 = vmatpush2.bf16.msra.mxu1 %v15887_v19  ;;  %4648 = vmatprep.subr.bf16.mxu0 %v15650_v1  ;;  %v4067_v1 = vld [vmem:[#allocation3 + $0x20] sm:$0x3] }
 0x5aa   :  { %4299 = vmatprep.subr.bf16.mxu1 %v15894_v16  ;;  %v4071_v10 = vpack.c.bf16 %v4067_v1, %v4067_v1  ;;  %v18919_v1 = vld [vmem:[#allocation34_spill] sm:$0xff] }
 0x5ac   :  { %4649 = vmatpush2.bf16.msra.mxu0 %v15645_v36  ;;  %v15929_v36 = vld [vmem:[%s18595_s3 + $0x2a0] ss:$8 sps:$4 sm:$0xff]  }
 0x5ad   :  { %4300 = vmatpush2.bf16.msra.mxu1 %v15901_v30  ;;  %4650 = vmatprep.subr.bf16.mxu0 %v15665_v53  ;;  %v15936_v53 = vld [vmem:[%s18595_s3 + $0x294] ss:$8 sps:$4 sm:$0xff]  }
 0x5ae   :  { %4301 = vmatprep.subr.bf16.mxu1 %v15908_v18 }
 0x5b0   :  { %4651 = vmatpush2.bf16.msra.mxu0 %v15674_v57  ;;  %v15943_v57 = vld [vmem:[%s18595_s3 + $0x290] ss:$8 sps:$4 sm:$0xff]  }
 0x5b1   :  { %4302 = vmatpush2.bf16.msra.mxu1 %v15915_v63  ;;  %4652 = vmatprep.subr.bf16.mxu0 %v15681_v40  ;;  %v15950_v40 = vld [vmem:[%s18595_s3 + $0x284] ss:$8 sps:$4 sm:$0xff]  }
 0x5b2   :  { %4303 = vmatprep.subr.bf16.mxu1 %v15922_v28 }
 0x5b4   :  { %4653 = vmatpush2.bf16.msra.mxu0 %v15687_v38  ;;  %v15956_v38 = vld [vmem:[%s18595_s3 + $0x280] ss:$8 sps:$4 sm:$0xff]  }
 0x5b5   :  { %4304 = vmatpush2.bf16.msra.mxu1 %v15929_v36  ;;  %5080 = vmatprep.subr.bf16.mxu0 %v15694_v15  ;;  %v4110_v15 = vrot.slane %v4071_v10, 1  ;;  %v18921_v10 = vld [vmem:[#allocation36_spill] sm:$0xff] }
 0x5b6   :  { %4305 = vmatprep.subr.bf16.mxu1 %v15936_v53 }
 0x5b7   :  { %v4111_v9 = vsel %vm877_vm11, %v4109_v29, %v4110_v15  ;;  %v18923_v15 = vld [vmem:[#allocation37_spill] sm:$0xff] }
 0x5b9   :  { %4306 = vmatpush2.bf16.msra.mxu1 %v15943_v57 }
 0x5ba   :  { %4307 = vmatprep.subr.bf16.mxu1 %v15950_v40 }
 0x5bd   :  { %4308 = vmatpush2.bf16.msra.mxu1 %v15956_v38 }
 0x5be   :  { %4825 = vmatprep.subr.bf16.mxu1 %v15314_v46  ;;  %v18901_v46 = vld [vmem:[#allocation16_spill] sm:$0xff] }
 0x5c0   :  { %4310 = vmatmul.mubr.bf16.vlgmr.msra.gmra.mxu1 %v4111_v9 }
 0x5c1   :  { %4826 = vmatpush1.bf16.msra.mxu1 %v15309_v44  ;;  %v18904_v44 = vld [vmem:[#allocation19_spill] sm:$0xff] }
 0x5c2   :  { %4827 = vmatprep.subr.bf16.mxu1 %v15319_v56  ;;  %v18905_v56 = vld [vmem:[#allocation20_spill] sm:$0xff] }
 0x5c5   :  { %4828 = vmatpush1.bf16.msra.mxu1 %v15336_v17  ;;  %v18906_v17 = vld [vmem:[#allocation21_spill] sm:$0xff] }
 0x5c6   :  { %4829 = vmatprep.subr.bf16.mxu1 %v15349_v13  ;;  %v18907_v13 = vld [vmem:[#allocation22_spill] sm:$0xff] }
 0x5c9   :  { %4830 = vmatpush1.bf16.msra.mxu1 %v18897_v8 }
 0x5ca   :  { %4831 = vmatprep.subr.bf16.mxu1 %v18898_v26 }
 0x5cd   :  { %4832 = vmatpush1.bf16.msra.mxu1 %v18899_v52 }
 0x5ce   :  { %4833 = vmatprep.subr.bf16.mxu1 %v18900_v50 }
 0x5d1   :  { %4834 = vmatpush1.bf16.msra.mxu1 %v18901_v46 }
 0x5d2   :  { %4835 = vmatprep.subr.bf16.mxu1 %v18902_v39 }
 0x5d5   :  { %4836 = vmatpush1.bf16.msra.mxu1 %v18903_v43 }
 0x5d6   :  { %4837 = vmatprep.subr.bf16.mxu1 %v18904_v44 }
 0x5d9   :  { %4838 = vmatpush1.bf16.msra.mxu1 %v18905_v56 }
 0x5da   :  { %4839 = vmatprep.subr.bf16.mxu1 %v18906_v17 }
 0x5dd   :  { %4840 = vmatpush1.bf16.msra.mxu1 %v18907_v13 }
 0x5de   :  { %4841 = vmatprep.subr.bf16.mxu1 %v18908_v60 }
 0x5e1   :  { %4842 = vmatpush2.bf16.msra.mxu1 %v18909_v62 }
 0x5e2   :  { %4843 = vmatprep.subr.bf16.mxu1 %v18910_v24 }
 0x5e5   :  { %4844 = vmatpush2.bf16.msra.mxu1 %v18911_v47 }
 0x5e6   :  { %4845 = vmatprep.subr.bf16.mxu1 %v18912_v21 }
 0x5e9   :  { %4846 = vmatpush2.bf16.msra.mxu1 %v18913_v27 }
 0x5ea   :  { %4847 = vmatprep.subr.bf16.mxu1 %v18914_v59 }
 0x5ed   :  { %4848 = vmatpush2.bf16.msra.mxu1 %v18915_v51 }
 0x5ee   :  { %4849 = vmatprep.subr.bf16.mxu1 %v18916_v25 }
 0x5f1   :  { %4850 = vmatpush2.bf16.msra.mxu1 %v18917_v12 }
 0x5f2   :  { %4851 = vmatprep.subr.bf16.mxu1 %v18918_v23 }
 0x5f5   :  { %4852 = vmatpush2.bf16.msra.mxu1 %v18919_v1 }
 0x5f6   :  { %4853 = vmatprep.subr.bf16.mxu1 %v18920_v22 }
 0x5f9   :  { %4854 = vmatpush2.bf16.msra.mxu1 %v18921_v10 }
 0x5fa   :  { %4855 = vmatprep.subr.bf16.mxu1 %v18922_v32 }
 0x5fd   :  { %4856 = vmatpush2.bf16.msra.mxu1 %v18923_v15 }
 0x637   :  { %v4056_v8 = vpop.f32.mrf.mxu0 }
 0x639   :  { %v4058_v52 = vpop.f32.mrf.mxu0 }
 0x63b   :  { %v4060_v39 = vpop.f32.mrf.mxu0 }
 0x63d   :  { %v4062_v24 = vpop.f32.mrf.mxu0 }
 0x640   :  { %v3853_v29 = vpop.f32.mrf.mxu1 }
 0x641   :  { %v4057_v46 = vadd.f32 %v4056_v8, %v3853_v29 }
 0x642   :  { %v3855_v9 = vpop.f32.mrf.mxu1 }
 0x643   :  { %v4059_v44 = vadd.f32 %v4058_v52, %v3855_v9 }
 0x644   :  { %v3857_v26 = vpop.f32.mrf.mxu1 }
 0x645   :  { %v4061_v13 = vadd.f32 %v4060_v39, %v3857_v26 }
 0x646   :  { %v3859_v50 = vpop.f32.mrf.mxu1 }
 0x647   :  { %v4063_v21 = vadd.f32 %v4062_v24, %v3859_v50 }
 0x680   :  { %v4311_v43 = vpop.f32.mrf.mxu1 }
 0x681   :  { %v4320_v56 = vadd.f32 %v4311_v43, %v4057_v46 }
 0x682   :  { %v4313_v17 = vpop.f32.mrf.mxu1 }
 0x683   :  { %v4324_v60 = vadd.f32 %v4320_v56, %v14516_v34  ;;  %v4321_v62 = vadd.f32 %v4313_v17, %v4059_v44 }
 0x684   :  { %v4315_v47 = vpop.f32.mrf.mxu1 }
 0x685   :  { %v4328_v27 = vmax.f32 %v4324_v60, 0.0  ;;  %v4325_v59 = vadd.f32 %v4321_v62, %v14520_v41  ;;  %v4322_v51 = vadd.f32 %v4315_v47, %v4061_v13 }
 0x686   :  { %v4317_v25 = vpop.f32.mrf.mxu1 }
 0x687   :  { %v4332_v12 = vmul.f32 %v14101_v49, %v4328_v27  ;;  %v4329_v23 = vmax.f32 %v4325_v59, 0.0  ;;  %v4326_v1 = vadd.f32 %v4322_v51, %v14516_v34  ;;  %v4323_v22 = vadd.f32 %v4317_v25, %v4063_v21 }
 0x689   :  { %v4340_v10 = vrot.slane %v4332_v12, 7  ;;  %v4333_v32 = vmul.f32 %v14101_v49, %v4329_v23  ;;  %v4330_v15 = vmax.f32 %v4326_v1, 0.0  ;;  %v4327_v29 = vadd.f32 %v4323_v22, %v14520_v41 }
 0x68b   :  { %4352 = vst [vmem:[#allocation4] sm:$0xfe] %v4340_v10  ;;  %v4341_v9 = vrot.slane %v4333_v32, 7  ;;  %v4334_v8 = vmul.f32 %v14109_v61, %v4330_v15  ;;  %v4331_v26 = vmax.f32 %v4327_v29, 0.0 }
 0x68d   :  { %4353 = vst [vmem:[#allocation4 + $0x8] sm:$0xfe] %v4341_v9  ;;  %v4342_v52 = vrot.slane %v4334_v8, 7  ;;  %v4335_v50 = vmul.f32 %v14109_v61, %v4331_v26 }
 0x68f   :  { %4356 = vst [vmem:[#allocation4 + $0x20] sm:$0x1] %v4342_v52  ;;  %v4344_v46 = vrot.slane %v4335_v50, 7  ;;  %v16003_v39 = vsel %vm301_vm9, %v4340_v10, %v4342_v52 }
 0x691   :  { %4357 = vst [vmem:[#allocation4 + $0x28] sm:$0x1] %v4344_v46  ;;  %v4345_v17 = vsel %vm301_vm9, %v4341_v9, %v4344_v46 }
 0x692   :  { %v4396_v43 = vld [vmem:[#allocation4] sm:$0xfe] }
 0x693   :  { %v4358_v44 = vld [vmem:[#allocation4] sm:$0xff]  ;;  %v4400_v56 = vpack.c.bf16 %v16003_v39, %v4396_v43 }
 0x694   :  { %v4359_v13 = vld [vmem:[#allocation4 + $0x8] sm:$0xff]  ;;  %v4362_v47 = vpack.c.bf16 %v16003_v39, %v4358_v44 }
 0x695   :  { %v4397_v60 = vld [vmem:[#allocation4 + $0x8] sm:$0xfe]  ;;  %v4363_v62 = vpack.c.bf16 %v4345_v17, %v4359_v13  ;;  %v4439_v27 = vshll.u32 %v4400_v56, 16  ;;  %v4437_v26 = vshrl.u32 %v4400_v56, 16 }
 0x696   :  { %v4401_v24 = vpack.c.bf16 %v4345_v17, %v4397_v60  ;;  %v4398_v21 = vld [vmem:[#allocation4 + $0x20] sm:$0x1]  ;;  %v4869_v12 = vld [vmem:[#allocation4 + $0x8] sm:$0xfc] }
 0x697   :  { %4857 = vmatprep.mubr.bf16.mxu1 %v4363_v62  ;;  %v4402_v51 = vpack.c.bf16 %v4398_v21, %v4398_v21  ;;  %v4441_v32 = vrot.slane %v4439_v27, 1  ;;  %v4873_v8 = vpack.c.bf16 %v4345_v17, %v4869_v12  ;;  %v16194_v56 = vld [vmem:[%s18595_s3 + $0x114] ss:$8 sps:$4 sm:$0xff]   ;;  %v16200_v17 = vld [vmem:[%s18595_s3 + $0x10] ss:$8 sps:$4 sm:$0xff]  }
 0x698   :  { %v4451_v59 = vshll.u32 %v4401_v24, 16  ;;  %4858 = vmatmul.mubr.bf16.vlgmr.msra.gmra.mxu1 %v4362_v47  ;;  %v4399_v25 = vld [vmem:[#allocation4 + $0x28] sm:$0x1]  ;;  %v4449_v29 = vshrl.u32 %v4401_v24, 16  ;;  %18932 = vst [vmem:[#allocation20_spill] sm:$0xff] %v16200_v17 }
 0x699   :  { %v4871_v23 = vld [vmem:[#allocation4 + $0x28] sm:$0x3]  ;;  %v4403_v1 = vpack.c.bf16 %v4399_v25, %v4399_v25  ;;  %v4444_v10 = vshll.u32 %v4402_v51, 16  ;;  %v4442_v44 = vor.u32 %v4441_v32, %v4437_v26  ;;  %v4915_v60 = vrot.slane %v4873_v8, 1  ;;  %v16207_v24 = vld [vmem:[%s18595_s3 + $0x4] ss:$8 sps:$4 sm:$0xff]  }
 0x69a   :  { %v4453_v22 = vrot.slane %v4451_v59, 1  ;;  %v4875_v15 = vpack.c.bf16 %v4871_v23, %v4871_v23  ;;  %18933 = vst [vmem:[#allocation21_spill] sm:$0xff] %v16207_v24  ;;  %v16212_v21 = vld [vmem:[%s18595_s3 + $0x110] ss:$8 sps:$4 sm:$0xff]   ;;  %v16219_v27 = vld [vmem:[%s18595_s3] ss:$8 sps:$4 sm:$0xff]  }
 0x69b   :  { %v4456_v9 = vshll.u32 %v4403_v1, 16  ;;  %v4446_v52 = vrot.slane %v4444_v10, 1  ;;  %18934 = vst [vmem:[#allocation22_spill] sm:$0xff] %v16219_v27  ;;  %v16226_v59 = vld [vmem:[%s18595_s3 + $0xf4] ss:$8 sps:$4 sm:$0xff]  }
 0x69c   :  { %v4454_v50 = vor.u32 %v4453_v22, %v4449_v29  ;;  %v4916_v43 = vrot.slane %v4875_v15, 1  ;;  %18935 = vst [vmem:[#allocation23_spill] sm:$0xff] %v16226_v59  ;;  %v16232_v51 = vld [vmem:[%s18595_s3 + $0xf0] ss:$8 sps:$4 sm:$0xff]   ;;  %v16239_v25 = vld [vmem:[%s18595_s3 + $0x104] ss:$8 sps:$4 sm:$0xff]  }
 0x69d   :  { %v4458_v46 = vrot.slane %v4456_v9, 1  ;;  %v4447_v62 = vsel %vm399_vm10, %v4442_v44, %v4446_v52  ;;  %18936 = vst [vmem:[#allocation24_spill] sm:$0xff] %v16232_v51  ;;  %v16244_v12 = vld [vmem:[%s18595_s3 + $0xe4] ss:$8 sps:$4 sm:$0xff]   ;;  %v16249_v23 = vld [vmem:[%s18595_s3 + $0x100] ss:$8 sps:$4 sm:$0xff]  }
 0x69e   :  { %v4917_v47 = vsel %vm877_vm11, %v4915_v60, %v4916_v43  ;;  %18937 = vst [vmem:[#allocation25_spill] sm:$0xff] %v16244_v12  ;;  %v16254_v1 = vld [vmem:[%s18595_s3 + $0xe0] ss:$8 sps:$4 sm:$0xff]   ;;  %v16263_v22 = vld [vmem:[%s18595_s3 + $0x1f4] ss:$8 sps:$4 sm:$0xff]  }
 0x69f   :  { %v4459_v13 = vsel %vm399_vm10, %v4454_v50, %v4458_v46  ;;  %18938 = vst [vmem:[#allocation26_spill] sm:$0xff] %v16254_v1  ;;  %v16268_v10 = vld [vmem:[%s18595_s3 + $0xd4] ss:$8 sps:$4 sm:$0xff]   ;;  %v16273_v32 = vld [vmem:[%s18595_s3 + $0x1f0] ss:$8 sps:$4 sm:$0xff]  }
 0x6a0   :  { %4654 = vmatprep.mubr.bf16.mxu0 %v4459_v13  ;;  %18939 = vst [vmem:[#allocation27_spill] sm:$0xff] %v16268_v10  ;;  %v16278_v15 = vld [vmem:[%s18595_s3 + $0xd0] ss:$8 sps:$4 sm:$0xff]   ;;  %v16287_v29 = vld [vmem:[%s18595_s3 + $0x1e4] ss:$8 sps:$4 sm:$0xff]  }
 0x6a1   :  { %4655 = vmatmul.mubr.bf16.vlgmr.msra.gmra.mxu0 %v4447_v62  ;;  %18940 = vst [vmem:[#allocation28_spill] sm:$0xff] %v16278_v15  ;;  %v16292_v9 = vld [vmem:[%s18595_s3 + $0xc4] ss:$8 sps:$4 sm:$0xff]   ;;  %v16297_v8 = vld [vmem:[%s18595_s3 + $0x1e0] ss:$8 sps:$4 sm:$0xff]  }
 0x6a2   :  { %5081 = vmatpush1.bf16.msra.mxu0 %v15745_v20  ;;  %5112 = vmatprep.mubr.bf16.mxu0 %v4917_v47  ;;  %v4870_v20 = vld [vmem:[#allocation4 + $0x20] sm:$0x3]  ;;  %18941 = vst [vmem:[#allocation29_spill] sm:$0xff] %v16292_v9  ;;  %v16311_v52 = vld [vmem:[%s18595_s3 + $0x1d4] ss:$8 sps:$4 sm:$0xff]  }
 0x6a3   :  { %5082 = vmatprep.subr.bf16.mxu0 %v15752_v48  ;;  %v4868_v48 = vld [vmem:[#allocation4] sm:$0xfc]  ;;  %v16316_v50 = vld [vmem:[%s18595_s3 + $0xb4] ss:$8 sps:$4 sm:$0xff]   ;;  %v16321_v46 = vld [vmem:[%s18595_s3 + $0x1d0] ss:$8 sps:$4 sm:$0xff]  }
 0x6a4   :  { %v16302_v26 = vld [vmem:[%s18595_s3 + $0xc0] ss:$8 sps:$4 sm:$0xff]   ;;  %18943 = vst [vmem:[#allocation31_spill] sm:$0xff] %v16316_v50  ;;  %v16326_v43 = vld [vmem:[%s18595_s3 + $0xb0] ss:$8 sps:$4 sm:$0xff]  }
 0x6a5   :  { %18942 = vst [vmem:[#allocation30_spill] sm:$0xff] %v16302_v26  ;;  %18944 = vst [vmem:[#allocation32_spill] sm:$0xff] %v16326_v43  ;;  %v16335_v44 = vld [vmem:[%s18595_s3 + $0x1c4] ss:$8 sps:$4 sm:$0xff]   ;;  %v16345_v60 = vld [vmem:[%s18595_s3 + $0x1c0] ss:$8 sps:$4 sm:$0xff]  }
 0x6a6   :  { %5083 = vmatpush1.bf16.msra.mxu0 %v15761_v37  ;;  %v4874_v37 = vpack.c.bf16 %v4870_v20, %v4870_v20  ;;  %v16340_v13 = vld [vmem:[%s18595_s3 + $0xa4] ss:$8 sps:$4 sm:$0xff]   ;;  %v16350_v62 = vld [vmem:[%s18595_s3 + $0xa0] ss:$8 sps:$4 sm:$0xff]   ;;  %v16359_v47 = vld [vmem:[%s18595_s3 + $0x1b4] ss:$8 sps:$4 sm:$0xff]  }
 0x6a7   :  { %5084 = vmatprep.subr.bf16.mxu0 %v15767_v54  ;;  %v4872_v54 = vpack.c.bf16 %v16003_v39, %v4868_v48  ;;  %v16188_v39 = vld [vmem:[%s18595_s3 + $0x120] ss:$8 sps:$4 sm:$0xff]   ;;  %18945 = vst [vmem:[#allocation33_spill] sm:$0xff] %v16340_v13  ;;  %18946 = vst [vmem:[#allocation34_spill] sm:$0xff] %v16350_v62  ;;  %v16364_v20 = vld [vmem:[%s18595_s3 + $0x94] ss:$8 sps:$4 sm:$0xff]  }
 0x6a8   :  { %18947 = vst [vmem:[#allocation35_spill] sm:$0xff] %v16364_v20  ;;  %v16369_v48 = vld [vmem:[%s18595_s3 + $0x1b0] ss:$8 sps:$4 sm:$0xff]  }
 0x6aa   :  { %5085 = vmatpush1.bf16.msra.mxu0 %v15775_v6  ;;  %v4913_v6 = vrot.slane %v4874_v37, 1  ;;  %v16374_v37 = vld [vmem:[%s18595_s3 + $0x90] ss:$8 sps:$4 sm:$0xff]  }
 0x6ab   :  { %5086 = vmatprep.subr.bf16.mxu0 %v15782_v4  ;;  %v4912_v4 = vrot.slane %v4872_v54, 1  ;;  %18948 = vst [vmem:[#allocation36_spill] sm:$0xff] %v16374_v37  ;;  %v16383_v54 = vld [vmem:[%s18595_s3 + $0x1a0] ss:$8 sps:$4 sm:$0xff]  }
 0x6ae   :  { %5087 = vmatpush1.bf16.msra.mxu0 %v15789_v58  ;;  %v4914_v58 = vsel %vm877_vm11, %v4912_v4, %v4913_v6  ;;  %v16388_v6 = vld [vmem:[%s18595_s3 + $0x1a4] ss:$8 sps:$4 sm:$0xff]   ;;  %v16393_v4 = vld [vmem:[%s18595_s3 + $0x80] ss:$8 sps:$4 sm:$0xff]  }
 0x6af   :  { %5088 = vmatprep.subr.bf16.mxu0 %v15796_v35  ;;  %v16047_v35 = vld [vmem:[%s18595_s3 + $0x70] ss:$8 sps:$4 sm:$0xff]   ;;  %18949 = vst [vmem:[#allocation39_spill] sm:$0xff] %v16393_v4 }
 0x6b2   :  { %5089 = vmatpush1.bf16.msra.mxu0 %v15803_v3  ;;  %v16052_v3 = vld [vmem:[%s18595_s3 + $0x74] ss:$8 sps:$4 sm:$0xff]  }
 0x6b3   :  { %5090 = vmatprep.subr.bf16.mxu0 %v15810_v55  ;;  %v16057_v55 = vld [vmem:[%s18595_s3 + $0x64] ss:$8 sps:$4 sm:$0xff]  }
 0x6b6   :  { %5091 = vmatpush1.bf16.msra.mxu0 %v15817_v11  ;;  %v16062_v11 = vld [vmem:[%s18595_s3 + $0x170] ss:$8 sps:$4 sm:$0xff]  }
 0x6b7   :  { %5092 = vmatprep.subr.bf16.mxu0 %v15824_v2  ;;  %v16067_v2 = vld [vmem:[%s18595_s3 + $0x174] ss:$8 sps:$4 sm:$0xff]  }
 0x6b8   :  { %5429 = vmatprep.subr.bf16.mxu1 %v16067_v2 }
 0x6b9   :  { %5430 = vmatpush1.bf16.msra.mxu1 %v16062_v11 }
 0x6ba   :  { %5093 = vmatpush1.bf16.msra.mxu0 %v15831_v0  ;;  %v16074_v0 = vld [vmem:[%s18595_s3 + $0x60] ss:$8 sps:$4 sm:$0xff]  }
 0x6bb   :  { %5094 = vmatprep.subr.bf16.mxu0 %v15838_v42  ;;  %v16080_v42 = vld [vmem:[%s18595_s3 + $0x164] ss:$8 sps:$4 sm:$0xff]  }
 0x6bc   :  { %5431 = vmatprep.subr.bf16.mxu1 %v16080_v42 }
 0x6be   :  { %5095 = vmatpush1.bf16.msra.mxu0 %v15845_v7  ;;  %v16087_v7 = vld [vmem:[%s18595_s3 + $0x54] ss:$8 sps:$4 sm:$0xff]  }
 0x6bf   :  { %5096 = vmatprep.subr.bf16.mxu0 %v15852_v14  ;;  %v16092_v14 = vld [vmem:[%s18595_s3 + $0x160] ss:$8 sps:$4 sm:$0xff]  }
 0x6c0   :  { %5432 = vmatpush1.bf16.msra.mxu1 %v16092_v14 }
 0x6c2   :  { %5097 = vmatpush2.bf16.msra.mxu0 %v15859_v33  ;;  %v16098_v33 = vld [vmem:[%s18595_s3 + $0x154] ss:$8 sps:$4 sm:$0xff]  }
 0x6c3   :  { %5098 = vmatprep.subr.bf16.mxu0 %v15866_v31  ;;  %v16104_v31 = vld [vmem:[%s18595_s3 + $0x50] ss:$8 sps:$4 sm:$0xff]   ;;  %5433 = vmatprep.subr.bf16.mxu1 %v16098_v33 }
 0x6c4   :  { %18924 = vst [vmem:[#allocation12_spill] sm:$0xff] %v16104_v31 }
 0x6c6   :  { %5099 = vmatpush2.bf16.msra.mxu0 %v15873_v45  ;;  %v16111_v45 = vld [vmem:[%s18595_s3 + $0x44] ss:$8 sps:$4 sm:$0xff]  }
 0x6c7   :  { %5100 = vmatprep.subr.bf16.mxu0 %v15880_v5  ;;  %18925 = vst [vmem:[#allocation13_spill] sm:$0xff] %v16111_v45  ;;  %v16116_v5 = vld [vmem:[%s18595_s3 + $0x150] ss:$8 sps:$4 sm:$0xff]  }
 0x6c8   :  { %5434 = vmatpush1.bf16.msra.mxu1 %v16116_v5 }
 0x6ca   :  { %5101 = vmatpush2.bf16.msra.mxu0 %v15887_v19  ;;  %v16122_v19 = vld [vmem:[%s18595_s3 + $0x144] ss:$8 sps:$4 sm:$0xff]  }
 0x6cb   :  { %5102 = vmatprep.subr.bf16.mxu0 %v15894_v16  ;;  %v16128_v16 = vld [vmem:[%s18595_s3 + $0x40] ss:$8 sps:$4 sm:$0xff]   ;;  %5435 = vmatprep.subr.bf16.mxu1 %v16122_v19 }
 0x6cc   :  { %18926 = vst [vmem:[#allocation14_spill] sm:$0xff] %v16128_v16 }
 0x6ce   :  { %5103 = vmatpush2.bf16.msra.mxu0 %v15901_v30  ;;  %v16135_v30 = vld [vmem:[%s18595_s3 + $0x34] ss:$8 sps:$4 sm:$0xff]  }
 0x6cf   :  { %5104 = vmatprep.subr.bf16.mxu0 %v15908_v18  ;;  %18927 = vst [vmem:[#allocation15_spill] sm:$0xff] %v16135_v30  ;;  %v16140_v18 = vld [vmem:[%s18595_s3 + $0x140] ss:$8 sps:$4 sm:$0xff]  }
 0x6d0   :  { %5436 = vmatpush1.bf16.msra.mxu1 %v16140_v18 }
 0x6d2   :  { %5105 = vmatpush2.bf16.msra.mxu0 %v15915_v63  ;;  %v16146_v63 = vld [vmem:[%s18595_s3 + $0x134] ss:$8 sps:$4 sm:$0xff]  }
 0x6d3   :  { %5106 = vmatprep.subr.bf16.mxu0 %v15922_v28  ;;  %v16152_v28 = vld [vmem:[%s18595_s3 + $0x30] ss:$8 sps:$4 sm:$0xff]   ;;  %5437 = vmatprep.subr.bf16.mxu1 %v16146_v63 }
 0x6d4   :  { %18928 = vst [vmem:[#allocation16_spill] sm:$0xff] %v16152_v28 }
 0x6d6   :  { %5107 = vmatpush2.bf16.msra.mxu0 %v15929_v36  ;;  %v16159_v36 = vld [vmem:[%s18595_s3 + $0x24] ss:$8 sps:$4 sm:$0xff]  }
 0x6d7   :  { %5108 = vmatprep.subr.bf16.mxu0 %v15936_v53  ;;  %18929 = vst [vmem:[#allocation17_spill] sm:$0xff] %v16159_v36  ;;  %v16164_v53 = vld [vmem:[%s18595_s3 + $0x130] ss:$8 sps:$4 sm:$0xff]  }
 0x6d8   :  { %5438 = vmatpush1.bf16.msra.mxu1 %v16164_v53 }
 0x6da   :  { %5109 = vmatpush2.bf16.msra.mxu0 %v15943_v57  ;;  %v16170_v57 = vld [vmem:[%s18595_s3 + $0x124] ss:$8 sps:$4 sm:$0xff]  }
 0x6db   :  { %5110 = vmatprep.subr.bf16.mxu0 %v15950_v40  ;;  %v16176_v40 = vld [vmem:[%s18595_s3 + $0x20] ss:$8 sps:$4 sm:$0xff]   ;;  %5439 = vmatprep.subr.bf16.mxu1 %v16170_v57 }
 0x6dc   :  { %18930 = vst [vmem:[#allocation18_spill] sm:$0xff] %v16176_v40  ;;  %5440 = vmatpush1.bf16.msra.mxu1 %v16188_v39 }
 0x6dd   :  { %5441 = vmatprep.subr.bf16.mxu1 %v16194_v56 }
 0x6de   :  { %5111 = vmatpush2.bf16.msra.mxu0 %v15956_v38  ;;  %v16183_v38 = vld [vmem:[%s18595_s3 + $0x14] ss:$8 sps:$4 sm:$0xff]  }
 0x6df   :  { %5632 = vmatprep.subr.bf16.mxu0 %v16052_v3  ;;  %18931 = vst [vmem:[#allocation19_spill] sm:$0xff] %v16183_v38 }
 0x6e0   :  { %5442 = vmatpush1.bf16.msra.mxu1 %v16212_v21 }
 0x6e1   :  { %5113 = vmatmul.mubr.bf16.vlgmr.msra.gmra.mxu0 %v4914_v58  ;;  %5443 = vmatprep.subr.bf16.mxu1 %v16239_v25  ;;  %v16398_v58 = vld [vmem:[%s18595_s3 + $0x84] ss:$8 sps:$4 sm:$0xff]  }
 0x6e2   :  { %5633 = vmatpush1.bf16.msra.mxu0 %v16047_v35  ;;  %18950 = vst [vmem:[#allocation37_spill] sm:$0xff] %v16398_v58 }
 0x6e3   :  { %5634 = vmatprep.subr.bf16.mxu0 %v16057_v55 }
 0x6e4   :  { %5444 = vmatpush1.bf16.msra.mxu1 %v16249_v23 }
 0x6e5   :  { %5445 = vmatprep.subr.bf16.mxu1 %v16263_v22 }
 0x6e6   :  { %5635 = vmatpush1.bf16.msra.mxu0 %v16074_v0 }
 0x6e7   :  { %5636 = vmatprep.subr.bf16.mxu0 %v16087_v7 }
 0x6e8   :  { %5446 = vmatpush2.bf16.msra.mxu1 %v16273_v32 }
 0x6e9   :  { %5447 = vmatprep.subr.bf16.mxu1 %v16287_v29 }
 0x6ea   :  { %5637 = vmatpush1.bf16.msra.mxu0 %v16104_v31  ;;  %v18951_v31 = vld [vmem:[#allocation38_spill] sm:$0xff] }
 0x6eb   :  { %5638 = vmatprep.subr.bf16.mxu0 %v16111_v45 }
 0x6ec   :  { %5448 = vmatpush2.bf16.msra.mxu1 %v16297_v8 }
 0x6ed   :  { %5449 = vmatprep.subr.bf16.mxu1 %v16311_v52 }
 0x6ee   :  { %5639 = vmatpush1.bf16.msra.mxu0 %v16128_v16 }
 0x6ef   :  { %5640 = vmatprep.subr.bf16.mxu0 %v16135_v30 }
 0x6f0   :  { %5450 = vmatpush2.bf16.msra.mxu1 %v16321_v46 }
 0x6f1   :  { %5451 = vmatprep.subr.bf16.mxu1 %v16335_v44 }
 0x6f2   :  { %5641 = vmatpush1.bf16.msra.mxu0 %v16152_v28 }
 0x6f3   :  { %5642 = vmatprep.subr.bf16.mxu0 %v16159_v36 }
 0x6f4   :  { %5452 = vmatpush2.bf16.msra.mxu1 %v16345_v60 }
 0x6f5   :  { %5453 = vmatprep.subr.bf16.mxu1 %v16359_v47 }
 0x6f6   :  { %5643 = vmatpush1.bf16.msra.mxu0 %v16176_v40 }
 0x6f7   :  { %5644 = vmatprep.subr.bf16.mxu0 %v16183_v38 }
 0x6f8   :  { %5454 = vmatpush2.bf16.msra.mxu1 %v16369_v48 }
 0x6f9   :  { %5455 = vmatprep.subr.bf16.mxu1 %v16388_v6 }
 0x6fa   :  { %5645 = vmatpush1.bf16.msra.mxu0 %v16200_v17 }
 0x6fb   :  { %5646 = vmatprep.subr.bf16.mxu0 %v16207_v24 }
 0x6fc   :  { %5456 = vmatpush2.bf16.msra.mxu1 %v16383_v54 }
 0x6fe   :  { %5647 = vmatpush1.bf16.msra.mxu0 %v16219_v27 }
 0x6ff   :  { %5648 = vmatprep.subr.bf16.mxu0 %v16226_v59 }
 0x702   :  { %5649 = vmatpush2.bf16.msra.mxu0 %v16232_v51 }
 0x703   :  { %5650 = vmatprep.subr.bf16.mxu0 %v16244_v12 }
 0x706   :  { %5651 = vmatpush2.bf16.msra.mxu0 %v16254_v1 }
 0x707   :  { %5652 = vmatprep.subr.bf16.mxu0 %v16268_v10 }
 0x70a   :  { %5653 = vmatpush2.bf16.msra.mxu0 %v16278_v15 }
 0x70b   :  { %5654 = vmatprep.subr.bf16.mxu0 %v16292_v9 }
 0x70e   :  { %5655 = vmatpush2.bf16.msra.mxu0 %v16302_v26 }
 0x70f   :  { %5656 = vmatprep.subr.bf16.mxu0 %v16316_v50 }
 0x712   :  { %5657 = vmatpush2.bf16.msra.mxu0 %v16326_v43 }
 0x713   :  { %5658 = vmatprep.subr.bf16.mxu0 %v16340_v13 }
 0x716   :  { %5659 = vmatpush2.bf16.msra.mxu0 %v16350_v62  ;;  %v16419_v62 = vld [vmem:[%s18595_s3 + $0x184] ss:$8 sps:$4 sm:$0xff]  }
 0x717   :  { %5660 = vmatprep.subr.bf16.mxu0 %v16364_v20  ;;  %v16412_v20 = vld [vmem:[%s18595_s3 + $0x190] ss:$8 sps:$4 sm:$0xff]  }
 0x71a   :  { %5661 = vmatpush2.bf16.msra.mxu0 %v16374_v37  ;;  %v16403_v37 = vld [vmem:[%s18595_s3 + $0x194] ss:$8 sps:$4 sm:$0xff]  }
 0x71b   :  { %5662 = vmatprep.subr.bf16.mxu0 %v16398_v58  ;;  %5457 = vmatprep.subr.bf16.mxu1 %v16403_v37 }
 0x71c   :  { %5458 = vmatpush2.bf16.msra.mxu1 %v16412_v20 }
 0x71d   :  { %5459 = vmatprep.subr.bf16.mxu1 %v16419_v62 }
 0x71e   :  { %5663 = vmatpush2.bf16.msra.mxu0 %v16393_v4  ;;  %v16425_v4 = vld [vmem:[%s18595_s3 + $0x180] ss:$8 sps:$4 sm:$0xff]  }
 0x71f   :  { %6232 = vmatprep.subr.bf16.mxu0 %v16067_v2  ;;  %v16432_v2 = vld [vmem:[%s18595_s3 + $0x274] ss:$8 sps:$4 sm:$0xff]  }
 0x720   :  { %5460 = vmatpush2.bf16.msra.mxu1 %v16425_v4 }
 0x721   :  { %5887 = vmatprep.subr.bf16.mxu1 %v16432_v2 }
 0x758   :  { %v4859_v43 = vpop.f32.mrf.mxu1 }
 0x75a   :  { %v4861_v26 = vpop.f32.mrf.mxu1 }
 0x75c   :  { %v4863_v10 = vpop.f32.mrf.mxu1 }
 0x75e   :  { %v4865_v38 = vpop.f32.mrf.mxu1 }
 0x761   :  { %v4656_v58 = vpop.f32.mrf.mxu0 }
 0x762   :  { %v4860_v15 = vadd.f32 %v4859_v43, %v4656_v58  ;;  %v18952_v43 = vmax.f32 %v18951_v31, 0.0 }
 0x763   :  { %v4658_v13 = vpop.f32.mrf.mxu0 }
 0x764   :  { %v4862_v12 = vadd.f32 %v4861_v26, %v4658_v13 }
 0x765   :  { %v4660_v50 = vpop.f32.mrf.mxu0 }
 0x766   :  { %v4864_v27 = vadd.f32 %v4863_v10, %v4660_v50 }
 0x767   :  { %v4662_v9 = vpop.f32.mrf.mxu0 }
 0x768   :  { %v4866_v36 = vadd.f32 %v4865_v38, %v4662_v9  ;;  %v18960_v9 = vld [vmem:[#allocation11_spill] sm:$0xff] }
 0x769   :  { %v18961_v26 = vmax.f32 %v18960_v9, 0.0 }
 0x7a1   :  { %v5114_v1 = vpop.f32.mrf.mxu0 }
 0x7a2   :  { %v5123_v51 = vadd.f32 %v5114_v1, %v4860_v15 }
 0x7a3   :  { %v5116_v59 = vpop.f32.mrf.mxu0 }
 0x7a4   :  { %v5127_v24 = vadd.f32 %v5123_v51, %v14516_v34  ;;  %v5124_v17 = vadd.f32 %v5116_v59, %v4862_v12  ;;  %v18954_v51 = vld [vmem:[#allocation40_spill] sm:$0xff] }
 0x7a5   :  { %v5118_v40 = vpop.f32.mrf.mxu0  ;;  %v18955_v12 = vmax.f32 %v18954_v51, 0.0 }
 0x7a6   :  { %v5131_v28 = vmul.f32 %v14101_v49, %v5127_v24  ;;  %v5128_v30 = vadd.f32 %v5124_v17, %v14520_v41  ;;  %v5125_v16 = vadd.f32 %v5118_v40, %v4864_v27  ;;  %v18957_v17 = vld [vmem:[#allocation10_spill] sm:$0xff] }
 0x7a7   :  { %v5120_v45 = vpop.f32.mrf.mxu0 }
 0x7a8   :  { %v16440_v58 = vadd.f32 %v5131_v28, %v18952_v43  ;;  %v5132_v1 = vmul.f32 %v14101_v49, %v5128_v30  ;;  %v5129_v10 = vadd.f32 %v5125_v16, %v14516_v34  ;;  %v5126_v15 = vadd.f32 %v5120_v45, %v4866_v36 }
 0x7a9   :  { %v18958_v30 = vmax.f32 %v18957_v17, 0.0 }
 0x7aa   :  { %18953 = vst [vmem:[#allocation38_spill] sm:$0xff] %v16440_v58  ;;  %v18715_v59 = vmax.f32 %v16440_v58, 0.0  ;;  %v16447_v38 = vadd.f32 %v5132_v1, %v18955_v12  ;;  %v5133_v24 = vmul.f32 %v14109_v61, %v5129_v10  ;;  %v5130_v40 = vadd.f32 %v5126_v15, %v14520_v41 }
 0x7ac   :  { %18956 = vst [vmem:[#allocation40_spill] sm:$0xff] %v16447_v38  ;;  %v5147_v31 = vrot.slane %v18715_v59, 7  ;;  %v18714_v28 = vmax.f32 %v16447_v38, 0.0  ;;  %v16456_v27 = vadd.f32 %v5133_v24, %v18958_v30  ;;  %v5134_v45 = vmul.f32 %v14109_v61, %v5130_v40 }
 0x7ae   :  { %18959 = vst [vmem:[#allocation10_spill] sm:$0xff] %v16456_v27  ;;  %5159 = vst [vmem:[#allocation3] sm:$0xfe] %v5147_v31  ;;  %v5148_v16 = vrot.slane %v18714_v28, 7  ;;  %v18712_v36 = vmax.f32 %v16456_v27, 0.0  ;;  %v16464_v50 = vadd.f32 %v5134_v45, %v18961_v26 }
 0x7b0   :  { %18962 = vst [vmem:[#allocation11_spill] sm:$0xff] %v16464_v50  ;;  %5160 = vst [vmem:[#allocation3 + $0x8] sm:$0xfe] %v5148_v16  ;;  %v5149_v13 = vrot.slane %v18712_v36, 7  ;;  %v18713_v43 = vmax.f32 %v16464_v50, 0.0 }
 0x7b2   :  { %5163 = vst [vmem:[#allocation3 + $0x20] sm:$0x1] %v5149_v13  ;;  %v5151_v1 = vrot.slane %v18713_v43, 7  ;;  %v16472_v10 = vsel %vm301_vm9, %v5147_v31, %v5149_v13 }
 0x7b4   :  { %5164 = vst [vmem:[#allocation3 + $0x28] sm:$0x1] %v5151_v1  ;;  %v5152_v24 = vsel %vm301_vm9, %v5148_v16, %v5151_v1 }
 0x7b5   :  { %v5203_v15 = vld [vmem:[#allocation3] sm:$0xfe] }
 0x7b6   :  { %v5165_v51 = vld [vmem:[#allocation3] sm:$0xff]  ;;  %v5207_v12 = vpack.c.bf16 %v16472_v10, %v5203_v15 }
 0x7b7   :  { %v5166_v40 = vld [vmem:[#allocation3 + $0x8] sm:$0xff]  ;;  %v5169_v9 = vpack.c.bf16 %v16472_v10, %v5165_v51 }
 0x7b8   :  { %v5204_v17 = vld [vmem:[#allocation3 + $0x8] sm:$0xfe]  ;;  %v5170_v30 = vpack.c.bf16 %v5152_v24, %v5166_v40  ;;  %v5246_v36 = vshll.u32 %v5207_v12, 16  ;;  %v5244_v38 = vshrl.u32 %v5207_v12, 16 }
 0x7b9   :  { %v5208_v45 = vpack.c.bf16 %v5152_v24, %v5204_v17  ;;  %v5205_v26 = vld [vmem:[#allocation3 + $0x20] sm:$0x1]  ;;  %v5676_v13 = vld [vmem:[#allocation3 + $0x8] sm:$0xfc] }
 0x7ba   :  { %5664 = vmatprep.mubr.bf16.mxu0 %v5170_v30  ;;  %v5209_v28 = vpack.c.bf16 %v5205_v26, %v5205_v26  ;;  %v5248_v16 = vrot.slane %v5246_v36, 1  ;;  %v5680_v17 = vpack.c.bf16 %v5152_v24, %v5676_v13  ;;  %v16490_v36 = vld [vmem:[%s18595_s3 + $0x264] ss:$8 sps:$4 sm:$0xff]  }
 0x7bb   :  { %v5258_v43 = vshll.u32 %v5208_v45, 16  ;;  %5665 = vmatmul.mubr.bf16.vlgmr.msra.gmra.mxu0 %v5169_v9  ;;  %v5206_v31 = vld [vmem:[#allocation3 + $0x28] sm:$0x1]  ;;  %v5256_v40 = vshrl.u32 %v5208_v45, 16  ;;  %v18965_v13 = vld [vmem:[#allocation14_spill] sm:$0xff] }
 0x7bc   :  { %v5678_v59 = vld [vmem:[#allocation3 + $0x28] sm:$0x3]  ;;  %v5210_v50 = vpack.c.bf16 %v5206_v31, %v5206_v31  ;;  %v5251_v15 = vshll.u32 %v5209_v28, 16  ;;  %6233 = vmatpush1.bf16.msra.mxu0 %v16062_v11  ;;  %v16483_v28 = vld [vmem:[%s18595_s3 + $0x270] ss:$8 sps:$4 sm:$0xff]   ;;  %v5249_v11 = vor.u32 %v5248_v16, %v5244_v38  ;;  %v18964_v31 = vld [vmem:[#allocation13_spill] sm:$0xff] }
 0x7bd   :  { %v5260_v27 = vrot.slane %v5258_v43, 1  ;;  %v5682_v1 = vpack.c.bf16 %v5678_v59, %v5678_v59  ;;  %6234 = vmatprep.subr.bf16.mxu0 %v16080_v42  ;;  %v5722_v59 = vrot.slane %v5680_v17, 1  ;;  %v16520_v38 = vld [vmem:[%s18595_s3 + $0x244] ss:$8 sps:$4 sm:$0xff]  }
 0x7be   :  { %v5263_v51 = vshll.u32 %v5210_v50, 16  ;;  %v5253_v30 = vrot.slane %v5251_v15, 1  ;;  %v5675_v50 = vld [vmem:[#allocation3] sm:$0xfc]  ;;  %v18966_v15 = vld [vmem:[#allocation15_spill] sm:$0xff]  ;;  %v18968_v16 = vld [vmem:[#allocation17_spill] sm:$0xff] }
 0x7bf   :  { %v5261_v58 = vor.u32 %v5260_v27, %v5256_v40  ;;  %v5723_v9 = vrot.slane %v5682_v1, 1  ;;  %v5679_v12 = vpack.c.bf16 %v16472_v10, %v5675_v50  ;;  %v18963_v10 = vld [vmem:[#allocation12_spill] sm:$0xff]  ;;  %v18969_v1 = vld [vmem:[#allocation18_spill] sm:$0xff]  ;;  %v18974_v40 = vld [vmem:[#allocation23_spill] sm:$0xff] }
 0x7c0   :  { %v5265_v26 = vrot.slane %v5263_v51, 1  ;;  %6235 = vmatpush1.bf16.msra.mxu0 %v16092_v14  ;;  %v5254_v27 = vsel %vm399_vm10, %v5249_v11, %v5253_v30  ;;  %v18975_v51 = vld [vmem:[#allocation24_spill] sm:$0xff]  ;;  %v18976_v17 = vld [vmem:[#allocation25_spill] sm:$0xff]  ;;  %v18977_v30 = vld [vmem:[#allocation26_spill] sm:$0xff] }
 0x7c1   :  { %6236 = vmatprep.subr.bf16.mxu0 %v16098_v33  ;;  %v5724_v14 = vsel %vm877_vm11, %v5722_v59, %v5723_v9  ;;  %v16499_v33 = vld [vmem:[%s18595_s3 + $0x260] ss:$8 sps:$4 sm:$0xff]   ;;  %v5719_v24 = vrot.slane %v5679_v12, 1  ;;  %v18982_v59 = vld [vmem:[#allocation31_spill] sm:$0xff] }
 0x7c2   :  { %v5266_v42 = vsel %vm399_vm10, %v5261_v58, %v5265_v26  ;;  %v16505_v58 = vld [vmem:[%s18595_s3 + $0x254] ss:$8 sps:$4 sm:$0xff]   ;;  %v18980_v11 = vld [vmem:[#allocation29_spill] sm:$0xff] }
 0x7c3   :  { %5461 = vmatprep.mubr.bf16.mxu1 %v5266_v42  ;;  %v18978_v26 = vld [vmem:[#allocation27_spill] sm:$0xff]  ;;  %v18979_v9 = vld [vmem:[#allocation28_spill] sm:$0xff]  ;;  %v18981_v42 = vld [vmem:[#allocation30_spill] sm:$0xff] }
 0x7c4   :  { %5462 = vmatmul.mubr.bf16.vlgmr.msra.gmra.mxu1 %v5254_v27  ;;  %6237 = vmatpush1.bf16.msra.mxu0 %v16116_v5  ;;  %v16513_v5 = vld [vmem:[%s18595_s3 + $0x250] ss:$8 sps:$4 sm:$0xff]   ;;  %v18988_v12 = vld [vmem:[#allocation37_spill] sm:$0xff] }
 0x7c5   :  { %5888 = vmatpush1.bf16.msra.mxu1 %v16483_v28  ;;  %5919 = vmatprep.mubr.bf16.mxu1 %v5724_v14  ;;  %v18983_v27 = vld [vmem:[#allocation32_spill] sm:$0xff]  ;;  %v18984_v14 = vld [vmem:[#allocation33_spill] sm:$0xff]  ;;  %v18986_v50 = vld [vmem:[#allocation35_spill] sm:$0xff] }
 0x7c6   :  { %5889 = vmatprep.subr.bf16.mxu1 %v16490_v36  ;;  %6238 = vmatprep.subr.bf16.mxu0 %v16122_v19  ;;  %v16527_v19 = vld [vmem:[%s18595_s3 + $0x240] ss:$8 sps:$4 sm:$0xff]  }
 0x7c8   :  { %6239 = vmatpush1.bf16.msra.mxu0 %v16140_v18  ;;  %v16534_v18 = vld [vmem:[%s18595_s3 + $0x234] ss:$8 sps:$4 sm:$0xff]  }
 0x7c9   :  { %5890 = vmatpush1.bf16.msra.mxu1 %v16499_v33  ;;  %6240 = vmatprep.subr.bf16.mxu0 %v16146_v63  ;;  %v16541_v63 = vld [vmem:[%s18595_s3 + $0x230] ss:$8 sps:$4 sm:$0xff]  }
 0x7ca   :  { %5891 = vmatprep.subr.bf16.mxu1 %v16505_v58 }
 0x7cc   :  { %6241 = vmatpush1.bf16.msra.mxu0 %v16164_v53  ;;  %v16548_v53 = vld [vmem:[%s18595_s3 + $0x224] ss:$8 sps:$4 sm:$0xff]  }
 0x7cd   :  { %5892 = vmatpush1.bf16.msra.mxu1 %v16513_v5  ;;  %6242 = vmatprep.subr.bf16.mxu0 %v16170_v57  ;;  %v16555_v57 = vld [vmem:[%s18595_s3 + $0x220] ss:$8 sps:$4 sm:$0xff]  }
 0x7ce   :  { %5893 = vmatprep.subr.bf16.mxu1 %v16520_v38 }
 0x7d0   :  { %6243 = vmatpush1.bf16.msra.mxu0 %v16188_v39  ;;  %v16562_v39 = vld [vmem:[%s18595_s3 + $0x214] ss:$8 sps:$4 sm:$0xff]  }
 0x7d1   :  { %5894 = vmatpush1.bf16.msra.mxu1 %v16527_v19  ;;  %6244 = vmatprep.subr.bf16.mxu0 %v16194_v56  ;;  %v16569_v56 = vld [vmem:[%s18595_s3 + $0x210] ss:$8 sps:$4 sm:$0xff]  }
 0x7d2   :  { %5895 = vmatprep.subr.bf16.mxu1 %v16534_v18 }
 0x7d4   :  { %6245 = vmatpush1.bf16.msra.mxu0 %v16212_v21  ;;  %v16576_v21 = vld [vmem:[%s18595_s3 + $0x204] ss:$8 sps:$4 sm:$0xff]  }
 0x7d5   :  { %5896 = vmatpush1.bf16.msra.mxu1 %v16541_v63  ;;  %6246 = vmatprep.subr.bf16.mxu0 %v16239_v25  ;;  %v16583_v25 = vld [vmem:[%s18595_s3 + $0x200] ss:$8 sps:$4 sm:$0xff]  }
 0x7d6   :  { %5897 = vmatprep.subr.bf16.mxu1 %v16548_v53 }
 0x7d8   :  { %6247 = vmatpush1.bf16.msra.mxu0 %v16249_v23  ;;  %v16590_v23 = vld [vmem:[%s18595_s3 + $0x2f4] ss:$8 sps:$4 sm:$0xff]  }
 0x7d9   :  { %5898 = vmatpush1.bf16.msra.mxu1 %v16555_v57  ;;  %6248 = vmatprep.subr.bf16.mxu0 %v16263_v22  ;;  %v16597_v22 = vld [vmem:[%s18595_s3 + $0x2f0] ss:$8 sps:$4 sm:$0xff]  }
 0x7da   :  { %5899 = vmatprep.subr.bf16.mxu1 %v16562_v39 }
 0x7dc   :  { %6249 = vmatpush2.bf16.msra.mxu0 %v16273_v32  ;;  %v16604_v32 = vld [vmem:[%s18595_s3 + $0x2e4] ss:$8 sps:$4 sm:$0xff]  }
 0x7dd   :  { %5900 = vmatpush1.bf16.msra.mxu1 %v16569_v56  ;;  %6250 = vmatprep.subr.bf16.mxu0 %v16287_v29  ;;  %v16611_v29 = vld [vmem:[%s18595_s3 + $0x2e0] ss:$8 sps:$4 sm:$0xff]  }
 0x7de   :  { %5901 = vmatprep.subr.bf16.mxu1 %v16576_v21 }
 0x7e0   :  { %6251 = vmatpush2.bf16.msra.mxu0 %v16297_v8  ;;  %v16618_v8 = vld [vmem:[%s18595_s3 + $0x2d4] ss:$8 sps:$4 sm:$0xff]  }
 0x7e1   :  { %5902 = vmatpush1.bf16.msra.mxu1 %v16583_v25  ;;  %6252 = vmatprep.subr.bf16.mxu0 %v16311_v52  ;;  %v16625_v52 = vld [vmem:[%s18595_s3 + $0x2d0] ss:$8 sps:$4 sm:$0xff]  }
 0x7e2   :  { %5903 = vmatprep.subr.bf16.mxu1 %v16590_v23 }
 0x7e4   :  { %6253 = vmatpush2.bf16.msra.mxu0 %v16321_v46  ;;  %v16632_v46 = vld [vmem:[%s18595_s3 + $0x2c4] ss:$8 sps:$4 sm:$0xff]  }
 0x7e5   :  { %5904 = vmatpush2.bf16.msra.mxu1 %v16597_v22  ;;  %6254 = vmatprep.subr.bf16.mxu0 %v16335_v44  ;;  %v16639_v44 = vld [vmem:[%s18595_s3 + $0x2c0] ss:$8 sps:$4 sm:$0xff]  }
 0x7e6   :  { %5905 = vmatprep.subr.bf16.mxu1 %v16604_v32 }
 0x7e8   :  { %6255 = vmatpush2.bf16.msra.mxu0 %v16345_v60  ;;  %v16646_v60 = vld [vmem:[%s18595_s3 + $0x2b4] ss:$8 sps:$4 sm:$0xff]  }
 0x7e9   :  { %5906 = vmatpush2.bf16.msra.mxu1 %v16611_v29  ;;  %6256 = vmatprep.subr.bf16.mxu0 %v16359_v47  ;;  %v16653_v47 = vld [vmem:[%s18595_s3 + $0x2b0] ss:$8 sps:$4 sm:$0xff]  }
 0x7ea   :  { %5907 = vmatprep.subr.bf16.mxu1 %v16618_v8 }
 0x7ec   :  { %6257 = vmatpush2.bf16.msra.mxu0 %v16369_v48  ;;  %v16660_v48 = vld [vmem:[%s18595_s3 + $0x2a4] ss:$8 sps:$4 sm:$0xff]  }
 0x7ed   :  { %5908 = vmatpush2.bf16.msra.mxu1 %v16625_v52  ;;  %6258 = vmatprep.subr.bf16.mxu0 %v16388_v6  ;;  %v5677_v6 = vld [vmem:[#allocation3 + $0x20] sm:$0x3] }
 0x7ee   :  { %5909 = vmatprep.subr.bf16.mxu1 %v16632_v46  ;;  %v5681_v43 = vpack.c.bf16 %v5677_v6, %v5677_v6  ;;  %v18985_v6 = vld [vmem:[#allocation34_spill] sm:$0xff] }
 0x7f0   :  { %6259 = vmatpush2.bf16.msra.mxu0 %v16383_v54  ;;  %v16667_v54 = vld [vmem:[%s18595_s3 + $0x2a0] ss:$8 sps:$4 sm:$0xff]  }
 0x7f1   :  { %5910 = vmatpush2.bf16.msra.mxu1 %v16639_v44  ;;  %6260 = vmatprep.subr.bf16.mxu0 %v16403_v37  ;;  %v16674_v37 = vld [vmem:[%s18595_s3 + $0x294] ss:$8 sps:$4 sm:$0xff]  }
 0x7f2   :  { %5911 = vmatprep.subr.bf16.mxu1 %v16646_v60 }
 0x7f4   :  { %6261 = vmatpush2.bf16.msra.mxu0 %v16412_v20  ;;  %v16681_v20 = vld [vmem:[%s18595_s3 + $0x290] ss:$8 sps:$4 sm:$0xff]  }
 0x7f5   :  { %5912 = vmatpush2.bf16.msra.mxu1 %v16653_v47  ;;  %6262 = vmatprep.subr.bf16.mxu0 %v16419_v62  ;;  %v16688_v62 = vld [vmem:[%s18595_s3 + $0x284] ss:$8 sps:$4 sm:$0xff]  }
 0x7f6   :  { %5913 = vmatprep.subr.bf16.mxu1 %v16660_v48 }
 0x7f8   :  { %6263 = vmatpush2.bf16.msra.mxu0 %v16425_v4  ;;  %v16694_v4 = vld [vmem:[%s18595_s3 + $0x280] ss:$8 sps:$4 sm:$0xff]  }
 0x7f9   :  { %5914 = vmatpush2.bf16.msra.mxu1 %v16667_v54  ;;  %6690 = vmatprep.subr.bf16.mxu0 %v16432_v2  ;;  %v5720_v2 = vrot.slane %v5681_v43, 1  ;;  %v18987_v43 = vld [vmem:[#allocation36_spill] sm:$0xff] }
 0x7fa   :  { %5915 = vmatprep.subr.bf16.mxu1 %v16674_v37 }
 0x7fb   :  { %v5721_v45 = vsel %vm877_vm11, %v5719_v24, %v5720_v2  ;;  %v18989_v2 = vld [vmem:[#allocation39_spill] sm:$0xff] }
 0x7fd   :  { %5916 = vmatpush2.bf16.msra.mxu1 %v16681_v20 }
 0x7fe   :  { %5917 = vmatprep.subr.bf16.mxu1 %v16688_v62 }
 0x801   :  { %5918 = vmatpush2.bf16.msra.mxu1 %v16694_v4 }
 0x802   :  { %6435 = vmatprep.subr.bf16.mxu1 %v16052_v3  ;;  %v18967_v3 = vld [vmem:[#allocation16_spill] sm:$0xff] }
 0x804   :  { %5920 = vmatmul.mubr.bf16.vlgmr.msra.gmra.mxu1 %v5721_v45 }
 0x805   :  { %6436 = vmatpush1.bf16.msra.mxu1 %v16047_v35  ;;  %v18970_v35 = vld [vmem:[#allocation19_spill] sm:$0xff] }
 0x806   :  { %6437 = vmatprep.subr.bf16.mxu1 %v16057_v55  ;;  %v18971_v55 = vld [vmem:[#allocation20_spill] sm:$0xff] }
 0x809   :  { %6438 = vmatpush1.bf16.msra.mxu1 %v16074_v0  ;;  %v18972_v0 = vld [vmem:[#allocation21_spill] sm:$0xff] }
 0x80a   :  { %6439 = vmatprep.subr.bf16.mxu1 %v16087_v7  ;;  %v18973_v7 = vld [vmem:[#allocation22_spill] sm:$0xff] }
 0x80d   :  { %6440 = vmatpush1.bf16.msra.mxu1 %v18963_v10 }
 0x80e   :  { %6441 = vmatprep.subr.bf16.mxu1 %v18964_v31 }
 0x811   :  { %6442 = vmatpush1.bf16.msra.mxu1 %v18965_v13 }
 0x812   :  { %6443 = vmatprep.subr.bf16.mxu1 %v18966_v15 }
 0x815   :  { %6444 = vmatpush1.bf16.msra.mxu1 %v18967_v3 }
 0x816   :  { %6445 = vmatprep.subr.bf16.mxu1 %v18968_v16 }
 0x819   :  { %6446 = vmatpush1.bf16.msra.mxu1 %v18969_v1 }
 0x81a   :  { %6447 = vmatprep.subr.bf16.mxu1 %v18970_v35 }
 0x81d   :  { %6448 = vmatpush1.bf16.msra.mxu1 %v18971_v55 }
 0x81e   :  { %6449 = vmatprep.subr.bf16.mxu1 %v18972_v0 }
 0x821   :  { %6450 = vmatpush1.bf16.msra.mxu1 %v18973_v7 }
 0x822   :  { %6451 = vmatprep.subr.bf16.mxu1 %v18974_v40 }
 0x825   :  { %6452 = vmatpush2.bf16.msra.mxu1 %v18975_v51 }
 0x826   :  { %6453 = vmatprep.subr.bf16.mxu1 %v18976_v17 }
 0x829   :  { %6454 = vmatpush2.bf16.msra.mxu1 %v18977_v30 }
 0x82a   :  { %6455 = vmatprep.subr.bf16.mxu1 %v18978_v26 }
 0x82d   :  { %6456 = vmatpush2.bf16.msra.mxu1 %v18979_v9 }
 0x82e   :  { %6457 = vmatprep.subr.bf16.mxu1 %v18980_v11 }
 0x831   :  { %6458 = vmatpush2.bf16.msra.mxu1 %v18981_v42 }
 0x832   :  { %6459 = vmatprep.subr.bf16.mxu1 %v18982_v59 }
 0x835   :  { %6460 = vmatpush2.bf16.msra.mxu1 %v18983_v27 }
 0x836   :  { %6461 = vmatprep.subr.bf16.mxu1 %v18984_v14 }
 0x839   :  { %6462 = vmatpush2.bf16.msra.mxu1 %v18985_v6 }
 0x83a   :  { %6463 = vmatprep.subr.bf16.mxu1 %v18986_v50 }
 0x83d   :  { %6464 = vmatpush2.bf16.msra.mxu1 %v18987_v43 }
 0x83e   :  { %6465 = vmatprep.subr.bf16.mxu1 %v18988_v12 }
 0x841   :  { %6466 = vmatpush2.bf16.msra.mxu1 %v18989_v2 }
 0x87b   :  { %v5666_v10 = vpop.f32.mrf.mxu0 }
 0x87d   :  { %v5668_v13 = vpop.f32.mrf.mxu0 }
 0x87f   :  { %v5670_v16 = vpop.f32.mrf.mxu0 }
 0x881   :  { %v5672_v17 = vpop.f32.mrf.mxu0 }
 0x884   :  { %v5463_v24 = vpop.f32.mrf.mxu1 }
 0x885   :  { %v5667_v3 = vadd.f32 %v5666_v10, %v5463_v24 }
 0x886   :  { %v5465_v45 = vpop.f32.mrf.mxu1 }
 0x887   :  { %v5669_v35 = vadd.f32 %v5668_v13, %v5465_v45 }
 0x888   :  { %v5467_v31 = vpop.f32.mrf.mxu1 }
 0x889   :  { %v5671_v7 = vadd.f32 %v5670_v16, %v5467_v31 }
 0x88a   :  { %v5469_v15 = vpop.f32.mrf.mxu1 }
 0x88b   :  { %v5673_v26 = vadd.f32 %v5672_v17, %v5469_v15 }
 0x8c4   :  { %v5921_v1 = vpop.f32.mrf.mxu1 }
 0x8c5   :  { %v5930_v55 = vadd.f32 %v5921_v1, %v5667_v3 }
 0x8c6   :  { %v5923_v0 = vpop.f32.mrf.mxu1 }
 0x8c7   :  { %v5934_v40 = vadd.f32 %v5930_v55, %v14516_v34  ;;  %v5931_v51 = vadd.f32 %v5923_v0, %v5669_v35 }
 0x8c8   :  { %v5925_v30 = vpop.f32.mrf.mxu1 }
 0x8c9   :  { %v5938_v9 = vmax.f32 %v5934_v40, 0.0  ;;  %v5935_v11 = vadd.f32 %v5931_v51, %v14520_v41  ;;  %v5932_v42 = vadd.f32 %v5925_v30, %v5671_v7 }
 0x8ca   :  { %v5927_v59 = vpop.f32.mrf.mxu1 }
 0x8cb   :  { %v5942_v27 = vmul.f32 %v14101_v49, %v5938_v9  ;;  %v5939_v14 = vmax.f32 %v5935_v11, 0.0  ;;  %v5936_v6 = vadd.f32 %v5932_v42, %v14516_v34  ;;  %v5933_v50 = vadd.f32 %v5927_v59, %v5673_v26 }
 0x8cd   :  { %v5950_v43 = vrot.slane %v5942_v27, 7  ;;  %v5943_v12 = vmul.f32 %v14101_v49, %v5939_v14  ;;  %v5940_v2 = vmax.f32 %v5936_v6, 0.0  ;;  %v5937_v24 = vadd.f32 %v5933_v50, %v14520_v41 }
 0x8cf   :  { %5962 = vst [vmem:[#allocation4] sm:$0xfe] %v5950_v43  ;;  %v5951_v45 = vrot.slane %v5943_v12, 7  ;;  %v5944_v10 = vmul.f32 %v14109_v61, %v5940_v2  ;;  %v5941_v31 = vmax.f32 %v5937_v24, 0.0 }
 0x8d1   :  { %5963 = vst [vmem:[#allocation4 + $0x8] sm:$0xfe] %v5951_v45  ;;  %v5952_v13 = vrot.slane %v5944_v10, 7  ;;  %v5945_v15 = vmul.f32 %v14109_v61, %v5941_v31 }
 0x8d3   :  { %5966 = vst [vmem:[#allocation4 + $0x20] sm:$0x1] %v5952_v13  ;;  %v5954_v3 = vrot.slane %v5945_v15, 7  ;;  %v16741_v16 = vsel %vm301_vm9, %v5950_v43, %v5952_v13 }
 0x8d5   :  { %5967 = vst [vmem:[#allocation4 + $0x28] sm:$0x1] %v5954_v3  ;;  %v5955_v0 = vsel %vm301_vm9, %v5951_v45, %v5954_v3 }
 0x8d6   :  { %v6006_v1 = vld [vmem:[#allocation4] sm:$0xfe] }
 0x8d7   :  { %v5968_v35 = vld [vmem:[#allocation4] sm:$0xff]  ;;  %v6010_v55 = vpack.c.bf16 %v16741_v16, %v6006_v1 }
 0x8d8   :  { %v5969_v7 = vld [vmem:[#allocation4 + $0x8] sm:$0xff]  ;;  %v5972_v30 = vpack.c.bf16 %v16741_v16, %v5968_v35 }
 0x8d9   :  { %v6007_v40 = vld [vmem:[#allocation4 + $0x8] sm:$0xfe]  ;;  %v5973_v51 = vpack.c.bf16 %v5955_v0, %v5969_v7  ;;  %v6049_v9 = vshll.u32 %v6010_v55, 16  ;;  %v6047_v31 = vshrl.u32 %v6010_v55, 16 }
 0x8da   :  { %v6011_v17 = vpack.c.bf16 %v5955_v0, %v6007_v40  ;;  %v6008_v26 = vld [vmem:[#allocation4 + $0x20] sm:$0x1]  ;;  %v6479_v27 = vld [vmem:[#allocation4 + $0x8] sm:$0xfc] }
 0x8db   :  { %6467 = vmatprep.mubr.bf16.mxu1 %v5973_v51  ;;  %v6012_v42 = vpack.c.bf16 %v6008_v26, %v6008_v26  ;;  %v6051_v12 = vrot.slane %v6049_v9, 1  ;;  %v6483_v10 = vpack.c.bf16 %v5955_v0, %v6479_v27  ;;  %v16932_v55 = vld [vmem:[%s18595_s3 + $0x114] ss:$8 sps:$4 sm:$0xff]   ;;  %v16938_v0 = vld [vmem:[%s18595_s3 + $0x10] ss:$8 sps:$4 sm:$0xff]  }
 0x8dc   :  { %v6061_v11 = vshll.u32 %v6011_v17, 16  ;;  %6468 = vmatmul.mubr.bf16.vlgmr.msra.gmra.mxu1 %v5972_v30  ;;  %v6009_v59 = vld [vmem:[#allocation4 + $0x28] sm:$0x1]  ;;  %v6059_v24 = vshrl.u32 %v6011_v17, 16  ;;  %18998 = vst [vmem:[#allocation20_spill] sm:$0xff] %v16938_v0 }
 0x8dd   :  { %v6481_v14 = vld [vmem:[#allocation4 + $0x28] sm:$0x3]  ;;  %v6013_v6 = vpack.c.bf16 %v6009_v59, %v6009_v59  ;;  %v6054_v43 = vshll.u32 %v6012_v42, 16  ;;  %v6052_v35 = vor.u32 %v6051_v12, %v6047_v31  ;;  %v6525_v40 = vrot.slane %v6483_v10, 1  ;;  %v16945_v17 = vld [vmem:[%s18595_s3 + $0x4] ss:$8 sps:$4 sm:$0xff]  }
 0x8de   :  { %v6063_v50 = vrot.slane %v6061_v11, 1  ;;  %v6485_v2 = vpack.c.bf16 %v6481_v14, %v6481_v14  ;;  %18999 = vst [vmem:[#allocation21_spill] sm:$0xff] %v16945_v17  ;;  %v16950_v26 = vld [vmem:[%s18595_s3 + $0x110] ss:$8 sps:$4 sm:$0xff]   ;;  %v16957_v9 = vld [vmem:[%s18595_s3] ss:$8 sps:$4 sm:$0xff]  }
 0x8df   :  { %v6066_v45 = vshll.u32 %v6013_v6, 16  ;;  %v6056_v13 = vrot.slane %v6054_v43, 1  ;;  %19000 = vst [vmem:[#allocation22_spill] sm:$0xff] %v16957_v9  ;;  %v16964_v11 = vld [vmem:[%s18595_s3 + $0xf4] ss:$8 sps:$4 sm:$0xff]  }
 0x8e0   :  { %v6064_v15 = vor.u32 %v6063_v50, %v6059_v24  ;;  %v6526_v1 = vrot.slane %v6485_v2, 1  ;;  %19001 = vst [vmem:[#allocation23_spill] sm:$0xff] %v16964_v11  ;;  %v16970_v42 = vld [vmem:[%s18595_s3 + $0xf0] ss:$8 sps:$4 sm:$0xff]   ;;  %v16977_v59 = vld [vmem:[%s18595_s3 + $0x104] ss:$8 sps:$4 sm:$0xff]  }
 0x8e1   :  { %v6068_v3 = vrot.slane %v6066_v45, 1  ;;  %v6057_v51 = vsel %vm399_vm10, %v6052_v35, %v6056_v13  ;;  %19002 = vst [vmem:[#allocation24_spill] sm:$0xff] %v16970_v42  ;;  %v16982_v27 = vld [vmem:[%s18595_s3 + $0xe4] ss:$8 sps:$4 sm:$0xff]   ;;  %v16987_v14 = vld [vmem:[%s18595_s3 + $0x100] ss:$8 sps:$4 sm:$0xff]  }
 0x8e2   :  { %v6527_v30 = vsel %vm877_vm11, %v6525_v40, %v6526_v1  ;;  %19003 = vst [vmem:[#allocation25_spill] sm:$0xff] %v16982_v27  ;;  %v16992_v6 = vld [vmem:[%s18595_s3 + $0xe0] ss:$8 sps:$4 sm:$0xff]   ;;  %v17001_v50 = vld [vmem:[%s18595_s3 + $0x1f4] ss:$8 sps:$4 sm:$0xff]  }
 0x8e3   :  { %v6069_v7 = vsel %vm399_vm10, %v6064_v15, %v6068_v3  ;;  %19004 = vst [vmem:[#allocation26_spill] sm:$0xff] %v16992_v6  ;;  %v17006_v43 = vld [vmem:[%s18595_s3 + $0xd4] ss:$8 sps:$4 sm:$0xff]   ;;  %v17011_v12 = vld [vmem:[%s18595_s3 + $0x1f0] ss:$8 sps:$4 sm:$0xff]  }
 0x8e4   :  { %6264 = vmatprep.mubr.bf16.mxu0 %v6069_v7  ;;  %19005 = vst [vmem:[#allocation27_spill] sm:$0xff] %v17006_v43  ;;  %v17016_v2 = vld [vmem:[%s18595_s3 + $0xd0] ss:$8 sps:$4 sm:$0xff]   ;;  %v17025_v24 = vld [vmem:[%s18595_s3 + $0x1e4] ss:$8 sps:$4 sm:$0xff]  }
 0x8e5   :  { %6265 = vmatmul.mubr.bf16.vlgmr.msra.gmra.mxu0 %v6057_v51  ;;  %19006 = vst [vmem:[#allocation28_spill] sm:$0xff] %v17016_v2  ;;  %v17030_v45 = vld [vmem:[%s18595_s3 + $0xc4] ss:$8 sps:$4 sm:$0xff]   ;;  %v17035_v10 = vld [vmem:[%s18595_s3 + $0x1e0] ss:$8 sps:$4 sm:$0xff]  }
 0x8e6   :  { %6691 = vmatpush1.bf16.msra.mxu0 %v16483_v28  ;;  %6722 = vmatprep.mubr.bf16.mxu0 %v6527_v30  ;;  %v6480_v28 = vld [vmem:[#allocation4 + $0x20] sm:$0x3]  ;;  %19007 = vst [vmem:[#allocation29_spill] sm:$0xff] %v17030_v45  ;;  %v17049_v13 = vld [vmem:[%s18595_s3 + $0x1d4] ss:$8 sps:$4 sm:$0xff]  }
 0x8e7   :  { %6692 = vmatprep.subr.bf16.mxu0 %v16490_v36  ;;  %v6478_v36 = vld [vmem:[#allocation4] sm:$0xfc]  ;;  %v17054_v15 = vld [vmem:[%s18595_s3 + $0xb4] ss:$8 sps:$4 sm:$0xff]   ;;  %v17059_v3 = vld [vmem:[%s18595_s3 + $0x1d0] ss:$8 sps:$4 sm:$0xff]  }
 0x8e8   :  { %v17040_v31 = vld [vmem:[%s18595_s3 + $0xc0] ss:$8 sps:$4 sm:$0xff]   ;;  %19009 = vst [vmem:[#allocation31_spill] sm:$0xff] %v17054_v15  ;;  %v17064_v1 = vld [vmem:[%s18595_s3 + $0xb0] ss:$8 sps:$4 sm:$0xff]  }
 0x8e9   :  { %19008 = vst [vmem:[#allocation30_spill] sm:$0xff] %v17040_v31  ;;  %19010 = vst [vmem:[#allocation32_spill] sm:$0xff] %v17064_v1  ;;  %v17073_v35 = vld [vmem:[%s18595_s3 + $0x1c4] ss:$8 sps:$4 sm:$0xff]   ;;  %v17083_v40 = vld [vmem:[%s18595_s3 + $0x1c0] ss:$8 sps:$4 sm:$0xff]  }
 0x8ea   :  { %6693 = vmatpush1.bf16.msra.mxu0 %v16499_v33  ;;  %v6484_v33 = vpack.c.bf16 %v6480_v28, %v6480_v28  ;;  %v17078_v7 = vld [vmem:[%s18595_s3 + $0xa4] ss:$8 sps:$4 sm:$0xff]   ;;  %v17088_v51 = vld [vmem:[%s18595_s3 + $0xa0] ss:$8 sps:$4 sm:$0xff]   ;;  %v17097_v30 = vld [vmem:[%s18595_s3 + $0x1b4] ss:$8 sps:$4 sm:$0xff]  }
 0x8eb   :  { %6694 = vmatprep.subr.bf16.mxu0 %v16505_v58  ;;  %v6482_v58 = vpack.c.bf16 %v16741_v16, %v6478_v36  ;;  %v16926_v16 = vld [vmem:[%s18595_s3 + $0x120] ss:$8 sps:$4 sm:$0xff]   ;;  %19011 = vst [vmem:[#allocation33_spill] sm:$0xff] %v17078_v7  ;;  %19012 = vst [vmem:[#allocation34_spill] sm:$0xff] %v17088_v51  ;;  %v17102_v28 = vld [vmem:[%s18595_s3 + $0x94] ss:$8 sps:$4 sm:$0xff]  }
 0x8ec   :  { %19013 = vst [vmem:[#allocation35_spill] sm:$0xff] %v17102_v28  ;;  %v17107_v36 = vld [vmem:[%s18595_s3 + $0x1b0] ss:$8 sps:$4 sm:$0xff]  }
 0x8ee   :  { %6695 = vmatpush1.bf16.msra.mxu0 %v16513_v5  ;;  %v6523_v5 = vrot.slane %v6484_v33, 1  ;;  %v17112_v33 = vld [vmem:[%s18595_s3 + $0x90] ss:$8 sps:$4 sm:$0xff]  }
 0x8ef   :  { %6696 = vmatprep.subr.bf16.mxu0 %v16520_v38  ;;  %v6522_v38 = vrot.slane %v6482_v58, 1  ;;  %19014 = vst [vmem:[#allocation36_spill] sm:$0xff] %v17112_v33  ;;  %v17121_v58 = vld [vmem:[%s18595_s3 + $0x1a0] ss:$8 sps:$4 sm:$0xff]  }
 0x8f2   :  { %6697 = vmatpush1.bf16.msra.mxu0 %v16527_v19  ;;  %v6524_v19 = vsel %vm877_vm11, %v6522_v38, %v6523_v5  ;;  %v17126_v5 = vld [vmem:[%s18595_s3 + $0x1a4] ss:$8 sps:$4 sm:$0xff]   ;;  %v17131_v38 = vld [vmem:[%s18595_s3 + $0x80] ss:$8 sps:$4 sm:$0xff]  }
 0x8f3   :  { %6698 = vmatprep.subr.bf16.mxu0 %v16534_v18  ;;  %v16785_v18 = vld [vmem:[%s18595_s3 + $0x70] ss:$8 sps:$4 sm:$0xff]   ;;  %19015 = vst [vmem:[#allocation37_spill] sm:$0xff] %v17131_v38 }
 0x8f6   :  { %6699 = vmatpush1.bf16.msra.mxu0 %v16541_v63  ;;  %v16790_v63 = vld [vmem:[%s18595_s3 + $0x74] ss:$8 sps:$4 sm:$0xff]  }
 0x8f7   :  { %6700 = vmatprep.subr.bf16.mxu0 %v16548_v53  ;;  %v16795_v53 = vld [vmem:[%s18595_s3 + $0x64] ss:$8 sps:$4 sm:$0xff]  }
 0x8fa   :  { %6701 = vmatpush1.bf16.msra.mxu0 %v16555_v57  ;;  %v16800_v57 = vld [vmem:[%s18595_s3 + $0x170] ss:$8 sps:$4 sm:$0xff]  }
 0x8fb   :  { %6702 = vmatprep.subr.bf16.mxu0 %v16562_v39  ;;  %v16805_v39 = vld [vmem:[%s18595_s3 + $0x174] ss:$8 sps:$4 sm:$0xff]  }
 0x8fc   :  { %7039 = vmatprep.subr.bf16.mxu1 %v16805_v39 }
 0x8fd   :  { %7040 = vmatpush1.bf16.msra.mxu1 %v16800_v57 }
 0x8fe   :  { %6703 = vmatpush1.bf16.msra.mxu0 %v16569_v56  ;;  %v16812_v56 = vld [vmem:[%s18595_s3 + $0x60] ss:$8 sps:$4 sm:$0xff]  }
 0x8ff   :  { %6704 = vmatprep.subr.bf16.mxu0 %v16576_v21  ;;  %v16818_v21 = vld [vmem:[%s18595_s3 + $0x164] ss:$8 sps:$4 sm:$0xff]  }
 0x900   :  { %7041 = vmatprep.subr.bf16.mxu1 %v16818_v21 }
 0x902   :  { %6705 = vmatpush1.bf16.msra.mxu0 %v16583_v25  ;;  %v16825_v25 = vld [vmem:[%s18595_s3 + $0x54] ss:$8 sps:$4 sm:$0xff]  }
 0x903   :  { %6706 = vmatprep.subr.bf16.mxu0 %v16590_v23  ;;  %v16830_v23 = vld [vmem:[%s18595_s3 + $0x160] ss:$8 sps:$4 sm:$0xff]  }
 0x904   :  { %7042 = vmatpush1.bf16.msra.mxu1 %v16830_v23 }
 0x906   :  { %6707 = vmatpush2.bf16.msra.mxu0 %v16597_v22  ;;  %v16836_v22 = vld [vmem:[%s18595_s3 + $0x154] ss:$8 sps:$4 sm:$0xff]  }
 0x907   :  { %6708 = vmatprep.subr.bf16.mxu0 %v16604_v32  ;;  %v16842_v32 = vld [vmem:[%s18595_s3 + $0x50] ss:$8 sps:$4 sm:$0xff]   ;;  %7043 = vmatprep.subr.bf16.mxu1 %v16836_v22 }
 0x908   :  { %18990 = vst [vmem:[#allocation12_spill] sm:$0xff] %v16842_v32 }
 0x90a   :  { %6709 = vmatpush2.bf16.msra.mxu0 %v16611_v29  ;;  %v16849_v29 = vld [vmem:[%s18595_s3 + $0x44] ss:$8 sps:$4 sm:$0xff]  }
 0x90b   :  { %6710 = vmatprep.subr.bf16.mxu0 %v16618_v8  ;;  %18991 = vst [vmem:[#allocation13_spill] sm:$0xff] %v16849_v29  ;;  %v16854_v8 = vld [vmem:[%s18595_s3 + $0x150] ss:$8 sps:$4 sm:$0xff]  }
 0x90c   :  { %7044 = vmatpush1.bf16.msra.mxu1 %v16854_v8 }
 0x90e   :  { %6711 = vmatpush2.bf16.msra.mxu0 %v16625_v52  ;;  %v16860_v52 = vld [vmem:[%s18595_s3 + $0x144] ss:$8 sps:$4 sm:$0xff]  }
 0x90f   :  { %6712 = vmatprep.subr.bf16.mxu0 %v16632_v46  ;;  %v16866_v46 = vld [vmem:[%s18595_s3 + $0x40] ss:$8 sps:$4 sm:$0xff]   ;;  %7045 = vmatprep.subr.bf16.mxu1 %v16860_v52 }
 0x910   :  { %18992 = vst [vmem:[#allocation14_spill] sm:$0xff] %v16866_v46 }
 0x912   :  { %6713 = vmatpush2.bf16.msra.mxu0 %v16639_v44  ;;  %v16873_v44 = vld [vmem:[%s18595_s3 + $0x34] ss:$8 sps:$4 sm:$0xff]  }
 0x913   :  { %6714 = vmatprep.subr.bf16.mxu0 %v16646_v60  ;;  %18993 = vst [vmem:[#allocation15_spill] sm:$0xff] %v16873_v44  ;;  %v16878_v60 = vld [vmem:[%s18595_s3 + $0x140] ss:$8 sps:$4 sm:$0xff]  }
 0x914   :  { %7046 = vmatpush1.bf16.msra.mxu1 %v16878_v60 }
 0x916   :  { %6715 = vmatpush2.bf16.msra.mxu0 %v16653_v47  ;;  %v16884_v47 = vld [vmem:[%s18595_s3 + $0x134] ss:$8 sps:$4 sm:$0xff]  }
 0x917   :  { %6716 = vmatprep.subr.bf16.mxu0 %v16660_v48  ;;  %v16890_v48 = vld [vmem:[%s18595_s3 + $0x30] ss:$8 sps:$4 sm:$0xff]   ;;  %7047 = vmatprep.subr.bf16.mxu1 %v16884_v47 }
 0x918   :  { %18994 = vst [vmem:[#allocation16_spill] sm:$0xff] %v16890_v48 }
 0x91a   :  { %6717 = vmatpush2.bf16.msra.mxu0 %v16667_v54  ;;  %v16897_v54 = vld [vmem:[%s18595_s3 + $0x24] ss:$8 sps:$4 sm:$0xff]  }
 0x91b   :  { %6718 = vmatprep.subr.bf16.mxu0 %v16674_v37  ;;  %18995 = vst [vmem:[#allocation17_spill] sm:$0xff] %v16897_v54  ;;  %v16902_v37 = vld [vmem:[%s18595_s3 + $0x130] ss:$8 sps:$4 sm:$0xff]  }
 0x91c   :  { %7048 = vmatpush1.bf16.msra.mxu1 %v16902_v37 }
 0x91e   :  { %6719 = vmatpush2.bf16.msra.mxu0 %v16681_v20  ;;  %v16908_v20 = vld [vmem:[%s18595_s3 + $0x124] ss:$8 sps:$4 sm:$0xff]  }
 0x91f   :  { %6720 = vmatprep.subr.bf16.mxu0 %v16688_v62  ;;  %v16914_v62 = vld [vmem:[%s18595_s3 + $0x20] ss:$8 sps:$4 sm:$0xff]   ;;  %7049 = vmatprep.subr.bf16.mxu1 %v16908_v20 }
 0x920   :  { %18996 = vst [vmem:[#allocation18_spill] sm:$0xff] %v16914_v62  ;;  %7050 = vmatpush1.bf16.msra.mxu1 %v16926_v16 }
 0x921   :  { %7051 = vmatprep.subr.bf16.mxu1 %v16932_v55 }
 0x922   :  { %6721 = vmatpush2.bf16.msra.mxu0 %v16694_v4  ;;  %v16921_v4 = vld [vmem:[%s18595_s3 + $0x14] ss:$8 sps:$4 sm:$0xff]  }
 0x923   :  { %7242 = vmatprep.subr.bf16.mxu0 %v16790_v63  ;;  %18997 = vst [vmem:[#allocation19_spill] sm:$0xff] %v16921_v4 }
 0x924   :  { %7052 = vmatpush1.bf16.msra.mxu1 %v16950_v26 }
 0x925   :  { %6723 = vmatmul.mubr.bf16.vlgmr.msra.gmra.mxu0 %v6524_v19  ;;  %7053 = vmatprep.subr.bf16.mxu1 %v16977_v59  ;;  %v17136_v19 = vld [vmem:[%s18595_s3 + $0x84] ss:$8 sps:$4 sm:$0xff]  }
 0x926   :  { %7243 = vmatpush1.bf16.msra.mxu0 %v16785_v18  ;;  %19016 = vst [vmem:[#allocation39_spill] sm:$0xff] %v17136_v19 }
 0x927   :  { %7244 = vmatprep.subr.bf16.mxu0 %v16795_v53 }
 0x928   :  { %7054 = vmatpush1.bf16.msra.mxu1 %v16987_v14 }
 0x929   :  { %7055 = vmatprep.subr.bf16.mxu1 %v17001_v50 }
 0x92a   :  { %7245 = vmatpush1.bf16.msra.mxu0 %v16812_v56 }
 0x92b   :  { %7246 = vmatprep.subr.bf16.mxu0 %v16825_v25 }
 0x92c   :  { %7056 = vmatpush2.bf16.msra.mxu1 %v17011_v12 }
 0x92d   :  { %7057 = vmatprep.subr.bf16.mxu1 %v17025_v24 }
 0x92e   :  { %7247 = vmatpush1.bf16.msra.mxu0 %v16842_v32  ;;  %v19017_v32 = vld [vmem:[#allocation38_spill] sm:$0xff] }
 0x92f   :  { %7248 = vmatprep.subr.bf16.mxu0 %v16849_v29 }
 0x930   :  { %7058 = vmatpush2.bf16.msra.mxu1 %v17035_v10 }
 0x931   :  { %7059 = vmatprep.subr.bf16.mxu1 %v17049_v13 }
 0x932   :  { %7249 = vmatpush1.bf16.msra.mxu0 %v16866_v46 }
 0x933   :  { %7250 = vmatprep.subr.bf16.mxu0 %v16873_v44 }
 0x934   :  { %7060 = vmatpush2.bf16.msra.mxu1 %v17059_v3 }
 0x935   :  { %7061 = vmatprep.subr.bf16.mxu1 %v17073_v35 }
 0x936   :  { %7251 = vmatpush1.bf16.msra.mxu0 %v16890_v48 }
 0x937   :  { %7252 = vmatprep.subr.bf16.mxu0 %v16897_v54 }
 0x938   :  { %7062 = vmatpush2.bf16.msra.mxu1 %v17083_v40 }
 0x939   :  { %7063 = vmatprep.subr.bf16.mxu1 %v17097_v30 }
 0x93a   :  { %7253 = vmatpush1.bf16.msra.mxu0 %v16914_v62 }
 0x93b   :  { %7254 = vmatprep.subr.bf16.mxu0 %v16921_v4 }
 0x93c   :  { %7064 = vmatpush2.bf16.msra.mxu1 %v17107_v36 }
 0x93d   :  { %7065 = vmatprep.subr.bf16.mxu1 %v17126_v5 }
 0x93e   :  { %7255 = vmatpush1.bf16.msra.mxu0 %v16938_v0 }
 0x93f   :  { %7256 = vmatprep.subr.bf16.mxu0 %v16945_v17 }
 0x940   :  { %7066 = vmatpush2.bf16.msra.mxu1 %v17121_v58 }
 0x942   :  { %7257 = vmatpush1.bf16.msra.mxu0 %v16957_v9 }
 0x943   :  { %7258 = vmatprep.subr.bf16.mxu0 %v16964_v11 }
 0x946   :  { %7259 = vmatpush2.bf16.msra.mxu0 %v16970_v42 }
 0x947   :  { %7260 = vmatprep.subr.bf16.mxu0 %v16982_v27 }
 0x94a   :  { %7261 = vmatpush2.bf16.msra.mxu0 %v16992_v6 }
 0x94b   :  { %7262 = vmatprep.subr.bf16.mxu0 %v17006_v43 }
 0x94e   :  { %7263 = vmatpush2.bf16.msra.mxu0 %v17016_v2 }
 0x94f   :  { %7264 = vmatprep.subr.bf16.mxu0 %v17030_v45 }
 0x952   :  { %7265 = vmatpush2.bf16.msra.mxu0 %v17040_v31 }
 0x953   :  { %7266 = vmatprep.subr.bf16.mxu0 %v17054_v15 }
 0x956   :  { %7267 = vmatpush2.bf16.msra.mxu0 %v17064_v1 }
 0x957   :  { %7268 = vmatprep.subr.bf16.mxu0 %v17078_v7 }
 0x95a   :  { %7269 = vmatpush2.bf16.msra.mxu0 %v17088_v51  ;;  %v17157_v51 = vld [vmem:[%s18595_s3 + $0x184] ss:$8 sps:$4 sm:$0xff]  }
 0x95b   :  { %7270 = vmatprep.subr.bf16.mxu0 %v17102_v28  ;;  %v17150_v28 = vld [vmem:[%s18595_s3 + $0x190] ss:$8 sps:$4 sm:$0xff]  }
 0x95e   :  { %7271 = vmatpush2.bf16.msra.mxu0 %v17112_v33  ;;  %v17141_v33 = vld [vmem:[%s18595_s3 + $0x194] ss:$8 sps:$4 sm:$0xff]  }
 0x95f   :  { %7272 = vmatprep.subr.bf16.mxu0 %v17136_v19  ;;  %7067 = vmatprep.subr.bf16.mxu1 %v17141_v33 }
 0x960   :  { %7068 = vmatpush2.bf16.msra.mxu1 %v17150_v28 }
 0x961   :  { %7069 = vmatprep.subr.bf16.mxu1 %v17157_v51 }
 0x962   :  { %7273 = vmatpush2.bf16.msra.mxu0 %v17131_v38  ;;  %v17163_v38 = vld [vmem:[%s18595_s3 + $0x180] ss:$8 sps:$4 sm:$0xff]  }
 0x963   :  { %7842 = vmatprep.subr.bf16.mxu0 %v16805_v39  ;;  %v17170_v39 = vld [vmem:[%s18595_s3 + $0x274] ss:$8 sps:$4 sm:$0xff]  }
 0x964   :  { %7070 = vmatpush2.bf16.msra.mxu1 %v17163_v38 }
 0x965   :  { %7497 = vmatprep.subr.bf16.mxu1 %v17170_v39 }
 0x99c   :  { %v6469_v1 = vpop.f32.mrf.mxu1 }
 0x99e   :  { %v6471_v31 = vpop.f32.mrf.mxu1 }
 0x9a0   :  { %v6473_v43 = vpop.f32.mrf.mxu1 }
 0x9a2   :  { %v6475_v4 = vpop.f32.mrf.mxu1 }
 0x9a5   :  { %v6266_v19 = vpop.f32.mrf.mxu0 }
 0x9a6   :  { %v6470_v2 = vadd.f32 %v6469_v1, %v6266_v19  ;;  %v19018_v1 = vmax.f32 %v19017_v32, 0.0 }
 0x9a7   :  { %v6268_v7 = vpop.f32.mrf.mxu0 }
 0x9a8   :  { %v6472_v27 = vadd.f32 %v6471_v31, %v6268_v7 }
 0x9a9   :  { %v6270_v15 = vpop.f32.mrf.mxu0 }
 0x9aa   :  { %v6474_v9 = vadd.f32 %v6473_v43, %v6270_v15 }
 0x9ab   :  { %v6272_v45 = vpop.f32.mrf.mxu0 }
 0x9ac   :  { %v6476_v54 = vadd.f32 %v6475_v4, %v6272_v45  ;;  %v19026_v45 = vld [vmem:[#allocation11_spill] sm:$0xff] }
 0x9ad   :  { %v19027_v31 = vmax.f32 %v19026_v45, 0.0 }
 0x9e5   :  { %v6724_v6 = vpop.f32.mrf.mxu0 }
 0x9e6   :  { %v6733_v42 = vadd.f32 %v6724_v6, %v6470_v2 }
 0x9e7   :  { %v6726_v11 = vpop.f32.mrf.mxu0 }
 0x9e8   :  { %v6737_v17 = vadd.f32 %v6733_v42, %v14516_v34  ;;  %v6734_v0 = vadd.f32 %v6726_v11, %v6472_v27  ;;  %v19020_v42 = vld [vmem:[#allocation40_spill] sm:$0xff] }
 0x9e9   :  { %v6728_v62 = vpop.f32.mrf.mxu0  ;;  %v19021_v27 = vmax.f32 %v19020_v42, 0.0 }
 0x9ea   :  { %v6741_v48 = vmul.f32 %v14101_v49, %v6737_v17  ;;  %v6738_v44 = vadd.f32 %v6734_v0, %v14520_v41  ;;  %v6735_v46 = vadd.f32 %v6728_v62, %v6474_v9  ;;  %v19023_v0 = vld [vmem:[#allocation10_spill] sm:$0xff] }
 0x9eb   :  { %v6730_v29 = vpop.f32.mrf.mxu0 }
 0x9ec   :  { %v17178_v19 = vadd.f32 %v6741_v48, %v19018_v1  ;;  %v6742_v6 = vmul.f32 %v14101_v49, %v6738_v44  ;;  %v6739_v43 = vadd.f32 %v6735_v46, %v14516_v34  ;;  %v6736_v2 = vadd.f32 %v6730_v29, %v6476_v54 }
 0x9ed   :  { %v19024_v44 = vmax.f32 %v19023_v0, 0.0 }
 0x9ee   :  { %19019 = vst [vmem:[#allocation38_spill] sm:$0xff] %v17178_v19  ;;  %v18750_v11 = vmax.f32 %v17178_v19, 0.0  ;;  %v17185_v4 = vadd.f32 %v6742_v6, %v19021_v27  ;;  %v6743_v17 = vmul.f32 %v14109_v61, %v6739_v43  ;;  %v6740_v62 = vadd.f32 %v6736_v2, %v14520_v41 }
 0x9f0   :  { %19022 = vst [vmem:[#allocation40_spill] sm:$0xff] %v17185_v4  ;;  %v6757_v32 = vrot.slane %v18750_v11, 7  ;;  %v18749_v48 = vmax.f32 %v17185_v4, 0.0  ;;  %v17194_v9 = vadd.f32 %v6743_v17, %v19024_v44  ;;  %v6744_v29 = vmul.f32 %v14109_v61, %v6740_v62 }
 0x9f2   :  { %19025 = vst [vmem:[#allocation10_spill] sm:$0xff] %v17194_v9  ;;  %6769 = vst [vmem:[#allocation3] sm:$0xfe] %v6757_v32  ;;  %v6758_v46 = vrot.slane %v18749_v48, 7  ;;  %v18747_v54 = vmax.f32 %v17194_v9, 0.0  ;;  %v17202_v15 = vadd.f32 %v6744_v29, %v19027_v31 }
 0x9f4   :  { %19028 = vst [vmem:[#allocation11_spill] sm:$0xff] %v17202_v15  ;;  %6770 = vst [vmem:[#allocation3 + $0x8] sm:$0xfe] %v6758_v46  ;;  %v6759_v7 = vrot.slane %v18747_v54, 7  ;;  %v18748_v1 = vmax.f32 %v17202_v15, 0.0 }
 0x9f6   :  { %6773 = vst [vmem:[#allocation3 + $0x20] sm:$0x1] %v6759_v7  ;;  %v6761_v6 = vrot.slane %v18748_v1, 7  ;;  %v17210_v43 = vsel %vm301_vm9, %v6757_v32, %v6759_v7 }
 0x9f8   :  { %6774 = vst [vmem:[#allocation3 + $0x28] sm:$0x1] %v6761_v6  ;;  %v6762_v17 = vsel %vm301_vm9, %v6758_v46, %v6761_v6 }
 0x9f9   :  { %v6813_v2 = vld [vmem:[#allocation3] sm:$0xfe] }
 0x9fa   :  { %v6775_v42 = vld [vmem:[#allocation3] sm:$0xff]  ;;  %v6817_v27 = vpack.c.bf16 %v17210_v43, %v6813_v2 }
 0x9fb   :  { %v6776_v62 = vld [vmem:[#allocation3 + $0x8] sm:$0xff]  ;;  %v6779_v45 = vpack.c.bf16 %v17210_v43, %v6775_v42 }
 0x9fc   :  { %v6814_v0 = vld [vmem:[#allocation3 + $0x8] sm:$0xfe]  ;;  %v6780_v44 = vpack.c.bf16 %v6762_v17, %v6776_v62  ;;  %v6856_v54 = vshll.u32 %v6817_v27, 16  ;;  %v6854_v4 = vshrl.u32 %v6817_v27, 16 }
 0x9fd   :  { %v6818_v29 = vpack.c.bf16 %v6762_v17, %v6814_v0  ;;  %v6815_v31 = vld [vmem:[#allocation3 + $0x20] sm:$0x1]  ;;  %v7286_v7 = vld [vmem:[#allocation3 + $0x8] sm:$0xfc] }
 0x9fe   :  { %7274 = vmatprep.mubr.bf16.mxu0 %v6780_v44  ;;  %v6819_v48 = vpack.c.bf16 %v6815_v31, %v6815_v31  ;;  %v6858_v46 = vrot.slane %v6856_v54, 1  ;;  %v7290_v0 = vpack.c.bf16 %v6762_v17, %v7286_v7  ;;  %v17228_v54 = vld [vmem:[%s18595_s3 + $0x264] ss:$8 sps:$4 sm:$0xff]  }
 0x9ff   :  { %v6868_v1 = vshll.u32 %v6818_v29, 16  ;;  %7275 = vmatmul.mubr.bf16.vlgmr.msra.gmra.mxu0 %v6779_v45  ;;  %v6816_v32 = vld [vmem:[#allocation3 + $0x28] sm:$0x1]  ;;  %v6866_v62 = vshrl.u32 %v6818_v29, 16  ;;  %v19031_v7 = vld [vmem:[#allocation14_spill] sm:$0xff] }
 0xa00   :  { %v7288_v11 = vld [vmem:[#allocation3 + $0x28] sm:$0x3]  ;;  %v6820_v15 = vpack.c.bf16 %v6816_v32, %v6816_v32  ;;  %v6861_v2 = vshll.u32 %v6819_v48, 16  ;;  %7843 = vmatpush1.bf16.msra.mxu0 %v16800_v57  ;;  %v17221_v48 = vld [vmem:[%s18595_s3 + $0x270] ss:$8 sps:$4 sm:$0xff]   ;;  %v6859_v57 = vor.u32 %v6858_v46, %v6854_v4  ;;  %v19030_v32 = vld [vmem:[#allocation13_spill] sm:$0xff] }
 0xa01   :  { %v6870_v9 = vrot.slane %v6868_v1, 1  ;;  %v7292_v6 = vpack.c.bf16 %v7288_v11, %v7288_v11  ;;  %7844 = vmatprep.subr.bf16.mxu0 %v16818_v21  ;;  %v7332_v11 = vrot.slane %v7290_v0, 1  ;;  %v17258_v4 = vld [vmem:[%s18595_s3 + $0x244] ss:$8 sps:$4 sm:$0xff]  }
 0xa02   :  { %v6873_v42 = vshll.u32 %v6820_v15, 16  ;;  %v6863_v44 = vrot.slane %v6861_v2, 1  ;;  %v7285_v15 = vld [vmem:[#allocation3] sm:$0xfc]  ;;  %v19032_v2 = vld [vmem:[#allocation15_spill] sm:$0xff]  ;;  %v19034_v46 = vld [vmem:[#allocation17_spill] sm:$0xff] }
 0xa03   :  { %v6871_v19 = vor.u32 %v6870_v9, %v6866_v62  ;;  %v7333_v45 = vrot.slane %v7292_v6, 1  ;;  %v7289_v27 = vpack.c.bf16 %v17210_v43, %v7285_v15  ;;  %v19029_v43 = vld [vmem:[#allocation12_spill] sm:$0xff]  ;;  %v19035_v6 = vld [vmem:[#allocation18_spill] sm:$0xff]  ;;  %v19040_v62 = vld [vmem:[#allocation23_spill] sm:$0xff] }
 0xa04   :  { %v6875_v31 = vrot.slane %v6873_v42, 1  ;;  %7845 = vmatpush1.bf16.msra.mxu0 %v16830_v23  ;;  %v6864_v9 = vsel %vm399_vm10, %v6859_v57, %v6863_v44  ;;  %v19041_v42 = vld [vmem:[#allocation24_spill] sm:$0xff]  ;;  %v19042_v0 = vld [vmem:[#allocation25_spill] sm:$0xff]  ;;  %v19043_v44 = vld [vmem:[#allocation26_spill] sm:$0xff] }
 0xa05   :  { %7846 = vmatprep.subr.bf16.mxu0 %v16836_v22  ;;  %v7334_v23 = vsel %vm877_vm11, %v7332_v11, %v7333_v45  ;;  %v17237_v22 = vld [vmem:[%s18595_s3 + $0x260] ss:$8 sps:$4 sm:$0xff]   ;;  %v7329_v17 = vrot.slane %v7289_v27, 1  ;;  %v19048_v11 = vld [vmem:[#allocation31_spill] sm:$0xff] }
 0xa06   :  { %v6876_v21 = vsel %vm399_vm10, %v6871_v19, %v6875_v31  ;;  %v17243_v19 = vld [vmem:[%s18595_s3 + $0x254] ss:$8 sps:$4 sm:$0xff]   ;;  %v19046_v57 = vld [vmem:[#allocation29_spill] sm:$0xff] }
 0xa07   :  { %7071 = vmatprep.mubr.bf16.mxu1 %v6876_v21  ;;  %v19044_v31 = vld [vmem:[#allocation27_spill] sm:$0xff]  ;;  %v19045_v45 = vld [vmem:[#allocation28_spill] sm:$0xff]  ;;  %v19047_v21 = vld [vmem:[#allocation30_spill] sm:$0xff] }
 0xa08   :  { %7072 = vmatmul.mubr.bf16.vlgmr.msra.gmra.mxu1 %v6864_v9  ;;  %7847 = vmatpush1.bf16.msra.mxu0 %v16854_v8  ;;  %v17251_v8 = vld [vmem:[%s18595_s3 + $0x250] ss:$8 sps:$4 sm:$0xff]  }
 0xa09   :  { %7498 = vmatpush1.bf16.msra.mxu1 %v17221_v48  ;;  %7529 = vmatprep.mubr.bf16.mxu1 %v7334_v23  ;;  %v19049_v9 = vld [vmem:[#allocation32_spill] sm:$0xff]  ;;  %v19050_v23 = vld [vmem:[#allocation33_spill] sm:$0xff]  ;;  %v19052_v15 = vld [vmem:[#allocation35_spill] sm:$0xff] }
 0xa0a   :  { %7499 = vmatprep.subr.bf16.mxu1 %v17228_v54  ;;  %7848 = vmatprep.subr.bf16.mxu0 %v16860_v52  ;;  %v17265_v52 = vld [vmem:[%s18595_s3 + $0x240] ss:$8 sps:$4 sm:$0xff]   ;;  %v19054_v27 = vld [vmem:[#allocation39_spill] sm:$0xff] }
 0xa0c   :  { %7849 = vmatpush1.bf16.msra.mxu0 %v16878_v60  ;;  %v17272_v60 = vld [vmem:[%s18595_s3 + $0x234] ss:$8 sps:$4 sm:$0xff]  }
 0xa0d   :  { %7500 = vmatpush1.bf16.msra.mxu1 %v17237_v22  ;;  %7850 = vmatprep.subr.bf16.mxu0 %v16884_v47  ;;  %v17279_v47 = vld [vmem:[%s18595_s3 + $0x230] ss:$8 sps:$4 sm:$0xff]  }
 0xa0e   :  { %7501 = vmatprep.subr.bf16.mxu1 %v17243_v19 }
 0xa10   :  { %7851 = vmatpush1.bf16.msra.mxu0 %v16902_v37  ;;  %v17286_v37 = vld [vmem:[%s18595_s3 + $0x224] ss:$8 sps:$4 sm:$0xff]  }
 0xa11   :  { %7502 = vmatpush1.bf16.msra.mxu1 %v17251_v8  ;;  %7852 = vmatprep.subr.bf16.mxu0 %v16908_v20  ;;  %v17293_v20 = vld [vmem:[%s18595_s3 + $0x220] ss:$8 sps:$4 sm:$0xff]  }
 0xa12   :  { %7503 = vmatprep.subr.bf16.mxu1 %v17258_v4 }
 0xa14   :  { %7853 = vmatpush1.bf16.msra.mxu0 %v16926_v16  ;;  %v17300_v16 = vld [vmem:[%s18595_s3 + $0x214] ss:$8 sps:$4 sm:$0xff]  }
 0xa15   :  { %7504 = vmatpush1.bf16.msra.mxu1 %v17265_v52  ;;  %7854 = vmatprep.subr.bf16.mxu0 %v16932_v55  ;;  %v17307_v55 = vld [vmem:[%s18595_s3 + $0x210] ss:$8 sps:$4 sm:$0xff]  }
 0xa16   :  { %7505 = vmatprep.subr.bf16.mxu1 %v17272_v60 }
 0xa18   :  { %7855 = vmatpush1.bf16.msra.mxu0 %v16950_v26  ;;  %v17314_v26 = vld [vmem:[%s18595_s3 + $0x204] ss:$8 sps:$4 sm:$0xff]  }
 0xa19   :  { %7506 = vmatpush1.bf16.msra.mxu1 %v17279_v47  ;;  %7856 = vmatprep.subr.bf16.mxu0 %v16977_v59  ;;  %v17321_v59 = vld [vmem:[%s18595_s3 + $0x200] ss:$8 sps:$4 sm:$0xff]  }
 0xa1a   :  { %7507 = vmatprep.subr.bf16.mxu1 %v17286_v37 }
 0xa1c   :  { %7857 = vmatpush1.bf16.msra.mxu0 %v16987_v14  ;;  %v17328_v14 = vld [vmem:[%s18595_s3 + $0x2f4] ss:$8 sps:$4 sm:$0xff]  }
 0xa1d   :  { %7508 = vmatpush1.bf16.msra.mxu1 %v17293_v20  ;;  %7858 = vmatprep.subr.bf16.mxu0 %v17001_v50  ;;  %v17335_v50 = vld [vmem:[%s18595_s3 + $0x2f0] ss:$8 sps:$4 sm:$0xff]  }
 0xa1e   :  { %7509 = vmatprep.subr.bf16.mxu1 %v17300_v16 }
 0xa20   :  { %7859 = vmatpush2.bf16.msra.mxu0 %v17011_v12  ;;  %v17342_v12 = vld [vmem:[%s18595_s3 + $0x2e4] ss:$8 sps:$4 sm:$0xff]  }
 0xa21   :  { %7510 = vmatpush1.bf16.msra.mxu1 %v17307_v55  ;;  %7860 = vmatprep.subr.bf16.mxu0 %v17025_v24  ;;  %v17349_v24 = vld [vmem:[%s18595_s3 + $0x2e0] ss:$8 sps:$4 sm:$0xff]  }
 0xa22   :  { %7511 = vmatprep.subr.bf16.mxu1 %v17314_v26 }
 0xa24   :  { %7861 = vmatpush2.bf16.msra.mxu0 %v17035_v10  ;;  %v17356_v10 = vld [vmem:[%s18595_s3 + $0x2d4] ss:$8 sps:$4 sm:$0xff]  }
 0xa25   :  { %7512 = vmatpush1.bf16.msra.mxu1 %v17321_v59  ;;  %7862 = vmatprep.subr.bf16.mxu0 %v17049_v13  ;;  %v17363_v13 = vld [vmem:[%s18595_s3 + $0x2d0] ss:$8 sps:$4 sm:$0xff]  }
 0xa26   :  { %7513 = vmatprep.subr.bf16.mxu1 %v17328_v14 }
 0xa28   :  { %7863 = vmatpush2.bf16.msra.mxu0 %v17059_v3  ;;  %v17370_v3 = vld [vmem:[%s18595_s3 + $0x2c4] ss:$8 sps:$4 sm:$0xff]  }
 0xa29   :  { %7514 = vmatpush2.bf16.msra.mxu1 %v17335_v50  ;;  %7864 = vmatprep.subr.bf16.mxu0 %v17073_v35  ;;  %v17377_v35 = vld [vmem:[%s18595_s3 + $0x2c0] ss:$8 sps:$4 sm:$0xff]  }
 0xa2a   :  { %7515 = vmatprep.subr.bf16.mxu1 %v17342_v12 }
 0xa2c   :  { %7865 = vmatpush2.bf16.msra.mxu0 %v17083_v40  ;;  %v17384_v40 = vld [vmem:[%s18595_s3 + $0x2b4] ss:$8 sps:$4 sm:$0xff]  }
 0xa2d   :  { %7516 = vmatpush2.bf16.msra.mxu1 %v17349_v24  ;;  %7866 = vmatprep.subr.bf16.mxu0 %v17097_v30  ;;  %v17391_v30 = vld [vmem:[%s18595_s3 + $0x2b0] ss:$8 sps:$4 sm:$0xff]  }
 0xa2e   :  { %7517 = vmatprep.subr.bf16.mxu1 %v17356_v10 }
 0xa30   :  { %7867 = vmatpush2.bf16.msra.mxu0 %v17107_v36  ;;  %v17398_v36 = vld [vmem:[%s18595_s3 + $0x2a4] ss:$8 sps:$4 sm:$0xff]  }
 0xa31   :  { %7518 = vmatpush2.bf16.msra.mxu1 %v17363_v13  ;;  %7868 = vmatprep.subr.bf16.mxu0 %v17126_v5  ;;  %v7287_v5 = vld [vmem:[#allocation3 + $0x20] sm:$0x3] }
 0xa32   :  { %7519 = vmatprep.subr.bf16.mxu1 %v17370_v3  ;;  %v7291_v1 = vpack.c.bf16 %v7287_v5, %v7287_v5  ;;  %v19051_v5 = vld [vmem:[#allocation34_spill] sm:$0xff] }
 0xa34   :  { %7869 = vmatpush2.bf16.msra.mxu0 %v17121_v58  ;;  %v17405_v58 = vld [vmem:[%s18595_s3 + $0x2a0] ss:$8 sps:$4 sm:$0xff]  }
 0xa35   :  { %7520 = vmatpush2.bf16.msra.mxu1 %v17377_v35  ;;  %7870 = vmatprep.subr.bf16.mxu0 %v17141_v33  ;;  %v17412_v33 = vld [vmem:[%s18595_s3 + $0x294] ss:$8 sps:$4 sm:$0xff]  }
 0xa36   :  { %7521 = vmatprep.subr.bf16.mxu1 %v17384_v40 }
 0xa38   :  { %7871 = vmatpush2.bf16.msra.mxu0 %v17150_v28  ;;  %v17419_v28 = vld [vmem:[%s18595_s3 + $0x290] ss:$8 sps:$4 sm:$0xff]  }
 0xa39   :  { %7522 = vmatpush2.bf16.msra.mxu1 %v17391_v30  ;;  %7872 = vmatprep.subr.bf16.mxu0 %v17157_v51  ;;  %v17426_v51 = vld [vmem:[%s18595_s3 + $0x284] ss:$8 sps:$4 sm:$0xff]  }
 0xa3a   :  { %7523 = vmatprep.subr.bf16.mxu1 %v17398_v36 }
 0xa3c   :  { %7873 = vmatpush2.bf16.msra.mxu0 %v17163_v38  ;;  %v17432_v38 = vld [vmem:[%s18595_s3 + $0x280] ss:$8 sps:$4 sm:$0xff]  }
 0xa3d   :  { %7524 = vmatpush2.bf16.msra.mxu1 %v17405_v58  ;;  %8300 = vmatprep.subr.bf16.mxu0 %v17170_v39  ;;  %v7330_v39 = vrot.slane %v7291_v1, 1  ;;  %v19053_v1 = vld [vmem:[#allocation36_spill] sm:$0xff] }
 0xa3e   :  { %7525 = vmatprep.subr.bf16.mxu1 %v17412_v33 }
 0xa3f   :  { %v7331_v29 = vsel %vm877_vm11, %v7329_v17, %v7330_v39  ;;  %v19055_v39 = vld [vmem:[#allocation37_spill] sm:$0xff] }
 0xa41   :  { %7526 = vmatpush2.bf16.msra.mxu1 %v17419_v28 }
 0xa42   :  { %7527 = vmatprep.subr.bf16.mxu1 %v17426_v51 }
 0xa45   :  { %7528 = vmatpush2.bf16.msra.mxu1 %v17432_v38 }
 0xa46   :  { %8045 = vmatprep.subr.bf16.mxu1 %v16790_v63  ;;  %v19033_v63 = vld [vmem:[#allocation16_spill] sm:$0xff] }
 0xa48   :  { %7530 = vmatmul.mubr.bf16.vlgmr.msra.gmra.mxu1 %v7331_v29 }
 0xa49   :  { %8046 = vmatpush1.bf16.msra.mxu1 %v16785_v18  ;;  %v19036_v18 = vld [vmem:[#allocation19_spill] sm:$0xff] }
 0xa4a   :  { %8047 = vmatprep.subr.bf16.mxu1 %v16795_v53  ;;  %v19037_v53 = vld [vmem:[#allocation20_spill] sm:$0xff] }
 0xa4d   :  { %8048 = vmatpush1.bf16.msra.mxu1 %v16812_v56  ;;  %v19038_v56 = vld [vmem:[#allocation21_spill] sm:$0xff] }
 0xa4e   :  { %8049 = vmatprep.subr.bf16.mxu1 %v16825_v25  ;;  %v19039_v25 = vld [vmem:[#allocation22_spill] sm:$0xff] }
 0xa51   :  { %8050 = vmatpush1.bf16.msra.mxu1 %v19029_v43 }
 0xa52   :  { %8051 = vmatprep.subr.bf16.mxu1 %v19030_v32 }
 0xa55   :  { %8052 = vmatpush1.bf16.msra.mxu1 %v19031_v7 }
 0xa56   :  { %8053 = vmatprep.subr.bf16.mxu1 %v19032_v2 }
 0xa59   :  { %8054 = vmatpush1.bf16.msra.mxu1 %v19033_v63 }
 0xa5a   :  { %8055 = vmatprep.subr.bf16.mxu1 %v19034_v46 }
 0xa5d   :  { %8056 = vmatpush1.bf16.msra.mxu1 %v19035_v6 }
 0xa5e   :  { %8057 = vmatprep.subr.bf16.mxu1 %v19036_v18 }
 0xa61   :  { %8058 = vmatpush1.bf16.msra.mxu1 %v19037_v53 }
 0xa62   :  { %8059 = vmatprep.subr.bf16.mxu1 %v19038_v56 }
 0xa65   :  { %8060 = vmatpush1.bf16.msra.mxu1 %v19039_v25 }
 0xa66   :  { %8061 = vmatprep.subr.bf16.mxu1 %v19040_v62 }
 0xa69   :  { %8062 = vmatpush2.bf16.msra.mxu1 %v19041_v42 }
 0xa6a   :  { %8063 = vmatprep.subr.bf16.mxu1 %v19042_v0 }
 0xa6d   :  { %8064 = vmatpush2.bf16.msra.mxu1 %v19043_v44 }
 0xa6e   :  { %8065 = vmatprep.subr.bf16.mxu1 %v19044_v31 }
 0xa71   :  { %8066 = vmatpush2.bf16.msra.mxu1 %v19045_v45 }
 0xa72   :  { %8067 = vmatprep.subr.bf16.mxu1 %v19046_v57 }
 0xa75   :  { %8068 = vmatpush2.bf16.msra.mxu1 %v19047_v21 }
 0xa76   :  { %8069 = vmatprep.subr.bf16.mxu1 %v19048_v11 }
 0xa79   :  { %8070 = vmatpush2.bf16.msra.mxu1 %v19049_v9 }
 0xa7a   :  { %8071 = vmatprep.subr.bf16.mxu1 %v19050_v23 }
 0xa7d   :  { %8072 = vmatpush2.bf16.msra.mxu1 %v19051_v5 }
 0xa7e   :  { %8073 = vmatprep.subr.bf16.mxu1 %v19052_v15 }
 0xa81   :  { %8074 = vmatpush2.bf16.msra.mxu1 %v19053_v1 }
 0xa82   :  { %8075 = vmatprep.subr.bf16.mxu1 %v19054_v27 }
 0xa85   :  { %8076 = vmatpush2.bf16.msra.mxu1 %v19055_v39 }
 0xabf   :  { %v7276_v43 = vpop.f32.mrf.mxu0 }
 0xac1   :  { %v7278_v7 = vpop.f32.mrf.mxu0 }
 0xac3   :  { %v7280_v46 = vpop.f32.mrf.mxu0 }
 0xac5   :  { %v7282_v0 = vpop.f32.mrf.mxu0 }
 0xac8   :  { %v7073_v17 = vpop.f32.mrf.mxu1 }
 0xac9   :  { %v7277_v63 = vadd.f32 %v7276_v43, %v7073_v17 }
 0xaca   :  { %v7075_v29 = vpop.f32.mrf.mxu1 }
 0xacb   :  { %v7279_v18 = vadd.f32 %v7278_v7, %v7075_v29 }
 0xacc   :  { %v7077_v32 = vpop.f32.mrf.mxu1 }
 0xacd   :  { %v7281_v25 = vadd.f32 %v7280_v46, %v7077_v32 }
 0xace   :  { %v7079_v2 = vpop.f32.mrf.mxu1 }
 0xacf   :  { %v7283_v31 = vadd.f32 %v7282_v0, %v7079_v2 }
 0xb08   :  { %v7531_v6 = vpop.f32.mrf.mxu1 }
 0xb09   :  { %v7540_v53 = vadd.f32 %v7531_v6, %v7277_v63 }
 0xb0a   :  { %v7533_v56 = vpop.f32.mrf.mxu1 }
 0xb0b   :  { %v7544_v62 = vadd.f32 %v7540_v53, %v14516_v34  ;;  %v7541_v42 = vadd.f32 %v7533_v56, %v7279_v18 }
 0xb0c   :  { %v7535_v44 = vpop.f32.mrf.mxu1 }
 0xb0d   :  { %v7548_v45 = vmax.f32 %v7544_v62, 0.0  ;;  %v7545_v57 = vadd.f32 %v7541_v42, %v14520_v41  ;;  %v7542_v21 = vadd.f32 %v7535_v44, %v7281_v25 }
 0xb0e   :  { %v7537_v11 = vpop.f32.mrf.mxu1 }
 0xb0f   :  { %v7552_v9 = vmul.f32 %v14101_v49, %v7548_v45  ;;  %v7549_v23 = vmax.f32 %v7545_v57, 0.0  ;;  %v7546_v5 = vadd.f32 %v7542_v21, %v14516_v34  ;;  %v7543_v15 = vadd.f32 %v7537_v11, %v7283_v31 }
 0xb11   :  { %v7560_v1 = vrot.slane %v7552_v9, 7  ;;  %v7553_v27 = vmul.f32 %v14101_v49, %v7549_v23  ;;  %v7550_v39 = vmax.f32 %v7546_v5, 0.0  ;;  %v7547_v17 = vadd.f32 %v7543_v15, %v14520_v41 }
 0xb13   :  { %7572 = vst [vmem:[#allocation4] sm:$0xfe] %v7560_v1  ;;  %v7561_v29 = vrot.slane %v7553_v27, 7  ;;  %v7554_v43 = vmul.f32 %v14109_v61, %v7550_v39  ;;  %v7551_v32 = vmax.f32 %v7547_v17, 0.0 }
 0xb15   :  { %7573 = vst [vmem:[#allocation4 + $0x8] sm:$0xfe] %v7561_v29  ;;  %v7562_v7 = vrot.slane %v7554_v43, 7  ;;  %v7555_v2 = vmul.f32 %v14109_v61, %v7551_v32 }
 0xb17   :  { %7576 = vst [vmem:[#allocation4 + $0x20] sm:$0x1] %v7562_v7  ;;  %v7564_v63 = vrot.slane %v7555_v2, 7  ;;  %v17479_v46 = vsel %vm301_vm9, %v7560_v1, %v7562_v7 }
 0xb19   :  { %7577 = vst [vmem:[#allocation4 + $0x28] sm:$0x1] %v7564_v63  ;;  %v7565_v56 = vsel %vm301_vm9, %v7561_v29, %v7564_v63 }
 0xb1a   :  { %v7616_v6 = vld [vmem:[#allocation4] sm:$0xfe] }
 0xb1b   :  { %v7578_v18 = vld [vmem:[#allocation4] sm:$0xff]  ;;  %v7620_v53 = vpack.c.bf16 %v17479_v46, %v7616_v6 }
 0xb1c   :  { %v7579_v25 = vld [vmem:[#allocation4 + $0x8] sm:$0xff]  ;;  %v7582_v44 = vpack.c.bf16 %v17479_v46, %v7578_v18 }
 0xb1d   :  { %v7617_v62 = vld [vmem:[#allocation4 + $0x8] sm:$0xfe]  ;;  %v7583_v42 = vpack.c.bf16 %v7565_v56, %v7579_v25  ;;  %v7659_v45 = vshll.u32 %v7620_v53, 16  ;;  %v7657_v32 = vshrl.u32 %v7620_v53, 16 }
 0xb1e   :  { %v7621_v0 = vpack.c.bf16 %v7565_v56, %v7617_v62  ;;  %v7618_v31 = vld [vmem:[#allocation4 + $0x20] sm:$0x1]  ;;  %v8089_v9 = vld [vmem:[#allocation4 + $0x8] sm:$0xfc] }
 0xb1f   :  { %8077 = vmatprep.mubr.bf16.mxu1 %v7583_v42  ;;  %v7622_v21 = vpack.c.bf16 %v7618_v31, %v7618_v31  ;;  %v7661_v27 = vrot.slane %v7659_v45, 1  ;;  %v8093_v43 = vpack.c.bf16 %v7565_v56, %v8089_v9  ;;  %v17670_v53 = vld [vmem:[%s18595_s3 + $0x114] ss:$8 sps:$4 sm:$0xff]   ;;  %v17676_v56 = vld [vmem:[%s18595_s3 + $0x10] ss:$8 sps:$4 sm:$0xff]  }
 0xb20   :  { %v7671_v57 = vshll.u32 %v7621_v0, 16  ;;  %8078 = vmatmul.mubr.bf16.vlgmr.msra.gmra.mxu1 %v7582_v44  ;;  %v7619_v11 = vld [vmem:[#allocation4 + $0x28] sm:$0x1]  ;;  %v7669_v17 = vshrl.u32 %v7621_v0, 16  ;;  %19064 = vst [vmem:[#allocation20_spill] sm:$0xff] %v17676_v56 }
 0xb21   :  { %v8091_v23 = vld [vmem:[#allocation4 + $0x28] sm:$0x3]  ;;  %v7623_v5 = vpack.c.bf16 %v7619_v11, %v7619_v11  ;;  %v7664_v1 = vshll.u32 %v7622_v21, 16  ;;  %v7662_v18 = vor.u32 %v7661_v27, %v7657_v32  ;;  %v8135_v62 = vrot.slane %v8093_v43, 1  ;;  %v17683_v0 = vld [vmem:[%s18595_s3 + $0x4] ss:$8 sps:$4 sm:$0xff]  }
 0xb22   :  { %v7673_v15 = vrot.slane %v7671_v57, 1  ;;  %v8095_v39 = vpack.c.bf16 %v8091_v23, %v8091_v23  ;;  %19065 = vst [vmem:[#allocation21_spill] sm:$0xff] %v17683_v0  ;;  %v17688_v31 = vld [vmem:[%s18595_s3 + $0x110] ss:$8 sps:$4 sm:$0xff]   ;;  %v17695_v45 = vld [vmem:[%s18595_s3] ss:$8 sps:$4 sm:$0xff]  }
 0xb23   :  { %v7676_v29 = vshll.u32 %v7623_v5, 16  ;;  %v7666_v7 = vrot.slane %v7664_v1, 1  ;;  %19066 = vst [vmem:[#allocation22_spill] sm:$0xff] %v17695_v45  ;;  %v17702_v57 = vld [vmem:[%s18595_s3 + $0xf4] ss:$8 sps:$4 sm:$0xff]  }
 0xb24   :  { %v7674_v2 = vor.u32 %v7673_v15, %v7669_v17  ;;  %v8136_v6 = vrot.slane %v8095_v39, 1  ;;  %19067 = vst [vmem:[#allocation23_spill] sm:$0xff] %v17702_v57  ;;  %v17708_v21 = vld [vmem:[%s18595_s3 + $0xf0] ss:$8 sps:$4 sm:$0xff]   ;;  %v17715_v11 = vld [vmem:[%s18595_s3 + $0x104] ss:$8 sps:$4 sm:$0xff]  }
 0xb25   :  { %v7678_v63 = vrot.slane %v7676_v29, 1  ;;  %v7667_v42 = vsel %vm399_vm10, %v7662_v18, %v7666_v7  ;;  %19068 = vst [vmem:[#allocation24_spill] sm:$0xff] %v17708_v21  ;;  %v17720_v9 = vld [vmem:[%s18595_s3 + $0xe4] ss:$8 sps:$4 sm:$0xff]   ;;  %v17725_v23 = vld [vmem:[%s18595_s3 + $0x100] ss:$8 sps:$4 sm:$0xff]  }
 0xb26   :  { %v8137_v44 = vsel %vm877_vm11, %v8135_v62, %v8136_v6  ;;  %19069 = vst [vmem:[#allocation25_spill] sm:$0xff] %v17720_v9  ;;  %v17730_v5 = vld [vmem:[%s18595_s3 + $0xe0] ss:$8 sps:$4 sm:$0xff]   ;;  %v17739_v15 = vld [vmem:[%s18595_s3 + $0x1f4] ss:$8 sps:$4 sm:$0xff]  }
 0xb27   :  { %v7679_v25 = vsel %vm399_vm10, %v7674_v2, %v7678_v63  ;;  %19070 = vst [vmem:[#allocation26_spill] sm:$0xff] %v17730_v5  ;;  %v17744_v1 = vld [vmem:[%s18595_s3 + $0xd4] ss:$8 sps:$4 sm:$0xff]   ;;  %v17749_v27 = vld [vmem:[%s18595_s3 + $0x1f0] ss:$8 sps:$4 sm:$0xff]  }
 0xb28   :  { %7874 = vmatprep.mubr.bf16.mxu0 %v7679_v25  ;;  %19071 = vst [vmem:[#allocation27_spill] sm:$0xff] %v17744_v1  ;;  %v17754_v39 = vld [vmem:[%s18595_s3 + $0xd0] ss:$8 sps:$4 sm:$0xff]   ;;  %v17763_v17 = vld [vmem:[%s18595_s3 + $0x1e4] ss:$8 sps:$4 sm:$0xff]  }
 0xb29   :  { %7875 = vmatmul.mubr.bf16.vlgmr.msra.gmra.mxu0 %v7667_v42  ;;  %19072 = vst [vmem:[#allocation28_spill] sm:$0xff] %v17754_v39  ;;  %v17768_v29 = vld [vmem:[%s18595_s3 + $0xc4] ss:$8 sps:$4 sm:$0xff]   ;;  %v17773_v43 = vld [vmem:[%s18595_s3 + $0x1e0] ss:$8 sps:$4 sm:$0xff]  }
 0xb2a   :  { %8301 = vmatpush1.bf16.msra.mxu0 %v17221_v48  ;;  %8332 = vmatprep.mubr.bf16.mxu0 %v8137_v44  ;;  %v8090_v48 = vld [vmem:[#allocation4 + $0x20] sm:$0x3]  ;;  %19073 = vst [vmem:[#allocation29_spill] sm:$0xff] %v17768_v29  ;;  %v17787_v7 = vld [vmem:[%s18595_s3 + $0x1d4] ss:$8 sps:$4 sm:$0xff]  }
 0xb2b   :  { %8302 = vmatprep.subr.bf16.mxu0 %v17228_v54  ;;  %v8088_v54 = vld [vmem:[#allocation4] sm:$0xfc]  ;;  %v17792_v2 = vld [vmem:[%s18595_s3 + $0xb4] ss:$8 sps:$4 sm:$0xff]   ;;  %v17797_v63 = vld [vmem:[%s18595_s3 + $0x1d0] ss:$8 sps:$4 sm:$0xff]  }
 0xb2c   :  { %v17778_v32 = vld [vmem:[%s18595_s3 + $0xc0] ss:$8 sps:$4 sm:$0xff]   ;;  %19075 = vst [vmem:[#allocation31_spill] sm:$0xff] %v17792_v2  ;;  %v17802_v6 = vld [vmem:[%s18595_s3 + $0xb0] ss:$8 sps:$4 sm:$0xff]  }
 0xb2d   :  { %19074 = vst [vmem:[#allocation30_spill] sm:$0xff] %v17778_v32  ;;  %19076 = vst [vmem:[#allocation32_spill] sm:$0xff] %v17802_v6  ;;  %v17811_v18 = vld [vmem:[%s18595_s3 + $0x1c4] ss:$8 sps:$4 sm:$0xff]   ;;  %v17821_v62 = vld [vmem:[%s18595_s3 + $0x1c0] ss:$8 sps:$4 sm:$0xff]  }
 0xb2e   :  { %8303 = vmatpush1.bf16.msra.mxu0 %v17237_v22  ;;  %v8094_v22 = vpack.c.bf16 %v8090_v48, %v8090_v48  ;;  %v17816_v25 = vld [vmem:[%s18595_s3 + $0xa4] ss:$8 sps:$4 sm:$0xff]   ;;  %v17826_v42 = vld [vmem:[%s18595_s3 + $0xa0] ss:$8 sps:$4 sm:$0xff]   ;;  %v17835_v44 = vld [vmem:[%s18595_s3 + $0x1b4] ss:$8 sps:$4 sm:$0xff]  }
 0xb2f   :  { %8304 = vmatprep.subr.bf16.mxu0 %v17243_v19  ;;  %v8092_v19 = vpack.c.bf16 %v17479_v46, %v8088_v54  ;;  %v17664_v46 = vld [vmem:[%s18595_s3 + $0x120] ss:$8 sps:$4 sm:$0xff]   ;;  %19077 = vst [vmem:[#allocation33_spill] sm:$0xff] %v17816_v25  ;;  %19078 = vst [vmem:[#allocation34_spill] sm:$0xff] %v17826_v42  ;;  %v17840_v48 = vld [vmem:[%s18595_s3 + $0x94] ss:$8 sps:$4 sm:$0xff]  }
 0xb30   :  { %19079 = vst [vmem:[#allocation35_spill] sm:$0xff] %v17840_v48  ;;  %v17845_v54 = vld [vmem:[%s18595_s3 + $0x1b0] ss:$8 sps:$4 sm:$0xff]  }
 0xb32   :  { %8305 = vmatpush1.bf16.msra.mxu0 %v17251_v8  ;;  %v8133_v8 = vrot.slane %v8094_v22, 1  ;;  %v17850_v22 = vld [vmem:[%s18595_s3 + $0x90] ss:$8 sps:$4 sm:$0xff]  }
 0xb33   :  { %8306 = vmatprep.subr.bf16.mxu0 %v17258_v4  ;;  %v8132_v4 = vrot.slane %v8092_v19, 1  ;;  %19080 = vst [vmem:[#allocation36_spill] sm:$0xff] %v17850_v22  ;;  %v17859_v19 = vld [vmem:[%s18595_s3 + $0x1a0] ss:$8 sps:$4 sm:$0xff]  }
 0xb36   :  { %8307 = vmatpush1.bf16.msra.mxu0 %v17265_v52  ;;  %v8134_v52 = vsel %vm877_vm11, %v8132_v4, %v8133_v8  ;;  %v17864_v8 = vld [vmem:[%s18595_s3 + $0x1a4] ss:$8 sps:$4 sm:$0xff]   ;;  %v17869_v4 = vld [vmem:[%s18595_s3 + $0x80] ss:$8 sps:$4 sm:$0xff]  }
 0xb37   :  { %8308 = vmatprep.subr.bf16.mxu0 %v17272_v60  ;;  %v17523_v60 = vld [vmem:[%s18595_s3 + $0x70] ss:$8 sps:$4 sm:$0xff]   ;;  %19081 = vst [vmem:[#allocation39_spill] sm:$0xff] %v17869_v4 }
 0xb3a   :  { %8309 = vmatpush1.bf16.msra.mxu0 %v17279_v47  ;;  %v17528_v47 = vld [vmem:[%s18595_s3 + $0x74] ss:$8 sps:$4 sm:$0xff]  }
 0xb3b   :  { %8310 = vmatprep.subr.bf16.mxu0 %v17286_v37  ;;  %v17533_v37 = vld [vmem:[%s18595_s3 + $0x64] ss:$8 sps:$4 sm:$0xff]  }
 0xb3e   :  { %8311 = vmatpush1.bf16.msra.mxu0 %v17293_v20  ;;  %v17538_v20 = vld [vmem:[%s18595_s3 + $0x170] ss:$8 sps:$4 sm:$0xff]  }
 0xb3f   :  { %8312 = vmatprep.subr.bf16.mxu0 %v17300_v16  ;;  %v17543_v16 = vld [vmem:[%s18595_s3 + $0x174] ss:$8 sps:$4 sm:$0xff]  }
 0xb40   :  { %8649 = vmatprep.subr.bf16.mxu1 %v17543_v16 }
 0xb41   :  { %8650 = vmatpush1.bf16.msra.mxu1 %v17538_v20 }
 0xb42   :  { %8313 = vmatpush1.bf16.msra.mxu0 %v17307_v55  ;;  %v17550_v55 = vld [vmem:[%s18595_s3 + $0x60] ss:$8 sps:$4 sm:$0xff]  }
 0xb43   :  { %8314 = vmatprep.subr.bf16.mxu0 %v17314_v26  ;;  %v17556_v26 = vld [vmem:[%s18595_s3 + $0x164] ss:$8 sps:$4 sm:$0xff]  }
 0xb44   :  { %8651 = vmatprep.subr.bf16.mxu1 %v17556_v26 }
 0xb46   :  { %8315 = vmatpush1.bf16.msra.mxu0 %v17321_v59  ;;  %v17563_v59 = vld [vmem:[%s18595_s3 + $0x54] ss:$8 sps:$4 sm:$0xff]  }
 0xb47   :  { %8316 = vmatprep.subr.bf16.mxu0 %v17328_v14  ;;  %v17568_v14 = vld [vmem:[%s18595_s3 + $0x160] ss:$8 sps:$4 sm:$0xff]  }
 0xb48   :  { %8652 = vmatpush1.bf16.msra.mxu1 %v17568_v14 }
 0xb4a   :  { %8317 = vmatpush2.bf16.msra.mxu0 %v17335_v50  ;;  %v17574_v50 = vld [vmem:[%s18595_s3 + $0x154] ss:$8 sps:$4 sm:$0xff]  }
 0xb4b   :  { %8318 = vmatprep.subr.bf16.mxu0 %v17342_v12  ;;  %v17580_v12 = vld [vmem:[%s18595_s3 + $0x50] ss:$8 sps:$4 sm:$0xff]   ;;  %8653 = vmatprep.subr.bf16.mxu1 %v17574_v50 }
 0xb4c   :  { %19056 = vst [vmem:[#allocation12_spill] sm:$0xff] %v17580_v12 }
 0xb4e   :  { %8319 = vmatpush2.bf16.msra.mxu0 %v17349_v24  ;;  %v17587_v24 = vld [vmem:[%s18595_s3 + $0x44] ss:$8 sps:$4 sm:$0xff]  }
 0xb4f   :  { %8320 = vmatprep.subr.bf16.mxu0 %v17356_v10  ;;  %19057 = vst [vmem:[#allocation13_spill] sm:$0xff] %v17587_v24  ;;  %v17592_v10 = vld [vmem:[%s18595_s3 + $0x150] ss:$8 sps:$4 sm:$0xff]  }
 0xb50   :  { %8654 = vmatpush1.bf16.msra.mxu1 %v17592_v10 }
 0xb52   :  { %8321 = vmatpush2.bf16.msra.mxu0 %v17363_v13  ;;  %v17598_v13 = vld [vmem:[%s18595_s3 + $0x144] ss:$8 sps:$4 sm:$0xff]  }
 0xb53   :  { %8322 = vmatprep.subr.bf16.mxu0 %v17370_v3  ;;  %v17604_v3 = vld [vmem:[%s18595_s3 + $0x40] ss:$8 sps:$4 sm:$0xff]   ;;  %8655 = vmatprep.subr.bf16.mxu1 %v17598_v13 }
 0xb54   :  { %19058 = vst [vmem:[#allocation14_spill] sm:$0xff] %v17604_v3 }
 0xb56   :  { %8323 = vmatpush2.bf16.msra.mxu0 %v17377_v35  ;;  %v17611_v35 = vld [vmem:[%s18595_s3 + $0x34] ss:$8 sps:$4 sm:$0xff]  }
 0xb57   :  { %8324 = vmatprep.subr.bf16.mxu0 %v17384_v40  ;;  %19059 = vst [vmem:[#allocation15_spill] sm:$0xff] %v17611_v35  ;;  %v17616_v40 = vld [vmem:[%s18595_s3 + $0x140] ss:$8 sps:$4 sm:$0xff]  }
 0xb58   :  { %8656 = vmatpush1.bf16.msra.mxu1 %v17616_v40 }
 0xb5a   :  { %8325 = vmatpush2.bf16.msra.mxu0 %v17391_v30  ;;  %v17622_v30 = vld [vmem:[%s18595_s3 + $0x134] ss:$8 sps:$4 sm:$0xff]  }
 0xb5b   :  { %8326 = vmatprep.subr.bf16.mxu0 %v17398_v36  ;;  %v17628_v36 = vld [vmem:[%s18595_s3 + $0x30] ss:$8 sps:$4 sm:$0xff]   ;;  %8657 = vmatprep.subr.bf16.mxu1 %v17622_v30 }
 0xb5c   :  { %19060 = vst [vmem:[#allocation16_spill] sm:$0xff] %v17628_v36 }
 0xb5e   :  { %8327 = vmatpush2.bf16.msra.mxu0 %v17405_v58  ;;  %v17635_v58 = vld [vmem:[%s18595_s3 + $0x24] ss:$8 sps:$4 sm:$0xff]  }
 0xb5f   :  { %8328 = vmatprep.subr.bf16.mxu0 %v17412_v33  ;;  %19061 = vst [vmem:[#allocation17_spill] sm:$0xff] %v17635_v58  ;;  %v17640_v33 = vld [vmem:[%s18595_s3 + $0x130] ss:$8 sps:$4 sm:$0xff]  }
 0xb60   :  { %8658 = vmatpush1.bf16.msra.mxu1 %v17640_v33 }
 0xb62   :  { %8329 = vmatpush2.bf16.msra.mxu0 %v17419_v28  ;;  %v17646_v28 = vld [vmem:[%s18595_s3 + $0x124] ss:$8 sps:$4 sm:$0xff]  }
 0xb63   :  { %8330 = vmatprep.subr.bf16.mxu0 %v17426_v51  ;;  %v17652_v51 = vld [vmem:[%s18595_s3 + $0x20] ss:$8 sps:$4 sm:$0xff]   ;;  %8659 = vmatprep.subr.bf16.mxu1 %v17646_v28 }
 0xb64   :  { %19062 = vst [vmem:[#allocation18_spill] sm:$0xff] %v17652_v51  ;;  %8660 = vmatpush1.bf16.msra.mxu1 %v17664_v46 }
 0xb65   :  { %8661 = vmatprep.subr.bf16.mxu1 %v17670_v53 }
 0xb66   :  { %8331 = vmatpush2.bf16.msra.mxu0 %v17432_v38  ;;  %v17659_v38 = vld [vmem:[%s18595_s3 + $0x14] ss:$8 sps:$4 sm:$0xff]  }
 0xb67   :  { %8852 = vmatprep.subr.bf16.mxu0 %v17528_v47  ;;  %19063 = vst [vmem:[#allocation19_spill] sm:$0xff] %v17659_v38 }
 0xb68   :  { %8662 = vmatpush1.bf16.msra.mxu1 %v17688_v31 }
 0xb69   :  { %8333 = vmatmul.mubr.bf16.vlgmr.msra.gmra.mxu0 %v8134_v52  ;;  %8663 = vmatprep.subr.bf16.mxu1 %v17715_v11  ;;  %v17874_v52 = vld [vmem:[%s18595_s3 + $0x84] ss:$8 sps:$4 sm:$0xff]  }
 0xb6a   :  { %8853 = vmatpush1.bf16.msra.mxu0 %v17523_v60  ;;  %19082 = vst [vmem:[#allocation37_spill] sm:$0xff] %v17874_v52 }
 0xb6b   :  { %8854 = vmatprep.subr.bf16.mxu0 %v17533_v37 }
 0xb6c   :  { %8664 = vmatpush1.bf16.msra.mxu1 %v17725_v23 }
 0xb6d   :  { %8665 = vmatprep.subr.bf16.mxu1 %v17739_v15 }
 0xb6e   :  { %8855 = vmatpush1.bf16.msra.mxu0 %v17550_v55 }
 0xb6f   :  { %8856 = vmatprep.subr.bf16.mxu0 %v17563_v59 }
 0xb70   :  { %8666 = vmatpush2.bf16.msra.mxu1 %v17749_v27 }
 0xb71   :  { %8667 = vmatprep.subr.bf16.mxu1 %v17763_v17 }
 0xb72   :  { %8857 = vmatpush1.bf16.msra.mxu0 %v17580_v12  ;;  %v19083_v12 = vld [vmem:[#allocation38_spill] sm:$0xff] }
 0xb73   :  { %8858 = vmatprep.subr.bf16.mxu0 %v17587_v24 }
 0xb74   :  { %8668 = vmatpush2.bf16.msra.mxu1 %v17773_v43 }
 0xb75   :  { %8669 = vmatprep.subr.bf16.mxu1 %v17787_v7 }
 0xb76   :  { %8859 = vmatpush1.bf16.msra.mxu0 %v17604_v3 }
 0xb77   :  { %8860 = vmatprep.subr.bf16.mxu0 %v17611_v35 }
 0xb78   :  { %8670 = vmatpush2.bf16.msra.mxu1 %v17797_v63 }
 0xb79   :  { %8671 = vmatprep.subr.bf16.mxu1 %v17811_v18 }
 0xb7a   :  { %8861 = vmatpush1.bf16.msra.mxu0 %v17628_v36 }
 0xb7b   :  { %8862 = vmatprep.subr.bf16.mxu0 %v17635_v58 }
 0xb7c   :  { %8672 = vmatpush2.bf16.msra.mxu1 %v17821_v62 }
 0xb7d   :  { %8673 = vmatprep.subr.bf16.mxu1 %v17835_v44 }
 0xb7e   :  { %8863 = vmatpush1.bf16.msra.mxu0 %v17652_v51 }
 0xb7f   :  { %8864 = vmatprep.subr.bf16.mxu0 %v17659_v38 }
 0xb80   :  { %8674 = vmatpush2.bf16.msra.mxu1 %v17845_v54 }
 0xb81   :  { %8675 = vmatprep.subr.bf16.mxu1 %v17864_v8 }
 0xb82   :  { %8865 = vmatpush1.bf16.msra.mxu0 %v17676_v56 }
 0xb83   :  { %8866 = vmatprep.subr.bf16.mxu0 %v17683_v0 }
 0xb84   :  { %8676 = vmatpush2.bf16.msra.mxu1 %v17859_v19 }
 0xb86   :  { %8867 = vmatpush1.bf16.msra.mxu0 %v17695_v45 }
 0xb87   :  { %8868 = vmatprep.subr.bf16.mxu0 %v17702_v57 }
 0xb8a   :  { %8869 = vmatpush2.bf16.msra.mxu0 %v17708_v21 }
 0xb8b   :  { %8870 = vmatprep.subr.bf16.mxu0 %v17720_v9 }
 0xb8e   :  { %8871 = vmatpush2.bf16.msra.mxu0 %v17730_v5 }
 0xb8f   :  { %8872 = vmatprep.subr.bf16.mxu0 %v17744_v1 }
 0xb92   :  { %8873 = vmatpush2.bf16.msra.mxu0 %v17754_v39 }
 0xb93   :  { %8874 = vmatprep.subr.bf16.mxu0 %v17768_v29 }
 0xb96   :  { %8875 = vmatpush2.bf16.msra.mxu0 %v17778_v32 }
 0xb97   :  { %8876 = vmatprep.subr.bf16.mxu0 %v17792_v2 }
 0xb9a   :  { %8877 = vmatpush2.bf16.msra.mxu0 %v17802_v6 }
 0xb9b   :  { %8878 = vmatprep.subr.bf16.mxu0 %v17816_v25 }
 0xb9e   :  { %8879 = vmatpush2.bf16.msra.mxu0 %v17826_v42  ;;  %v17895_v42 = vld [vmem:[%s18595_s3 + $0x184] ss:$8 sps:$4 sm:$0xff]  }
 0xb9f   :  { %8880 = vmatprep.subr.bf16.mxu0 %v17840_v48  ;;  %v17887_v48 = vld [vmem:[%s18595_s3 + $0x190] ss:$8 sps:$4 sm:$0xff]  }
 0xba2   :  { %8881 = vmatpush2.bf16.msra.mxu0 %v17850_v22  ;;  %v17879_v22 = vld [vmem:[%s18595_s3 + $0x194] ss:$8 sps:$4 sm:$0xff]  }
 0xba3   :  { %8882 = vmatprep.subr.bf16.mxu0 %v17874_v52  ;;  %8677 = vmatprep.subr.bf16.mxu1 %v17879_v22  ;;  %v17901_v52 = vld [vmem:[%s18595_s3 + $0x180] ss:$8 sps:$4 sm:$0xff]  }
 0xba4   :  { %8678 = vmatpush2.bf16.msra.mxu1 %v17887_v48 }
 0xba5   :  { %8679 = vmatprep.subr.bf16.mxu1 %v17895_v42 }
 0xba6   :  { %8883 = vmatpush2.bf16.msra.mxu0 %v17869_v4 }
 0xba7   :  { %9452 = vmatprep.subr.bf16.mxu0 %v17543_v16  ;;  %v17908_v16 = vld [vmem:[%s18595_s3 + $0x274] ss:$8 sps:$4 sm:$0xff]  }
 0xba8   :  { %8680 = vmatpush2.bf16.msra.mxu1 %v17901_v52 }
 0xba9   :  { %9107 = vmatprep.subr.bf16.mxu1 %v17908_v16 }
 0xbe0   :  { %v8079_v6 = vpop.f32.mrf.mxu1 }
 0xbe2   :  { %v8081_v32 = vpop.f32.mrf.mxu1 }
 0xbe4   :  { %v8083_v1 = vpop.f32.mrf.mxu1 }
 0xbe6   :  { %v8085_v38 = vpop.f32.mrf.mxu1 }
 0xbe9   :  { %v7876_v4 = vpop.f32.mrf.mxu0 }
 0xbea   :  { %v8080_v39 = vadd.f32 %v8079_v6, %v7876_v4  ;;  %v19084_v6 = vmax.f32 %v19083_v12, 0.0 }
 0xbeb   :  { %v7878_v25 = vpop.f32.mrf.mxu0 }
 0xbec   :  { %v8082_v9 = vadd.f32 %v8081_v32, %v7878_v25 }
 0xbed   :  { %v7880_v2 = vpop.f32.mrf.mxu0 }
 0xbee   :  { %v8084_v45 = vadd.f32 %v8083_v1, %v7880_v2 }
 0xbef   :  { %v7882_v29 = vpop.f32.mrf.mxu0 }
 0xbf0   :  { %v8086_v58 = vadd.f32 %v8085_v38, %v7882_v29  ;;  %v19092_v29 = vld [vmem:[#allocation11_spill] sm:$0xff] }
 0xbf1   :  { %v19093_v32 = vmax.f32 %v19092_v29, 0.0 }
 0xc29   :  { %v8334_v5 = vpop.f32.mrf.mxu0 }
 0xc2a   :  { %v8343_v21 = vadd.f32 %v8334_v5, %v8080_v39 }
 0xc2b   :  { %v8336_v57 = vpop.f32.mrf.mxu0 }
 0xc2c   :  { %v8347_v0 = vadd.f32 %v8343_v21, %v14516_v34  ;;  %v8344_v56 = vadd.f32 %v8336_v57, %v8082_v9  ;;  %v19086_v21 = vld [vmem:[#allocation40_spill] sm:$0xff] }
 0xc2d   :  { %v8338_v51 = vpop.f32.mrf.mxu0  ;;  %v19087_v9 = vmax.f32 %v19086_v21, 0.0 }
 0xc2e   :  { %v8351_v36 = vmul.f32 %v14101_v49, %v8347_v0  ;;  %v8348_v35 = vadd.f32 %v8344_v56, %v14520_v41  ;;  %v8345_v3 = vadd.f32 %v8338_v51, %v8084_v45  ;;  %v19089_v56 = vld [vmem:[#allocation10_spill] sm:$0xff] }
 0xc2f   :  { %v8340_v24 = vpop.f32.mrf.mxu0 }
 0xc30   :  { %v17916_v4 = vadd.f32 %v8351_v36, %v19084_v6  ;;  %v8352_v5 = vmul.f32 %v14101_v49, %v8348_v35  ;;  %v8349_v1 = vadd.f32 %v8345_v3, %v14516_v34  ;;  %v8346_v39 = vadd.f32 %v8340_v24, %v8086_v58 }
 0xc31   :  { %v19090_v35 = vmax.f32 %v19089_v56, 0.0 }
 0xc32   :  { %19085 = vst [vmem:[#allocation38_spill] sm:$0xff] %v17916_v4  ;;  %v18785_v57 = vmax.f32 %v17916_v4, 0.0  ;;  %v17923_v38 = vadd.f32 %v8352_v5, %v19087_v9  ;;  %v8353_v0 = vmul.f32 %v14109_v61, %v8349_v1  ;;  %v8350_v51 = vadd.f32 %v8346_v39, %v14520_v41 }
 0xc34   :  { %19088 = vst [vmem:[#allocation40_spill] sm:$0xff] %v17923_v38  ;;  %v8367_v12 = vrot.slane %v18785_v57, 7  ;;  %v18784_v36 = vmax.f32 %v17923_v38, 0.0  ;;  %v17932_v45 = vadd.f32 %v8353_v0, %v19090_v35  ;;  %v8354_v24 = vmul.f32 %v14109_v61, %v8350_v51 }
 0xc36   :  { %19091 = vst [vmem:[#allocation10_spill] sm:$0xff] %v17932_v45  ;;  %8379 = vst [vmem:[#allocation3] sm:$0xfe] %v8367_v12  ;;  %v8368_v3 = vrot.slane %v18784_v36, 7  ;;  %v18782_v58 = vmax.f32 %v17932_v45, 0.0  ;;  %v17940_v2 = vadd.f32 %v8354_v24, %v19093_v32 }
 0xc38   :  { %19094 = vst [vmem:[#allocation11_spill] sm:$0xff] %v17940_v2  ;;  %8380 = vst [vmem:[#allocation3 + $0x8] sm:$0xfe] %v8368_v3  ;;  %v8369_v25 = vrot.slane %v18782_v58, 7  ;;  %v18783_v6 = vmax.f32 %v17940_v2, 0.0 }
 0xc3a   :  { %v17946_v5 = vsel %vm301_vm9, %v8367_v12, %v8369_v25  ;;  %8383 = vst [vmem:[#allocation3 + $0x20] sm:$0x1] %v8369_v25  ;;  %v8371_v1 = vrot.slane %v18783_v6, 7 }
 0xc3c   :  { %v8372_v39 = vsel %vm301_vm9, %v8368_v3, %v8371_v1  ;;  %8384 = vst [vmem:[#allocation3 + $0x28] sm:$0x1] %v8371_v1 }
 0xc3d   :  { %v8423_v21 = vld [vmem:[#allocation3] sm:$0xfe] }
 0xc3e   :  { %v8385_v9 = vld [vmem:[#allocation3] sm:$0xff]  ;;  %v8427_v0 = vpack.c.bf16 %v17946_v5, %v8423_v21 }
 0xc3f   :  { %v8386_v51 = vld [vmem:[#allocation3 + $0x8] sm:$0xff]  ;;  %v8389_v29 = vpack.c.bf16 %v17946_v5, %v8385_v9 }
 0xc40   :  { %v8424_v56 = vld [vmem:[#allocation3 + $0x8] sm:$0xfe]  ;;  %v8390_v35 = vpack.c.bf16 %v8372_v39, %v8386_v51  ;;  %v8466_v12 = vshll.u32 %v8427_v0, 16  ;;  %v8464_v38 = vshrl.u32 %v8427_v0, 16 }
 0xc41   :  { %v8428_v24 = vpack.c.bf16 %v8372_v39, %v8424_v56  ;;  %v8425_v32 = vld [vmem:[#allocation3 + $0x20] sm:$0x1]  ;;  %v8896_v36 = vld [vmem:[#allocation3 + $0x8] sm:$0xfc] }
 0xc42   :  { %8884 = vmatprep.mubr.bf16.mxu0 %v8390_v35  ;;  %v8429_v58 = vpack.c.bf16 %v8425_v32, %v8425_v32  ;;  %v8468_v21 = vrot.slane %v8466_v12, 1  ;;  %v8900_v56 = vpack.c.bf16 %v8372_v39, %v8896_v36  ;;  %v17966_v36 = vld [vmem:[%s18595_s3 + $0x264] ss:$8 sps:$4 sm:$0xff]  }
 0xc43   :  { %v8478_v25 = vshll.u32 %v8428_v24, 16  ;;  %8885 = vmatmul.mubr.bf16.vlgmr.msra.gmra.mxu0 %v8389_v29  ;;  %v8426_v6 = vld [vmem:[#allocation3 + $0x28] sm:$0x1]  ;;  %v8476_v51 = vshrl.u32 %v8428_v24, 16  ;;  %v19096_v12 = vld [vmem:[#allocation13_spill] sm:$0xff] }
 0xc44   :  { %v8898_v3 = vld [vmem:[#allocation3 + $0x28] sm:$0x3]  ;;  %v8430_v1 = vpack.c.bf16 %v8426_v6, %v8426_v6  ;;  %v8471_v2 = vshll.u32 %v8429_v58, 16  ;;  %9453 = vmatpush1.bf16.msra.mxu0 %v17538_v20  ;;  %v17959_v58 = vld [vmem:[%s18595_s3 + $0x270] ss:$8 sps:$4 sm:$0xff]   ;;  %v8469_v20 = vor.u32 %v8468_v21, %v8464_v38  ;;  %v8942_v6 = vrot.slane %v8900_v56, 1 }
 0xc45   :  { %v8480_v57 = vrot.slane %v8478_v25, 1  ;;  %v8902_v45 = vpack.c.bf16 %v8898_v3, %v8898_v3  ;;  %9454 = vmatprep.subr.bf16.mxu0 %v17556_v26  ;;  %v17996_v38 = vld [vmem:[%s18595_s3 + $0x244] ss:$8 sps:$4 sm:$0xff]   ;;  %v19098_v3 = vld [vmem:[#allocation15_spill] sm:$0xff] }
 0xc46   :  { %v8483_v9 = vshll.u32 %v8430_v1, 16  ;;  %v8473_v35 = vrot.slane %v8471_v2, 1  ;;  %v19097_v25 = vld [vmem:[#allocation14_spill] sm:$0xff]  ;;  %v19100_v1 = vld [vmem:[#allocation17_spill] sm:$0xff] }
 0xc47   :  { %v8481_v4 = vor.u32 %v8480_v57, %v8476_v51  ;;  %v8943_v29 = vrot.slane %v8902_v45, 1  ;;  %v8895_v45 = vld [vmem:[#allocation3] sm:$0xfc]  ;;  %v19101_v21 = vld [vmem:[#allocation18_spill] sm:$0xff]  ;;  %v19106_v51 = vld [vmem:[#allocation23_spill] sm:$0xff] }
 0xc48   :  { %v8485_v32 = vrot.slane %v8483_v9, 1  ;;  %9455 = vmatpush1.bf16.msra.mxu0 %v17568_v14  ;;  %v8474_v57 = vsel %vm399_vm10, %v8469_v20, %v8473_v35  ;;  %v8899_v39 = vpack.c.bf16 %v17946_v5, %v8895_v45  ;;  %v19095_v5 = vld [vmem:[#allocation12_spill] sm:$0xff]  ;;  %v19108_v56 = vld [vmem:[#allocation25_spill] sm:$0xff]  ;;  %v19109_v35 = vld [vmem:[#allocation26_spill] sm:$0xff] }
 0xc49   :  { %9456 = vmatprep.subr.bf16.mxu0 %v17574_v50  ;;  %v8944_v14 = vsel %vm877_vm11, %v8942_v6, %v8943_v29  ;;  %v17975_v50 = vld [vmem:[%s18595_s3 + $0x260] ss:$8 sps:$4 sm:$0xff]   ;;  %v19114_v6 = vld [vmem:[#allocation31_spill] sm:$0xff] }
 0xc4a   :  { %v8486_v26 = vsel %vm399_vm10, %v8481_v4, %v8485_v32  ;;  %v17981_v4 = vld [vmem:[%s18595_s3 + $0x254] ss:$8 sps:$4 sm:$0xff]   ;;  %v8939_v0 = vrot.slane %v8899_v39, 1  ;;  %v19112_v20 = vld [vmem:[#allocation29_spill] sm:$0xff] }
 0xc4b   :  { %8681 = vmatprep.mubr.bf16.mxu1 %v8486_v26  ;;  %v19107_v9 = vld [vmem:[#allocation24_spill] sm:$0xff]  ;;  %v19110_v32 = vld [vmem:[#allocation27_spill] sm:$0xff]  ;;  %v19113_v26 = vld [vmem:[#allocation30_spill] sm:$0xff] }
 0xc4c   :  { %8682 = vmatmul.mubr.bf16.vlgmr.msra.gmra.mxu1 %v8474_v57  ;;  %9457 = vmatpush1.bf16.msra.mxu0 %v17592_v10  ;;  %v17989_v10 = vld [vmem:[%s18595_s3 + $0x250] ss:$8 sps:$4 sm:$0xff]   ;;  %v19120_v39 = vld [vmem:[#allocation37_spill] sm:$0xff] }
 0xc4d   :  { %9108 = vmatpush1.bf16.msra.mxu1 %v17959_v58  ;;  %9139 = vmatprep.mubr.bf16.mxu1 %v8944_v14  ;;  %v19111_v29 = vld [vmem:[#allocation28_spill] sm:$0xff]  ;;  %v19116_v14 = vld [vmem:[#allocation33_spill] sm:$0xff]  ;;  %v19118_v45 = vld [vmem:[#allocation35_spill] sm:$0xff] }
 0xc4e   :  { %9109 = vmatprep.subr.bf16.mxu1 %v17966_v36  ;;  %9458 = vmatprep.subr.bf16.mxu0 %v17598_v13  ;;  %v18003_v13 = vld [vmem:[%s18595_s3 + $0x240] ss:$8 sps:$4 sm:$0xff]  }
 0xc4f   :  { %v19115_v57 = vld [vmem:[#allocation32_spill] sm:$0xff] }
 0xc50   :  { %9459 = vmatpush1.bf16.msra.mxu0 %v17616_v40  ;;  %v18010_v40 = vld [vmem:[%s18595_s3 + $0x234] ss:$8 sps:$4 sm:$0xff]  }
 0xc51   :  { %9110 = vmatpush1.bf16.msra.mxu1 %v17975_v50  ;;  %9460 = vmatprep.subr.bf16.mxu0 %v17622_v30  ;;  %v18017_v30 = vld [vmem:[%s18595_s3 + $0x230] ss:$8 sps:$4 sm:$0xff]  }
 0xc52   :  { %9111 = vmatprep.subr.bf16.mxu1 %v17981_v4 }
 0xc54   :  { %9461 = vmatpush1.bf16.msra.mxu0 %v17640_v33  ;;  %v18024_v33 = vld [vmem:[%s18595_s3 + $0x224] ss:$8 sps:$4 sm:$0xff]  }
 0xc55   :  { %9112 = vmatpush1.bf16.msra.mxu1 %v17989_v10  ;;  %9462 = vmatprep.subr.bf16.mxu0 %v17646_v28  ;;  %v18031_v28 = vld [vmem:[%s18595_s3 + $0x220] ss:$8 sps:$4 sm:$0xff]  }
 0xc56   :  { %9113 = vmatprep.subr.bf16.mxu1 %v17996_v38 }
 0xc58   :  { %9463 = vmatpush1.bf16.msra.mxu0 %v17664_v46  ;;  %v18038_v46 = vld [vmem:[%s18595_s3 + $0x214] ss:$8 sps:$4 sm:$0xff]  }
 0xc59   :  { %9114 = vmatpush1.bf16.msra.mxu1 %v18003_v13  ;;  %9464 = vmatprep.subr.bf16.mxu0 %v17670_v53  ;;  %v18045_v53 = vld [vmem:[%s18595_s3 + $0x210] ss:$8 sps:$4 sm:$0xff]  }
 0xc5a   :  { %9115 = vmatprep.subr.bf16.mxu1 %v18010_v40 }
 0xc5c   :  { %9465 = vmatpush1.bf16.msra.mxu0 %v17688_v31  ;;  %v18052_v31 = vld [vmem:[%s18595_s3 + $0x204] ss:$8 sps:$4 sm:$0xff]  }
 0xc5d   :  { %9116 = vmatpush1.bf16.msra.mxu1 %v18017_v30  ;;  %9466 = vmatprep.subr.bf16.mxu0 %v17715_v11  ;;  %v18059_v11 = vld [vmem:[%s18595_s3 + $0x200] ss:$8 sps:$4 sm:$0xff]  }
 0xc5e   :  { %9117 = vmatprep.subr.bf16.mxu1 %v18024_v33 }
 0xc60   :  { %9467 = vmatpush1.bf16.msra.mxu0 %v17725_v23  ;;  %v18066_v23 = vld [vmem:[%s18595_s3 + $0x2f4] ss:$8 sps:$4 sm:$0xff]  }
 0xc61   :  { %9118 = vmatpush1.bf16.msra.mxu1 %v18031_v28  ;;  %9468 = vmatprep.subr.bf16.mxu0 %v17739_v15  ;;  %v18073_v15 = vld [vmem:[%s18595_s3 + $0x2f0] ss:$8 sps:$4 sm:$0xff]  }
 0xc62   :  { %9119 = vmatprep.subr.bf16.mxu1 %v18038_v46 }
 0xc64   :  { %9469 = vmatpush2.bf16.msra.mxu0 %v17749_v27  ;;  %v18080_v27 = vld [vmem:[%s18595_s3 + $0x2e4] ss:$8 sps:$4 sm:$0xff]  }
 0xc65   :  { %9120 = vmatpush1.bf16.msra.mxu1 %v18045_v53  ;;  %9470 = vmatprep.subr.bf16.mxu0 %v17763_v17  ;;  %v18087_v17 = vld [vmem:[%s18595_s3 + $0x2e0] ss:$8 sps:$4 sm:$0xff]  }
 0xc66   :  { %9121 = vmatprep.subr.bf16.mxu1 %v18052_v31 }
 0xc68   :  { %9471 = vmatpush2.bf16.msra.mxu0 %v17773_v43  ;;  %v18094_v43 = vld [vmem:[%s18595_s3 + $0x2d4] ss:$8 sps:$4 sm:$0xff]  }
 0xc69   :  { %9122 = vmatpush1.bf16.msra.mxu1 %v18059_v11  ;;  %9472 = vmatprep.subr.bf16.mxu0 %v17787_v7  ;;  %v18101_v7 = vld [vmem:[%s18595_s3 + $0x2d0] ss:$8 sps:$4 sm:$0xff]  }
 0xc6a   :  { %9123 = vmatprep.subr.bf16.mxu1 %v18066_v23 }
 0xc6c   :  { %9473 = vmatpush2.bf16.msra.mxu0 %v17797_v63  ;;  %v18108_v63 = vld [vmem:[%s18595_s3 + $0x2c4] ss:$8 sps:$4 sm:$0xff]  }
 0xc6d   :  { %9124 = vmatpush2.bf16.msra.mxu1 %v18073_v15  ;;  %9474 = vmatprep.subr.bf16.mxu0 %v17811_v18  ;;  %v18115_v18 = vld [vmem:[%s18595_s3 + $0x2c0] ss:$8 sps:$4 sm:$0xff]  }
 0xc6e   :  { %9125 = vmatprep.subr.bf16.mxu1 %v18080_v27 }
 0xc70   :  { %9475 = vmatpush2.bf16.msra.mxu0 %v17821_v62  ;;  %v18122_v62 = vld [vmem:[%s18595_s3 + $0x2b4] ss:$8 sps:$4 sm:$0xff]  }
 0xc71   :  { %9126 = vmatpush2.bf16.msra.mxu1 %v18087_v17  ;;  %9476 = vmatprep.subr.bf16.mxu0 %v17835_v44  ;;  %v18129_v44 = vld [vmem:[%s18595_s3 + $0x2b0] ss:$8 sps:$4 sm:$0xff]  }
 0xc72   :  { %9127 = vmatprep.subr.bf16.mxu1 %v18094_v43 }
 0xc74   :  { %9477 = vmatpush2.bf16.msra.mxu0 %v17845_v54  ;;  %v18136_v54 = vld [vmem:[%s18595_s3 + $0x2a4] ss:$8 sps:$4 sm:$0xff]  }
 0xc75   :  { %9128 = vmatpush2.bf16.msra.mxu1 %v18101_v7  ;;  %9478 = vmatprep.subr.bf16.mxu0 %v17864_v8  ;;  %v8897_v8 = vld [vmem:[#allocation3 + $0x20] sm:$0x3] }
 0xc76   :  { %9129 = vmatprep.subr.bf16.mxu1 %v18108_v63  ;;  %v8901_v2 = vpack.c.bf16 %v8897_v8, %v8897_v8  ;;  %v19117_v8 = vld [vmem:[#allocation34_spill] sm:$0xff] }
 0xc78   :  { %9479 = vmatpush2.bf16.msra.mxu0 %v17859_v19  ;;  %v18143_v19 = vld [vmem:[%s18595_s3 + $0x2a0] ss:$8 sps:$4 sm:$0xff]  }
 0xc79   :  { %9130 = vmatpush2.bf16.msra.mxu1 %v18115_v18  ;;  %9480 = vmatprep.subr.bf16.mxu0 %v17879_v22  ;;  %v18150_v22 = vld [vmem:[%s18595_s3 + $0x294] ss:$8 sps:$4 sm:$0xff]  }
 0xc7a   :  { %9131 = vmatprep.subr.bf16.mxu1 %v18122_v62 }
 0xc7c   :  { %9481 = vmatpush2.bf16.msra.mxu0 %v17887_v48  ;;  %v18157_v48 = vld [vmem:[%s18595_s3 + $0x290] ss:$8 sps:$4 sm:$0xff]  }
 0xc7d   :  { %9132 = vmatpush2.bf16.msra.mxu1 %v18129_v44  ;;  %9482 = vmatprep.subr.bf16.mxu0 %v17895_v42  ;;  %v18164_v42 = vld [vmem:[%s18595_s3 + $0x284] ss:$8 sps:$4 sm:$0xff]  }
 0xc7e   :  { %9133 = vmatprep.subr.bf16.mxu1 %v18136_v54 }
 0xc80   :  { %9483 = vmatpush2.bf16.msra.mxu0 %v17901_v52  ;;  %v18170_v52 = vld [vmem:[%s18595_s3 + $0x280] ss:$8 sps:$4 sm:$0xff]  }
 0xc81   :  { %9134 = vmatpush2.bf16.msra.mxu1 %v18143_v19  ;;  %9910 = vmatprep.subr.bf16.mxu0 %v17908_v16  ;;  %v8940_v16 = vrot.slane %v8901_v2, 1  ;;  %v19119_v2 = vld [vmem:[#allocation36_spill] sm:$0xff] }
 0xc82   :  { %9135 = vmatprep.subr.bf16.mxu1 %v18150_v22 }
 0xc83   :  { %v8941_v24 = vsel %vm877_vm11, %v8939_v0, %v8940_v16  ;;  %v19121_v16 = vld [vmem:[#allocation39_spill] sm:$0xff] }
 0xc85   :  { %9136 = vmatpush2.bf16.msra.mxu1 %v18157_v48 }
 0xc86   :  { %9137 = vmatprep.subr.bf16.mxu1 %v18164_v42 }
 0xc89   :  { %9138 = vmatpush2.bf16.msra.mxu1 %v18170_v52 }
 0xc8a   :  { %9655 = vmatprep.subr.bf16.mxu1 %v17528_v47  ;;  %v19099_v47 = vld [vmem:[#allocation16_spill] sm:$0xff] }
 0xc8c   :  { %9140 = vmatmul.mubr.bf16.vlgmr.msra.gmra.mxu1 %v8941_v24 }
 0xc8d   :  { %9656 = vmatpush1.bf16.msra.mxu1 %v17523_v60  ;;  %v19102_v60 = vld [vmem:[#allocation19_spill] sm:$0xff] }
 0xc8e   :  { %9657 = vmatprep.subr.bf16.mxu1 %v17533_v37  ;;  %v19103_v37 = vld [vmem:[#allocation20_spill] sm:$0xff] }
 0xc91   :  { %9658 = vmatpush1.bf16.msra.mxu1 %v17550_v55  ;;  %v19104_v55 = vld [vmem:[#allocation21_spill] sm:$0xff] }
 0xc92   :  { %9659 = vmatprep.subr.bf16.mxu1 %v17563_v59  ;;  %v19105_v59 = vld [vmem:[#allocation22_spill] sm:$0xff] }
 0xc95   :  { %9660 = vmatpush1.bf16.msra.mxu1 %v19095_v5 }
 0xc96   :  { %9661 = vmatprep.subr.bf16.mxu1 %v19096_v12 }
 0xc99   :  { %9662 = vmatpush1.bf16.msra.mxu1 %v19097_v25 }
 0xc9a   :  { %9663 = vmatprep.subr.bf16.mxu1 %v19098_v3 }
 0xc9d   :  { %9664 = vmatpush1.bf16.msra.mxu1 %v19099_v47 }
 0xc9e   :  { %9665 = vmatprep.subr.bf16.mxu1 %v19100_v1 }
 0xca1   :  { %9666 = vmatpush1.bf16.msra.mxu1 %v19101_v21 }
 0xca2   :  { %9667 = vmatprep.subr.bf16.mxu1 %v19102_v60 }
 0xca5   :  { %9668 = vmatpush1.bf16.msra.mxu1 %v19103_v37 }
 0xca6   :  { %9669 = vmatprep.subr.bf16.mxu1 %v19104_v55 }
 0xca9   :  { %9670 = vmatpush1.bf16.msra.mxu1 %v19105_v59 }
 0xcaa   :  { %9671 = vmatprep.subr.bf16.mxu1 %v19106_v51 }
 0xcad   :  { %9672 = vmatpush2.bf16.msra.mxu1 %v19107_v9 }
 0xcae   :  { %9673 = vmatprep.subr.bf16.mxu1 %v19108_v56 }
 0xcb1   :  { %9674 = vmatpush2.bf16.msra.mxu1 %v19109_v35 }
 0xcb2   :  { %9675 = vmatprep.subr.bf16.mxu1 %v19110_v32 }
 0xcb5   :  { %9676 = vmatpush2.bf16.msra.mxu1 %v19111_v29 }
 0xcb6   :  { %9677 = vmatprep.subr.bf16.mxu1 %v19112_v20 }
 0xcb9   :  { %9678 = vmatpush2.bf16.msra.mxu1 %v19113_v26 }
 0xcba   :  { %9679 = vmatprep.subr.bf16.mxu1 %v19114_v6 }
 0xcbd   :  { %9680 = vmatpush2.bf16.msra.mxu1 %v19115_v57 }
 0xcbe   :  { %9681 = vmatprep.subr.bf16.mxu1 %v19116_v14 }
 0xcc1   :  { %9682 = vmatpush2.bf16.msra.mxu1 %v19117_v8 }
 0xcc2   :  { %9683 = vmatprep.subr.bf16.mxu1 %v19118_v45 }
 0xcc5   :  { %9684 = vmatpush2.bf16.msra.mxu1 %v19119_v2 }
 0xcc6   :  { %9685 = vmatprep.subr.bf16.mxu1 %v19120_v39 }
 0xcc9   :  { %9686 = vmatpush2.bf16.msra.mxu1 %v19121_v16 }
 0xd03   :  { %v8886_v5 = vpop.f32.mrf.mxu0 }
 0xd05   :  { %v8888_v25 = vpop.f32.mrf.mxu0 }
 0xd07   :  { %v8890_v1 = vpop.f32.mrf.mxu0 }
 0xd09   :  { %v8892_v56 = vpop.f32.mrf.mxu0 }
 0xd0c   :  { %v8683_v0 = vpop.f32.mrf.mxu1 }
 0xd0d   :  { %v8887_v47 = vadd.f32 %v8886_v5, %v8683_v0 }
 0xd0e   :  { %v8685_v24 = vpop.f32.mrf.mxu1 }
 0xd0f   :  { %v8889_v60 = vadd.f32 %v8888_v25, %v8685_v24 }
 0xd10   :  { %v8687_v12 = vpop.f32.mrf.mxu1 }
 0xd11   :  { %v8891_v59 = vadd.f32 %v8890_v1, %v8687_v12 }
 0xd12   :  { %v8689_v3 = vpop.f32.mrf.mxu1 }
 0xd13   :  { %v8893_v32 = vadd.f32 %v8892_v56, %v8689_v3 }
 0xd4c   :  { %v9141_v21 = vpop.f32.mrf.mxu1 }
 0xd4d   :  { %v9150_v37 = vadd.f32 %v9141_v21, %v8887_v47 }
 0xd4e   :  { %v9143_v55 = vpop.f32.mrf.mxu1 }
 0xd4f   :  { %v9154_v51 = vadd.f32 %v9150_v37, %v14516_v34  ;;  %v9151_v9 = vadd.f32 %v9143_v55, %v8889_v60 }
 0xd50   :  { %v9145_v35 = vpop.f32.mrf.mxu1 }
 0xd51   :  { %v9158_v29 = vmax.f32 %v9154_v51, 0.0  ;;  %v9155_v20 = vadd.f32 %v9151_v9, %v14520_v41  ;;  %v9152_v26 = vadd.f32 %v9145_v35, %v8891_v59 }
 0xd52   :  { %v9147_v6 = vpop.f32.mrf.mxu1 }
 0xd53   :  { %v9162_v57 = vmul.f32 %v14101_v49, %v9158_v29  ;;  %v9159_v14 = vmax.f32 %v9155_v20, 0.0  ;;  %v9156_v8 = vadd.f32 %v9152_v26, %v14516_v34  ;;  %v9153_v45 = vadd.f32 %v9147_v6, %v8893_v32 }
 0xd55   :  { %v9170_v2 = vrot.slane %v9162_v57, 7  ;;  %v9163_v39 = vmul.f32 %v14101_v49, %v9159_v14  ;;  %v9160_v16 = vmax.f32 %v9156_v8, 0.0  ;;  %v9157_v0 = vadd.f32 %v9153_v45, %v14520_v41 }
 0xd57   :  { %9182 = vst [vmem:[#allocation4] sm:$0xfe] %v9170_v2  ;;  %v9171_v24 = vrot.slane %v9163_v39, 7  ;;  %v9164_v5 = vmul.f32 %v14109_v61, %v9160_v16  ;;  %v9161_v12 = vmax.f32 %v9157_v0, 0.0 }
 0xd59   :  { %9183 = vst [vmem:[#allocation4 + $0x8] sm:$0xfe] %v9171_v24  ;;  %v9172_v25 = vrot.slane %v9164_v5, 7  ;;  %v9165_v3 = vmul.f32 %v14109_v61, %v9161_v12 }
 0xd5b   :  { %v18217_v47 = vsel %vm301_vm9, %v9170_v2, %v9172_v25  ;;  %9186 = vst [vmem:[#allocation4 + $0x20] sm:$0x1] %v9172_v25  ;;  %v9174_v1 = vrot.slane %v9165_v3, 7 }
 0xd5d   :  { %v9175_v21 = vsel %vm301_vm9, %v9171_v24, %v9174_v1  ;;  %9187 = vst [vmem:[#allocation4 + $0x28] sm:$0x1] %v9174_v1 }
 0xd5e   :  { %v9226_v60 = vld [vmem:[#allocation4] sm:$0xfe] }
 0xd5f   :  { %v9188_v37 = vld [vmem:[#allocation4] sm:$0xff]  ;;  %v9230_v55 = vpack.c.bf16 %v18217_v47, %v9226_v60 }
 0xd60   :  { %v9189_v59 = vld [vmem:[#allocation4 + $0x8] sm:$0xff]  ;;  %v9192_v35 = vpack.c.bf16 %v18217_v47, %v9188_v37 }
 0xd61   :  { %v9227_v51 = vld [vmem:[#allocation4 + $0x8] sm:$0xfe]  ;;  %v9193_v9 = vpack.c.bf16 %v9175_v21, %v9189_v59  ;;  %v9269_v29 = vshll.u32 %v9230_v55, 16  ;;  %v9267_v12 = vshrl.u32 %v9230_v55, 16  ;;  %v9976_v55 = vld [vmem:[%s18597_s5 + $0x18] sm:$0xff] }
 0xd62   :  { %v9231_v56 = vpack.c.bf16 %v9175_v21, %v9227_v51  ;;  %v9228_v32 = vld [vmem:[#allocation4 + $0x20] sm:$0x1]  ;;  %v9699_v57 = vld [vmem:[#allocation4 + $0x8] sm:$0xfc] }
 0xd63   :  { %9687 = vmatprep.mubr.bf16.mxu1 %v9193_v9  ;;  %v9232_v26 = vpack.c.bf16 %v9228_v32, %v9228_v32  ;;  %v9271_v39 = vrot.slane %v9269_v29, 1  ;;  %v9703_v5 = vpack.c.bf16 %v9175_v21, %v9699_v57  ;;  %v9992_v21 = vld [vmem:[%s18597_s5 + $0x98] sm:$0xff]  ;;  %v9975_v32 = vld [vmem:[%s18597_s5 + $0x10] sm:$0xff]  ;;  %v9990_v29 = vld [vmem:[%s18597_s5 + $0x88] sm:$0xff] }
 0xd64   :  { %v9281_v20 = vshll.u32 %v9231_v56, 16  ;;  %9688 = vmatmul.mubr.bf16.vlgmr.msra.gmra.mxu1 %v9192_v35  ;;  %v9229_v6 = vld [vmem:[#allocation4 + $0x28] sm:$0x1]  ;;  %v9279_v0 = vshrl.u32 %v9231_v56, 16 }
 0xd65   :  { %v9701_v14 = vld [vmem:[#allocation4 + $0x28] sm:$0x3]  ;;  %v9233_v8 = vpack.c.bf16 %v9229_v6, %v9229_v6  ;;  %v9274_v2 = vshll.u32 %v9232_v26, 16  ;;  %v9272_v37 = vor.u32 %v9271_v39, %v9267_v12  ;;  %v9745_v51 = vrot.slane %v9703_v5, 1  ;;  %v9989_v26 = vld [vmem:[%s18597_s5 + $0x80] sm:$0xff] }
 0xd66   :  { %v9283_v45 = vrot.slane %v9281_v20, 1  ;;  %v9705_v16 = vpack.c.bf16 %v9701_v14, %v9701_v14  ;;  %v9991_v56 = vld [vmem:[%s18597_s5 + $0x90] sm:$0xff]  ;;  %v9974_v20 = vld [vmem:[%s18597_s5 + $0x8] sm:$0xff]  ;;  %v9973_v6 = vld [vmem:[%s18597_s5] sm:$0xff] }
 0xd67   :  { %v9286_v24 = vshll.u32 %v9233_v8, 16  ;;  %v9276_v25 = vrot.slane %v9274_v2, 1 }
 0xd68   :  { %v9284_v3 = vor.u32 %v9283_v45, %v9279_v0  ;;  %v9746_v60 = vrot.slane %v9705_v16, 1 }
 0xd69   :  { %v9288_v1 = vrot.slane %v9286_v24, 1  ;;  %v9277_v9 = vsel %vm399_vm10, %v9272_v37, %v9276_v25 }
 0xd6a   :  { %v9747_v35 = vsel %vm877_vm11, %v9745_v51, %v9746_v60 }
 0xd6b   :  { %v9289_v59 = vsel %vm399_vm10, %v9284_v3, %v9288_v1 }
 0xd6c   :  { %9484 = vmatprep.mubr.bf16.mxu0 %v9289_v59 }
 0xd6d   :  { %9485 = vmatmul.mubr.bf16.vlgmr.msra.gmra.mxu0 %v9277_v9 }
 0xd6e   :  { %9911 = vmatpush1.bf16.msra.mxu0 %v17959_v58  ;;  %9942 = vmatprep.mubr.bf16.mxu0 %v9747_v35  ;;  %v9700_v58 = vld [vmem:[#allocation4 + $0x20] sm:$0x3] }
 0xd6f   :  { %9912 = vmatprep.subr.bf16.mxu0 %v17966_v36  ;;  %v9698_v36 = vld [vmem:[#allocation4] sm:$0xfc] }
 0xd72   :  { %9913 = vmatpush1.bf16.msra.mxu0 %v17975_v50  ;;  %v9704_v50 = vpack.c.bf16 %v9700_v58, %v9700_v58 }
 0xd73   :  { %9914 = vmatprep.subr.bf16.mxu0 %v17981_v4  ;;  %v9702_v4 = vpack.c.bf16 %v18217_v47, %v9698_v36  ;;  %v9977_v47 = vld [vmem:[%s18597_s5 + $0x20] sm:$0xff] }
 0xd76   :  { %9915 = vmatpush1.bf16.msra.mxu0 %v17989_v10  ;;  %v9743_v10 = vrot.slane %v9704_v50, 1 }
 0xd77   :  { %9916 = vmatprep.subr.bf16.mxu0 %v17996_v38  ;;  %v9742_v38 = vrot.slane %v9702_v4, 1 }
 0xd7a   :  { %9917 = vmatpush1.bf16.msra.mxu0 %v18003_v13  ;;  %v9744_v13 = vsel %vm877_vm11, %v9742_v38, %v9743_v10  ;;  %v19123_v38 = vld [vmem:[#allocation38_spill] sm:$0xff] }
 0xd7b   :  { %9918 = vmatprep.subr.bf16.mxu0 %v18010_v40  ;;  %v19122_v40 = vmov 0.0  }
 0xd7e   :  { %9919 = vmatpush1.bf16.msra.mxu0 %v18017_v30  ;;  %v10004_v30 = vld [vmem:[%s18597_s5 + $0xf8] sm:$0xff] }
 0xd7f   :  { %9920 = vmatprep.subr.bf16.mxu0 %v18024_v33  ;;  %v9988_v33 = vld [vmem:[%s18597_s5 + $0x78] sm:$0xff]  ;;  %12619 = vmatprep.subr.mxu1 %v10004_v30 }
 0xd80   :  { %12620 = vmatpush3.msra.mxu1 %v9988_v33 }
 0xd82   :  { %9921 = vmatpush1.bf16.msra.mxu0 %v18031_v28  ;;  %v10003_v28 = vld [vmem:[%s18597_s5 + $0xf0] sm:$0xff] }
 0xd83   :  { %9922 = vmatprep.subr.bf16.mxu0 %v18038_v46  ;;  %v9987_v46 = vld [vmem:[%s18597_s5 + $0x70] sm:$0xff]  ;;  %12621 = vmatprep.subr.mxu1 %v10003_v28 }
 0xd84   :  { %12622 = vmatpush3.msra.mxu1 %v9987_v46  ;;  %v19125_v46 = vld [vmem:[#allocation40_spill] sm:$0xff] }
 0xd86   :  { %9923 = vmatpush1.bf16.msra.mxu0 %v18045_v53  ;;  %v10002_v53 = vld [vmem:[%s18597_s5 + $0xe8] sm:$0xff] }
 0xd87   :  { %9924 = vmatprep.subr.bf16.mxu0 %v18052_v31  ;;  %v9986_v31 = vld [vmem:[%s18597_s5 + $0x68] sm:$0xff]  ;;  %12623 = vmatprep.subr.mxu1 %v10002_v53  ;;  %v19126_v53 = vmax.f32 %v19125_v46, 0.0  ;;  %v10303_v46 = vld [vmem:[%s18600_s8 + $0x90] sm:$0xff] }
 0xd88   :  { %12624 = vmatpush3.msra.mxu1 %v9986_v31 }
 0xd8a   :  { %9925 = vmatpush1.bf16.msra.mxu0 %v18059_v11  ;;  %v10001_v11 = vld [vmem:[%s18597_s5 + $0xe0] sm:$0xff] }
 0xd8b   :  { %9926 = vmatprep.subr.bf16.mxu0 %v18066_v23  ;;  %v9985_v23 = vld [vmem:[%s18597_s5 + $0x60] sm:$0xff]  ;;  %12625 = vmatprep.subr.mxu1 %v10001_v11 }
 0xd8c   :  { %12626 = vmatpush3.msra.mxu1 %v9985_v23 }
 0xd8e   :  { %9927 = vmatpush2.bf16.msra.mxu0 %v18073_v15  ;;  %v10000_v15 = vld [vmem:[%s18597_s5 + $0xd8] sm:$0xff] }
 0xd8f   :  { %9928 = vmatprep.subr.bf16.mxu0 %v18080_v27  ;;  %v9984_v27 = vld [vmem:[%s18597_s5 + $0x58] sm:$0xff]  ;;  %12627 = vmatprep.subr.mxu1 %v10000_v15 }
 0xd90   :  { %12628 = vmatpush3.msra.mxu1 %v9984_v27  ;;  %v19127_v27 = vld [vmem:[#allocation10_spill] sm:$0xff] }
 0xd92   :  { %9929 = vmatpush2.bf16.msra.mxu0 %v18087_v17  ;;  %v9999_v17 = vld [vmem:[%s18597_s5 + $0xd0] sm:$0xff] }
 0xd93   :  { %9930 = vmatprep.subr.bf16.mxu0 %v18094_v43  ;;  %v9983_v43 = vld [vmem:[%s18597_s5 + $0x50] sm:$0xff]  ;;  %12629 = vmatprep.subr.mxu1 %v9999_v17  ;;  %v19128_v17 = vmax.f32 %v19127_v27, 0.0  ;;  %v10301_v27 = vld [vmem:[%s18600_s8 + $0x80] sm:$0xff] }
 0xd94   :  { %12630 = vmatpush3.msra.mxu1 %v9983_v43 }
 0xd96   :  { %9931 = vmatpush2.bf16.msra.mxu0 %v18101_v7  ;;  %v9998_v7 = vld [vmem:[%s18597_s5 + $0xc8] sm:$0xff] }
 0xd97   :  { %9932 = vmatprep.subr.bf16.mxu0 %v18108_v63  ;;  %v9982_v63 = vld [vmem:[%s18597_s5 + $0x48] sm:$0xff]  ;;  %12631 = vmatprep.subr.mxu1 %v9998_v7 }
 0xd98   :  { %12632 = vmatpush3.msra.mxu1 %v9982_v63 }
 0xd9a   :  { %9933 = vmatpush2.bf16.msra.mxu0 %v18115_v18  ;;  %v9997_v18 = vld [vmem:[%s18597_s5 + $0xc0] sm:$0xff] }
 0xd9b   :  { %9934 = vmatprep.subr.bf16.mxu0 %v18122_v62  ;;  %v9981_v62 = vld [vmem:[%s18597_s5 + $0x40] sm:$0xff]  ;;  %12633 = vmatprep.subr.mxu1 %v9997_v18 }
 0xd9c   :  { %12634 = vmatpush3.msra.mxu1 %v9981_v62  ;;  %v10091_v62 = vld [vmem:[%s18599_s7 + $0x10] sm:$0xff] }
 0xd9e   :  { %9935 = vmatpush2.bf16.msra.mxu0 %v18129_v44  ;;  %v9996_v44 = vld [vmem:[%s18597_s5 + $0xb8] sm:$0xff] }
 0xd9f   :  { %9936 = vmatprep.subr.bf16.mxu0 %v18136_v54  ;;  %v9980_v54 = vld [vmem:[%s18597_s5 + $0x38] sm:$0xff]  ;;  %12635 = vmatprep.subr.mxu1 %v9996_v44 }
 0xda0   :  { %12636 = vmatpush3.msra.mxu1 %v9980_v54  ;;  %v10332_v44 = vld [vmem:[%s18600_s8 + $0x178] sm:$0xff]  ;;  %v10331_v54 = vld [vmem:[%s18600_s8 + $0x170] sm:$0xff] }
 0xda2   :  { %9937 = vmatpush2.bf16.msra.mxu0 %v18143_v19  ;;  %v9995_v19 = vld [vmem:[%s18597_s5 + $0xb0] sm:$0xff] }
 0xda3   :  { %9938 = vmatprep.subr.bf16.mxu0 %v18150_v22  ;;  %12637 = vmatprep.subr.mxu1 %v9995_v19  ;;  %v9979_v22 = vld [vmem:[%s18597_s5 + $0x30] sm:$0xff]  ;;  %v10330_v19 = vld [vmem:[%s18600_s8 + $0x168] sm:$0xff] }
 0xda4   :  { %12638 = vmatpush3.msra.mxu1 %v9979_v22  ;;  %v10329_v22 = vld [vmem:[%s18600_s8 + $0x160] sm:$0xff] }
 0xda6   :  { %9939 = vmatpush2.bf16.msra.mxu0 %v18157_v48  ;;  %v9994_v48 = vld [vmem:[%s18597_s5 + $0xa8] sm:$0xff] }
 0xda7   :  { %9940 = vmatprep.subr.bf16.mxu0 %v18164_v42  ;;  %12639 = vmatprep.subr.mxu1 %v9994_v48  ;;  %v9978_v42 = vld [vmem:[%s18597_s5 + $0x28] sm:$0xff]  ;;  %v10328_v48 = vld [vmem:[%s18600_s8 + $0x158] sm:$0xff] }
 0xda8   :  { %12640 = vmatpush3.msra.mxu1 %v9978_v42  ;;  %v10327_v42 = vld [vmem:[%s18600_s8 + $0x150] sm:$0xff] }
 0xdaa   :  { %9941 = vmatpush2.bf16.msra.mxu0 %v18170_v52  ;;  %v9993_v52 = vld [vmem:[%s18597_s5 + $0xa0] sm:$0xff]  ;;  %s13759_s5 = smov [#allocation5]  }
 0xdab   :  { %12641 = vmatprep.subr.mxu1 %v9993_v52  ;;  %v10326_v52 = vld [vmem:[%s18600_s8 + $0x148] sm:$0xff]  ;;  %s10661_s23 = sshll.u32 %s13759_s5, 4  ;;  %s10662_s23 = int_to_ptr.vmem [resolvable:$true] %s10661_s23 }
 0xdac   :  { %12642 = vmatpush3.msra.mxu1 %v9977_v47  ;;  %v10325_v47 = vld [vmem:[%s18600_s8 + $0x140] sm:$0xff]  ;;  %p13739_p1 = scmp.lt.s32.totalorder %s10662_s23, %s10662_s23 }
 0xdad   :  { %9943 = vmatmul.mubr.bf16.vlgmr.msra.gmra.mxu0 %v9744_v13  ;;  %12643 = vmatprep.subr.mxu1 %v9992_v21  ;;  %v19124_v13 = vmax.f32 %v19123_v38, 0.0  ;;  %v10324_v21 = vld [vmem:[%s18600_s8 + $0x138] sm:$0xff]  ;;  %v10290_v38 = vld [vmem:[%s18600_s8 + $0x28] sm:$0xff] }
 0xdae   :  { %10163 = vmatprep.mubr.f32.mxu0 %v19122_v40  ;;  %12644 = vmatpush3.msra.mxu1 %v9976_v55 }
 0xdaf   :  { %12645 = vmatprep.subr.mxu1 %v9991_v56  ;;  %v12604_v56 = vld [vmem:[%s18598_s6] ss:$0 sm:$0xff] }
 0xdb0   :  { %12646 = vmatpush3.msra.mxu1 %v9975_v32 }
 0xdb1   :  { %12647 = vmatprep.subr.mxu1 %v9990_v29 }
 0xdb2   :  { %12648 = vmatpush3.msra.mxu1 %v9974_v20 }
 0xdb3   :  { %12649 = vmatprep.subr.mxu1 %v9989_v26 }
 0xdb4   :  { %12650 = vmatpush3.msra.mxu1 %v9973_v6 }
 0xdb5   :  { %12733 = vmatprep.subr.mxu1 %v10332_v44 }
 0xe24   :  { %v9689_v8 = vpop.f32.mrf.mxu1 }
 0xe26   :  { %v9691_v2 = vpop.f32.mrf.mxu1 }
 0xe28   :  { %v9693_v0 = vpop.f32.mrf.mxu1 }
 0xe2a   :  { %v9695_v37 = vpop.f32.mrf.mxu1 }
 0xe2d   :  { %v9486_v57 = vpop.f32.mrf.mxu0 }
 0xe2e   :  { %v9690_v16 = vadd.f32 %v9689_v8, %v9486_v57  ;;  %v10316_v8 = vld [vmem:[%s18600_s8 + $0xf8] sm:$0xff] }
 0xe2f   :  { %v9488_v14 = vpop.f32.mrf.mxu0 }
 0xe30   :  { %v9692_v5 = vadd.f32 %v9691_v2, %v9488_v14 }
 0xe31   :  { %v9490_v45 = vpop.f32.mrf.mxu0 }
 0xe32   :  { %v9694_v3 = vadd.f32 %v9693_v0, %v9490_v45  ;;  %v10299_v0 = vld [vmem:[%s18600_s8 + $0x70] sm:$0xff] }
 0xe33   :  { %v9492_v39 = vpop.f32.mrf.mxu0 }
 0xe34   :  { %v9696_v51 = vadd.f32 %v9695_v37, %v9492_v39  ;;  %v10300_v39 = vld [vmem:[%s18600_s8 + $0x78] sm:$0xff]  ;;  %v10295_v37 = vld [vmem:[%s18600_s8 + $0x50] sm:$0xff] }
 0xe6d   :  { %v9944_v24 = vpop.f32.mrf.mxu0 }
 0xe6e   :  { %v9953_v12 = vadd.f32 %v9944_v24, %v9690_v16  ;;  %v10315_v16 = vld [vmem:[%s18600_s8 + $0xf0] sm:$0xff]  ;;  %v10314_v24 = vld [vmem:[%s18600_s8 + $0xe8] sm:$0xff] }
 0xe6f   :  { %v9946_v25 = vpop.f32.mrf.mxu0 }
 0xe70   :  { %v9957_v1 = vadd.f32 %v9953_v12, %v14516_v34  ;;  %v9954_v60 = vadd.f32 %v9946_v25, %v9692_v5  ;;  %v10298_v5 = vld [vmem:[%s18600_s8 + $0x68] sm:$0xff]  ;;  %v10313_v12 = vld [vmem:[%s18600_s8 + $0xe0] sm:$0xff] }
 0xe71   :  { %v9948_v59 = vpop.f32.mrf.mxu0  ;;  %v10297_v25 = vld [vmem:[%s18600_s8 + $0x60] sm:$0xff] }
 0xe72   :  { %v9961_v9 = vmul.f32 %v14101_v49, %v9957_v1  ;;  %v9958_v35 = vadd.f32 %v9954_v60, %v14520_v41  ;;  %v9955_v58 = vadd.f32 %v9948_v59, %v9694_v3  ;;  %v10312_v3 = vld [vmem:[%s18600_s8 + $0xd8] sm:$0xff]  ;;  %v10311_v60 = vld [vmem:[%s18600_s8 + $0xd0] sm:$0xff]  ;;  %v10310_v59 = vld [vmem:[%s18600_s8 + $0xc8] sm:$0xff] }
 0xe73   :  { %v9950_v36 = vpop.f32.mrf.mxu0  ;;  %v10296_v1 = vld [vmem:[%s18600_s8 + $0x58] sm:$0xff] }
 0xe74   :  { %v9962_v50 = vmul.f32 %v14101_v49, %v9958_v35  ;;  %v9959_v4 = vadd.f32 %v9955_v58, %v14516_v34  ;;  %v9956_v10 = vadd.f32 %v9950_v36, %v9696_v51  ;;  %v9965_v30 = vadd.f32 %v9961_v9, %v19124_v13  ;;  %v19129_v34 = vld [vmem:[#allocation11_spill] sm:$0xff]  ;;  %v10294_v51 = vld [vmem:[%s18600_s8 + $0x48] sm:$0xff]  ;;  %v10309_v9 = vld [vmem:[%s18600_s8 + $0xc0] sm:$0xff] }
 0xe75   :  { %v19130_v43 = vmax.f32 %v19129_v34, 0.0  ;;  %v10293_v35 = vld [vmem:[%s18600_s8 + $0x40] sm:$0xff]  ;;  %v10308_v58 = vld [vmem:[%s18600_s8 + $0xb8] sm:$0xff] }
 0xe76   :  { %v9963_v33 = vmul.f32 %v14109_v61, %v9959_v4  ;;  %v9960_v28 = vadd.f32 %v9956_v10, %v14520_v41  ;;  %v9966_v31 = vadd.f32 %v9962_v50, %v19126_v53  ;;  %v9969_v15 = vmax.f32 %v9965_v30, 0.0  ;;  %v10090_v41 = vld [vmem:[%s18599_s7 + $0x8] sm:$0xff]  ;;  %v10292_v36 = vld [vmem:[%s18600_s8 + $0x38] sm:$0xff]  ;;  %v10307_v50 = vld [vmem:[%s18600_s8 + $0xb0] sm:$0xff] }
 0xe77   :  { %10129 = vmatprep.subr.mxu0 %v10090_v41  ;;  %v10291_v4 = vld [vmem:[%s18600_s8 + $0x30] sm:$0xff]  ;;  %v10306_v10 = vld [vmem:[%s18600_s8 + $0xa8] sm:$0xff]  ;;  %v10305_v13 = vld [vmem:[%s18600_s8 + $0xa0] sm:$0xff] }
 0xe78   :  { %v9964_v11 = vmul.f32 %v14109_v61, %v9960_v28  ;;  %v9970_v23 = vmax.f32 %v9966_v31, 0.0  ;;  %v9967_v49 = vadd.f32 %v9963_v33, %v19128_v17  ;;  %v10089_v61 = vld [vmem:[%s18599_s7] sm:$0xff]  ;;  %v10304_v33 = vld [vmem:[%s18600_s8 + $0x98] sm:$0xff]  ;;  %v10323_v53 = vld [vmem:[%s18600_s8 + $0x130] sm:$0xff] }
 0xe79   :  { %10130 = vmatpush1.msra.mxu0 %v10089_v61  ;;  %v10289_v30 = vld [vmem:[%s18600_s8 + $0x20] sm:$0xff]  ;;  %v10288_v28 = vld [vmem:[%s18600_s8 + $0x18] sm:$0xff]  ;;  %v10287_v31 = vld [vmem:[%s18600_s8 + $0x10] sm:$0xff] }
 0xe7a   :  { %10076 = vmatprep.mubr.f32.mxu1 %v9970_v23  ;;  %v9968_v7 = vadd.f32 %v9964_v11, %v19130_v43  ;;  %v9971_v18 = vmax.f32 %v9967_v49, 0.0  ;;  %12728 = vmatprep.subr.mxu0 %v10091_v62  ;;  %v10302_v11 = vld [vmem:[%s18600_s8 + $0x88] sm:$0xff]  ;;  %v10321_v17 = vld [vmem:[%s18600_s8 + $0x120] sm:$0xff]  ;;  %v10320_v34 = vld [vmem:[%s18600_s8 + $0x118] sm:$0xff] }
 0xe7b   :  { %10077 = vmatmul.mubr.f32.vlgmr.msra.gmra.mxu1 %v9969_v15  ;;  %v10322_v23 = vld [vmem:[%s18600_s8 + $0x128] sm:$0xff]  ;;  %v10285_v49 = vld [vmem:[%s18600_s8] sm:$0xff]  ;;  %v10319_v43 = vld [vmem:[%s18600_s8 + $0x110] sm:$0xff] }
 0xe7c   :  { %v9972_v63 = vmax.f32 %v9968_v7, 0.0  ;;  %12734 = vmatpush3.msra.mxu1 %v10332_v44  ;;  %v10286_v15 = vld [vmem:[%s18600_s8 + $0x8] sm:$0xff] }
 0xe7d   :  { %12735 = vmatprep.subr.mxu1 %v10331_v54  ;;  %v10318_v7 = vld [vmem:[%s18600_s8 + $0x108] sm:$0xff] }
 0xe7e   :  { %10081 = vmatprep.mubr.f32.mxu1 %v9972_v63  ;;  %12736 = vmatpush3.msra.mxu1 %v10331_v54  ;;  %v10317_v63 = vld [vmem:[%s18600_s8 + $0x100] sm:$0xff] }
 0xe7f   :  { %10082 = vmatmul.mubr.f32.gmra.mxu1 %v9971_v18  ;;  %12737 = vmatprep.subr.mxu1 %v10330_v19  ;;  %v19131_v18 = vlaneseq }
 0xe80   :  { %12738 = vmatpush3.msra.mxu1 %v10330_v19 }
 0xe81   :  { %12739 = vmatprep.subr.mxu1 %v10329_v22  ;;  %v10252_v41 = vand.u32 127, %v19131_v18 }
 0xe82   :  { %12740 = vmatpush3.msra.mxu1 %v10329_v22 }
 0xe83   :  { %12741 = vmatprep.subr.mxu1 %v10328_v48  ;;  %v10253_v61 = vadd.s32 128, %v10252_v41  ;;  %v10255_v44 = vshra.s32 %v10252_v41, 6  ;;  %v10254_v22 = vadd.s32 256, %v10252_v41 }
 0xe84   :  { %12742 = vmatpush3.msra.mxu1 %v10328_v48  ;;  %v19132_v48 = vld [vmem:[#allocation8_spill] sm:$0xff] }
 0xe85   :  { %12743 = vmatprep.subr.mxu1 %v10327_v42  ;;  %v10258_v19 = vadd.s32 1, %v10255_v44 }
 0xe86   :  { %12744 = vmatpush3.msra.mxu1 %v10327_v42  ;;  %v10257_v42 = vshra.s32 %v10254_v22, 6 }
 0xe87   :  { %12745 = vmatprep.subr.mxu1 %v10326_v52  ;;  %vm10261_vm14 = vcmp.eq.s32.totalorder %v10258_v19, %v19132_v48 }
 0xe88   :  { %12746 = vmatpush3.msra.mxu1 %v10326_v52 }
 0xe89   :  { %12747 = vmatprep.subr.mxu1 %v10325_v47 }
 0xe8a   :  { %12748 = vmatpush3.msra.mxu1 %v10325_v47 }
 0xe8b   :  { %12749 = vmatprep.subr.mxu1 %v10324_v21 }
 0xe8c   :  { %12750 = vmatpush3.msra.mxu1 %v10324_v21  ;;  %v12609_v21 = vsel %vm10261_vm14, 1.0, %v19122_v40 }
 0xe8d   :  { %12751 = vmatprep.subr.mxu1 %v10323_v53 }
 0xe8e   :  { %12752 = vmatpush3.msra.mxu1 %v10323_v53 }
 0xe8f   :  { %12753 = vmatprep.subr.mxu1 %v10322_v23 }
 0xe90   :  { %12754 = vmatpush3.msra.mxu1 %v10322_v23  ;;  %v12617_v23 = vld [vmem:[%s18604_s12] ss:$0 sm:$0xff] }
 0xe91   :  { %12755 = vmatprep.subr.mxu1 %v10321_v17 }
 0xe92   :  { %12756 = vmatpush3.msra.mxu1 %v10321_v17 }
 0xe93   :  { %12757 = vmatprep.subr.mxu1 %v10320_v34 }
 0xe94   :  { %12758 = vmatpush3.msra.mxu1 %v10320_v34 }
 0xe95   :  { %12759 = vmatprep.subr.mxu1 %v10319_v43 }
 0xe96   :  { %12760 = vmatpush3.msra.mxu1 %v10319_v43 }
 0xe97   :  { %12761 = vmatprep.subr.mxu1 %v10318_v7 }
 0xe98   :  { %12762 = vmatpush3.msra.mxu1 %v10318_v7 }
 0xe99   :  { %12763 = vmatprep.subr.mxu1 %v10317_v63 }
 0xe9a   :  { %12764 = vmatpush3.msra.mxu1 %v10317_v63 }
 0xf3b   :  { %v12651_v55 = vpop.f32.mrf.mxu1 }
 0xf3d   :  { %v12652_v32 = vpop.f32.mrf.mxu1 }
 0xf3e   :  { %v12653_v29 = vadd.f32 %v12652_v32, %v12651_v55  ;;  %v19133_v55 = vld [vmem:[#allocation9_spill] sm:$0xff]  ;;  %v10260_v32 = vadd.s32 1, %v10257_v42 }
 0xf3f   :  { %v12654_v20 = vpop.f32.mrf.mxu1  ;;  %vm10264_vm1 = vcmp.eq.s32.totalorder %v10258_v19, %v19133_v55 }
 0xf40   :  { %v10079_v26 = vadd.f32 %v12653_v29, %v12604_v56  ;;  %vm10263_vm2 = vcmp.eq.s32.totalorder %v10260_v32, %v19132_v48  ;;  %vm10266_vm3 = vcmp.eq.s32.totalorder %v10260_v32, %v19133_v55 }
 0xf41   :  { %v12655_v6 = vpop.f32.mrf.mxu1 }
 0xf42   :  { %v10087_v57 = vmax.f32 %v10079_v26, 0.0  ;;  %v12656_v14 = vadd.f32 %v12655_v6, %v12654_v20 }
 0xf44   :  { %v10084_v45 = vadd.f32 %v12656_v14, %v12604_v56  ;;  %12605 = vmatmul.mubr.msk.f32.vlgmr.msra.gmra.mxu0 %vm10092_vm12, %v10087_v57 }
 0xf45   :  { %10169 = vmatprep.mubr.f32.mxu0 %v19122_v40  ;;  %12729 = vmatpush3.msra.mxu0 %v10091_v62  ;;  %v10256_v62 = vshra.s32 %v10253_v61, 6 }
 0xf46   :  { %v10088_v2 = vmax.f32 %v10084_v45, 0.0  ;;  %12660 = vmatprep.subr.mxu0 %v10316_v8 }
 0xf47   :  { %v10259_v54 = vadd.s32 1, %v10256_v62 }
 0xf48   :  { %12606 = vmatmul.mubr.msk.f32.gmra.mxu0 %vm10092_vm12, %v10088_v2 }
 0xf49   :  { %12730 = vmatprep.mubr.msk.f32.mxu0 %vm10092_vm12, %v10087_v57  ;;  %vm10262_vm13 = vcmp.eq.s32.totalorder %v10259_v54, %v19132_v48  ;;  %vm10265_vm15 = vcmp.eq.s32.totalorder %v10259_v54, %v19133_v55  ;;  %v12612_v57 = vsel %vm10264_vm1, 1.0, %v19122_v40 }
 0xf4a   :  { %v12610_v47 = vsel %vm10262_vm13, 1.0, %v19122_v40  ;;  %v12613_v6 = vsel %vm10265_vm15, 1.0, %v19122_v40 }
 0xf4c   :  { %12731 = vmatmul.mubr.msk.f32.vlgmr.msra.gmra.mxu0 %vm10092_vm12, %v10088_v2 }
 0xf4d   :  { %12661 = vmatpush3.msra.mxu0 %v10300_v39  ;;  %v12611_v39 = vsel %vm10263_vm2, 1.0, %v19122_v40 }
 0xf4e   :  { %12662 = vmatprep.subr.mxu0 %v10315_v16  ;;  %v12614_v16 = vsel %vm10266_vm3, 1.0, %v19122_v40 }
 0xf4f   :  { %12663 = vmatpush3.msra.mxu0 %v10299_v0 }
 0xf50   :  { %12664 = vmatprep.subr.mxu0 %v10314_v24 }
 0xf51   :  { %12665 = vmatpush3.msra.mxu0 %v10298_v5 }
 0xf52   :  { %12666 = vmatprep.subr.mxu0 %v10313_v12 }
 0xf53   :  { %12667 = vmatpush3.msra.mxu0 %v10297_v25 }
 0xf54   :  { %12668 = vmatprep.subr.mxu0 %v10312_v3 }
 0xf55   :  { %12669 = vmatpush3.msra.mxu0 %v10296_v1 }
 0xf56   :  { %12670 = vmatprep.subr.mxu0 %v10311_v60 }
 0xf57   :  { %12671 = vmatpush3.msra.mxu0 %v10295_v37 }
 0xf58   :  { %12672 = vmatprep.subr.mxu0 %v10310_v59 }
 0xf59   :  { %12673 = vmatpush3.msra.mxu0 %v10294_v51 }
 0xf5a   :  { %12674 = vmatprep.subr.mxu0 %v10309_v9 }
 0xf5b   :  { %12675 = vmatpush3.msra.mxu0 %v10293_v35 }
 0xf5c   :  { %12676 = vmatprep.subr.mxu0 %v10308_v58  ;;  %v10483_v58 = vld [vmem:[%s18601_s9] sm:$0x3] }
 0xf5d   :  { %12677 = vmatpush3.msra.mxu0 %v10292_v36  ;;  %v10572_v36 = vld [vmem:[%s18603_s11 + $0x38] sm:$0xff] }
 0xf5e   :  { %12678 = vmatprep.subr.mxu0 %v10307_v50  ;;  %v10571_v50 = vld [vmem:[%s18603_s11 + $0x30] sm:$0xff] }
 0xf5f   :  { %12679 = vmatpush3.msra.mxu0 %v10291_v4  ;;  %v10570_v4 = vld [vmem:[%s18603_s11 + $0x28] sm:$0xff] }
 0xf60   :  { %12680 = vmatprep.subr.mxu0 %v10306_v10  ;;  %v10569_v10 = vld [vmem:[%s18603_s11 + $0x20] sm:$0xff] }
 0xf61   :  { %12681 = vmatpush3.msra.mxu0 %v10290_v38  ;;  %v10568_v38 = vld [vmem:[%s18603_s11 + $0x18] sm:$0xff] }
 0xf62   :  { %12682 = vmatprep.subr.mxu0 %v10305_v13  ;;  %v10567_v13 = vld [vmem:[%s18603_s11 + $0x10] sm:$0xff] }
 0xf63   :  { %12683 = vmatpush3.msra.mxu0 %v10289_v30  ;;  %v10566_v30 = vld [vmem:[%s18603_s11 + $0x8] sm:$0xff] }
 0xf64   :  { %12684 = vmatprep.subr.mxu0 %v10304_v33  ;;  %v10565_v33 = vld [vmem:[%s18603_s11] sm:$0xff]  ;;  %s13734_s11 = scalar_lea.vmem %s10662_s23, 32 }
 0xf65   :  { %12685 = vmatpush3.msra.mxu0 %v10288_v28  ;;  %v12615_v28 = vld [vmem:[%s18602_s10] ss:$0 sm:$0xff]  ;;  %p13735_p0 = scmp.ne.s32.totalorder %s10662_s23, %s13734_s11  ;;  %p13740_p2 = scmp.lt.s32.totalorder %s13734_s11, %s13734_s11 }
 0xf66   :  { %12686 = vmatprep.subr.mxu0 %v10303_v46 }
 0xf67   :  { %12687 = vmatpush3.msra.mxu0 %v10287_v31  ;;  %p13741_p3 = por %p13740_p2, %p13739_p1 }
 0xf68   :  { %12688 = vmatprep.subr.mxu0 %v10302_v11 }
 0xf69   :  { %12689 = vmatpush3.msra.mxu0 %v10286_v15  ;;  %p13742_p4 = pnand %p13741_p3, %p13735_p0 }
 0xf6a   :  { %12690 = vmatprep.subr.mxu0 %v10301_v27 }
 0xf6b   :  { %12691 = vmatpush3.msra.mxu0 %v10285_v49 }
 0xf6c   :  { %12768 = vmatprep.subr.mxu0 %v19122_v40 }
0x1004   :  { %v10165_v52 = vpop.f32.mrf.mxu0 }
0x1005   :  { %v10279_v20 = vmul.f32 %v12609_v21, %v10165_v52 }
0x1006   :  { %v10167_v56 = vpop.f32.mrf.mxu0 }
0x1007   :  { %v10280_v29 = vmul.f32 %v12610_v47, %v10167_v56 }
0x1008   :  { %v10171_v26 = vpop.f32.mrf.mxu0 }
0x1009   :  { %10397 = vmatprep.mubr.f32.mxu0 %v10280_v29  ;;  %v10282_v45 = vmul.f32 %v12612_v57, %v10171_v26 }
0x100a   :  { %v10173_v14 = vpop.f32.mrf.mxu0  ;;  %10398 = vmatmul.mubr.f32.vlgmr.msra.gmra.mxu0 %v10279_v20 }
0x100b   :  { %v10283_v8 = vmul.f32 %v12613_v6, %v10173_v14 }
0x100c   :  { %v12732_v2 = vpop.f32.mrf.mxu0 }
0x100d   :  { %10402 = vmatprep.mubr.f32.mxu0 %v10283_v8  ;;  %v10284_v5 = vmul.f32 %v12732_v2, %v12614_v16 }
0x100e   :  { %v10242_v0 = vpop.f32.mrf.mxu0  ;;  %10403 = vmatmul.mubr.f32.gmra.mxu0 %v10282_v45 }
0x100f   :  { %v10281_v24 = vmul.f32 %v12611_v39, %v10242_v0  ;;  %12772 = vmatprep.mubr.msk.f32.mxu0 %vm13758_vm4, %v19122_v40 }
0x1011   :  { %12765 = vmatprep.mubr.f32.mxu1 %v10281_v24 }
0x1012   :  { %12766 = vmatmul.mubr.f32.vlgmr.msra.gmra.mxu1 %v10284_v5 }
0x10ca   :  { %v12692_v12 = vpop.f32.mrf.mxu0 }
0x10cc   :  { %v12693_v25 = vpop.f32.mrf.mxu0 }
0x10cd   :  { %v12694_v59 = vadd.f32 %v12693_v25, %v12692_v12 }
0x10ce   :  { %v12695_v3 = vpop.f32.mrf.mxu0 }
0x10d0   :  { %v12696_v1 = vpop.f32.mrf.mxu0 }
0x10d1   :  { %v12697_v60 = vadd.f32 %v12696_v1, %v12695_v3 }
0x10d2   :  { %v12767_v37 = vpop.f32.mrf.mxu1 }
0x10d3   :  { %v10480_v51 = vadd.f32 %v12767_v37, %v12697_v60 }
0x10d4   :  { %v10474_v9 = vpop.f32.mrf.mxu1 }
0x10d5   :  { %v10475_v35 = vadd.f32 %v12694_v59, %v10474_v9  ;;  %12769 = vmatpush3.msra.mxu0 %v10480_v51 }
0x10d6   :  { %12770 = vmatprep.subr.mxu0 %v19122_v40 }
0x10d7   :  { %12771 = vmatpush3.msra.mxu0 %v10475_v35 }
0x10d8   :  { %12773 = vmatmul.mubr.msk.f32.vlgmr.msra.gmra.mxu0 %vm80_vm0, %v10483_v58  ;;  %12775 = vmatprep.subr.mxu0 %v19122_v40  ;;  %vm10580_vm0 = vcmask 523264  }
0x10d9   :  { %12776 = vmatpush3.msra.mxu0 %v10572_v36  ;;  %12791 = vmatprep.mubr.msk.f32.mxu0 %vm13758_vm4, %v19122_v40 }
0x10da   :  { %12777 = vmatprep.subr.mxu0 %v19122_v40 }
0x10db   :  { %12778 = vmatpush3.msra.mxu0 %v10571_v50 }
0x10dc   :  { %12779 = vmatprep.subr.mxu0 %v19122_v40 }
0x10dd   :  { %12780 = vmatpush3.msra.mxu0 %v10570_v4 }
0x10de   :  { %12781 = vmatprep.subr.mxu0 %v19122_v40 }
0x10df   :  { %12782 = vmatpush3.msra.mxu0 %v10569_v10 }
0x10e0   :  { %12783 = vmatprep.subr.mxu0 %v19122_v40 }
0x10e1   :  { %12784 = vmatpush3.msra.mxu0 %v10568_v38 }
0x10e2   :  { %12785 = vmatprep.subr.mxu0 %v19122_v40 }
0x10e3   :  { %12786 = vmatpush3.msra.mxu0 %v10567_v13 }
0x10e4   :  { %12787 = vmatprep.subr.mxu0 %v19122_v40 }
0x10e5   :  { %12788 = vmatpush3.msra.mxu0 %v10566_v30 }
0x10e6   :  { %12789 = vmatprep.subr.mxu0 %v19122_v40 }
0x10e7   :  { %12790 = vmatpush3.msra.mxu0 %v10565_v33 }
0x1198   :  { %v10560_v46 = vpop.f32.mrf.mxu0 }
0x1199   :  { %v10561_v53 = vadd.f32 %v12615_v28, %v10560_v46 }
0x119a   :  { %v12774_v31 = vpop.f32.mrf.mxu0 }
0x119b   :  { %v10564_v11 = vmax.f32 %v10561_v53, 0.0 }
0x119d   :  { %12792 = vmatmul.mubr.msk.f32.vlgmr.msra.gmra.mxu0 %vm10580_vm0, %v10564_v11 }
0x125d   :  { %v10650_v40 = vpop.f32.mrf.mxu0 }
0x125e   :  { %v10651_v15 = vadd.f32 %v12617_v23, %v10650_v40 }
0x125f   :  { %v12793_v27 = vpop.f32.mrf.mxu0 }
0x1260   :  { %10654 = vst [vmem:[#allocation5] sm:$0x3] %v10651_v15 }
0x1261   :  { %13745 = shalt.err (!%p13742_p4)
}
0x1262   :  { %10664 = dma.vmem_to_hbm [thread:$0]  %s10662_s23, 32, %s18605_s13, [#allocation6]  }
0x1263   :  { %13754 = dma.done.wait [#allocation6], 32  }
0x1264   :  { %13755 = vsyncadd [#allocation6], 4294967264 }
0x1265   :  { %10668 = vsyncpa [#allocation6], 1 }

</bundles_post_ra>
